<compile_context>
chip_gen: v7x
topology: tpu7x:2x2x1
jax: 0.10.0
libtpu: 0.0.40
codegen_flags: <defaults>
</compile_context>

<pallas_src>
import functools

import jax
import jax.numpy as jnp
from jax.experimental import pallas as pl
from jax.experimental.pallas import tpu as pltpu


_VMEM_SPEC = pl.BlockSpec(memory_space=pltpu.MemorySpace.VMEM)
_LANE = 128


def _round_up(x, m):
    return (x + m - 1) // m * m


# ----------------------------------------------------------------------------
# Pallas kernel: one bi-GRU layer (optionally fused with the final Linear)
# ----------------------------------------------------------------------------
def _bigru_layer_kernel(*refs, seq_len, batch, hpad, num_dirs, fuse_fc):
    """Fused forward+reverse GRU layer over a full sequence.

    x_ref   : (T*B, Ein)      time-major flattened inputs (bf16, lane-padded)
    wih_ref : (D, Ein, 3*Hp)  input->hidden weights (bf16), gate order [r,z,n],
                              each gate block lane-aligned / 128-wide
    whh_ref : (D, Hp, 3*Hp)   hidden->hidden weights (bf16)
    bih_ref : (D, 1, 3*Hp)    input bias (f32)
    bhh_ref : (D, 1, 3*Hp)    hidden bias (f32)
    If fuse_fc:
      fcw_ref : (D*Hp, Cp) bf16, fcb_ref : (1, Cp) f32
      output  : logits (T*B, Cp) f32; hidden states go to a VMEM scratch only.
    Else:
      output  : (T*B, D*Hp) bf16 per-timestep hidden states; direction d
                occupies lanes [d*Hp, (d+1)*Hp).
    gx scratch: D VMEM buffers (T*B, 3*Hp) f32, precomputed input projections.
    """
    if fuse_fc:
        (x_ref, wih_ref, whh_ref, bih_ref, bhh_ref, fcw_ref, fcb_ref,
         logits_ref, *scratch) = refs
        *gx_scr, h_out = scratch                 # h_out: (T*B, D*Hp) bf16 VMEM
    else:
        (x_ref, wih_ref, whh_ref, bih_ref, bhh_ref, h_out, *gx_scr) = refs

    T, B, Hp, D = seq_len, batch, hpad, num_dirs

    # --- Phase 1: all input projections in one MXU matmul per direction -----
    # (off the recurrent critical path; bf16 operands, f32 accumulation)
    x = x_ref[...]
    for d in range(D):
        gx_scr[d][...] = (
            jnp.dot(x, wih_ref[d], preferred_element_type=jnp.float32)
            + bih_ref[d])

    # --- Phase 2: sequential recurrence --------------------------------------
    # Recurrent weights and bias broadcasts are loaded/hoisted once.
    whh = [whh_ref[d] for d in range(D)]                          # (Hp,3Hp) bf16
    bhh = [jnp.broadcast_to(bhh_ref[d], (B, 3 * Hp)) for d in range(D)]

    # Fully-unrolled recurrence (T is small & static): hidden state stays in
    # vregs, every slice offset is static, and the scheduler can overlap step
    # i's gate math with step i+1's gx loads.
    # TODO(synk): for long sequences, switch to a lax.fori_loop(..., unroll=k)
    # over T-chunks with the gx precompute pipelined from HBM instead of being
    # fully VMEM-resident.
    hs = [jnp.zeros((B, Hp), jnp.float32) for _ in range(D)]
    for i in range(T):
        for d in range(D):
            t = i if d == 0 else T - 1 - i      # direction 1 runs reversed
            row = t * B
            h = hs[d]
            gh = jnp.dot(h.astype(jnp.bfloat16), whh[d],
                         preferred_element_type=jnp.float32) + bhh[d]
            g = gx_scr[d][row:row + B, :]
            r = jax.nn.sigmoid(g[:, :Hp] + gh[:, :Hp])
            z = jax.nn.sigmoid(g[:, Hp:2 * Hp] + gh[:, Hp:2 * Hp])
            n = jnp.tanh(g[:, 2 * Hp:] + r * gh[:, 2 * Hp:])
            h_new = (1.0 - z) * n + z * h
            h_out[row:row + B, d * Hp:(d + 1) * Hp] = (
                h_new.astype(h_out.dtype))
            hs[d] = h_new

    # --- Phase 3 (last layer only): fused Linear -----------------------------
    if fuse_fc:
        logits_ref[...] = (
            jnp.dot(h_out[...], fcw_ref[...],
                    preferred_element_type=jnp.float32)
            + fcb_ref[...]).astype(logits_ref.dtype)


# ----------------------------------------------------------------------------
# Wrapper
# ----------------------------------------------------------------------------
def bigru_layer(x, wih, whh, bih, bhh, *, seq_len, batch,
                fc_w=None, fc_b=None):
    """x: (T*B, Ein) bf16 -> (T*B, D*Hp) bf16, or (T*B, Cp) f32 logits when the
    final Linear is fused (fc_w/fc_b provided)."""
    TB, Ein = x.shape
    D, Hp = whh.shape[0], whh.shape[1]
    fuse_fc = fc_w is not None

    kernel = functools.partial(_bigru_layer_kernel, seq_len=seq_len,
                               batch=batch, hpad=Hp, num_dirs=D,
                               fuse_fc=fuse_fc)

    flops = 2 * D * TB * (Ein + Hp) * 3 * Hp
    transcendentals = D * TB * 3 * Hp
    bytes_accessed = (x.size * 2 + wih.size * 2 + whh.size * 2
                      + (bih.size + bhh.size) * 4)
    scratch = [pltpu.VMEM((TB, 3 * Hp), jnp.float32) for _ in range(D)]

    if fuse_fc:
        Cp = fc_w.shape[1]
        out_shape = jax.ShapeDtypeStruct((TB, Cp), jnp.float32)
        scratch = scratch + [pltpu.VMEM((TB, D * Hp), jnp.bfloat16)]
        args = (x, wih, whh, bih, bhh, fc_w, fc_b)
        flops += 2 * TB * (D * Hp) * Cp
        bytes_accessed += fc_w.size * 2 + fc_b.size * 4 + TB * Cp * 4
    else:
        out_shape = jax.ShapeDtypeStruct((TB, D * Hp), jnp.bfloat16)
        args = (x, wih, whh, bih, bhh)
        bytes_accessed += TB * D * Hp * 2

    return pl.pallas_call(
        kernel,
        out_shape=out_shape,
        in_specs=[_VMEM_SPEC] * len(args),
        out_specs=_VMEM_SPEC,
        scratch_shapes=scratch,
        compiler_params=pltpu.CompilerParams(
            vmem_limit_bytes=32 * 1024 * 1024),
        cost_estimate=pl.CostEstimate(flops=flops,
                                      transcendentals=transcendentals,
                                      bytes_accessed=bytes_accessed),
    )(*args)


def seq_tagger_forward(kparams, ids, *, num_class):
    """ids: (B, T) int32 token indices -> (B*T, num_class) logits."""
    B, T = ids.shape
    # Embedding gather directly in time-major flattened row order (row = t*B+b).
    flat_ids = jnp.transpose(ids).reshape(-1)
    x = jnp.take(kparams["embedding"], flat_ids, axis=0)        # (T*B, Ep) bf16

    layers = kparams["gru"]
    for layer in layers[:-1]:
        x = bigru_layer(x, layer["wih"], layer["whh"], layer["bih"],
                        layer["bhh"], seq_len=T, batch=B)
        # nn.Dropout between GRU layers: identity (eval mode).

    last = layers[-1]
    # Last layer with the Linear fused in-kernel (dropout after GRU: identity).
    logits_tm = bigru_layer(x, last["wih"], last["whh"], last["bih"],
                            last["bhh"], seq_len=T, batch=B,
                            fc_w=kparams["fc_w"], fc_b=kparams["fc_b"])

    # Only the small logits block is permuted back to the batch-first
    # flattening used by the PyTorch module, then padding classes are dropped.
    Cp = logits_tm.shape[-1]
    logits = (logits_tm.reshape(T, B, Cp).transpose(1, 0, 2)
              .reshape(B * T, Cp))
    return logits[:, :num_class]


# ----------------------------------------------------------------------------
# Parameter construction (logical, PyTorch-like) + kernel-layout preparation
# ----------------------------------------------------------------------------
def init_params(key, *, vocab, emb_dim, hidden, num_layers, bidirectional,
                num_class):
    """Logical parameters mirroring torch.nn.{Embedding,GRU,Linear}."""
    D = 2 if bidirectional else 1
    keys = iter(jax.random.split(key, 1 + num_layers * D * 4 + 2))

    def u(k, shape, bound):
        return jax.random.uniform(k, shape, jnp.float32, -bound, bound)

    params = {"embedding": jax.random.normal(next(keys), (vocab, emb_dim),
                                             jnp.float32)}
    kH = 1.0 / float(hidden) ** 0.5
    gru = []
    for layer in range(num_layers):
        in_dim = emb_dim if layer == 0 else hidden * D
        dirs = []
        for d in range(D):
            dirs.append({
                # PyTorch orientation; gate order [r, z, n]
                "w_ih": u(next(keys), (3 * hidden, in_dim), kH),
                "w_hh": u(next(keys), (3 * hidden, hidden), kH),
                "b_ih": u(next(keys), (3 * hidden,), kH),
                "b_hh": u(next(keys), (3 * hidden,), kH),
                "reverse": d == 1,
            })
        gru.append(dirs)
    params["gru"] = gru

    out_size = hidden * D
    kF = 1.0 / float(out_size) ** 0.5
    params["fc_w"] = u(next(keys), (num_class, out_size), kF)
    params["fc_b"] = u(next(keys), (num_class,), kF)
    return params


def prepare_kernel_params(params, *, hidden, bidirectional, num_class):
    """Pad / transpose / cast logical params into the lane-dense kernel layout.

    Each gate (and each direction block of the inputs) gets its own 128-wide
    lane-aligned block; padded rows/cols are zero so padded hidden lanes stay
    exactly zero throughout the recurrence.
    """
    H = hidden
    Hp = _round_up(H, _LANE)
    D = 2 if bidirectional else 1

    emb = params["embedding"]
    E = emb.shape[1]
    Ep = _round_up(E, _LANE)

    def pad_gate_cols(w_t):                       # (rows, 3H) -> (rows, 3Hp)
        out = jnp.zeros((w_t.shape[0], 3 * Hp), jnp.float32)
        for g in range(3):
            out = out.at[:, g * Hp:g * Hp + H].set(w_t[:, g * H:(g + 1) * H])
        return out

    def pad_input_rows(w_t, layer):               # pad the contraction dim
        if layer == 0:
            return jnp.pad(w_t, ((0, Ep - w_t.shape[0]), (0, 0)))
        out = jnp.zeros((D * Hp, w_t.shape[1]), jnp.float32)
        for d in range(D):
            out = out.at[d * Hp:d * Hp + H, :].set(w_t[d * H:(d + 1) * H, :])
        return out

    kp = {"embedding": jnp.pad(emb, ((0, 0), (0, Ep - E))).astype(jnp.bfloat16)}

    gru = []
    for layer, dirs in enumerate(params["gru"]):
        wih, whh, bih, bhh = [], [], [], []
        for d in dirs:
            wih.append(pad_gate_cols(pad_input_rows(d["w_ih"].T, layer)
                                     ).astype(jnp.bfloat16))
            whh.append(pad_gate_cols(jnp.pad(d["w_hh"].T,
                                             ((0, Hp - H), (0, 0)))
                                     ).astype(jnp.bfloat16))
            bih.append(pad_gate_cols(d["b_ih"][None, :]))
            bhh.append(pad_gate_cols(d["b_hh"][None, :]))
        gru.append({"wih": jnp.stack(wih),   # (D, Ein_pad, 3Hp) bf16
                    "whh": jnp.stack(whh),   # (D, Hp,      3Hp) bf16
                    "bih": jnp.stack(bih),   # (D, 1,       3Hp) f32
                    "bhh": jnp.stack(bhh)})  # (D, 1,       3Hp) f32
    kp["gru"] = gru

    Cp = _round_up(num_class, _LANE)
    fc_w_t = params["fc_w"].T                                   # (D*H, C)
    fcw = jnp.zeros((D * Hp, Cp), jnp.float32)
    for d in range(D):
        fcw = fcw.at[d * Hp:d * Hp + H, :num_class].set(
            fc_w_t[d * H:(d + 1) * H, :])
    kp["fc_w"] = fcw.astype(jnp.bfloat16)
    kp["fc_b"] = jnp.zeros((1, Cp), jnp.float32).at[0, :num_class].set(
        params["fc_b"])
    return kp


# ----------------------------------------------------------------------------
# Pure-JAX reference mirroring the kernel numerics (bf16 matmul operands,
# f32 accumulation / gate math) and torch.nn.GRU semantics.
# ----------------------------------------------------------------------------
def _mm_bf16(a, b):
    return jnp.dot(a.astype(jnp.bfloat16), b.astype(jnp.bfloat16),
                   preferred_element_type=jnp.float32)


def _gru_layer_ref(x_tbf, w_ih, w_hh, b_ih, b_hh, reverse):
    T, B, _ = x_tbf.shape
    H = w_hh.shape[1]
    wih_t, whh_t = w_ih.T, w_hh.T
    h = jnp.zeros((B, H), jnp.float32)
    ts = range(T - 1, -1, -1) if reverse else range(T)
    outs = [None] * T
    for t in ts:
        g = _mm_bf16(x_tbf[t], wih_t) + b_ih[None, :]
        gh = _mm_bf16(h, whh_t) + b_hh[None, :]
        r = jax.nn.sigmoid(g[:, :H] + gh[:, :H])
        z = jax.nn.sigmoid(g[:, H:2 * H] + gh[:, H:2 * H])
        n = jnp.tanh(g[:, 2 * H:] + r * gh[:, 2 * H:])
        h = (1.0 - z) * n + z * h
        outs[t] = h
    return jnp.stack(outs, axis=0)


def seq_tagger_ref(params, ids, num_class):
    B, T = ids.shape
    x = jnp.take(params["embedding"], ids, axis=0)
    x = jnp.transpose(x, (1, 0, 2)).astype(jnp.float32)
    for dirs in params["gru"]:
        outs = [_gru_layer_ref(x, d["w_ih"], d["w_hh"], d["b_ih"], d["b_hh"],
                               d["reverse"]) for d in dirs]
        x = jnp.concatenate(outs, axis=-1)
    out = jnp.transpose(x, (1, 0, 2)).reshape(B * T, x.shape[-1])
    return _mm_bf16(out, params["fc_w"].T) + params["fc_b"][None, :]


# ----------------------------------------------------------------------------
if __name__ == "__main__":
    VOCAB = 50
    EMB = 32
    HIDDEN = 32
    NUM_LAYERS = 2
    BIDIRECTIONAL = True
    NUM_CLASS = 9
    PAD_IDX = 0
    B, T = 2, 8

    key = jax.random.PRNGKey(0)
    k_param, k_ids = jax.random.split(key)
    params = init_params(k_param, vocab=VOCAB, emb_dim=EMB, hidden=HIDDEN,
                         num_layers=NUM_LAYERS, bidirectional=BIDIRECTIONAL,
                         num_class=NUM_CLASS)
    kparams = prepare_kernel_params(params, hidden=HIDDEN,
                                    bidirectional=BIDIRECTIONAL,
                                    num_class=NUM_CLASS)
    ids = jax.random.randint(k_ids, (B, T), 0, VOCAB, dtype=jnp.int32)
    ids = ids.at[:, -1].set(PAD_IDX)   # include some padding tokens

    forward = jax.jit(functools.partial(seq_tagger_forward,
                                        num_class=NUM_CLASS))
    logits = forward(kparams, ids)
    jax.block_until_ready(logits)

    ref = seq_tagger_ref(params, ids, NUM_CLASS)
    assert logits.shape == (B * T, NUM_CLASS), logits.shape
    max_err = float(jnp.max(jnp.abs(logits - ref)))
    assert jnp.allclose(logits, ref, rtol=2e-2, atol=2e-2), max_err

    print("KERNEL_OK")
</pallas_src>

<mosaic_0001>
module attributes {stable_mosaic.version = 11 : i64} {
  func.func @_bigru_layer_kernel(%arg0: memref<16x128xbf16, #tpu.memory_space<vmem>>, %arg1: memref<2x128x384xbf16, #tpu.memory_space<vmem>>, %arg2: memref<2x128x384xbf16, #tpu.memory_space<vmem>>, %arg3: memref<2x1x384xf32, #tpu.memory_space<vmem>>, %arg4: memref<2x1x384xf32, #tpu.memory_space<vmem>>, %arg5: memref<16x256xbf16, #tpu.memory_space<vmem>>, %arg6: memref<16x384xf32, #tpu.memory_space<vmem>>, %arg7: memref<16x384xf32, #tpu.memory_space<vmem>>) attributes {dimension_semantics = [], scalar_prefetch = 0 : i64, scratch_operands = 2 : i64, tpu.core_type = #tpu.core_type<tc>} {
    %c0 = arith.constant 0 : index
    %c0_0 = arith.constant 0 : index
    %0 = vector.load %arg0[%c0, %c0_0] : memref<16x128xbf16, #tpu.memory_space<vmem>>, vector<16x128xbf16>
    %c0_1 = arith.constant 0 : index
    %c0_2 = arith.constant 0 : index
    %c0_3 = arith.constant 0 : index
    %1 = vector.load %arg1[%c0_1, %c0_2, %c0_3] : memref<2x128x384xbf16, #tpu.memory_space<vmem>>, vector<1x128x384xbf16>
    %2 = vector.shape_cast %1 : vector<1x128x384xbf16> to vector<128x384xbf16>
    %cst = arith.constant dense<0.000000e+00> : vector<16x384xf32>
    %3 = tpu.matmul %0, %2, %cst {dimension_numbers = #tpu.dot_dimension_numbers<[1], [0], [0], [1], [0, 0, 1, 1], [], []>} : vector<16x128xbf16>, vector<128x384xbf16>, vector<16x384xf32> -> vector<16x384xf32>
    %c0_4 = arith.constant 0 : index
    %c0_5 = arith.constant 0 : index
    %c0_6 = arith.constant 0 : index
    %4 = vector.load %arg3[%c0_4, %c0_5, %c0_6] : memref<2x1x384xf32, #tpu.memory_space<vmem>>, vector<1x1x384xf32>
    %5 = vector.shape_cast %4 : vector<1x1x384xf32> to vector<1x384xf32>
    %6 = vector.broadcast %5 : vector<1x384xf32> to vector<16x384xf32>
    %7 = arith.addf %3, %6 : vector<16x384xf32>
    %c0_7 = arith.constant 0 : index
    %c0_8 = arith.constant 0 : index
    %8 = vector.load %arg6[%c0_7, %c0_8] : memref<16x384xf32, #tpu.memory_space<vmem>>, vector<16x384xf32>
    tpu.vector_store %arg6[%c0_7, %c0_8], %7 {strides = array<i32>} : memref<16x384xf32, #tpu.memory_space<vmem>>, vector<16x384xf32>,
    %c1 = arith.constant 1 : index
    %c0_9 = arith.constant 0 : index
    %c0_10 = arith.constant 0 : index
    %9 = vector.load %arg1[%c1, %c0_9, %c0_10] : memref<2x128x384xbf16, #tpu.memory_space<vmem>>, vector<1x128x384xbf16>
    %10 = vector.shape_cast %9 : vector<1x128x384xbf16> to vector<128x384xbf16>
    %cst_11 = arith.constant dense<0.000000e+00> : vector<16x384xf32>
    %11 = tpu.matmul %0, %10, %cst_11 {dimension_numbers = #tpu.dot_dimension_numbers<[1], [0], [0], [1], [0, 0, 1, 1], [], []>} : vector<16x128xbf16>, vector<128x384xbf16>, vector<16x384xf32> -> vector<16x384xf32>
    %c1_12 = arith.constant 1 : index
    %c0_13 = arith.constant 0 : index
    %c0_14 = arith.constant 0 : index
    %12 = vector.load %arg3[%c1_12, %c0_13, %c0_14] : memref<2x1x384xf32, #tpu.memory_space<vmem>>, vector<1x1x384xf32>
    %13 = vector.shape_cast %12 : vector<1x1x384xf32> to vector<1x384xf32>
    %14 = vector.broadcast %13 : vector<1x384xf32> to vector<16x384xf32>
    %15 = arith.addf %11, %14 : vector<16x384xf32>
    %c0_15 = arith.constant 0 : index
    %c0_16 = arith.constant 0 : index
    %16 = vector.load %arg7[%c0_15, %c0_16] : memref<16x384xf32, #tpu.memory_space<vmem>>, vector<16x384xf32>
    tpu.vector_store %arg7[%c0_15, %c0_16], %15 {strides = array<i32>} : memref<16x384xf32, #tpu.memory_space<vmem>>, vector<16x384xf32>,
    %c0_17 = arith.constant 0 : index
    %c0_18 = arith.constant 0 : index
    %c0_19 = arith.constant 0 : index
    %17 = vector.load %arg2[%c0_17, %c0_18, %c0_19] : memref<2x128x384xbf16, #tpu.memory_space<vmem>>, vector<1x128x384xbf16>
    %18 = vector.shape_cast %17 : vector<1x128x384xbf16> to vector<128x384xbf16>
    %c1_20 = arith.constant 1 : index
    %c0_21 = arith.constant 0 : index
    %c0_22 = arith.constant 0 : index
    %19 = vector.load %arg2[%c1_20, %c0_21, %c0_22] : memref<2x128x384xbf16, #tpu.memory_space<vmem>>, vector<1x128x384xbf16>
    %20 = vector.shape_cast %19 : vector<1x128x384xbf16> to vector<128x384xbf16>
    %c0_23 = arith.constant 0 : index
    %c0_24 = arith.constant 0 : index
    %c0_25 = arith.constant 0 : index
    %21 = vector.load %arg4[%c0_23, %c0_24, %c0_25] : memref<2x1x384xf32, #tpu.memory_space<vmem>>, vector<1x1x384xf32>
    %22 = vector.shape_cast %21 : vector<1x1x384xf32> to vector<1x384xf32>
    %23 = vector.shape_cast %22 : vector<1x384xf32> to vector<1x384xf32>
    %24 = vector.broadcast %23 : vector<1x384xf32> to vector<2x384xf32>
    %c1_26 = arith.constant 1 : index
    %c0_27 = arith.constant 0 : index
    %c0_28 = arith.constant 0 : index
    %25 = vector.load %arg4[%c1_26, %c0_27, %c0_28] : memref<2x1x384xf32, #tpu.memory_space<vmem>>, vector<1x1x384xf32>
    %26 = vector.shape_cast %25 : vector<1x1x384xf32> to vector<1x384xf32>
    %27 = vector.shape_cast %26 : vector<1x384xf32> to vector<1x384xf32>
    %28 = vector.broadcast %27 : vector<1x384xf32> to vector<2x384xf32>
    %cst_29 = arith.constant 0.000000e+00 : f32
    %29 = vector.broadcast %cst_29 : f32 to vector<2x128xf32>
    %cst_30 = arith.constant 0.000000e+00 : f32
    %30 = vector.broadcast %cst_30 : f32 to vector<2x128xf32>
    %31 = arith.truncf %29 : vector<2x128xf32> to vector<2x128xbf16>
    %cst_31 = arith.constant dense<0.000000e+00> : vector<2x384xf32>
    %32 = tpu.matmul %31, %18, %cst_31 {dimension_numbers = #tpu.dot_dimension_numbers<[1], [0], [0], [1], [0, 0, 1, 1], [], []>} : vector<2x128xbf16>, vector<128x384xbf16>, vector<2x384xf32> -> vector<2x384xf32>
    %33 = arith.addf %32, %24 : vector<2x384xf32>
    %c0_32 = arith.constant 0 : index
    %c0_33 = arith.constant 0 : index
    %34 = vector.load %arg6[%c0_32, %c0_33] : memref<16x384xf32, #tpu.memory_space<vmem>>, vector<2x384xf32>
    %35 = vector.extract_strided_slice %34 {offsets = [0, 0], sizes = [2, 128], strides = [1, 1]} : vector<2x384xf32> to vector<2x128xf32>
    %36 = vector.extract_strided_slice %33 {offsets = [0, 0], sizes = [2, 128], strides = [1, 1]} : vector<2x384xf32> to vector<2x128xf32>
    %37 = arith.addf %35, %36 : vector<2x128xf32>
    %38 = arith.negf %37 : vector<2x128xf32>
    %39 = math.exp %38 : vector<2x128xf32>
    %cst_34 = arith.constant 1.000000e+00 : f32
    %40 = vector.broadcast %cst_34 : f32 to vector<2x128xf32>
    %41 = arith.addf %40, %39 : vector<2x128xf32>
    %42 = arith.divf %40, %41 : vector<2x128xf32>
    %43 = vector.extract_strided_slice %34 {offsets = [0, 128], sizes = [2, 128], strides = [1, 1]} : vector<2x384xf32> to vector<2x128xf32>
    %44 = vector.extract_strided_slice %33 {offsets = [0, 128], sizes = [2, 128], strides = [1, 1]} : vector<2x384xf32> to vector<2x128xf32>
    %45 = arith.addf %43, %44 : vector<2x128xf32>
    %46 = arith.negf %45 : vector<2x128xf32>
    %47 = math.exp %46 : vector<2x128xf32>
    %cst_35 = arith.constant 1.000000e+00 : f32
    %48 = vector.broadcast %cst_35 : f32 to vector<2x128xf32>
    %49 = arith.addf %48, %47 : vector<2x128xf32>
    %50 = arith.divf %48, %49 : vector<2x128xf32>
    %51 = vector.extract_strided_slice %34 {offsets = [0, 256], sizes = [2, 128], strides = [1, 1]} : vector<2x384xf32> to vector<2x128xf32>
    %52 = vector.extract_strided_slice %33 {offsets = [0, 256], sizes = [2, 128], strides = [1, 1]} : vector<2x384xf32> to vector<2x128xf32>
    %53 = arith.mulf %42, %52 : vector<2x128xf32>
    %54 = arith.addf %51, %53 : vector<2x128xf32>
    %55 = math.tanh %54 : vector<2x128xf32>
    %cst_36 = arith.constant 1.000000e+00 : f32
    %56 = vector.broadcast %cst_36 : f32 to vector<2x128xf32>
    %57 = arith.subf %56, %50 : vector<2x128xf32>
    %58 = arith.mulf %57, %55 : vector<2x128xf32>
    %59 = arith.mulf %50, %29 : vector<2x128xf32>
    %60 = arith.addf %58, %59 : vector<2x128xf32>
    %61 = arith.truncf %60 : vector<2x128xf32> to vector<2x128xbf16>
    %c0_37 = arith.constant 0 : index
    %c0_38 = arith.constant 0 : index
    %62 = vector.load %arg5[%c0_37, %c0_38] : memref<16x256xbf16, #tpu.memory_space<vmem>>, vector<2x128xbf16>
    tpu.vector_store %arg5[%c0_37, %c0_38], %61 {strides = array<i32>} : memref<16x256xbf16, #tpu.memory_space<vmem>>, vector<2x128xbf16>,
    %63 = arith.truncf %30 : vector<2x128xf32> to vector<2x128xbf16>
    %cst_39 = arith.constant dense<0.000000e+00> : vector<2x384xf32>
    %64 = tpu.matmul %63, %20, %cst_39 {dimension_numbers = #tpu.dot_dimension_numbers<[1], [0], [0], [1], [0, 0, 1, 1], [], []>} : vector<2x128xbf16>, vector<128x384xbf16>, vector<2x384xf32> -> vector<2x384xf32>
    %65 = arith.addf %64, %28 : vector<2x384xf32>
    %c14 = arith.constant 14 : index
    %c0_40 = arith.constant 0 : index
    %66 = vector.load %arg7[%c14, %c0_40] : memref<16x384xf32, #tpu.memory_space<vmem>>, vector<2x384xf32>
    %67 = vector.extract_strided_slice %66 {offsets = [0, 0], sizes = [2, 128], strides = [1, 1]} : vector<2x384xf32> to vector<2x128xf32>
    %68 = vector.extract_strided_slice %65 {offsets = [0, 0], sizes = [2, 128], strides = [1, 1]} : vector<2x384xf32> to vector<2x128xf32>
    %69 = arith.addf %67, %68 : vector<2x128xf32>
    %70 = arith.negf %69 : vector<2x128xf32>
    %71 = math.exp %70 : vector<2x128xf32>
    %cst_41 = arith.constant 1.000000e+00 : f32
    %72 = vector.broadcast %cst_41 : f32 to vector<2x128xf32>
    %73 = arith.addf %72, %71 : vector<2x128xf32>
    %74 = arith.divf %72, %73 : vector<2x128xf32>
    %75 = vector.extract_strided_slice %66 {offsets = [0, 128], sizes = [2, 128], strides = [1, 1]} : vector<2x384xf32> to vector<2x128xf32>
    %76 = vector.extract_strided_slice %65 {offsets = [0, 128], sizes = [2, 128], strides = [1, 1]} : vector<2x384xf32> to vector<2x128xf32>
    %77 = arith.addf %75, %76 : vector<2x128xf32>
    %78 = arith.negf %77 : vector<2x128xf32>
    %79 = math.exp %78 : vector<2x128xf32>
    %cst_42 = arith.constant 1.000000e+00 : f32
    %80 = vector.broadcast %cst_42 : f32 to vector<2x128xf32>
    %81 = arith.addf %80, %79 : vector<2x128xf32>
    %82 = arith.divf %80, %81 : vector<2x128xf32>
    %83 = vector.extract_strided_slice %66 {offsets = [0, 256], sizes = [2, 128], strides = [1, 1]} : vector<2x384xf32> to vector<2x128xf32>
    %84 = vector.extract_strided_slice %65 {offsets = [0, 256], sizes = [2, 128], strides = [1, 1]} : vector<2x384xf32> to vector<2x128xf32>
    %85 = arith.mulf %74, %84 : vector<2x128xf32>
    %86 = arith.addf %83, %85 : vector<2x128xf32>
    %87 = math.tanh %86 : vector<2x128xf32>
    %cst_43 = arith.constant 1.000000e+00 : f32
    %88 = vector.broadcast %cst_43 : f32 to vector<2x128xf32>
    %89 = arith.subf %88, %82 : vector<2x128xf32>
    %90 = arith.mulf %89, %87 : vector<2x128xf32>
    %91 = arith.mulf %82, %30 : vector<2x128xf32>
    %92 = arith.addf %90, %91 : vector<2x128xf32>
    %93 = arith.truncf %92 : vector<2x128xf32> to vector<2x128xbf16>
    %c14_44 = arith.constant 14 : index
    %c128 = arith.constant 128 : index
    %94 = vector.load %arg5[%c14_44, %c128] : memref<16x256xbf16, #tpu.memory_space<vmem>>, vector<2x128xbf16>
    tpu.vector_store %arg5[%c14_44, %c128], %93 {strides = array<i32>} : memref<16x256xbf16, #tpu.memory_space<vmem>>, vector<2x128xbf16>,
    %95 = arith.truncf %60 : vector<2x128xf32> to vector<2x128xbf16>
    %cst_45 = arith.constant dense<0.000000e+00> : vector<2x384xf32>
    %96 = tpu.matmul %95, %18, %cst_45 {dimension_numbers = #tpu.dot_dimension_numbers<[1], [0], [0], [1], [0, 0, 1, 1], [], []>} : vector<2x128xbf16>, vector<128x384xbf16>, vector<2x384xf32> -> vector<2x384xf32>
    %97 = arith.addf %96, %24 : vector<2x384xf32>
    %c2 = arith.constant 2 : index
    %c0_46 = arith.constant 0 : index
    %98 = vector.load %arg6[%c2, %c0_46] : memref<16x384xf32, #tpu.memory_space<vmem>>, vector<2x384xf32>
    %99 = vector.extract_strided_slice %98 {offsets = [0, 0], sizes = [2, 128], strides = [1, 1]} : vector<2x384xf32> to vector<2x128xf32>
    %100 = vector.extract_strided_slice %97 {offsets = [0, 0], sizes = [2, 128], strides = [1, 1]} : vector<2x384xf32> to vector<2x128xf32>
    %101 = arith.addf %99, %100 : vector<2x128xf32>
    %102 = arith.negf %101 : vector<2x128xf32>
    %103 = math.exp %102 : vector<2x128xf32>
    %cst_47 = arith.constant 1.000000e+00 : f32
    %104 = vector.broadcast %cst_47 : f32 to vector<2x128xf32>
    %105 = arith.addf %104, %103 : vector<2x128xf32>
    %106 = arith.divf %104, %105 : vector<2x128xf32>
    %107 = vector.extract_strided_slice %98 {offsets = [0, 128], sizes = [2, 128], strides = [1, 1]} : vector<2x384xf32> to vector<2x128xf32>
    %108 = vector.extract_strided_slice %97 {offsets = [0, 128], sizes = [2, 128], strides = [1, 1]} : vector<2x384xf32> to vector<2x128xf32>
    %109 = arith.addf %107, %108 : vector<2x128xf32>
    %110 = arith.negf %109 : vector<2x128xf32>
    %111 = math.exp %110 : vector<2x128xf32>
    %cst_48 = arith.constant 1.000000e+00 : f32
    %112 = vector.broadcast %cst_48 : f32 to vector<2x128xf32>
    %113 = arith.addf %112, %111 : vector<2x128xf32>
    %114 = arith.divf %112, %113 : vector<2x128xf32>
    %115 = vector.extract_strided_slice %98 {offsets = [0, 256], sizes = [2, 128], strides = [1, 1]} : vector<2x384xf32> to vector<2x128xf32>
    %116 = vector.extract_strided_slice %97 {offsets = [0, 256], sizes = [2, 128], strides = [1, 1]} : vector<2x384xf32> to vector<2x128xf32>
    %117 = arith.mulf %106, %116 : vector<2x128xf32>
    %118 = arith.addf %115, %117 : vector<2x128xf32>
    %119 = math.tanh %118 : vector<2x128xf32>
    %cst_49 = arith.constant 1.000000e+00 : f32
    %120 = vector.broadcast %cst_49 : f32 to vector<2x128xf32>
    %121 = arith.subf %120, %114 : vector<2x128xf32>
    %122 = arith.mulf %121, %119 : vector<2x128xf32>
    %123 = arith.mulf %114, %60 : vector<2x128xf32>
    %124 = arith.addf %122, %123 : vector<2x128xf32>
    %125 = arith.truncf %124 : vector<2x128xf32> to vector<2x128xbf16>
    %c2_50 = arith.constant 2 : index
    %c0_51 = arith.constant 0 : index
    %126 = vector.load %arg5[%c2_50, %c0_51] : memref<16x256xbf16, #tpu.memory_space<vmem>>, vector<2x128xbf16>
    tpu.vector_store %arg5[%c2_50, %c0_51], %125 {strides = array<i32>} : memref<16x256xbf16, #tpu.memory_space<vmem>>, vector<2x128xbf16>,
    %127 = arith.truncf %92 : vector<2x128xf32> to vector<2x128xbf16>
    %cst_52 = arith.constant dense<0.000000e+00> : vector<2x384xf32>
    %128 = tpu.matmul %127, %20, %cst_52 {dimension_numbers = #tpu.dot_dimension_numbers<[1], [0], [0], [1], [0, 0, 1, 1], [], []>} : vector<2x128xbf16>, vector<128x384xbf16>, vector<2x384xf32> -> vector<2x384xf32>
    %129 = arith.addf %128, %28 : vector<2x384xf32>
    %c12 = arith.constant 12 : index
    %c0_53 = arith.constant 0 : index
    %130 = vector.load %arg7[%c12, %c0_53] : memref<16x384xf32, #tpu.memory_space<vmem>>, vector<2x384xf32>
    %131 = vector.extract_strided_slice %130 {offsets = [0, 0], sizes = [2, 128], strides = [1, 1]} : vector<2x384xf32> to vector<2x128xf32>
    %132 = vector.extract_strided_slice %129 {offsets = [0, 0], sizes = [2, 128], strides = [1, 1]} : vector<2x384xf32> to vector<2x128xf32>
    %133 = arith.addf %131, %132 : vector<2x128xf32>
    %134 = arith.negf %133 : vector<2x128xf32>
    %135 = math.exp %134 : vector<2x128xf32>
    %cst_54 = arith.constant 1.000000e+00 : f32
    %136 = vector.broadcast %cst_54 : f32 to vector<2x128xf32>
    %137 = arith.addf %136, %135 : vector<2x128xf32>
    %138 = arith.divf %136, %137 : vector<2x128xf32>
    %139 = vector.extract_strided_slice %130 {offsets = [0, 128], sizes = [2, 128], strides = [1, 1]} : vector<2x384xf32> to vector<2x128xf32>
    %140 = vector.extract_strided_slice %129 {offsets = [0, 128], sizes = [2, 128], strides = [1, 1]} : vector<2x384xf32> to vector<2x128xf32>
    %141 = arith.addf %139, %140 : vector<2x128xf32>
    %142 = arith.negf %141 : vector<2x128xf32>
    %143 = math.exp %142 : vector<2x128xf32>
    %cst_55 = arith.constant 1.000000e+00 : f32
    %144 = vector.broadcast %cst_55 : f32 to vector<2x128xf32>
    %145 = arith.addf %144, %143 : vector<2x128xf32>
    %146 = arith.divf %144, %145 : vector<2x128xf32>
    %147 = vector.extract_strided_slice %130 {offsets = [0, 256], sizes = [2, 128], strides = [1, 1]} : vector<2x384xf32> to vector<2x128xf32>
    %148 = vector.extract_strided_slice %129 {offsets = [0, 256], sizes = [2, 128], strides = [1, 1]} : vector<2x384xf32> to vector<2x128xf32>
    %149 = arith.mulf %138, %148 : vector<2x128xf32>
    %150 = arith.addf %147, %149 : vector<2x128xf32>
    %151 = math.tanh %150 : vector<2x128xf32>
    %cst_56 = arith.constant 1.000000e+00 : f32
    %152 = vector.broadcast %cst_56 : f32 to vector<2x128xf32>
    %153 = arith.subf %152, %146 : vector<2x128xf32>
    %154 = arith.mulf %153, %151 : vector<2x128xf32>
    %155 = arith.mulf %146, %92 : vector<2x128xf32>
    %156 = arith.addf %154, %155 : vector<2x128xf32>
    %157 = arith.truncf %156 : vector<2x128xf32> to vector<2x128xbf16>
    %c12_57 = arith.constant 12 : index
    %c128_58 = arith.constant 128 : index
    %158 = vector.load %arg5[%c12_57, %c128_58] : memref<16x256xbf16, #tpu.memory_space<vmem>>, vector<2x128xbf16>
    tpu.vector_store %arg5[%c12_57, %c128_58], %157 {strides = array<i32>} : memref<16x256xbf16, #tpu.memory_space<vmem>>, vector<2x128xbf16>,
    %159 = arith.truncf %124 : vector<2x128xf32> to vector<2x128xbf16>
    %cst_59 = arith.constant dense<0.000000e+00> : vector<2x384xf32>
    %160 = tpu.matmul %159, %18, %cst_59 {dimension_numbers = #tpu.dot_dimension_numbers<[1], [0], [0], [1], [0, 0, 1, 1], [], []>} : vector<2x128xbf16>, vector<128x384xbf16>, vector<2x384xf32> -> vector<2x384xf32>
    %161 = arith.addf %160, %24 : vector<2x384xf32>
    %c4 = arith.constant 4 : index
    %c0_60 = arith.constant 0 : index
    %162 = vector.load %arg6[%c4, %c0_60] : memref<16x384xf32, #tpu.memory_space<vmem>>, vector<2x384xf32>
    %163 = vector.extract_strided_slice %162 {offsets = [0, 0], sizes = [2, 128], strides = [1, 1]} : vector<2x384xf32> to vector<2x128xf32>
    %164 = vector.extract_strided_slice %161 {offsets = [0, 0], sizes = [2, 128], strides = [1, 1]} : vector<2x384xf32> to vector<2x128xf32>
    %165 = arith.addf %163, %164 : vector<2x128xf32>
    %166 = arith.negf %165 : vector<2x128xf32>
    %167 = math.exp %166 : vector<2x128xf32>
    %cst_61 = arith.constant 1.000000e+00 : f32
    %168 = vector.broadcast %cst_61 : f32 to vector<2x128xf32>
    %169 = arith.addf %168, %167 : vector<2x128xf32>
    %170 = arith.divf %168, %169 : vector<2x128xf32>
    %171 = vector.extract_strided_slice %162 {offsets = [0, 128], sizes = [2, 128], strides = [1, 1]} : vector<2x384xf32> to vector<2x128xf32>
    %172 = vector.extract_strided_slice %161 {offsets = [0, 128], sizes = [2, 128], strides = [1, 1]} : vector<2x384xf32> to vector<2x128xf32>
    %173 = arith.addf %171, %172 : vector<2x128xf32>
    %174 = arith.negf %173 : vector<2x128xf32>
    %175 = math.exp %174 : vector<2x128xf32>
    %cst_62 = arith.constant 1.000000e+00 : f32
    %176 = vector.broadcast %cst_62 : f32 to vector<2x128xf32>
    %177 = arith.addf %176, %175 : vector<2x128xf32>
    %178 = arith.divf %176, %177 : vector<2x128xf32>
    %179 = vector.extract_strided_slice %162 {offsets = [0, 256], sizes = [2, 128], strides = [1, 1]} : vector<2x384xf32> to vector<2x128xf32>
    %180 = vector.extract_strided_slice %161 {offsets = [0, 256], sizes = [2, 128], strides = [1, 1]} : vector<2x384xf32> to vector<2x128xf32>
    %181 = arith.mulf %170, %180 : vector<2x128xf32>
    %182 = arith.addf %179, %181 : vector<2x128xf32>
    %183 = math.tanh %182 : vector<2x128xf32>
    %cst_63 = arith.constant 1.000000e+00 : f32
    %184 = vector.broadcast %cst_63 : f32 to vector<2x128xf32>
    %185 = arith.subf %184, %178 : vector<2x128xf32>
    %186 = arith.mulf %185, %183 : vector<2x128xf32>
    %187 = arith.mulf %178, %124 : vector<2x128xf32>
    %188 = arith.addf %186, %187 : vector<2x128xf32>
    %189 = arith.truncf %188 : vector<2x128xf32> to vector<2x128xbf16>
    %c4_64 = arith.constant 4 : index
    %c0_65 = arith.constant 0 : index
    %190 = vector.load %arg5[%c4_64, %c0_65] : memref<16x256xbf16, #tpu.memory_space<vmem>>, vector<2x128xbf16>
    tpu.vector_store %arg5[%c4_64, %c0_65], %189 {strides = array<i32>} : memref<16x256xbf16, #tpu.memory_space<vmem>>, vector<2x128xbf16>,
    %191 = arith.truncf %156 : vector<2x128xf32> to vector<2x128xbf16>
    %cst_66 = arith.constant dense<0.000000e+00> : vector<2x384xf32>
    %192 = tpu.matmul %191, %20, %cst_66 {dimension_numbers = #tpu.dot_dimension_numbers<[1], [0], [0], [1], [0, 0, 1, 1], [], []>} : vector<2x128xbf16>, vector<128x384xbf16>, vector<2x384xf32> -> vector<2x384xf32>
    %193 = arith.addf %192, %28 : vector<2x384xf32>
    %c10 = arith.constant 10 : index
    %c0_67 = arith.constant 0 : index
    %194 = vector.load %arg7[%c10, %c0_67] : memref<16x384xf32, #tpu.memory_space<vmem>>, vector<2x384xf32>
    %195 = vector.extract_strided_slice %194 {offsets = [0, 0], sizes = [2, 128], strides = [1, 1]} : vector<2x384xf32> to vector<2x128xf32>
    %196 = vector.extract_strided_slice %193 {offsets = [0, 0], sizes = [2, 128], strides = [1, 1]} : vector<2x384xf32> to vector<2x128xf32>
    %197 = arith.addf %195, %196 : vector<2x128xf32>
    %198 = arith.negf %197 : vector<2x128xf32>
    %199 = math.exp %198 : vector<2x128xf32>
    %cst_68 = arith.constant 1.000000e+00 : f32
    %200 = vector.broadcast %cst_68 : f32 to vector<2x128xf32>
    %201 = arith.addf %200, %199 : vector<2x128xf32>
    %202 = arith.divf %200, %201 : vector<2x128xf32>
    %203 = vector.extract_strided_slice %194 {offsets = [0, 128], sizes = [2, 128], strides = [1, 1]} : vector<2x384xf32> to vector<2x128xf32>
    %204 = vector.extract_strided_slice %193 {offsets = [0, 128], sizes = [2, 128], strides = [1, 1]} : vector<2x384xf32> to vector<2x128xf32>
    %205 = arith.addf %203, %204 : vector<2x128xf32>
    %206 = arith.negf %205 : vector<2x128xf32>
    %207 = math.exp %206 : vector<2x128xf32>
    %cst_69 = arith.constant 1.000000e+00 : f32
    %208 = vector.broadcast %cst_69 : f32 to vector<2x128xf32>
    %209 = arith.addf %208, %207 : vector<2x128xf32>
    %210 = arith.divf %208, %209 : vector<2x128xf32>
    %211 = vector.extract_strided_slice %194 {offsets = [0, 256], sizes = [2, 128], strides = [1, 1]} : vector<2x384xf32> to vector<2x128xf32>
    %212 = vector.extract_strided_slice %193 {offsets = [0, 256], sizes = [2, 128], strides = [1, 1]} : vector<2x384xf32> to vector<2x128xf32>
    %213 = arith.mulf %202, %212 : vector<2x128xf32>
    %214 = arith.addf %211, %213 : vector<2x128xf32>
    %215 = math.tanh %214 : vector<2x128xf32>
    %cst_70 = arith.constant 1.000000e+00 : f32
    %216 = vector.broadcast %cst_70 : f32 to vector<2x128xf32>
    %217 = arith.subf %216, %210 : vector<2x128xf32>
    %218 = arith.mulf %217, %215 : vector<2x128xf32>
    %219 = arith.mulf %210, %156 : vector<2x128xf32>
    %220 = arith.addf %218, %219 : vector<2x128xf32>
    %221 = arith.truncf %220 : vector<2x128xf32> to vector<2x128xbf16>
    %c10_71 = arith.constant 10 : index
    %c128_72 = arith.constant 128 : index
    %222 = vector.load %arg5[%c10_71, %c128_72] : memref<16x256xbf16, #tpu.memory_space<vmem>>, vector<2x128xbf16>
    tpu.vector_store %arg5[%c10_71, %c128_72], %221 {strides = array<i32>} : memref<16x256xbf16, #tpu.memory_space<vmem>>, vector<2x128xbf16>,
    %223 = arith.truncf %188 : vector<2x128xf32> to vector<2x128xbf16>
    %cst_73 = arith.constant dense<0.000000e+00> : vector<2x384xf32>
    %224 = tpu.matmul %223, %18, %cst_73 {dimension_numbers = #tpu.dot_dimension_numbers<[1], [0], [0], [1], [0, 0, 1, 1], [], []>} : vector<2x128xbf16>, vector<128x384xbf16>, vector<2x384xf32> -> vector<2x384xf32>
    %225 = arith.addf %224, %24 : vector<2x384xf32>
    %c6 = arith.constant 6 : index
    %c0_74 = arith.constant 0 : index
    %226 = vector.load %arg6[%c6, %c0_74] : memref<16x384xf32, #tpu.memory_space<vmem>>, vector<2x384xf32>
    %227 = vector.extract_strided_slice %226 {offsets = [0, 0], sizes = [2, 128], strides = [1, 1]} : vector<2x384xf32> to vector<2x128xf32>
    %228 = vector.extract_strided_slice %225 {offsets = [0, 0], sizes = [2, 128], strides = [1, 1]} : vector<2x384xf32> to vector<2x128xf32>
    %229 = arith.addf %227, %228 : vector<2x128xf32>
    %230 = arith.negf %229 : vector<2x128xf32>
    %231 = math.exp %230 : vector<2x128xf32>
    %cst_75 = arith.constant 1.000000e+00 : f32
    %232 = vector.broadcast %cst_75 : f32 to vector<2x128xf32>
    %233 = arith.addf %232, %231 : vector<2x128xf32>
    %234 = arith.divf %232, %233 : vector<2x128xf32>
    %235 = vector.extract_strided_slice %226 {offsets = [0, 128], sizes = [2, 128], strides = [1, 1]} : vector<2x384xf32> to vector<2x128xf32>
    %236 = vector.extract_strided_slice %225 {offsets = [0, 128], sizes = [2, 128], strides = [1, 1]} : vector<2x384xf32> to vector<2x128xf32>
    %237 = arith.addf %235, %236 : vector<2x128xf32>
    %238 = arith.negf %237 : vector<2x128xf32>
    %239 = math.exp %238 : vector<2x128xf32>
    %cst_76 = arith.constant 1.000000e+00 : f32
    %240 = vector.broadcast %cst_76 : f32 to vector<2x128xf32>
    %241 = arith.addf %240, %239 : vector<2x128xf32>
    %242 = arith.divf %240, %241 : vector<2x128xf32>
    %243 = vector.extract_strided_slice %226 {offsets = [0, 256], sizes = [2, 128], strides = [1, 1]} : vector<2x384xf32> to vector<2x128xf32>
    %244 = vector.extract_strided_slice %225 {offsets = [0, 256], sizes = [2, 128], strides = [1, 1]} : vector<2x384xf32> to vector<2x128xf32>
    %245 = arith.mulf %234, %244 : vector<2x128xf32>
    %246 = arith.addf %243, %245 : vector<2x128xf32>
    %247 = math.tanh %246 : vector<2x128xf32>
    %cst_77 = arith.constant 1.000000e+00 : f32
    %248 = vector.broadcast %cst_77 : f32 to vector<2x128xf32>
    %249 = arith.subf %248, %242 : vector<2x128xf32>
    %250 = arith.mulf %249, %247 : vector<2x128xf32>
    %251 = arith.mulf %242, %188 : vector<2x128xf32>
    %252 = arith.addf %250, %251 : vector<2x128xf32>
    %253 = arith.truncf %252 : vector<2x128xf32> to vector<2x128xbf16>
    %c6_78 = arith.constant 6 : index
    %c0_79 = arith.constant 0 : index
    %254 = vector.load %arg5[%c6_78, %c0_79] : memref<16x256xbf16, #tpu.memory_space<vmem>>, vector<2x128xbf16>
    tpu.vector_store %arg5[%c6_78, %c0_79], %253 {strides = array<i32>} : memref<16x256xbf16, #tpu.memory_space<vmem>>, vector<2x128xbf16>,
    %255 = arith.truncf %220 : vector<2x128xf32> to vector<2x128xbf16>
    %cst_80 = arith.constant dense<0.000000e+00> : vector<2x384xf32>
    %256 = tpu.matmul %255, %20, %cst_80 {dimension_numbers = #tpu.dot_dimension_numbers<[1], [0], [0], [1], [0, 0, 1, 1], [], []>} : vector<2x128xbf16>, vector<128x384xbf16>, vector<2x384xf32> -> vector<2x384xf32>
    %257 = arith.addf %256, %28 : vector<2x384xf32>
    %c8 = arith.constant 8 : index
    %c0_81 = arith.constant 0 : index
    %258 = vector.load %arg7[%c8, %c0_81] : memref<16x384xf32, #tpu.memory_space<vmem>>, vector<2x384xf32>
    %259 = vector.extract_strided_slice %258 {offsets = [0, 0], sizes = [2, 128], strides = [1, 1]} : vector<2x384xf32> to vector<2x128xf32>
    %260 = vector.extract_strided_slice %257 {offsets = [0, 0], sizes = [2, 128], strides = [1, 1]} : vector<2x384xf32> to vector<2x128xf32>
    %261 = arith.addf %259, %260 : vector<2x128xf32>
    %262 = arith.negf %261 : vector<2x128xf32>
    %263 = math.exp %262 : vector<2x128xf32>
    %cst_82 = arith.constant 1.000000e+00 : f32
    %264 = vector.broadcast %cst_82 : f32 to vector<2x128xf32>
    %265 = arith.addf %264, %263 : vector<2x128xf32>
    %266 = arith.divf %264, %265 : vector<2x128xf32>
    %267 = vector.extract_strided_slice %258 {offsets = [0, 128], sizes = [2, 128], strides = [1, 1]} : vector<2x384xf32> to vector<2x128xf32>
    %268 = vector.extract_strided_slice %257 {offsets = [0, 128], sizes = [2, 128], strides = [1, 1]} : vector<2x384xf32> to vector<2x128xf32>
    %269 = arith.addf %267, %268 : vector<2x128xf32>
    %270 = arith.negf %269 : vector<2x128xf32>
    %271 = math.exp %270 : vector<2x128xf32>
    %cst_83 = arith.constant 1.000000e+00 : f32
    %272 = vector.broadcast %cst_83 : f32 to vector<2x128xf32>
    %273 = arith.addf %272, %271 : vector<2x128xf32>
    %274 = arith.divf %272, %273 : vector<2x128xf32>
    %275 = vector.extract_strided_slice %258 {offsets = [0, 256], sizes = [2, 128], strides = [1, 1]} : vector<2x384xf32> to vector<2x128xf32>
    %276 = vector.extract_strided_slice %257 {offsets = [0, 256], sizes = [2, 128], strides = [1, 1]} : vector<2x384xf32> to vector<2x128xf32>
    %277 = arith.mulf %266, %276 : vector<2x128xf32>
    %278 = arith.addf %275, %277 : vector<2x128xf32>
    %279 = math.tanh %278 : vector<2x128xf32>
    %cst_84 = arith.constant 1.000000e+00 : f32
    %280 = vector.broadcast %cst_84 : f32 to vector<2x128xf32>
    %281 = arith.subf %280, %274 : vector<2x128xf32>
    %282 = arith.mulf %281, %279 : vector<2x128xf32>
    %283 = arith.mulf %274, %220 : vector<2x128xf32>
    %284 = arith.addf %282, %283 : vector<2x128xf32>
    %285 = arith.truncf %284 : vector<2x128xf32> to vector<2x128xbf16>
    %c8_85 = arith.constant 8 : index
    %c128_86 = arith.constant 128 : index
    %286 = vector.load %arg5[%c8_85, %c128_86] : memref<16x256xbf16, #tpu.memory_space<vmem>>, vector<2x128xbf16>
    tpu.vector_store %arg5[%c8_85, %c128_86], %285 {strides = array<i32>} : memref<16x256xbf16, #tpu.memory_space<vmem>>, vector<2x128xbf16>,
    %287 = arith.truncf %252 : vector<2x128xf32> to vector<2x128xbf16>
    %cst_87 = arith.constant dense<0.000000e+00> : vector<2x384xf32>
    %288 = tpu.matmul %287, %18, %cst_87 {dimension_numbers = #tpu.dot_dimension_numbers<[1], [0], [0], [1], [0, 0, 1, 1], [], []>} : vector<2x128xbf16>, vector<128x384xbf16>, vector<2x384xf32> -> vector<2x384xf32>
    %289 = arith.addf %288, %24 : vector<2x384xf32>
    %c8_88 = arith.constant 8 : index
    %c0_89 = arith.constant 0 : index
    %290 = vector.load %arg6[%c8_88, %c0_89] : memref<16x384xf32, #tpu.memory_space<vmem>>, vector<2x384xf32>
    %291 = vector.extract_strided_slice %290 {offsets = [0, 0], sizes = [2, 128], strides = [1, 1]} : vector<2x384xf32> to vector<2x128xf32>
    %292 = vector.extract_strided_slice %289 {offsets = [0, 0], sizes = [2, 128], strides = [1, 1]} : vector<2x384xf32> to vector<2x128xf32>
    %293 = arith.addf %291, %292 : vector<2x128xf32>
    %294 = arith.negf %293 : vector<2x128xf32>
    %295 = math.exp %294 : vector<2x128xf32>
    %cst_90 = arith.constant 1.000000e+00 : f32
    %296 = vector.broadcast %cst_90 : f32 to vector<2x128xf32>
    %297 = arith.addf %296, %295 : vector<2x128xf32>
    %298 = arith.divf %296, %297 : vector<2x128xf32>
    %299 = vector.extract_strided_slice %290 {offsets = [0, 128], sizes = [2, 128], strides = [1, 1]} : vector<2x384xf32> to vector<2x128xf32>
    %300 = vector.extract_strided_slice %289 {offsets = [0, 128], sizes = [2, 128], strides = [1, 1]} : vector<2x384xf32> to vector<2x128xf32>
    %301 = arith.addf %299, %300 : vector<2x128xf32>
    %302 = arith.negf %301 : vector<2x128xf32>
    %303 = math.exp %302 : vector<2x128xf32>
    %cst_91 = arith.constant 1.000000e+00 : f32
    %304 = vector.broadcast %cst_91 : f32 to vector<2x128xf32>
    %305 = arith.addf %304, %303 : vector<2x128xf32>
    %306 = arith.divf %304, %305 : vector<2x128xf32>
    %307 = vector.extract_strided_slice %290 {offsets = [0, 256], sizes = [2, 128], strides = [1, 1]} : vector<2x384xf32> to vector<2x128xf32>
    %308 = vector.extract_strided_slice %289 {offsets = [0, 256], sizes = [2, 128], strides = [1, 1]} : vector<2x384xf32> to vector<2x128xf32>
    %309 = arith.mulf %298, %308 : vector<2x128xf32>
    %310 = arith.addf %307, %309 : vector<2x128xf32>
    %311 = math.tanh %310 : vector<2x128xf32>
    %cst_92 = arith.constant 1.000000e+00 : f32
    %312 = vector.broadcast %cst_92 : f32 to vector<2x128xf32>
    %313 = arith.subf %312, %306 : vector<2x128xf32>
    %314 = arith.mulf %313, %311 : vector<2x128xf32>
    %315 = arith.mulf %306, %252 : vector<2x128xf32>
    %316 = arith.addf %314, %315 : vector<2x128xf32>
    %317 = arith.truncf %316 : vector<2x128xf32> to vector<2x128xbf16>
    %c8_93 = arith.constant 8 : index
    %c0_94 = arith.constant 0 : index
    %318 = vector.load %arg5[%c8_93, %c0_94] : memref<16x256xbf16, #tpu.memory_space<vmem>>, vector<2x128xbf16>
    tpu.vector_store %arg5[%c8_93, %c0_94], %317 {strides = array<i32>} : memref<16x256xbf16, #tpu.memory_space<vmem>>, vector<2x128xbf16>,
    %319 = arith.truncf %284 : vector<2x128xf32> to vector<2x128xbf16>
    %cst_95 = arith.constant dense<0.000000e+00> : vector<2x384xf32>
    %320 = tpu.matmul %319, %20, %cst_95 {dimension_numbers = #tpu.dot_dimension_numbers<[1], [0], [0], [1], [0, 0, 1, 1], [], []>} : vector<2x128xbf16>, vector<128x384xbf16>, vector<2x384xf32> -> vector<2x384xf32>
    %321 = arith.addf %320, %28 : vector<2x384xf32>
    %c6_96 = arith.constant 6 : index
    %c0_97 = arith.constant 0 : index
    %322 = vector.load %arg7[%c6_96, %c0_97] : memref<16x384xf32, #tpu.memory_space<vmem>>, vector<2x384xf32>
    %323 = vector.extract_strided_slice %322 {offsets = [0, 0], sizes = [2, 128], strides = [1, 1]} : vector<2x384xf32> to vector<2x128xf32>
    %324 = vector.extract_strided_slice %321 {offsets = [0, 0], sizes = [2, 128], strides = [1, 1]} : vector<2x384xf32> to vector<2x128xf32>
    %325 = arith.addf %323, %324 : vector<2x128xf32>
    %326 = arith.negf %325 : vector<2x128xf32>
    %327 = math.exp %326 : vector<2x128xf32>
    %cst_98 = arith.constant 1.000000e+00 : f32
    %328 = vector.broadcast %cst_98 : f32 to vector<2x128xf32>
    %329 = arith.addf %328, %327 : vector<2x128xf32>
    %330 = arith.divf %328, %329 : vector<2x128xf32>
    %331 = vector.extract_strided_slice %322 {offsets = [0, 128], sizes = [2, 128], strides = [1, 1]} : vector<2x384xf32> to vector<2x128xf32>
    %332 = vector.extract_strided_slice %321 {offsets = [0, 128], sizes = [2, 128], strides = [1, 1]} : vector<2x384xf32> to vector<2x128xf32>
    %333 = arith.addf %331, %332 : vector<2x128xf32>
    %334 = arith.negf %333 : vector<2x128xf32>
    %335 = math.exp %334 : vector<2x128xf32>
    %cst_99 = arith.constant 1.000000e+00 : f32
    %336 = vector.broadcast %cst_99 : f32 to vector<2x128xf32>
    %337 = arith.addf %336, %335 : vector<2x128xf32>
    %338 = arith.divf %336, %337 : vector<2x128xf32>
    %339 = vector.extract_strided_slice %322 {offsets = [0, 256], sizes = [2, 128], strides = [1, 1]} : vector<2x384xf32> to vector<2x128xf32>
    %340 = vector.extract_strided_slice %321 {offsets = [0, 256], sizes = [2, 128], strides = [1, 1]} : vector<2x384xf32> to vector<2x128xf32>
    %341 = arith.mulf %330, %340 : vector<2x128xf32>
    %342 = arith.addf %339, %341 : vector<2x128xf32>
    %343 = math.tanh %342 : vector<2x128xf32>
    %cst_100 = arith.constant 1.000000e+00 : f32
    %344 = vector.broadcast %cst_100 : f32 to vector<2x128xf32>
    %345 = arith.subf %344, %338 : vector<2x128xf32>
    %346 = arith.mulf %345, %343 : vector<2x128xf32>
    %347 = arith.mulf %338, %284 : vector<2x128xf32>
    %348 = arith.addf %346, %347 : vector<2x128xf32>
    %349 = arith.truncf %348 : vector<2x128xf32> to vector<2x128xbf16>
    %c6_101 = arith.constant 6 : index
    %c128_102 = arith.constant 128 : index
    %350 = vector.load %arg5[%c6_101, %c128_102] : memref<16x256xbf16, #tpu.memory_space<vmem>>, vector<2x128xbf16>
    tpu.vector_store %arg5[%c6_101, %c128_102], %349 {strides = array<i32>} : memref<16x256xbf16, #tpu.memory_space<vmem>>, vector<2x128xbf16>,
    %351 = arith.truncf %316 : vector<2x128xf32> to vector<2x128xbf16>
    %cst_103 = arith.constant dense<0.000000e+00> : vector<2x384xf32>
    %352 = tpu.matmul %351, %18, %cst_103 {dimension_numbers = #tpu.dot_dimension_numbers<[1], [0], [0], [1], [0, 0, 1, 1], [], []>} : vector<2x128xbf16>, vector<128x384xbf16>, vector<2x384xf32> -> vector<2x384xf32>
    %353 = arith.addf %352, %24 : vector<2x384xf32>
    %c10_104 = arith.constant 10 : index
    %c0_105 = arith.constant 0 : index
    %354 = vector.load %arg6[%c10_104, %c0_105] : memref<16x384xf32, #tpu.memory_space<vmem>>, vector<2x384xf32>
    %355 = vector.extract_strided_slice %354 {offsets = [0, 0], sizes = [2, 128], strides = [1, 1]} : vector<2x384xf32> to vector<2x128xf32>
    %356 = vector.extract_strided_slice %353 {offsets = [0, 0], sizes = [2, 128], strides = [1, 1]} : vector<2x384xf32> to vector<2x128xf32>
    %357 = arith.addf %355, %356 : vector<2x128xf32>
    %358 = arith.negf %357 : vector<2x128xf32>
    %359 = math.exp %358 : vector<2x128xf32>
    %cst_106 = arith.constant 1.000000e+00 : f32
    %360 = vector.broadcast %cst_106 : f32 to vector<2x128xf32>
    %361 = arith.addf %360, %359 : vector<2x128xf32>
    %362 = arith.divf %360, %361 : vector<2x128xf32>
    %363 = vector.extract_strided_slice %354 {offsets = [0, 128], sizes = [2, 128], strides = [1, 1]} : vector<2x384xf32> to vector<2x128xf32>
    %364 = vector.extract_strided_slice %353 {offsets = [0, 128], sizes = [2, 128], strides = [1, 1]} : vector<2x384xf32> to vector<2x128xf32>
    %365 = arith.addf %363, %364 : vector<2x128xf32>
    %366 = arith.negf %365 : vector<2x128xf32>
    %367 = math.exp %366 : vector<2x128xf32>
    %cst_107 = arith.constant 1.000000e+00 : f32
    %368 = vector.broadcast %cst_107 : f32 to vector<2x128xf32>
    %369 = arith.addf %368, %367 : vector<2x128xf32>
    %370 = arith.divf %368, %369 : vector<2x128xf32>
    %371 = vector.extract_strided_slice %354 {offsets = [0, 256], sizes = [2, 128], strides = [1, 1]} : vector<2x384xf32> to vector<2x128xf32>
    %372 = vector.extract_strided_slice %353 {offsets = [0, 256], sizes = [2, 128], strides = [1, 1]} : vector<2x384xf32> to vector<2x128xf32>
    %373 = arith.mulf %362, %372 : vector<2x128xf32>
    %374 = arith.addf %371, %373 : vector<2x128xf32>
    %375 = math.tanh %374 : vector<2x128xf32>
    %cst_108 = arith.constant 1.000000e+00 : f32
    %376 = vector.broadcast %cst_108 : f32 to vector<2x128xf32>
    %377 = arith.subf %376, %370 : vector<2x128xf32>
    %378 = arith.mulf %377, %375 : vector<2x128xf32>
    %379 = arith.mulf %370, %316 : vector<2x128xf32>
    %380 = arith.addf %378, %379 : vector<2x128xf32>
    %381 = arith.truncf %380 : vector<2x128xf32> to vector<2x128xbf16>
    %c10_109 = arith.constant 10 : index
    %c0_110 = arith.constant 0 : index
    %382 = vector.load %arg5[%c10_109, %c0_110] : memref<16x256xbf16, #tpu.memory_space<vmem>>, vector<2x128xbf16>
    tpu.vector_store %arg5[%c10_109, %c0_110], %381 {strides = array<i32>} : memref<16x256xbf16, #tpu.memory_space<vmem>>, vector<2x128xbf16>,
    %383 = arith.truncf %348 : vector<2x128xf32> to vector<2x128xbf16>
    %cst_111 = arith.constant dense<0.000000e+00> : vector<2x384xf32>
    %384 = tpu.matmul %383, %20, %cst_111 {dimension_numbers = #tpu.dot_dimension_numbers<[1], [0], [0], [1], [0, 0, 1, 1], [], []>} : vector<2x128xbf16>, vector<128x384xbf16>, vector<2x384xf32> -> vector<2x384xf32>
    %385 = arith.addf %384, %28 : vector<2x384xf32>
    %c4_112 = arith.constant 4 : index
    %c0_113 = arith.constant 0 : index
    %386 = vector.load %arg7[%c4_112, %c0_113] : memref<16x384xf32, #tpu.memory_space<vmem>>, vector<2x384xf32>
    %387 = vector.extract_strided_slice %386 {offsets = [0, 0], sizes = [2, 128], strides = [1, 1]} : vector<2x384xf32> to vector<2x128xf32>
    %388 = vector.extract_strided_slice %385 {offsets = [0, 0], sizes = [2, 128], strides = [1, 1]} : vector<2x384xf32> to vector<2x128xf32>
    %389 = arith.addf %387, %388 : vector<2x128xf32>
    %390 = arith.negf %389 : vector<2x128xf32>
    %391 = math.exp %390 : vector<2x128xf32>
    %cst_114 = arith.constant 1.000000e+00 : f32
    %392 = vector.broadcast %cst_114 : f32 to vector<2x128xf32>
    %393 = arith.addf %392, %391 : vector<2x128xf32>
    %394 = arith.divf %392, %393 : vector<2x128xf32>
    %395 = vector.extract_strided_slice %386 {offsets = [0, 128], sizes = [2, 128], strides = [1, 1]} : vector<2x384xf32> to vector<2x128xf32>
    %396 = vector.extract_strided_slice %385 {offsets = [0, 128], sizes = [2, 128], strides = [1, 1]} : vector<2x384xf32> to vector<2x128xf32>
    %397 = arith.addf %395, %396 : vector<2x128xf32>
    %398 = arith.negf %397 : vector<2x128xf32>
    %399 = math.exp %398 : vector<2x128xf32>
    %cst_115 = arith.constant 1.000000e+00 : f32
    %400 = vector.broadcast %cst_115 : f32 to vector<2x128xf32>
    %401 = arith.addf %400, %399 : vector<2x128xf32>
    %402 = arith.divf %400, %401 : vector<2x128xf32>
    %403 = vector.extract_strided_slice %386 {offsets = [0, 256], sizes = [2, 128], strides = [1, 1]} : vector<2x384xf32> to vector<2x128xf32>
    %404 = vector.extract_strided_slice %385 {offsets = [0, 256], sizes = [2, 128], strides = [1, 1]} : vector<2x384xf32> to vector<2x128xf32>
    %405 = arith.mulf %394, %404 : vector<2x128xf32>
    %406 = arith.addf %403, %405 : vector<2x128xf32>
    %407 = math.tanh %406 : vector<2x128xf32>
    %cst_116 = arith.constant 1.000000e+00 : f32
    %408 = vector.broadcast %cst_116 : f32 to vector<2x128xf32>
    %409 = arith.subf %408, %402 : vector<2x128xf32>
    %410 = arith.mulf %409, %407 : vector<2x128xf32>
    %411 = arith.mulf %402, %348 : vector<2x128xf32>
    %412 = arith.addf %410, %411 : vector<2x128xf32>
    %413 = arith.truncf %412 : vector<2x128xf32> to vector<2x128xbf16>
    %c4_117 = arith.constant 4 : index
    %c128_118 = arith.constant 128 : index
    %414 = vector.load %arg5[%c4_117, %c128_118] : memref<16x256xbf16, #tpu.memory_space<vmem>>, vector<2x128xbf16>
    tpu.vector_store %arg5[%c4_117, %c128_118], %413 {strides = array<i32>} : memref<16x256xbf16, #tpu.memory_space<vmem>>, vector<2x128xbf16>,
    %415 = arith.truncf %380 : vector<2x128xf32> to vector<2x128xbf16>
    %cst_119 = arith.constant dense<0.000000e+00> : vector<2x384xf32>
    %416 = tpu.matmul %415, %18, %cst_119 {dimension_numbers = #tpu.dot_dimension_numbers<[1], [0], [0], [1], [0, 0, 1, 1], [], []>} : vector<2x128xbf16>, vector<128x384xbf16>, vector<2x384xf32> -> vector<2x384xf32>
    %417 = arith.addf %416, %24 : vector<2x384xf32>
    %c12_120 = arith.constant 12 : index
    %c0_121 = arith.constant 0 : index
    %418 = vector.load %arg6[%c12_120, %c0_121] : memref<16x384xf32, #tpu.memory_space<vmem>>, vector<2x384xf32>
    %419 = vector.extract_strided_slice %418 {offsets = [0, 0], sizes = [2, 128], strides = [1, 1]} : vector<2x384xf32> to vector<2x128xf32>
    %420 = vector.extract_strided_slice %417 {offsets = [0, 0], sizes = [2, 128], strides = [1, 1]} : vector<2x384xf32> to vector<2x128xf32>
    %421 = arith.addf %419, %420 : vector<2x128xf32>
    %422 = arith.negf %421 : vector<2x128xf32>
    %423 = math.exp %422 : vector<2x128xf32>
    %cst_122 = arith.constant 1.000000e+00 : f32
    %424 = vector.broadcast %cst_122 : f32 to vector<2x128xf32>
    %425 = arith.addf %424, %423 : vector<2x128xf32>
    %426 = arith.divf %424, %425 : vector<2x128xf32>
    %427 = vector.extract_strided_slice %418 {offsets = [0, 128], sizes = [2, 128], strides = [1, 1]} : vector<2x384xf32> to vector<2x128xf32>
    %428 = vector.extract_strided_slice %417 {offsets = [0, 128], sizes = [2, 128], strides = [1, 1]} : vector<2x384xf32> to vector<2x128xf32>
    %429 = arith.addf %427, %428 : vector<2x128xf32>
    %430 = arith.negf %429 : vector<2x128xf32>
    %431 = math.exp %430 : vector<2x128xf32>
    %cst_123 = arith.constant 1.000000e+00 : f32
    %432 = vector.broadcast %cst_123 : f32 to vector<2x128xf32>
    %433 = arith.addf %432, %431 : vector<2x128xf32>
    %434 = arith.divf %432, %433 : vector<2x128xf32>
    %435 = vector.extract_strided_slice %418 {offsets = [0, 256], sizes = [2, 128], strides = [1, 1]} : vector<2x384xf32> to vector<2x128xf32>
    %436 = vector.extract_strided_slice %417 {offsets = [0, 256], sizes = [2, 128], strides = [1, 1]} : vector<2x384xf32> to vector<2x128xf32>
    %437 = arith.mulf %426, %436 : vector<2x128xf32>
    %438 = arith.addf %435, %437 : vector<2x128xf32>
    %439 = math.tanh %438 : vector<2x128xf32>
    %cst_124 = arith.constant 1.000000e+00 : f32
    %440 = vector.broadcast %cst_124 : f32 to vector<2x128xf32>
    %441 = arith.subf %440, %434 : vector<2x128xf32>
    %442 = arith.mulf %441, %439 : vector<2x128xf32>
    %443 = arith.mulf %434, %380 : vector<2x128xf32>
    %444 = arith.addf %442, %443 : vector<2x128xf32>
    %445 = arith.truncf %444 : vector<2x128xf32> to vector<2x128xbf16>
    %c12_125 = arith.constant 12 : index
    %c0_126 = arith.constant 0 : index
    %446 = vector.load %arg5[%c12_125, %c0_126] : memref<16x256xbf16, #tpu.memory_space<vmem>>, vector<2x128xbf16>
    tpu.vector_store %arg5[%c12_125, %c0_126], %445 {strides = array<i32>} : memref<16x256xbf16, #tpu.memory_space<vmem>>, vector<2x128xbf16>,
    %447 = arith.truncf %412 : vector<2x128xf32> to vector<2x128xbf16>
    %cst_127 = arith.constant dense<0.000000e+00> : vector<2x384xf32>
    %448 = tpu.matmul %447, %20, %cst_127 {dimension_numbers = #tpu.dot_dimension_numbers<[1], [0], [0], [1], [0, 0, 1, 1], [], []>} : vector<2x128xbf16>, vector<128x384xbf16>, vector<2x384xf32> -> vector<2x384xf32>
    %449 = arith.addf %448, %28 : vector<2x384xf32>
    %c2_128 = arith.constant 2 : index
    %c0_129 = arith.constant 0 : index
    %450 = vector.load %arg7[%c2_128, %c0_129] : memref<16x384xf32, #tpu.memory_space<vmem>>, vector<2x384xf32>
    %451 = vector.extract_strided_slice %450 {offsets = [0, 0], sizes = [2, 128], strides = [1, 1]} : vector<2x384xf32> to vector<2x128xf32>
    %452 = vector.extract_strided_slice %449 {offsets = [0, 0], sizes = [2, 128], strides = [1, 1]} : vector<2x384xf32> to vector<2x128xf32>
    %453 = arith.addf %451, %452 : vector<2x128xf32>
    %454 = arith.negf %453 : vector<2x128xf32>
    %455 = math.exp %454 : vector<2x128xf32>
    %cst_130 = arith.constant 1.000000e+00 : f32
    %456 = vector.broadcast %cst_130 : f32 to vector<2x128xf32>
    %457 = arith.addf %456, %455 : vector<2x128xf32>
    %458 = arith.divf %456, %457 : vector<2x128xf32>
    %459 = vector.extract_strided_slice %450 {offsets = [0, 128], sizes = [2, 128], strides = [1, 1]} : vector<2x384xf32> to vector<2x128xf32>
    %460 = vector.extract_strided_slice %449 {offsets = [0, 128], sizes = [2, 128], strides = [1, 1]} : vector<2x384xf32> to vector<2x128xf32>
    %461 = arith.addf %459, %460 : vector<2x128xf32>
    %462 = arith.negf %461 : vector<2x128xf32>
    %463 = math.exp %462 : vector<2x128xf32>
    %cst_131 = arith.constant 1.000000e+00 : f32
    %464 = vector.broadcast %cst_131 : f32 to vector<2x128xf32>
    %465 = arith.addf %464, %463 : vector<2x128xf32>
    %466 = arith.divf %464, %465 : vector<2x128xf32>
    %467 = vector.extract_strided_slice %450 {offsets = [0, 256], sizes = [2, 128], strides = [1, 1]} : vector<2x384xf32> to vector<2x128xf32>
    %468 = vector.extract_strided_slice %449 {offsets = [0, 256], sizes = [2, 128], strides = [1, 1]} : vector<2x384xf32> to vector<2x128xf32>
    %469 = arith.mulf %458, %468 : vector<2x128xf32>
    %470 = arith.addf %467, %469 : vector<2x128xf32>
    %471 = math.tanh %470 : vector<2x128xf32>
    %cst_132 = arith.constant 1.000000e+00 : f32
    %472 = vector.broadcast %cst_132 : f32 to vector<2x128xf32>
    %473 = arith.subf %472, %466 : vector<2x128xf32>
    %474 = arith.mulf %473, %471 : vector<2x128xf32>
    %475 = arith.mulf %466, %412 : vector<2x128xf32>
    %476 = arith.addf %474, %475 : vector<2x128xf32>
    %477 = arith.truncf %476 : vector<2x128xf32> to vector<2x128xbf16>
    %c2_133 = arith.constant 2 : index
    %c128_134 = arith.constant 128 : index
    %478 = vector.load %arg5[%c2_133, %c128_134] : memref<16x256xbf16, #tpu.memory_space<vmem>>, vector<2x128xbf16>
    tpu.vector_store %arg5[%c2_133, %c128_134], %477 {strides = array<i32>} : memref<16x256xbf16, #tpu.memory_space<vmem>>, vector<2x128xbf16>,
    %479 = arith.truncf %444 : vector<2x128xf32> to vector<2x128xbf16>
    %cst_135 = arith.constant dense<0.000000e+00> : vector<2x384xf32>
    %480 = tpu.matmul %479, %18, %cst_135 {dimension_numbers = #tpu.dot_dimension_numbers<[1], [0], [0], [1], [0, 0, 1, 1], [], []>} : vector<2x128xbf16>, vector<128x384xbf16>, vector<2x384xf32> -> vector<2x384xf32>
    %481 = arith.addf %480, %24 : vector<2x384xf32>
    %c14_136 = arith.constant 14 : index
    %c0_137 = arith.constant 0 : index
    %482 = vector.load %arg6[%c14_136, %c0_137] : memref<16x384xf32, #tpu.memory_space<vmem>>, vector<2x384xf32>
    %483 = vector.extract_strided_slice %482 {offsets = [0, 0], sizes = [2, 128], strides = [1, 1]} : vector<2x384xf32> to vector<2x128xf32>
    %484 = vector.extract_strided_slice %481 {offsets = [0, 0], sizes = [2, 128], strides = [1, 1]} : vector<2x384xf32> to vector<2x128xf32>
    %485 = arith.addf %483, %484 : vector<2x128xf32>
    %486 = arith.negf %485 : vector<2x128xf32>
    %487 = math.exp %486 : vector<2x128xf32>
    %cst_138 = arith.constant 1.000000e+00 : f32
    %488 = vector.broadcast %cst_138 : f32 to vector<2x128xf32>
    %489 = arith.addf %488, %487 : vector<2x128xf32>
    %490 = arith.divf %488, %489 : vector<2x128xf32>
    %491 = vector.extract_strided_slice %482 {offsets = [0, 128], sizes = [2, 128], strides = [1, 1]} : vector<2x384xf32> to vector<2x128xf32>
    %492 = vector.extract_strided_slice %481 {offsets = [0, 128], sizes = [2, 128], strides = [1, 1]} : vector<2x384xf32> to vector<2x128xf32>
    %493 = arith.addf %491, %492 : vector<2x128xf32>
    %494 = arith.negf %493 : vector<2x128xf32>
    %495 = math.exp %494 : vector<2x128xf32>
    %cst_139 = arith.constant 1.000000e+00 : f32
    %496 = vector.broadcast %cst_139 : f32 to vector<2x128xf32>
    %497 = arith.addf %496, %495 : vector<2x128xf32>
    %498 = arith.divf %496, %497 : vector<2x128xf32>
    %499 = vector.extract_strided_slice %482 {offsets = [0, 256], sizes = [2, 128], strides = [1, 1]} : vector<2x384xf32> to vector<2x128xf32>
    %500 = vector.extract_strided_slice %481 {offsets = [0, 256], sizes = [2, 128], strides = [1, 1]} : vector<2x384xf32> to vector<2x128xf32>
    %501 = arith.mulf %490, %500 : vector<2x128xf32>
    %502 = arith.addf %499, %501 : vector<2x128xf32>
    %503 = math.tanh %502 : vector<2x128xf32>
    %cst_140 = arith.constant 1.000000e+00 : f32
    %504 = vector.broadcast %cst_140 : f32 to vector<2x128xf32>
    %505 = arith.subf %504, %498 : vector<2x128xf32>
    %506 = arith.mulf %505, %503 : vector<2x128xf32>
    %507 = arith.mulf %498, %444 : vector<2x128xf32>
    %508 = arith.addf %506, %507 : vector<2x128xf32>
    %509 = arith.truncf %508 : vector<2x128xf32> to vector<2x128xbf16>
    %c14_141 = arith.constant 14 : index
    %c0_142 = arith.constant 0 : index
    %510 = vector.load %arg5[%c14_141, %c0_142] : memref<16x256xbf16, #tpu.memory_space<vmem>>, vector<2x128xbf16>
    tpu.vector_store %arg5[%c14_141, %c0_142], %509 {strides = array<i32>} : memref<16x256xbf16, #tpu.memory_space<vmem>>, vector<2x128xbf16>,
    %511 = arith.truncf %476 : vector<2x128xf32> to vector<2x128xbf16>
    %cst_143 = arith.constant dense<0.000000e+00> : vector<2x384xf32>
    %512 = tpu.matmul %511, %20, %cst_143 {dimension_numbers = #tpu.dot_dimension_numbers<[1], [0], [0], [1], [0, 0, 1, 1], [], []>} : vector<2x128xbf16>, vector<128x384xbf16>, vector<2x384xf32> -> vector<2x384xf32>
    %513 = arith.addf %512, %28 : vector<2x384xf32>
    %c0_144 = arith.constant 0 : index
    %c0_145 = arith.constant 0 : index
    %514 = vector.load %arg7[%c0_144, %c0_145] : memref<16x384xf32, #tpu.memory_space<vmem>>, vector<2x384xf32>
    %515 = vector.extract_strided_slice %514 {offsets = [0, 0], sizes = [2, 128], strides = [1, 1]} : vector<2x384xf32> to vector<2x128xf32>
    %516 = vector.extract_strided_slice %513 {offsets = [0, 0], sizes = [2, 128], strides = [1, 1]} : vector<2x384xf32> to vector<2x128xf32>
    %517 = arith.addf %515, %516 : vector<2x128xf32>
    %518 = arith.negf %517 : vector<2x128xf32>
    %519 = math.exp %518 : vector<2x128xf32>
    %cst_146 = arith.constant 1.000000e+00 : f32
    %520 = vector.broadcast %cst_146 : f32 to vector<2x128xf32>
    %521 = arith.addf %520, %519 : vector<2x128xf32>
    %522 = arith.divf %520, %521 : vector<2x128xf32>
    %523 = vector.extract_strided_slice %514 {offsets = [0, 128], sizes = [2, 128], strides = [1, 1]} : vector<2x384xf32> to vector<2x128xf32>
    %524 = vector.extract_strided_slice %513 {offsets = [0, 128], sizes = [2, 128], strides = [1, 1]} : vector<2x384xf32> to vector<2x128xf32>
    %525 = arith.addf %523, %524 : vector<2x128xf32>
    %526 = arith.negf %525 : vector<2x128xf32>
    %527 = math.exp %526 : vector<2x128xf32>
    %cst_147 = arith.constant 1.000000e+00 : f32
    %528 = vector.broadcast %cst_147 : f32 to vector<2x128xf32>
    %529 = arith.addf %528, %527 : vector<2x128xf32>
    %530 = arith.divf %528, %529 : vector<2x128xf32>
    %531 = vector.extract_strided_slice %514 {offsets = [0, 256], sizes = [2, 128], strides = [1, 1]} : vector<2x384xf32> to vector<2x128xf32>
    %532 = vector.extract_strided_slice %513 {offsets = [0, 256], sizes = [2, 128], strides = [1, 1]} : vector<2x384xf32> to vector<2x128xf32>
    %533 = arith.mulf %522, %532 : vector<2x128xf32>
    %534 = arith.addf %531, %533 : vector<2x128xf32>
    %535 = math.tanh %534 : vector<2x128xf32>
    %cst_148 = arith.constant 1.000000e+00 : f32
    %536 = vector.broadcast %cst_148 : f32 to vector<2x128xf32>
    %537 = arith.subf %536, %530 : vector<2x128xf32>
    %538 = arith.mulf %537, %535 : vector<2x128xf32>
    %539 = arith.mulf %530, %476 : vector<2x128xf32>
    %540 = arith.addf %538, %539 : vector<2x128xf32>
    %541 = arith.truncf %540 : vector<2x128xf32> to vector<2x128xbf16>
    %c0_149 = arith.constant 0 : index
    %c128_150 = arith.constant 128 : index
    %542 = vector.load %arg5[%c0_149, %c128_150] : memref<16x256xbf16, #tpu.memory_space<vmem>>, vector<2x128xbf16>
    tpu.vector_store %arg5[%c0_149, %c128_150], %541 {strides = array<i32>} : memref<16x256xbf16, #tpu.memory_space<vmem>>, vector<2x128xbf16>,
    return
  }
}

module attributes {stable_mosaic.version = 11 : i64} {
  func.func @_bigru_layer_kernel(%arg0: memref<16x256xbf16, #tpu.memory_space<vmem>>, %arg1: memref<2x256x384xbf16, #tpu.memory_space<vmem>>, %arg2: memref<2x128x384xbf16, #tpu.memory_space<vmem>>, %arg3: memref<2x1x384xf32, #tpu.memory_space<vmem>>, %arg4: memref<2x1x384xf32, #tpu.memory_space<vmem>>, %arg5: memref<256x128xbf16, #tpu.memory_space<vmem>>, %arg6: memref<1x128xf32, #tpu.memory_space<vmem>>, %arg7: memref<16x128xf32, #tpu.memory_space<vmem>>, %arg8: memref<16x384xf32, #tpu.memory_space<vmem>>, %arg9: memref<16x384xf32, #tpu.memory_space<vmem>>, %arg10: memref<16x256xbf16, #tpu.memory_space<vmem>>) attributes {dimension_semantics = [], scalar_prefetch = 0 : i64, scratch_operands = 3 : i64, tpu.core_type = #tpu.core_type<tc>} {
    %c0 = arith.constant 0 : index
    %c0_0 = arith.constant 0 : index
    %0 = vector.load %arg0[%c0, %c0_0] : memref<16x256xbf16, #tpu.memory_space<vmem>>, vector<16x256xbf16>
    %c0_1 = arith.constant 0 : index
    %c0_2 = arith.constant 0 : index
    %c0_3 = arith.constant 0 : index
    %1 = vector.load %arg1[%c0_1, %c0_2, %c0_3] : memref<2x256x384xbf16, #tpu.memory_space<vmem>>, vector<1x256x384xbf16>
    %2 = vector.shape_cast %1 : vector<1x256x384xbf16> to vector<256x384xbf16>
    %cst = arith.constant dense<0.000000e+00> : vector<16x384xf32>
    %3 = tpu.matmul %0, %2, %cst {dimension_numbers = #tpu.dot_dimension_numbers<[1], [0], [0], [1], [0, 0, 1, 1], [], []>} : vector<16x256xbf16>, vector<256x384xbf16>, vector<16x384xf32> -> vector<16x384xf32>
    %c0_4 = arith.constant 0 : index
    %c0_5 = arith.constant 0 : index
    %c0_6 = arith.constant 0 : index
    %4 = vector.load %arg3[%c0_4, %c0_5, %c0_6] : memref<2x1x384xf32, #tpu.memory_space<vmem>>, vector<1x1x384xf32>
    %5 = vector.shape_cast %4 : vector<1x1x384xf32> to vector<1x384xf32>
    %6 = vector.broadcast %5 : vector<1x384xf32> to vector<16x384xf32>
    %7 = arith.addf %3, %6 : vector<16x384xf32>
    %c0_7 = arith.constant 0 : index
    %c0_8 = arith.constant 0 : index
    %8 = vector.load %arg8[%c0_7, %c0_8] : memref<16x384xf32, #tpu.memory_space<vmem>>, vector<16x384xf32>
    tpu.vector_store %arg8[%c0_7, %c0_8], %7 {strides = array<i32>} : memref<16x384xf32, #tpu.memory_space<vmem>>, vector<16x384xf32>,
    %c1 = arith.constant 1 : index
    %c0_9 = arith.constant 0 : index
    %c0_10 = arith.constant 0 : index
    %9 = vector.load %arg1[%c1, %c0_9, %c0_10] : memref<2x256x384xbf16, #tpu.memory_space<vmem>>, vector<1x256x384xbf16>
    %10 = vector.shape_cast %9 : vector<1x256x384xbf16> to vector<256x384xbf16>
    %cst_11 = arith.constant dense<0.000000e+00> : vector<16x384xf32>
    %11 = tpu.matmul %0, %10, %cst_11 {dimension_numbers = #tpu.dot_dimension_numbers<[1], [0], [0], [1], [0, 0, 1, 1], [], []>} : vector<16x256xbf16>, vector<256x384xbf16>, vector<16x384xf32> -> vector<16x384xf32>
    %c1_12 = arith.constant 1 : index
    %c0_13 = arith.constant 0 : index
    %c0_14 = arith.constant 0 : index
    %12 = vector.load %arg3[%c1_12, %c0_13, %c0_14] : memref<2x1x384xf32, #tpu.memory_space<vmem>>, vector<1x1x384xf32>
    %13 = vector.shape_cast %12 : vector<1x1x384xf32> to vector<1x384xf32>
    %14 = vector.broadcast %13 : vector<1x384xf32> to vector<16x384xf32>
    %15 = arith.addf %11, %14 : vector<16x384xf32>
    %c0_15 = arith.constant 0 : index
    %c0_16 = arith.constant 0 : index
    %16 = vector.load %arg9[%c0_15, %c0_16] : memref<16x384xf32, #tpu.memory_space<vmem>>, vector<16x384xf32>
    tpu.vector_store %arg9[%c0_15, %c0_16], %15 {strides = array<i32>} : memref<16x384xf32, #tpu.memory_space<vmem>>, vector<16x384xf32>,
    %c0_17 = arith.constant 0 : index
    %c0_18 = arith.constant 0 : index
    %c0_19 = arith.constant 0 : index
    %17 = vector.load %arg2[%c0_17, %c0_18, %c0_19] : memref<2x128x384xbf16, #tpu.memory_space<vmem>>, vector<1x128x384xbf16>
    %18 = vector.shape_cast %17 : vector<1x128x384xbf16> to vector<128x384xbf16>
    %c1_20 = arith.constant 1 : index
    %c0_21 = arith.constant 0 : index
    %c0_22 = arith.constant 0 : index
    %19 = vector.load %arg2[%c1_20, %c0_21, %c0_22] : memref<2x128x384xbf16, #tpu.memory_space<vmem>>, vector<1x128x384xbf16>
    %20 = vector.shape_cast %19 : vector<1x128x384xbf16> to vector<128x384xbf16>
    %c0_23 = arith.constant 0 : index
    %c0_24 = arith.constant 0 : index
    %c0_25 = arith.constant 0 : index
    %21 = vector.load %arg4[%c0_23, %c0_24, %c0_25] : memref<2x1x384xf32, #tpu.memory_space<vmem>>, vector<1x1x384xf32>
    %22 = vector.shape_cast %21 : vector<1x1x384xf32> to vector<1x384xf32>
    %23 = vector.shape_cast %22 : vector<1x384xf32> to vector<1x384xf32>
    %24 = vector.broadcast %23 : vector<1x384xf32> to vector<2x384xf32>
    %c1_26 = arith.constant 1 : index
    %c0_27 = arith.constant 0 : index
    %c0_28 = arith.constant 0 : index
    %25 = vector.load %arg4[%c1_26, %c0_27, %c0_28] : memref<2x1x384xf32, #tpu.memory_space<vmem>>, vector<1x1x384xf32>
    %26 = vector.shape_cast %25 : vector<1x1x384xf32> to vector<1x384xf32>
    %27 = vector.shape_cast %26 : vector<1x384xf32> to vector<1x384xf32>
    %28 = vector.broadcast %27 : vector<1x384xf32> to vector<2x384xf32>
    %cst_29 = arith.constant 0.000000e+00 : f32
    %29 = vector.broadcast %cst_29 : f32 to vector<2x128xf32>
    %cst_30 = arith.constant 0.000000e+00 : f32
    %30 = vector.broadcast %cst_30 : f32 to vector<2x128xf32>
    %31 = arith.truncf %29 : vector<2x128xf32> to vector<2x128xbf16>
    %cst_31 = arith.constant dense<0.000000e+00> : vector<2x384xf32>
    %32 = tpu.matmul %31, %18, %cst_31 {dimension_numbers = #tpu.dot_dimension_numbers<[1], [0], [0], [1], [0, 0, 1, 1], [], []>} : vector<2x128xbf16>, vector<128x384xbf16>, vector<2x384xf32> -> vector<2x384xf32>
    %33 = arith.addf %32, %24 : vector<2x384xf32>
    %c0_32 = arith.constant 0 : index
    %c0_33 = arith.constant 0 : index
    %34 = vector.load %arg8[%c0_32, %c0_33] : memref<16x384xf32, #tpu.memory_space<vmem>>, vector<2x384xf32>
    %35 = vector.extract_strided_slice %34 {offsets = [0, 0], sizes = [2, 128], strides = [1, 1]} : vector<2x384xf32> to vector<2x128xf32>
    %36 = vector.extract_strided_slice %33 {offsets = [0, 0], sizes = [2, 128], strides = [1, 1]} : vector<2x384xf32> to vector<2x128xf32>
    %37 = arith.addf %35, %36 : vector<2x128xf32>
    %38 = arith.negf %37 : vector<2x128xf32>
    %39 = math.exp %38 : vector<2x128xf32>
    %cst_34 = arith.constant 1.000000e+00 : f32
    %40 = vector.broadcast %cst_34 : f32 to vector<2x128xf32>
    %41 = arith.addf %40, %39 : vector<2x128xf32>
    %42 = arith.divf %40, %41 : vector<2x128xf32>
    %43 = vector.extract_strided_slice %34 {offsets = [0, 128], sizes = [2, 128], strides = [1, 1]} : vector<2x384xf32> to vector<2x128xf32>
    %44 = vector.extract_strided_slice %33 {offsets = [0, 128], sizes = [2, 128], strides = [1, 1]} : vector<2x384xf32> to vector<2x128xf32>
    %45 = arith.addf %43, %44 : vector<2x128xf32>
    %46 = arith.negf %45 : vector<2x128xf32>
    %47 = math.exp %46 : vector<2x128xf32>
    %cst_35 = arith.constant 1.000000e+00 : f32
    %48 = vector.broadcast %cst_35 : f32 to vector<2x128xf32>
    %49 = arith.addf %48, %47 : vector<2x128xf32>
    %50 = arith.divf %48, %49 : vector<2x128xf32>
    %51 = vector.extract_strided_slice %34 {offsets = [0, 256], sizes = [2, 128], strides = [1, 1]} : vector<2x384xf32> to vector<2x128xf32>
    %52 = vector.extract_strided_slice %33 {offsets = [0, 256], sizes = [2, 128], strides = [1, 1]} : vector<2x384xf32> to vector<2x128xf32>
    %53 = arith.mulf %42, %52 : vector<2x128xf32>
    %54 = arith.addf %51, %53 : vector<2x128xf32>
    %55 = math.tanh %54 : vector<2x128xf32>
    %cst_36 = arith.constant 1.000000e+00 : f32
    %56 = vector.broadcast %cst_36 : f32 to vector<2x128xf32>
    %57 = arith.subf %56, %50 : vector<2x128xf32>
    %58 = arith.mulf %57, %55 : vector<2x128xf32>
    %59 = arith.mulf %50, %29 : vector<2x128xf32>
    %60 = arith.addf %58, %59 : vector<2x128xf32>
    %61 = arith.truncf %60 : vector<2x128xf32> to vector<2x128xbf16>
    %c0_37 = arith.constant 0 : index
    %c0_38 = arith.constant 0 : index
    %62 = vector.load %arg10[%c0_37, %c0_38] : memref<16x256xbf16, #tpu.memory_space<vmem>>, vector<2x128xbf16>
    tpu.vector_store %arg10[%c0_37, %c0_38], %61 {strides = array<i32>} : memref<16x256xbf16, #tpu.memory_space<vmem>>, vector<2x128xbf16>,
    %63 = arith.truncf %30 : vector<2x128xf32> to vector<2x128xbf16>
    %cst_39 = arith.constant dense<0.000000e+00> : vector<2x384xf32>
    %64 = tpu.matmul %63, %20, %cst_39 {dimension_numbers = #tpu.dot_dimension_numbers<[1], [0], [0], [1], [0, 0, 1, 1], [], []>} : vector<2x128xbf16>, vector<128x384xbf16>, vector<2x384xf32> -> vector<2x384xf32>
    %65 = arith.addf %64, %28 : vector<2x384xf32>
    %c14 = arith.constant 14 : index
    %c0_40 = arith.constant 0 : index
    %66 = vector.load %arg9[%c14, %c0_40] : memref<16x384xf32, #tpu.memory_space<vmem>>, vector<2x384xf32>
    %67 = vector.extract_strided_slice %66 {offsets = [0, 0], sizes = [2, 128], strides = [1, 1]} : vector<2x384xf32> to vector<2x128xf32>
    %68 = vector.extract_strided_slice %65 {offsets = [0, 0], sizes = [2, 128], strides = [1, 1]} : vector<2x384xf32> to vector<2x128xf32>
    %69 = arith.addf %67, %68 : vector<2x128xf32>
    %70 = arith.negf %69 : vector<2x128xf32>
    %71 = math.exp %70 : vector<2x128xf32>
    %cst_41 = arith.constant 1.000000e+00 : f32
    %72 = vector.broadcast %cst_41 : f32 to vector<2x128xf32>
    %73 = arith.addf %72, %71 : vector<2x128xf32>
    %74 = arith.divf %72, %73 : vector<2x128xf32>
    %75 = vector.extract_strided_slice %66 {offsets = [0, 128], sizes = [2, 128], strides = [1, 1]} : vector<2x384xf32> to vector<2x128xf32>
    %76 = vector.extract_strided_slice %65 {offsets = [0, 128], sizes = [2, 128], strides = [1, 1]} : vector<2x384xf32> to vector<2x128xf32>
    %77 = arith.addf %75, %76 : vector<2x128xf32>
    %78 = arith.negf %77 : vector<2x128xf32>
    %79 = math.exp %78 : vector<2x128xf32>
    %cst_42 = arith.constant 1.000000e+00 : f32
    %80 = vector.broadcast %cst_42 : f32 to vector<2x128xf32>
    %81 = arith.addf %80, %79 : vector<2x128xf32>
    %82 = arith.divf %80, %81 : vector<2x128xf32>
    %83 = vector.extract_strided_slice %66 {offsets = [0, 256], sizes = [2, 128], strides = [1, 1]} : vector<2x384xf32> to vector<2x128xf32>
    %84 = vector.extract_strided_slice %65 {offsets = [0, 256], sizes = [2, 128], strides = [1, 1]} : vector<2x384xf32> to vector<2x128xf32>
    %85 = arith.mulf %74, %84 : vector<2x128xf32>
    %86 = arith.addf %83, %85 : vector<2x128xf32>
    %87 = math.tanh %86 : vector<2x128xf32>
    %cst_43 = arith.constant 1.000000e+00 : f32
    %88 = vector.broadcast %cst_43 : f32 to vector<2x128xf32>
    %89 = arith.subf %88, %82 : vector<2x128xf32>
    %90 = arith.mulf %89, %87 : vector<2x128xf32>
    %91 = arith.mulf %82, %30 : vector<2x128xf32>
    %92 = arith.addf %90, %91 : vector<2x128xf32>
    %93 = arith.truncf %92 : vector<2x128xf32> to vector<2x128xbf16>
    %c14_44 = arith.constant 14 : index
    %c128 = arith.constant 128 : index
    %94 = vector.load %arg10[%c14_44, %c128] : memref<16x256xbf16, #tpu.memory_space<vmem>>, vector<2x128xbf16>
    tpu.vector_store %arg10[%c14_44, %c128], %93 {strides = array<i32>} : memref<16x256xbf16, #tpu.memory_space<vmem>>, vector<2x128xbf16>,
    %95 = arith.truncf %60 : vector<2x128xf32> to vector<2x128xbf16>
    %cst_45 = arith.constant dense<0.000000e+00> : vector<2x384xf32>
    %96 = tpu.matmul %95, %18, %cst_45 {dimension_numbers = #tpu.dot_dimension_numbers<[1], [0], [0], [1], [0, 0, 1, 1], [], []>} : vector<2x128xbf16>, vector<128x384xbf16>, vector<2x384xf32> -> vector<2x384xf32>
    %97 = arith.addf %96, %24 : vector<2x384xf32>
    %c2 = arith.constant 2 : index
    %c0_46 = arith.constant 0 : index
    %98 = vector.load %arg8[%c2, %c0_46] : memref<16x384xf32, #tpu.memory_space<vmem>>, vector<2x384xf32>
    %99 = vector.extract_strided_slice %98 {offsets = [0, 0], sizes = [2, 128], strides = [1, 1]} : vector<2x384xf32> to vector<2x128xf32>
    %100 = vector.extract_strided_slice %97 {offsets = [0, 0], sizes = [2, 128], strides = [1, 1]} : vector<2x384xf32> to vector<2x128xf32>
    %101 = arith.addf %99, %100 : vector<2x128xf32>
    %102 = arith.negf %101 : vector<2x128xf32>
    %103 = math.exp %102 : vector<2x128xf32>
    %cst_47 = arith.constant 1.000000e+00 : f32
    %104 = vector.broadcast %cst_47 : f32 to vector<2x128xf32>
    %105 = arith.addf %104, %103 : vector<2x128xf32>
    %106 = arith.divf %104, %105 : vector<2x128xf32>
    %107 = vector.extract_strided_slice %98 {offsets = [0, 128], sizes = [2, 128], strides = [1, 1]} : vector<2x384xf32> to vector<2x128xf32>
    %108 = vector.extract_strided_slice %97 {offsets = [0, 128], sizes = [2, 128], strides = [1, 1]} : vector<2x384xf32> to vector<2x128xf32>
    %109 = arith.addf %107, %108 : vector<2x128xf32>
    %110 = arith.negf %109 : vector<2x128xf32>
    %111 = math.exp %110 : vector<2x128xf32>
    %cst_48 = arith.constant 1.000000e+00 : f32
    %112 = vector.broadcast %cst_48 : f32 to vector<2x128xf32>
    %113 = arith.addf %112, %111 : vector<2x128xf32>
    %114 = arith.divf %112, %113 : vector<2x128xf32>
    %115 = vector.extract_strided_slice %98 {offsets = [0, 256], sizes = [2, 128], strides = [1, 1]} : vector<2x384xf32> to vector<2x128xf32>
    %116 = vector.extract_strided_slice %97 {offsets = [0, 256], sizes = [2, 128], strides = [1, 1]} : vector<2x384xf32> to vector<2x128xf32>
    %117 = arith.mulf %106, %116 : vector<2x128xf32>
    %118 = arith.addf %115, %117 : vector<2x128xf32>
    %119 = math.tanh %118 : vector<2x128xf32>
    %cst_49 = arith.constant 1.000000e+00 : f32
    %120 = vector.broadcast %cst_49 : f32 to vector<2x128xf32>
    %121 = arith.subf %120, %114 : vector<2x128xf32>
    %122 = arith.mulf %121, %119 : vector<2x128xf32>
    %123 = arith.mulf %114, %60 : vector<2x128xf32>
    %124 = arith.addf %122, %123 : vector<2x128xf32>
    %125 = arith.truncf %124 : vector<2x128xf32> to vector<2x128xbf16>
    %c2_50 = arith.constant 2 : index
    %c0_51 = arith.constant 0 : index
    %126 = vector.load %arg10[%c2_50, %c0_51] : memref<16x256xbf16, #tpu.memory_space<vmem>>, vector<2x128xbf16>
    tpu.vector_store %arg10[%c2_50, %c0_51], %125 {strides = array<i32>} : memref<16x256xbf16, #tpu.memory_space<vmem>>, vector<2x128xbf16>,
    %127 = arith.truncf %92 : vector<2x128xf32> to vector<2x128xbf16>
    %cst_52 = arith.constant dense<0.000000e+00> : vector<2x384xf32>
    %128 = tpu.matmul %127, %20, %cst_52 {dimension_numbers = #tpu.dot_dimension_numbers<[1], [0], [0], [1], [0, 0, 1, 1], [], []>} : vector<2x128xbf16>, vector<128x384xbf16>, vector<2x384xf32> -> vector<2x384xf32>
    %129 = arith.addf %128, %28 : vector<2x384xf32>
    %c12 = arith.constant 12 : index
    %c0_53 = arith.constant 0 : index
    %130 = vector.load %arg9[%c12, %c0_53] : memref<16x384xf32, #tpu.memory_space<vmem>>, vector<2x384xf32>
    %131 = vector.extract_strided_slice %130 {offsets = [0, 0], sizes = [2, 128], strides = [1, 1]} : vector<2x384xf32> to vector<2x128xf32>
    %132 = vector.extract_strided_slice %129 {offsets = [0, 0], sizes = [2, 128], strides = [1, 1]} : vector<2x384xf32> to vector<2x128xf32>
    %133 = arith.addf %131, %132 : vector<2x128xf32>
    %134 = arith.negf %133 : vector<2x128xf32>
    %135 = math.exp %134 : vector<2x128xf32>
    %cst_54 = arith.constant 1.000000e+00 : f32
    %136 = vector.broadcast %cst_54 : f32 to vector<2x128xf32>
    %137 = arith.addf %136, %135 : vector<2x128xf32>
    %138 = arith.divf %136, %137 : vector<2x128xf32>
    %139 = vector.extract_strided_slice %130 {offsets = [0, 128], sizes = [2, 128], strides = [1, 1]} : vector<2x384xf32> to vector<2x128xf32>
    %140 = vector.extract_strided_slice %129 {offsets = [0, 128], sizes = [2, 128], strides = [1, 1]} : vector<2x384xf32> to vector<2x128xf32>
    %141 = arith.addf %139, %140 : vector<2x128xf32>
    %142 = arith.negf %141 : vector<2x128xf32>
    %143 = math.exp %142 : vector<2x128xf32>
    %cst_55 = arith.constant 1.000000e+00 : f32
    %144 = vector.broadcast %cst_55 : f32 to vector<2x128xf32>
    %145 = arith.addf %144, %143 : vector<2x128xf32>
    %146 = arith.divf %144, %145 : vector<2x128xf32>
    %147 = vector.extract_strided_slice %130 {offsets = [0, 256], sizes = [2, 128], strides = [1, 1]} : vector<2x384xf32> to vector<2x128xf32>
    %148 = vector.extract_strided_slice %129 {offsets = [0, 256], sizes = [2, 128], strides = [1, 1]} : vector<2x384xf32> to vector<2x128xf32>
    %149 = arith.mulf %138, %148 : vector<2x128xf32>
    %150 = arith.addf %147, %149 : vector<2x128xf32>
    %151 = math.tanh %150 : vector<2x128xf32>
    %cst_56 = arith.constant 1.000000e+00 : f32
    %152 = vector.broadcast %cst_56 : f32 to vector<2x128xf32>
    %153 = arith.subf %152, %146 : vector<2x128xf32>
    %154 = arith.mulf %153, %151 : vector<2x128xf32>
    %155 = arith.mulf %146, %92 : vector<2x128xf32>
    %156 = arith.addf %154, %155 : vector<2x128xf32>
    %157 = arith.truncf %156 : vector<2x128xf32> to vector<2x128xbf16>
    %c12_57 = arith.constant 12 : index
    %c128_58 = arith.constant 128 : index
    %158 = vector.load %arg10[%c12_57, %c128_58] : memref<16x256xbf16, #tpu.memory_space<vmem>>, vector<2x128xbf16>
    tpu.vector_store %arg10[%c12_57, %c128_58], %157 {strides = array<i32>} : memref<16x256xbf16, #tpu.memory_space<vmem>>, vector<2x128xbf16>,
    %159 = arith.truncf %124 : vector<2x128xf32> to vector<2x128xbf16>
    %cst_59 = arith.constant dense<0.000000e+00> : vector<2x384xf32>
    %160 = tpu.matmul %159, %18, %cst_59 {dimension_numbers = #tpu.dot_dimension_numbers<[1], [0], [0], [1], [0, 0, 1, 1], [], []>} : vector<2x128xbf16>, vector<128x384xbf16>, vector<2x384xf32> -> vector<2x384xf32>
    %161 = arith.addf %160, %24 : vector<2x384xf32>
    %c4 = arith.constant 4 : index
    %c0_60 = arith.constant 0 : index
    %162 = vector.load %arg8[%c4, %c0_60] : memref<16x384xf32, #tpu.memory_space<vmem>>, vector<2x384xf32>
    %163 = vector.extract_strided_slice %162 {offsets = [0, 0], sizes = [2, 128], strides = [1, 1]} : vector<2x384xf32> to vector<2x128xf32>
    %164 = vector.extract_strided_slice %161 {offsets = [0, 0], sizes = [2, 128], strides = [1, 1]} : vector<2x384xf32> to vector<2x128xf32>
    %165 = arith.addf %163, %164 : vector<2x128xf32>
    %166 = arith.negf %165 : vector<2x128xf32>
    %167 = math.exp %166 : vector<2x128xf32>
    %cst_61 = arith.constant 1.000000e+00 : f32
    %168 = vector.broadcast %cst_61 : f32 to vector<2x128xf32>
    %169 = arith.addf %168, %167 : vector<2x128xf32>
    %170 = arith.divf %168, %169 : vector<2x128xf32>
    %171 = vector.extract_strided_slice %162 {offsets = [0, 128], sizes = [2, 128], strides = [1, 1]} : vector<2x384xf32> to vector<2x128xf32>
    %172 = vector.extract_strided_slice %161 {offsets = [0, 128], sizes = [2, 128], strides = [1, 1]} : vector<2x384xf32> to vector<2x128xf32>
    %173 = arith.addf %171, %172 : vector<2x128xf32>
    %174 = arith.negf %173 : vector<2x128xf32>
    %175 = math.exp %174 : vector<2x128xf32>
    %cst_62 = arith.constant 1.000000e+00 : f32
    %176 = vector.broadcast %cst_62 : f32 to vector<2x128xf32>
    %177 = arith.addf %176, %175 : vector<2x128xf32>
    %178 = arith.divf %176, %177 : vector<2x128xf32>
    %179 = vector.extract_strided_slice %162 {offsets = [0, 256], sizes = [2, 128], strides = [1, 1]} : vector<2x384xf32> to vector<2x128xf32>
    %180 = vector.extract_strided_slice %161 {offsets = [0, 256], sizes = [2, 128], strides = [1, 1]} : vector<2x384xf32> to vector<2x128xf32>
    %181 = arith.mulf %170, %180 : vector<2x128xf32>
    %182 = arith.addf %179, %181 : vector<2x128xf32>
    %183 = math.tanh %182 : vector<2x128xf32>
    %cst_63 = arith.constant 1.000000e+00 : f32
    %184 = vector.broadcast %cst_63 : f32 to vector<2x128xf32>
    %185 = arith.subf %184, %178 : vector<2x128xf32>
    %186 = arith.mulf %185, %183 : vector<2x128xf32>
    %187 = arith.mulf %178, %124 : vector<2x128xf32>
    %188 = arith.addf %186, %187 : vector<2x128xf32>
    %189 = arith.truncf %188 : vector<2x128xf32> to vector<2x128xbf16>
    %c4_64 = arith.constant 4 : index
    %c0_65 = arith.constant 0 : index
    %190 = vector.load %arg10[%c4_64, %c0_65] : memref<16x256xbf16, #tpu.memory_space<vmem>>, vector<2x128xbf16>
    tpu.vector_store %arg10[%c4_64, %c0_65], %189 {strides = array<i32>} : memref<16x256xbf16, #tpu.memory_space<vmem>>, vector<2x128xbf16>,
    %191 = arith.truncf %156 : vector<2x128xf32> to vector<2x128xbf16>
    %cst_66 = arith.constant dense<0.000000e+00> : vector<2x384xf32>
    %192 = tpu.matmul %191, %20, %cst_66 {dimension_numbers = #tpu.dot_dimension_numbers<[1], [0], [0], [1], [0, 0, 1, 1], [], []>} : vector<2x128xbf16>, vector<128x384xbf16>, vector<2x384xf32> -> vector<2x384xf32>
    %193 = arith.addf %192, %28 : vector<2x384xf32>
    %c10 = arith.constant 10 : index
    %c0_67 = arith.constant 0 : index
    %194 = vector.load %arg9[%c10, %c0_67] : memref<16x384xf32, #tpu.memory_space<vmem>>, vector<2x384xf32>
    %195 = vector.extract_strided_slice %194 {offsets = [0, 0], sizes = [2, 128], strides = [1, 1]} : vector<2x384xf32> to vector<2x128xf32>
    %196 = vector.extract_strided_slice %193 {offsets = [0, 0], sizes = [2, 128], strides = [1, 1]} : vector<2x384xf32> to vector<2x128xf32>
    %197 = arith.addf %195, %196 : vector<2x128xf32>
    %198 = arith.negf %197 : vector<2x128xf32>
    %199 = math.exp %198 : vector<2x128xf32>
    %cst_68 = arith.constant 1.000000e+00 : f32
    %200 = vector.broadcast %cst_68 : f32 to vector<2x128xf32>
    %201 = arith.addf %200, %199 : vector<2x128xf32>
    %202 = arith.divf %200, %201 : vector<2x128xf32>
    %203 = vector.extract_strided_slice %194 {offsets = [0, 128], sizes = [2, 128], strides = [1, 1]} : vector<2x384xf32> to vector<2x128xf32>
    %204 = vector.extract_strided_slice %193 {offsets = [0, 128], sizes = [2, 128], strides = [1, 1]} : vector<2x384xf32> to vector<2x128xf32>
    %205 = arith.addf %203, %204 : vector<2x128xf32>
    %206 = arith.negf %205 : vector<2x128xf32>
    %207 = math.exp %206 : vector<2x128xf32>
    %cst_69 = arith.constant 1.000000e+00 : f32
    %208 = vector.broadcast %cst_69 : f32 to vector<2x128xf32>
    %209 = arith.addf %208, %207 : vector<2x128xf32>
    %210 = arith.divf %208, %209 : vector<2x128xf32>
    %211 = vector.extract_strided_slice %194 {offsets = [0, 256], sizes = [2, 128], strides = [1, 1]} : vector<2x384xf32> to vector<2x128xf32>
    %212 = vector.extract_strided_slice %193 {offsets = [0, 256], sizes = [2, 128], strides = [1, 1]} : vector<2x384xf32> to vector<2x128xf32>
    %213 = arith.mulf %202, %212 : vector<2x128xf32>
    %214 = arith.addf %211, %213 : vector<2x128xf32>
    %215 = math.tanh %214 : vector<2x128xf32>
    %cst_70 = arith.constant 1.000000e+00 : f32
    %216 = vector.broadcast %cst_70 : f32 to vector<2x128xf32>
    %217 = arith.subf %216, %210 : vector<2x128xf32>
    %218 = arith.mulf %217, %215 : vector<2x128xf32>
    %219 = arith.mulf %210, %156 : vector<2x128xf32>
    %220 = arith.addf %218, %219 : vector<2x128xf32>
    %221 = arith.truncf %220 : vector<2x128xf32> to vector<2x128xbf16>
    %c10_71 = arith.constant 10 : index
    %c128_72 = arith.constant 128 : index
    %222 = vector.load %arg10[%c10_71, %c128_72] : memref<16x256xbf16, #tpu.memory_space<vmem>>, vector<2x128xbf16>
    tpu.vector_store %arg10[%c10_71, %c128_72], %221 {strides = array<i32>} : memref<16x256xbf16, #tpu.memory_space<vmem>>, vector<2x128xbf16>,
    %223 = arith.truncf %188 : vector<2x128xf32> to vector<2x128xbf16>
    %cst_73 = arith.constant dense<0.000000e+00> : vector<2x384xf32>
    %224 = tpu.matmul %223, %18, %cst_73 {dimension_numbers = #tpu.dot_dimension_numbers<[1], [0], [0], [1], [0, 0, 1, 1], [], []>} : vector<2x128xbf16>, vector<128x384xbf16>, vector<2x384xf32> -> vector<2x384xf32>
    %225 = arith.addf %224, %24 : vector<2x384xf32>
    %c6 = arith.constant 6 : index
    %c0_74 = arith.constant 0 : index
    %226 = vector.load %arg8[%c6, %c0_74] : memref<16x384xf32, #tpu.memory_space<vmem>>, vector<2x384xf32>
    %227 = vector.extract_strided_slice %226 {offsets = [0, 0], sizes = [2, 128], strides = [1, 1]} : vector<2x384xf32> to vector<2x128xf32>
    %228 = vector.extract_strided_slice %225 {offsets = [0, 0], sizes = [2, 128], strides = [1, 1]} : vector<2x384xf32> to vector<2x128xf32>
    %229 = arith.addf %227, %228 : vector<2x128xf32>
    %230 = arith.negf %229 : vector<2x128xf32>
    %231 = math.exp %230 : vector<2x128xf32>
    %cst_75 = arith.constant 1.000000e+00 : f32
    %232 = vector.broadcast %cst_75 : f32 to vector<2x128xf32>
    %233 = arith.addf %232, %231 : vector<2x128xf32>
    %234 = arith.divf %232, %233 : vector<2x128xf32>
    %235 = vector.extract_strided_slice %226 {offsets = [0, 128], sizes = [2, 128], strides = [1, 1]} : vector<2x384xf32> to vector<2x128xf32>
    %236 = vector.extract_strided_slice %225 {offsets = [0, 128], sizes = [2, 128], strides = [1, 1]} : vector<2x384xf32> to vector<2x128xf32>
    %237 = arith.addf %235, %236 : vector<2x128xf32>
    %238 = arith.negf %237 : vector<2x128xf32>
    %239 = math.exp %238 : vector<2x128xf32>
    %cst_76 = arith.constant 1.000000e+00 : f32
    %240 = vector.broadcast %cst_76 : f32 to vector<2x128xf32>
    %241 = arith.addf %240, %239 : vector<2x128xf32>
    %242 = arith.divf %240, %241 : vector<2x128xf32>
    %243 = vector.extract_strided_slice %226 {offsets = [0, 256], sizes = [2, 128], strides = [1, 1]} : vector<2x384xf32> to vector<2x128xf32>
    %244 = vector.extract_strided_slice %225 {offsets = [0, 256], sizes = [2, 128], strides = [1, 1]} : vector<2x384xf32> to vector<2x128xf32>
    %245 = arith.mulf %234, %244 : vector<2x128xf32>
    %246 = arith.addf %243, %245 : vector<2x128xf32>
    %247 = math.tanh %246 : vector<2x128xf32>
    %cst_77 = arith.constant 1.000000e+00 : f32
    %248 = vector.broadcast %cst_77 : f32 to vector<2x128xf32>
    %249 = arith.subf %248, %242 : vector<2x128xf32>
    %250 = arith.mulf %249, %247 : vector<2x128xf32>
    %251 = arith.mulf %242, %188 : vector<2x128xf32>
    %252 = arith.addf %250, %251 : vector<2x128xf32>
    %253 = arith.truncf %252 : vector<2x128xf32> to vector<2x128xbf16>
    %c6_78 = arith.constant 6 : index
    %c0_79 = arith.constant 0 : index
    %254 = vector.load %arg10[%c6_78, %c0_79] : memref<16x256xbf16, #tpu.memory_space<vmem>>, vector<2x128xbf16>
    tpu.vector_store %arg10[%c6_78, %c0_79], %253 {strides = array<i32>} : memref<16x256xbf16, #tpu.memory_space<vmem>>, vector<2x128xbf16>,
    %255 = arith.truncf %220 : vector<2x128xf32> to vector<2x128xbf16>
    %cst_80 = arith.constant dense<0.000000e+00> : vector<2x384xf32>
    %256 = tpu.matmul %255, %20, %cst_80 {dimension_numbers = #tpu.dot_dimension_numbers<[1], [0], [0], [1], [0, 0, 1, 1], [], []>} : vector<2x128xbf16>, vector<128x384xbf16>, vector<2x384xf32> -> vector<2x384xf32>
    %257 = arith.addf %256, %28 : vector<2x384xf32>
    %c8 = arith.constant 8 : index
    %c0_81 = arith.constant 0 : index
    %258 = vector.load %arg9[%c8, %c0_81] : memref<16x384xf32, #tpu.memory_space<vmem>>, vector<2x384xf32>
    %259 = vector.extract_strided_slice %258 {offsets = [0, 0], sizes = [2, 128], strides = [1, 1]} : vector<2x384xf32> to vector<2x128xf32>
    %260 = vector.extract_strided_slice %257 {offsets = [0, 0], sizes = [2, 128], strides = [1, 1]} : vector<2x384xf32> to vector<2x128xf32>
    %261 = arith.addf %259, %260 : vector<2x128xf32>
    %262 = arith.negf %261 : vector<2x128xf32>
    %263 = math.exp %262 : vector<2x128xf32>
    %cst_82 = arith.constant 1.000000e+00 : f32
    %264 = vector.broadcast %cst_82 : f32 to vector<2x128xf32>
    %265 = arith.addf %264, %263 : vector<2x128xf32>
    %266 = arith.divf %264, %265 : vector<2x128xf32>
    %267 = vector.extract_strided_slice %258 {offsets = [0, 128], sizes = [2, 128], strides = [1, 1]} : vector<2x384xf32> to vector<2x128xf32>
    %268 = vector.extract_strided_slice %257 {offsets = [0, 128], sizes = [2, 128], strides = [1, 1]} : vector<2x384xf32> to vector<2x128xf32>
    %269 = arith.addf %267, %268 : vector<2x128xf32>
    %270 = arith.negf %269 : vector<2x128xf32>
    %271 = math.exp %270 : vector<2x128xf32>
    %cst_83 = arith.constant 1.000000e+00 : f32
    %272 = vector.broadcast %cst_83 : f32 to vector<2x128xf32>
    %273 = arith.addf %272, %271 : vector<2x128xf32>
    %274 = arith.divf %272, %273 : vector<2x128xf32>
    %275 = vector.extract_strided_slice %258 {offsets = [0, 256], sizes = [2, 128], strides = [1, 1]} : vector<2x384xf32> to vector<2x128xf32>
    %276 = vector.extract_strided_slice %257 {offsets = [0, 256], sizes = [2, 128], strides = [1, 1]} : vector<2x384xf32> to vector<2x128xf32>
    %277 = arith.mulf %266, %276 : vector<2x128xf32>
    %278 = arith.addf %275, %277 : vector<2x128xf32>
    %279 = math.tanh %278 : vector<2x128xf32>
    %cst_84 = arith.constant 1.000000e+00 : f32
    %280 = vector.broadcast %cst_84 : f32 to vector<2x128xf32>
    %281 = arith.subf %280, %274 : vector<2x128xf32>
    %282 = arith.mulf %281, %279 : vector<2x128xf32>
    %283 = arith.mulf %274, %220 : vector<2x128xf32>
    %284 = arith.addf %282, %283 : vector<2x128xf32>
    %285 = arith.truncf %284 : vector<2x128xf32> to vector<2x128xbf16>
    %c8_85 = arith.constant 8 : index
    %c128_86 = arith.constant 128 : index
    %286 = vector.load %arg10[%c8_85, %c128_86] : memref<16x256xbf16, #tpu.memory_space<vmem>>, vector<2x128xbf16>
    tpu.vector_store %arg10[%c8_85, %c128_86], %285 {strides = array<i32>} : memref<16x256xbf16, #tpu.memory_space<vmem>>, vector<2x128xbf16>,
    %287 = arith.truncf %252 : vector<2x128xf32> to vector<2x128xbf16>
    %cst_87 = arith.constant dense<0.000000e+00> : vector<2x384xf32>
    %288 = tpu.matmul %287, %18, %cst_87 {dimension_numbers = #tpu.dot_dimension_numbers<[1], [0], [0], [1], [0, 0, 1, 1], [], []>} : vector<2x128xbf16>, vector<128x384xbf16>, vector<2x384xf32> -> vector<2x384xf32>
    %289 = arith.addf %288, %24 : vector<2x384xf32>
    %c8_88 = arith.constant 8 : index
    %c0_89 = arith.constant 0 : index
    %290 = vector.load %arg8[%c8_88, %c0_89] : memref<16x384xf32, #tpu.memory_space<vmem>>, vector<2x384xf32>
    %291 = vector.extract_strided_slice %290 {offsets = [0, 0], sizes = [2, 128], strides = [1, 1]} : vector<2x384xf32> to vector<2x128xf32>
    %292 = vector.extract_strided_slice %289 {offsets = [0, 0], sizes = [2, 128], strides = [1, 1]} : vector<2x384xf32> to vector<2x128xf32>
    %293 = arith.addf %291, %292 : vector<2x128xf32>
    %294 = arith.negf %293 : vector<2x128xf32>
    %295 = math.exp %294 : vector<2x128xf32>
    %cst_90 = arith.constant 1.000000e+00 : f32
    %296 = vector.broadcast %cst_90 : f32 to vector<2x128xf32>
    %297 = arith.addf %296, %295 : vector<2x128xf32>
    %298 = arith.divf %296, %297 : vector<2x128xf32>
    %299 = vector.extract_strided_slice %290 {offsets = [0, 128], sizes = [2, 128], strides = [1, 1]} : vector<2x384xf32> to vector<2x128xf32>
    %300 = vector.extract_strided_slice %289 {offsets = [0, 128], sizes = [2, 128], strides = [1, 1]} : vector<2x384xf32> to vector<2x128xf32>
    %301 = arith.addf %299, %300 : vector<2x128xf32>
    %302 = arith.negf %301 : vector<2x128xf32>
    %303 = math.exp %302 : vector<2x128xf32>
    %cst_91 = arith.constant 1.000000e+00 : f32
    %304 = vector.broadcast %cst_91 : f32 to vector<2x128xf32>
    %305 = arith.addf %304, %303 : vector<2x128xf32>
    %306 = arith.divf %304, %305 : vector<2x128xf32>
    %307 = vector.extract_strided_slice %290 {offsets = [0, 256], sizes = [2, 128], strides = [1, 1]} : vector<2x384xf32> to vector<2x128xf32>
    %308 = vector.extract_strided_slice %289 {offsets = [0, 256], sizes = [2, 128], strides = [1, 1]} : vector<2x384xf32> to vector<2x128xf32>
    %309 = arith.mulf %298, %308 : vector<2x128xf32>
    %310 = arith.addf %307, %309 : vector<2x128xf32>
    %311 = math.tanh %310 : vector<2x128xf32>
    %cst_92 = arith.constant 1.000000e+00 : f32
    %312 = vector.broadcast %cst_92 : f32 to vector<2x128xf32>
    %313 = arith.subf %312, %306 : vector<2x128xf32>
    %314 = arith.mulf %313, %311 : vector<2x128xf32>
    %315 = arith.mulf %306, %252 : vector<2x128xf32>
    %316 = arith.addf %314, %315 : vector<2x128xf32>
    %317 = arith.truncf %316 : vector<2x128xf32> to vector<2x128xbf16>
    %c8_93 = arith.constant 8 : index
    %c0_94 = arith.constant 0 : index
    %318 = vector.load %arg10[%c8_93, %c0_94] : memref<16x256xbf16, #tpu.memory_space<vmem>>, vector<2x128xbf16>
    tpu.vector_store %arg10[%c8_93, %c0_94], %317 {strides = array<i32>} : memref<16x256xbf16, #tpu.memory_space<vmem>>, vector<2x128xbf16>,
    %319 = arith.truncf %284 : vector<2x128xf32> to vector<2x128xbf16>
    %cst_95 = arith.constant dense<0.000000e+00> : vector<2x384xf32>
    %320 = tpu.matmul %319, %20, %cst_95 {dimension_numbers = #tpu.dot_dimension_numbers<[1], [0], [0], [1], [0, 0, 1, 1], [], []>} : vector<2x128xbf16>, vector<128x384xbf16>, vector<2x384xf32> -> vector<2x384xf32>
    %321 = arith.addf %320, %28 : vector<2x384xf32>
    %c6_96 = arith.constant 6 : index
    %c0_97 = arith.constant 0 : index
    %322 = vector.load %arg9[%c6_96, %c0_97] : memref<16x384xf32, #tpu.memory_space<vmem>>, vector<2x384xf32>
    %323 = vector.extract_strided_slice %322 {offsets = [0, 0], sizes = [2, 128], strides = [1, 1]} : vector<2x384xf32> to vector<2x128xf32>
    %324 = vector.extract_strided_slice %321 {offsets = [0, 0], sizes = [2, 128], strides = [1, 1]} : vector<2x384xf32> to vector<2x128xf32>
    %325 = arith.addf %323, %324 : vector<2x128xf32>
    %326 = arith.negf %325 : vector<2x128xf32>
    %327 = math.exp %326 : vector<2x128xf32>
    %cst_98 = arith.constant 1.000000e+00 : f32
    %328 = vector.broadcast %cst_98 : f32 to vector<2x128xf32>
    %329 = arith.addf %328, %327 : vector<2x128xf32>
    %330 = arith.divf %328, %329 : vector<2x128xf32>
    %331 = vector.extract_strided_slice %322 {offsets = [0, 128], sizes = [2, 128], strides = [1, 1]} : vector<2x384xf32> to vector<2x128xf32>
    %332 = vector.extract_strided_slice %321 {offsets = [0, 128], sizes = [2, 128], strides = [1, 1]} : vector<2x384xf32> to vector<2x128xf32>
    %333 = arith.addf %331, %332 : vector<2x128xf32>
    %334 = arith.negf %333 : vector<2x128xf32>
    %335 = math.exp %334 : vector<2x128xf32>
    %cst_99 = arith.constant 1.000000e+00 : f32
    %336 = vector.broadcast %cst_99 : f32 to vector<2x128xf32>
    %337 = arith.addf %336, %335 : vector<2x128xf32>
    %338 = arith.divf %336, %337 : vector<2x128xf32>
    %339 = vector.extract_strided_slice %322 {offsets = [0, 256], sizes = [2, 128], strides = [1, 1]} : vector<2x384xf32> to vector<2x128xf32>
    %340 = vector.extract_strided_slice %321 {offsets = [0, 256], sizes = [2, 128], strides = [1, 1]} : vector<2x384xf32> to vector<2x128xf32>
    %341 = arith.mulf %330, %340 : vector<2x128xf32>
    %342 = arith.addf %339, %341 : vector<2x128xf32>
    %343 = math.tanh %342 : vector<2x128xf32>
    %cst_100 = arith.constant 1.000000e+00 : f32
    %344 = vector.broadcast %cst_100 : f32 to vector<2x128xf32>
    %345 = arith.subf %344, %338 : vector<2x128xf32>
    %346 = arith.mulf %345, %343 : vector<2x128xf32>
    %347 = arith.mulf %338, %284 : vector<2x128xf32>
    %348 = arith.addf %346, %347 : vector<2x128xf32>
    %349 = arith.truncf %348 : vector<2x128xf32> to vector<2x128xbf16>
    %c6_101 = arith.constant 6 : index
    %c128_102 = arith.constant 128 : index
    %350 = vector.load %arg10[%c6_101, %c128_102] : memref<16x256xbf16, #tpu.memory_space<vmem>>, vector<2x128xbf16>
    tpu.vector_store %arg10[%c6_101, %c128_102], %349 {strides = array<i32>} : memref<16x256xbf16, #tpu.memory_space<vmem>>, vector<2x128xbf16>,
    %351 = arith.truncf %316 : vector<2x128xf32> to vector<2x128xbf16>
    %cst_103 = arith.constant dense<0.000000e+00> : vector<2x384xf32>
    %352 = tpu.matmul %351, %18, %cst_103 {dimension_numbers = #tpu.dot_dimension_numbers<[1], [0], [0], [1], [0, 0, 1, 1], [], []>} : vector<2x128xbf16>, vector<128x384xbf16>, vector<2x384xf32> -> vector<2x384xf32>
    %353 = arith.addf %352, %24 : vector<2x384xf32>
    %c10_104 = arith.constant 10 : index
    %c0_105 = arith.constant 0 : index
    %354 = vector.load %arg8[%c10_104, %c0_105] : memref<16x384xf32, #tpu.memory_space<vmem>>, vector<2x384xf32>
    %355 = vector.extract_strided_slice %354 {offsets = [0, 0], sizes = [2, 128], strides = [1, 1]} : vector<2x384xf32> to vector<2x128xf32>
    %356 = vector.extract_strided_slice %353 {offsets = [0, 0], sizes = [2, 128], strides = [1, 1]} : vector<2x384xf32> to vector<2x128xf32>
    %357 = arith.addf %355, %356 : vector<2x128xf32>
    %358 = arith.negf %357 : vector<2x128xf32>
    %359 = math.exp %358 : vector<2x128xf32>
    %cst_106 = arith.constant 1.000000e+00 : f32
    %360 = vector.broadcast %cst_106 : f32 to vector<2x128xf32>
    %361 = arith.addf %360, %359 : vector<2x128xf32>
    %362 = arith.divf %360, %361 : vector<2x128xf32>
    %363 = vector.extract_strided_slice %354 {offsets = [0, 128], sizes = [2, 128], strides = [1, 1]} : vector<2x384xf32> to vector<2x128xf32>
    %364 = vector.extract_strided_slice %353 {offsets = [0, 128], sizes = [2, 128], strides = [1, 1]} : vector<2x384xf32> to vector<2x128xf32>
    %365 = arith.addf %363, %364 : vector<2x128xf32>
    %366 = arith.negf %365 : vector<2x128xf32>
    %367 = math.exp %366 : vector<2x128xf32>
    %cst_107 = arith.constant 1.000000e+00 : f32
    %368 = vector.broadcast %cst_107 : f32 to vector<2x128xf32>
    %369 = arith.addf %368, %367 : vector<2x128xf32>
    %370 = arith.divf %368, %369 : vector<2x128xf32>
    %371 = vector.extract_strided_slice %354 {offsets = [0, 256], sizes = [2, 128], strides = [1, 1]} : vector<2x384xf32> to vector<2x128xf32>
    %372 = vector.extract_strided_slice %353 {offsets = [0, 256], sizes = [2, 128], strides = [1, 1]} : vector<2x384xf32> to vector<2x128xf32>
    %373 = arith.mulf %362, %372 : vector<2x128xf32>
    %374 = arith.addf %371, %373 : vector<2x128xf32>
    %375 = math.tanh %374 : vector<2x128xf32>
    %cst_108 = arith.constant 1.000000e+00 : f32
    %376 = vector.broadcast %cst_108 : f32 to vector<2x128xf32>
    %377 = arith.subf %376, %370 : vector<2x128xf32>
    %378 = arith.mulf %377, %375 : vector<2x128xf32>
    %379 = arith.mulf %370, %316 : vector<2x128xf32>
    %380 = arith.addf %378, %379 : vector<2x128xf32>
    %381 = arith.truncf %380 : vector<2x128xf32> to vector<2x128xbf16>
    %c10_109 = arith.constant 10 : index
    %c0_110 = arith.constant 0 : index
    %382 = vector.load %arg10[%c10_109, %c0_110] : memref<16x256xbf16, #tpu.memory_space<vmem>>, vector<2x128xbf16>
    tpu.vector_store %arg10[%c10_109, %c0_110], %381 {strides = array<i32>} : memref<16x256xbf16, #tpu.memory_space<vmem>>, vector<2x128xbf16>,
    %383 = arith.truncf %348 : vector<2x128xf32> to vector<2x128xbf16>
    %cst_111 = arith.constant dense<0.000000e+00> : vector<2x384xf32>
    %384 = tpu.matmul %383, %20, %cst_111 {dimension_numbers = #tpu.dot_dimension_numbers<[1], [0], [0], [1], [0, 0, 1, 1], [], []>} : vector<2x128xbf16>, vector<128x384xbf16>, vector<2x384xf32> -> vector<2x384xf32>
    %385 = arith.addf %384, %28 : vector<2x384xf32>
    %c4_112 = arith.constant 4 : index
    %c0_113 = arith.constant 0 : index
    %386 = vector.load %arg9[%c4_112, %c0_113] : memref<16x384xf32, #tpu.memory_space<vmem>>, vector<2x384xf32>
    %387 = vector.extract_strided_slice %386 {offsets = [0, 0], sizes = [2, 128], strides = [1, 1]} : vector<2x384xf32> to vector<2x128xf32>
    %388 = vector.extract_strided_slice %385 {offsets = [0, 0], sizes = [2, 128], strides = [1, 1]} : vector<2x384xf32> to vector<2x128xf32>
    %389 = arith.addf %387, %388 : vector<2x128xf32>
    %390 = arith.negf %389 : vector<2x128xf32>
    %391 = math.exp %390 : vector<2x128xf32>
    %cst_114 = arith.constant 1.000000e+00 : f32
    %392 = vector.broadcast %cst_114 : f32 to vector<2x128xf32>
    %393 = arith.addf %392, %391 : vector<2x128xf32>
    %394 = arith.divf %392, %393 : vector<2x128xf32>
    %395 = vector.extract_strided_slice %386 {offsets = [0, 128], sizes = [2, 128], strides = [1, 1]} : vector<2x384xf32> to vector<2x128xf32>
    %396 = vector.extract_strided_slice %385 {offsets = [0, 128], sizes = [2, 128], strides = [1, 1]} : vector<2x384xf32> to vector<2x128xf32>
    %397 = arith.addf %395, %396 : vector<2x128xf32>
    %398 = arith.negf %397 : vector<2x128xf32>
    %399 = math.exp %398 : vector<2x128xf32>
    %cst_115 = arith.constant 1.000000e+00 : f32
    %400 = vector.broadcast %cst_115 : f32 to vector<2x128xf32>
    %401 = arith.addf %400, %399 : vector<2x128xf32>
    %402 = arith.divf %400, %401 : vector<2x128xf32>
    %403 = vector.extract_strided_slice %386 {offsets = [0, 256], sizes = [2, 128], strides = [1, 1]} : vector<2x384xf32> to vector<2x128xf32>
    %404 = vector.extract_strided_slice %385 {offsets = [0, 256], sizes = [2, 128], strides = [1, 1]} : vector<2x384xf32> to vector<2x128xf32>
    %405 = arith.mulf %394, %404 : vector<2x128xf32>
    %406 = arith.addf %403, %405 : vector<2x128xf32>
    %407 = math.tanh %406 : vector<2x128xf32>
    %cst_116 = arith.constant 1.000000e+00 : f32
    %408 = vector.broadcast %cst_116 : f32 to vector<2x128xf32>
    %409 = arith.subf %408, %402 : vector<2x128xf32>
    %410 = arith.mulf %409, %407 : vector<2x128xf32>
    %411 = arith.mulf %402, %348 : vector<2x128xf32>
    %412 = arith.addf %410, %411 : vector<2x128xf32>
    %413 = arith.truncf %412 : vector<2x128xf32> to vector<2x128xbf16>
    %c4_117 = arith.constant 4 : index
    %c128_118 = arith.constant 128 : index
    %414 = vector.load %arg10[%c4_117, %c128_118] : memref<16x256xbf16, #tpu.memory_space<vmem>>, vector<2x128xbf16>
    tpu.vector_store %arg10[%c4_117, %c128_118], %413 {strides = array<i32>} : memref<16x256xbf16, #tpu.memory_space<vmem>>, vector<2x128xbf16>,
    %415 = arith.truncf %380 : vector<2x128xf32> to vector<2x128xbf16>
    %cst_119 = arith.constant dense<0.000000e+00> : vector<2x384xf32>
    %416 = tpu.matmul %415, %18, %cst_119 {dimension_numbers = #tpu.dot_dimension_numbers<[1], [0], [0], [1], [0, 0, 1, 1], [], []>} : vector<2x128xbf16>, vector<128x384xbf16>, vector<2x384xf32> -> vector<2x384xf32>
    %417 = arith.addf %416, %24 : vector<2x384xf32>
    %c12_120 = arith.constant 12 : index
    %c0_121 = arith.constant 0 : index
    %418 = vector.load %arg8[%c12_120, %c0_121] : memref<16x384xf32, #tpu.memory_space<vmem>>, vector<2x384xf32>
    %419 = vector.extract_strided_slice %418 {offsets = [0, 0], sizes = [2, 128], strides = [1, 1]} : vector<2x384xf32> to vector<2x128xf32>
    %420 = vector.extract_strided_slice %417 {offsets = [0, 0], sizes = [2, 128], strides = [1, 1]} : vector<2x384xf32> to vector<2x128xf32>
    %421 = arith.addf %419, %420 : vector<2x128xf32>
    %422 = arith.negf %421 : vector<2x128xf32>
    %423 = math.exp %422 : vector<2x128xf32>
    %cst_122 = arith.constant 1.000000e+00 : f32
    %424 = vector.broadcast %cst_122 : f32 to vector<2x128xf32>
    %425 = arith.addf %424, %423 : vector<2x128xf32>
    %426 = arith.divf %424, %425 : vector<2x128xf32>
    %427 = vector.extract_strided_slice %418 {offsets = [0, 128], sizes = [2, 128], strides = [1, 1]} : vector<2x384xf32> to vector<2x128xf32>
    %428 = vector.extract_strided_slice %417 {offsets = [0, 128], sizes = [2, 128], strides = [1, 1]} : vector<2x384xf32> to vector<2x128xf32>
    %429 = arith.addf %427, %428 : vector<2x128xf32>
    %430 = arith.negf %429 : vector<2x128xf32>
    %431 = math.exp %430 : vector<2x128xf32>
    %cst_123 = arith.constant 1.000000e+00 : f32
    %432 = vector.broadcast %cst_123 : f32 to vector<2x128xf32>
    %433 = arith.addf %432, %431 : vector<2x128xf32>
    %434 = arith.divf %432, %433 : vector<2x128xf32>
    %435 = vector.extract_strided_slice %418 {offsets = [0, 256], sizes = [2, 128], strides = [1, 1]} : vector<2x384xf32> to vector<2x128xf32>
    %436 = vector.extract_strided_slice %417 {offsets = [0, 256], sizes = [2, 128], strides = [1, 1]} : vector<2x384xf32> to vector<2x128xf32>
    %437 = arith.mulf %426, %436 : vector<2x128xf32>
    %438 = arith.addf %435, %437 : vector<2x128xf32>
    %439 = math.tanh %438 : vector<2x128xf32>
    %cst_124 = arith.constant 1.000000e+00 : f32
    %440 = vector.broadcast %cst_124 : f32 to vector<2x128xf32>
    %441 = arith.subf %440, %434 : vector<2x128xf32>
    %442 = arith.mulf %441, %439 : vector<2x128xf32>
    %443 = arith.mulf %434, %380 : vector<2x128xf32>
    %444 = arith.addf %442, %443 : vector<2x128xf32>
    %445 = arith.truncf %444 : vector<2x128xf32> to vector<2x128xbf16>
    %c12_125 = arith.constant 12 : index
    %c0_126 = arith.constant 0 : index
    %446 = vector.load %arg10[%c12_125, %c0_126] : memref<16x256xbf16, #tpu.memory_space<vmem>>, vector<2x128xbf16>
    tpu.vector_store %arg10[%c12_125, %c0_126], %445 {strides = array<i32>} : memref<16x256xbf16, #tpu.memory_space<vmem>>, vector<2x128xbf16>,
    %447 = arith.truncf %412 : vector<2x128xf32> to vector<2x128xbf16>
    %cst_127 = arith.constant dense<0.000000e+00> : vector<2x384xf32>
    %448 = tpu.matmul %447, %20, %cst_127 {dimension_numbers = #tpu.dot_dimension_numbers<[1], [0], [0], [1], [0, 0, 1, 1], [], []>} : vector<2x128xbf16>, vector<128x384xbf16>, vector<2x384xf32> -> vector<2x384xf32>
    %449 = arith.addf %448, %28 : vector<2x384xf32>
    %c2_128 = arith.constant 2 : index
    %c0_129 = arith.constant 0 : index
    %450 = vector.load %arg9[%c2_128, %c0_129] : memref<16x384xf32, #tpu.memory_space<vmem>>, vector<2x384xf32>
    %451 = vector.extract_strided_slice %450 {offsets = [0, 0], sizes = [2, 128], strides = [1, 1]} : vector<2x384xf32> to vector<2x128xf32>
    %452 = vector.extract_strided_slice %449 {offsets = [0, 0], sizes = [2, 128], strides = [1, 1]} : vector<2x384xf32> to vector<2x128xf32>
    %453 = arith.addf %451, %452 : vector<2x128xf32>
    %454 = arith.negf %453 : vector<2x128xf32>
    %455 = math.exp %454 : vector<2x128xf32>
    %cst_130 = arith.constant 1.000000e+00 : f32
    %456 = vector.broadcast %cst_130 : f32 to vector<2x128xf32>
    %457 = arith.addf %456, %455 : vector<2x128xf32>
    %458 = arith.divf %456, %457 : vector<2x128xf32>
    %459 = vector.extract_strided_slice %450 {offsets = [0, 128], sizes = [2, 128], strides = [1, 1]} : vector<2x384xf32> to vector<2x128xf32>
    %460 = vector.extract_strided_slice %449 {offsets = [0, 128], sizes = [2, 128], strides = [1, 1]} : vector<2x384xf32> to vector<2x128xf32>
    %461 = arith.addf %459, %460 : vector<2x128xf32>
    %462 = arith.negf %461 : vector<2x128xf32>
    %463 = math.exp %462 : vector<2x128xf32>
    %cst_131 = arith.constant 1.000000e+00 : f32
    %464 = vector.broadcast %cst_131 : f32 to vector<2x128xf32>
    %465 = arith.addf %464, %463 : vector<2x128xf32>
    %466 = arith.divf %464, %465 : vector<2x128xf32>
    %467 = vector.extract_strided_slice %450 {offsets = [0, 256], sizes = [2, 128], strides = [1, 1]} : vector<2x384xf32> to vector<2x128xf32>
    %468 = vector.extract_strided_slice %449 {offsets = [0, 256], sizes = [2, 128], strides = [1, 1]} : vector<2x384xf32> to vector<2x128xf32>
    %469 = arith.mulf %458, %468 : vector<2x128xf32>
    %470 = arith.addf %467, %469 : vector<2x128xf32>
    %471 = math.tanh %470 : vector<2x128xf32>
    %cst_132 = arith.constant 1.000000e+00 : f32
    %472 = vector.broadcast %cst_132 : f32 to vector<2x128xf32>
    %473 = arith.subf %472, %466 : vector<2x128xf32>
    %474 = arith.mulf %473, %471 : vector<2x128xf32>
    %475 = arith.mulf %466, %412 : vector<2x128xf32>
    %476 = arith.addf %474, %475 : vector<2x128xf32>
    %477 = arith.truncf %476 : vector<2x128xf32> to vector<2x128xbf16>
    %c2_133 = arith.constant 2 : index
    %c128_134 = arith.constant 128 : index
    %478 = vector.load %arg10[%c2_133, %c128_134] : memref<16x256xbf16, #tpu.memory_space<vmem>>, vector<2x128xbf16>
    tpu.vector_store %arg10[%c2_133, %c128_134], %477 {strides = array<i32>} : memref<16x256xbf16, #tpu.memory_space<vmem>>, vector<2x128xbf16>,
    %479 = arith.truncf %444 : vector<2x128xf32> to vector<2x128xbf16>
    %cst_135 = arith.constant dense<0.000000e+00> : vector<2x384xf32>
    %480 = tpu.matmul %479, %18, %cst_135 {dimension_numbers = #tpu.dot_dimension_numbers<[1], [0], [0], [1], [0, 0, 1, 1], [], []>} : vector<2x128xbf16>, vector<128x384xbf16>, vector<2x384xf32> -> vector<2x384xf32>
    %481 = arith.addf %480, %24 : vector<2x384xf32>
    %c14_136 = arith.constant 14 : index
    %c0_137 = arith.constant 0 : index
    %482 = vector.load %arg8[%c14_136, %c0_137] : memref<16x384xf32, #tpu.memory_space<vmem>>, vector<2x384xf32>
    %483 = vector.extract_strided_slice %482 {offsets = [0, 0], sizes = [2, 128], strides = [1, 1]} : vector<2x384xf32> to vector<2x128xf32>
    %484 = vector.extract_strided_slice %481 {offsets = [0, 0], sizes = [2, 128], strides = [1, 1]} : vector<2x384xf32> to vector<2x128xf32>
    %485 = arith.addf %483, %484 : vector<2x128xf32>
    %486 = arith.negf %485 : vector<2x128xf32>
    %487 = math.exp %486 : vector<2x128xf32>
    %cst_138 = arith.constant 1.000000e+00 : f32
    %488 = vector.broadcast %cst_138 : f32 to vector<2x128xf32>
    %489 = arith.addf %488, %487 : vector<2x128xf32>
    %490 = arith.divf %488, %489 : vector<2x128xf32>
    %491 = vector.extract_strided_slice %482 {offsets = [0, 128], sizes = [2, 128], strides = [1, 1]} : vector<2x384xf32> to vector<2x128xf32>
    %492 = vector.extract_strided_slice %481 {offsets = [0, 128], sizes = [2, 128], strides = [1, 1]} : vector<2x384xf32> to vector<2x128xf32>
    %493 = arith.addf %491, %492 : vector<2x128xf32>
    %494 = arith.negf %493 : vector<2x128xf32>
    %495 = math.exp %494 : vector<2x128xf32>
    %cst_139 = arith.constant 1.000000e+00 : f32
    %496 = vector.broadcast %cst_139 : f32 to vector<2x128xf32>
    %497 = arith.addf %496, %495 : vector<2x128xf32>
    %498 = arith.divf %496, %497 : vector<2x128xf32>
    %499 = vector.extract_strided_slice %482 {offsets = [0, 256], sizes = [2, 128], strides = [1, 1]} : vector<2x384xf32> to vector<2x128xf32>
    %500 = vector.extract_strided_slice %481 {offsets = [0, 256], sizes = [2, 128], strides = [1, 1]} : vector<2x384xf32> to vector<2x128xf32>
    %501 = arith.mulf %490, %500 : vector<2x128xf32>
    %502 = arith.addf %499, %501 : vector<2x128xf32>
    %503 = math.tanh %502 : vector<2x128xf32>
    %cst_140 = arith.constant 1.000000e+00 : f32
    %504 = vector.broadcast %cst_140 : f32 to vector<2x128xf32>
    %505 = arith.subf %504, %498 : vector<2x128xf32>
    %506 = arith.mulf %505, %503 : vector<2x128xf32>
    %507 = arith.mulf %498, %444 : vector<2x128xf32>
    %508 = arith.addf %506, %507 : vector<2x128xf32>
    %509 = arith.truncf %508 : vector<2x128xf32> to vector<2x128xbf16>
    %c14_141 = arith.constant 14 : index
    %c0_142 = arith.constant 0 : index
    %510 = vector.load %arg10[%c14_141, %c0_142] : memref<16x256xbf16, #tpu.memory_space<vmem>>, vector<2x128xbf16>
    tpu.vector_store %arg10[%c14_141, %c0_142], %509 {strides = array<i32>} : memref<16x256xbf16, #tpu.memory_space<vmem>>, vector<2x128xbf16>,
    %511 = arith.truncf %476 : vector<2x128xf32> to vector<2x128xbf16>
    %cst_143 = arith.constant dense<0.000000e+00> : vector<2x384xf32>
    %512 = tpu.matmul %511, %20, %cst_143 {dimension_numbers = #tpu.dot_dimension_numbers<[1], [0], [0], [1], [0, 0, 1, 1], [], []>} : vector<2x128xbf16>, vector<128x384xbf16>, vector<2x384xf32> -> vector<2x384xf32>
    %513 = arith.addf %512, %28 : vector<2x384xf32>
    %c0_144 = arith.constant 0 : index
    %c0_145 = arith.constant 0 : index
    %514 = vector.load %arg9[%c0_144, %c0_145] : memref<16x384xf32, #tpu.memory_space<vmem>>, vector<2x384xf32>
    %515 = vector.extract_strided_slice %514 {offsets = [0, 0], sizes = [2, 128], strides = [1, 1]} : vector<2x384xf32> to vector<2x128xf32>
    %516 = vector.extract_strided_slice %513 {offsets = [0, 0], sizes = [2, 128], strides = [1, 1]} : vector<2x384xf32> to vector<2x128xf32>
    %517 = arith.addf %515, %516 : vector<2x128xf32>
    %518 = arith.negf %517 : vector<2x128xf32>
    %519 = math.exp %518 : vector<2x128xf32>
    %cst_146 = arith.constant 1.000000e+00 : f32
    %520 = vector.broadcast %cst_146 : f32 to vector<2x128xf32>
    %521 = arith.addf %520, %519 : vector<2x128xf32>
    %522 = arith.divf %520, %521 : vector<2x128xf32>
    %523 = vector.extract_strided_slice %514 {offsets = [0, 128], sizes = [2, 128], strides = [1, 1]} : vector<2x384xf32> to vector<2x128xf32>
    %524 = vector.extract_strided_slice %513 {offsets = [0, 128], sizes = [2, 128], strides = [1, 1]} : vector<2x384xf32> to vector<2x128xf32>
    %525 = arith.addf %523, %524 : vector<2x128xf32>
    %526 = arith.negf %525 : vector<2x128xf32>
    %527 = math.exp %526 : vector<2x128xf32>
    %cst_147 = arith.constant 1.000000e+00 : f32
    %528 = vector.broadcast %cst_147 : f32 to vector<2x128xf32>
    %529 = arith.addf %528, %527 : vector<2x128xf32>
    %530 = arith.divf %528, %529 : vector<2x128xf32>
    %531 = vector.extract_strided_slice %514 {offsets = [0, 256], sizes = [2, 128], strides = [1, 1]} : vector<2x384xf32> to vector<2x128xf32>
    %532 = vector.extract_strided_slice %513 {offsets = [0, 256], sizes = [2, 128], strides = [1, 1]} : vector<2x384xf32> to vector<2x128xf32>
    %533 = arith.mulf %522, %532 : vector<2x128xf32>
    %534 = arith.addf %531, %533 : vector<2x128xf32>
    %535 = math.tanh %534 : vector<2x128xf32>
    %cst_148 = arith.constant 1.000000e+00 : f32
    %536 = vector.broadcast %cst_148 : f32 to vector<2x128xf32>
    %537 = arith.subf %536, %530 : vector<2x128xf32>
    %538 = arith.mulf %537, %535 : vector<2x128xf32>
    %539 = arith.mulf %530, %476 : vector<2x128xf32>
    %540 = arith.addf %538, %539 : vector<2x128xf32>
    %541 = arith.truncf %540 : vector<2x128xf32> to vector<2x128xbf16>
    %c0_149 = arith.constant 0 : index
    %c128_150 = arith.constant 128 : index
    %542 = vector.load %arg10[%c0_149, %c128_150] : memref<16x256xbf16, #tpu.memory_space<vmem>>, vector<2x128xbf16>
    tpu.vector_store %arg10[%c0_149, %c128_150], %541 {strides = array<i32>} : memref<16x256xbf16, #tpu.memory_space<vmem>>, vector<2x128xbf16>,
    %c0_151 = arith.constant 0 : index
    %c0_152 = arith.constant 0 : index
    %543 = vector.load %arg10[%c0_151, %c0_152] : memref<16x256xbf16, #tpu.memory_space<vmem>>, vector<16x256xbf16>
    %c0_153 = arith.constant 0 : index
    %c0_154 = arith.constant 0 : index
    %544 = vector.load %arg5[%c0_153, %c0_154] : memref<256x128xbf16, #tpu.memory_space<vmem>>, vector<256x128xbf16>
    %cst_155 = arith.constant dense<0.000000e+00> : vector<16x128xf32>
    %545 = tpu.matmul %543, %544, %cst_155 {dimension_numbers = #tpu.dot_dimension_numbers<[1], [0], [0], [1], [0, 0, 1, 1], [], []>} : vector<16x256xbf16>, vector<256x128xbf16>, vector<16x128xf32> -> vector<16x128xf32>
    %c0_156 = arith.constant 0 : index
    %c0_157 = arith.constant 0 : index
    %546 = vector.load %arg6[%c0_156, %c0_157] : memref<1x128xf32, #tpu.memory_space<vmem>>, vector<1x128xf32>
    %547 = vector.broadcast %546 : vector<1x128xf32> to vector<16x128xf32>
    %548 = arith.addf %545, %547 : vector<16x128xf32>
    %c0_158 = arith.constant 0 : index
    %c0_159 = arith.constant 0 : index
    %549 = vector.load %arg7[%c0_158, %c0_159] : memref<16x128xf32, #tpu.memory_space<vmem>>, vector<16x128xf32>
    tpu.vector_store %arg7[%c0_158, %c0_159], %548 {strides = array<i32>} : memref<16x128xf32, #tpu.memory_space<vmem>>, vector<16x128xf32>,
    return
  }
}

</mosaic_0001>

<bundles_post_ra>
// kernel: seq_tagger_forward.2
= control target key start
LH: loop header
LB: loop body
LE: loop exit
PB: predicated region body
PF: predicated region fallthrough
CT: control target
= control target key end

     0   :  { %10 = vsyncpa [#allocation5], 0  ;;  %s5050_s0 = inlined_call_operand.vmem [shape: bf16[16,128], index: 0, kind: input, shape index: {}]   ;;  %s5051_s1 = inlined_call_operand.hbm [shape: bf16[2,128,384], index: 1, kind: input, shape index: {}]   ;;  %s5052_s2 = inlined_call_operand.hbm [shape: bf16[2,128,384], index: 2, kind: input, shape index: {}]   ;;  %s5053_s3 = inlined_call_operand.hbm [shape: f32[2,1,384], index: 3, kind: input, shape index: {}]   ;;  %s5054_s4 = inlined_call_operand.hbm [shape: f32[2,1,384], index: 4, kind: input, shape index: {}]   ;;  %s5055_s5 = inlined_call_operand.vmem [shape: bf16[16,256], index: 5, kind: output, shape index: {}]  }
   0x1   :  { %11 = vsyncpa [#allocation7], 0 }
   0x2   :  { %12 = vsyncpa [#allocation10], 0  ;;  %s3999_s18 = smov [#allocation6]   ;;  %s4000_s20 = smov [#allocation4]  }
   0x3   :  { %s32_s19 = sshll.u32 %s3999_s18, 4  ;;  %s20_s21 = sshll.u32 %s4000_s20, 4  ;;  %s33_s19 = int_to_ptr.vmem [resolvable:$true] %s32_s19  ;;  %s4040_s21 = int_to_ptr.vmem [resolvable:$true] %s20_s21 }
   0x4   :  { %s3905_s24 = scalar_lea.hbm %s5052_s2, 6144 }
   0x5   :  { %p3906_p0 = scmp.ne.s32.totalorder %s5052_s2, %s3905_s24  ;;  %p3909_p1 = scmp.lt.u32.totalorder %s3905_s24, %s5052_s2 }
   0x7   :  { %p3911_p2 = pnand %p3909_p1, %p3906_p0 }
   0x9   :  { %3914 = shalt.err (!%p3911_p2)
}
   0xa   :  { %s3915_s29 = scalar_lea.vmem %s33_s19, 6144  ;;  %p3920_p4 = scmp.lt.s32.totalorder %s33_s19, %s33_s19 }
   0xb   :  { %p3916_p3 = scmp.ne.s32.totalorder %s33_s19, %s3915_s29  ;;  %p3921_p5 = scmp.lt.s32.totalorder %s3915_s29, %s3915_s29 }
   0xd   :  { %p3922_p6 = por %p3921_p5, %p3920_p4 }
   0xf   :  { %p3923_p7 = pnand %p3922_p6, %p3916_p3 }
  0x11   :  { %3926 = shalt.err (!%p3923_p7)
}
  0x12   :  { %s4001_s30 = smov 192   ;;  %s4002_s6 = smov 12  }
  0x13   :  { %38 = dma.hbm_to_vmem [thread:$0]  %s5052_s2, 6144, %s33_s19, [#allocation7], %s4001_s30, %s4001_s30, %s4002_s6  }
  0x14   :  { %s3927_s11 = scalar_lea.hbm %s5051_s1, 6144 }
  0x15   :  { %p3928_p8 = scmp.ne.s32.totalorder %s5051_s1, %s3927_s11  ;;  %p3931_p9 = scmp.lt.u32.totalorder %s3927_s11, %s5051_s1 }
  0x17   :  { %p3933_p10 = pnand %p3931_p9, %p3928_p8 }
  0x19   :  { %3936 = shalt.err (!%p3933_p10)
}
  0x1a   :  { %s3937_s16 = scalar_lea.vmem %s4040_s21, 6144  ;;  %p3942_p12 = scmp.lt.s32.totalorder %s4040_s21, %s4040_s21 }
  0x1b   :  { %p3938_p11 = scmp.ne.s32.totalorder %s4040_s21, %s3937_s16  ;;  %p3943_p13 = scmp.lt.s32.totalorder %s3937_s16, %s3937_s16 }
  0x1d   :  { %p3944_p0 = por %p3943_p13, %p3942_p12 }
  0x1f   :  { %p3945_p1 = pnand %p3944_p0, %p3938_p11 }
  0x21   :  { %3948 = shalt.err (!%p3945_p1)
}
  0x22   :  { %26 = dma.hbm_to_vmem [thread:$0]  %s5051_s1, 6144, %s4040_s21, [#allocation5], %s4001_s30, %s4001_s30, %s4002_s6  }
  0x23   :  { %s4003_s18 = smov [#allocation8]   ;;  %s3949_s23 = scalar_lea.hbm %s5053_s3, 96 }
  0x24   :  { %s44_s19 = sshll.u32 %s4003_s18, 4  ;;  %p3950_p2 = scmp.ne.s32.totalorder %s5053_s3, %s3949_s23  ;;  %s45_s19 = int_to_ptr.vmem [resolvable:$true] %s44_s19 }
  0x25   :  { %p3953_p3 = scmp.lt.u32.totalorder %s3949_s23, %s5053_s3 }
  0x27   :  { %p3955_p4 = pnand %p3953_p3, %p3950_p2 }
  0x29   :  { %3958 = shalt.err (!%p3955_p4)
}
  0x2a   :  { %s3959_s28 = scalar_lea.vmem %s45_s19, 96  ;;  %p3964_p6 = scmp.lt.s32.totalorder %s45_s19, %s45_s19 }
  0x2b   :  { %p3960_p5 = scmp.ne.s32.totalorder %s45_s19, %s3959_s28  ;;  %p3965_p7 = scmp.lt.s32.totalorder %s3959_s28, %s3959_s28 }
  0x2d   :  { %p3966_p8 = por %p3965_p7, %p3964_p6 }
  0x2f   :  { %p3967_p9 = pnand %p3966_p8, %p3960_p5 }
  0x31   :  { %3970 = shalt.err (!%p3967_p9)
}
  0x32   :  { %s4004_s1 = smov 48   ;;  %s4005_s21 = smov 3  }
  0x33   :  { %50 = dma.hbm_to_vmem [thread:$0]  %s5053_s3, 96, %s45_s19, [#allocation7], %s4004_s1, %s4004_s1, %s4005_s21  }
  0x34   :  { %s4006_s6 = smov [#allocation9]   ;;  %s3971_s10 = scalar_lea.hbm %s5054_s4, 96 }
  0x35   :  { %s56_s7 = sshll.u32 %s4006_s6, 4  ;;  %p3972_p10 = scmp.ne.s32.totalorder %s5054_s4, %s3971_s10  ;;  %s57_s7 = int_to_ptr.vmem [resolvable:$true] %s56_s7 }
  0x36   :  { %p3975_p11 = scmp.lt.u32.totalorder %s3971_s10, %s5054_s4 }
  0x38   :  { %p3977_p12 = pnand %p3975_p11, %p3972_p10 }
  0x3a   :  { %3980 = shalt.err (!%p3977_p12)
}
  0x3b   :  { %s3981_s15 = scalar_lea.vmem %s57_s7, 96  ;;  %p3986_p0 = scmp.lt.s32.totalorder %s57_s7, %s57_s7 }
  0x3c   :  { %p3982_p13 = scmp.ne.s32.totalorder %s57_s7, %s3981_s15  ;;  %p3987_p1 = scmp.lt.s32.totalorder %s3981_s15, %s3981_s15 }
  0x3e   :  { %p3988_p2 = por %p3987_p1, %p3986_p0 }
  0x40   :  { %p3989_p3 = pnand %p3988_p2, %p3982_p13 }
  0x42   :  { %3992 = shalt.err (!%p3989_p3)
}
  0x43   :  { %62 = dma.hbm_to_vmem [thread:$0]  %s5054_s4, 96, %s57_s7, [#allocation10], %s4004_s1, %s4004_s1, %s4005_s21  }
  0x44   :  { %3993 = dma.done.wait [#allocation5], 6144  }
  0x45   :  { %3994 = vsyncadd [#allocation5], 4294961152 }
  0x46   :  { %3995 = dma.done.wait [#allocation7], 6240  }
  0x47   :  { %3996 = vsyncadd [#allocation7], 4294961056 }
  0x48   :  { %3997 = dma.done.wait [#allocation10], 96  }
  0x49   :  { %3998 = vsyncadd [#allocation10], 4294967200  ;;  %v5058_v0 = vmov 0.0   ;;  %v5056_v1 = vmov 0   ;;  %vm4009_vm0 = vmmov 0   ;;  %v4106_v25 = vld [vmem:[%s5050_s0] sm:$0xff]  }
  0x4a   :  { %3169 = vmatprep.subr.bf16.mxu1 %v5058_v0  ;;  %293 = vmatprep.mubr.bf16.mxu0 %v5056_v1  ;;  %v3540_v2 = vld [vmem:[#allocation4 + $0x4] ss:$12 sps:$4 sm:$0xff]   ;;  %v3542_v3 = vld [vmem:[#allocation4] ss:$12 sps:$4 sm:$0xff]   ;;  %v3543_v4 = vld [vmem:[#allocation4 + $0x1c] ss:$12 sps:$4 sm:$0xff]  }
  0x4b   :  { %3185 = vmatprep.mubr.msk.bf16.mxu1 %vm4009_vm0, %v5058_v0  ;;  %261 = vmatprep.subr.bf16.mxu0 %v3540_v2  ;;  %v3545_v5 = vld [vmem:[#allocation4 + $0x18] ss:$12 sps:$4 sm:$0xff]   ;;  %v3546_v6 = vld [vmem:[#allocation4 + $0x34] ss:$12 sps:$4 sm:$0xff]   ;;  %v3548_v7 = vld [vmem:[#allocation4 + $0x30] ss:$12 sps:$4 sm:$0xff]  }
  0x4c   :  { %262 = vmatpush1.bf16.msra.mxu0 %v3542_v3  ;;  %v3549_v8 = vld [vmem:[#allocation4 + $0x4c] ss:$12 sps:$4 sm:$0xff]   ;;  %v3561_v9 = vld [vmem:[#allocation4 + $0x8] ss:$12 sps:$4 sm:$0xff]   ;;  %v3552_v11 = vld [vmem:[#allocation4 + $0x64] ss:$12 sps:$4 sm:$0xff]  }
  0x4d   :  { %263 = vmatprep.subr.bf16.mxu0 %v3543_v4  ;;  %v3551_v10 = vld [vmem:[#allocation4 + $0x48] ss:$12 sps:$4 sm:$0xff]   ;;  %3170 = vmatpush3.bf16.msra.mxu1 %v3561_v9  ;;  %v3565_v12 = vld [vmem:[#allocation4 + $0x20] ss:$12 sps:$4 sm:$0xff]   ;;  %v3570_v15 = vld [vmem:[#allocation4 + $0x38] ss:$12 sps:$4 sm:$0xff]  }
  0x4e   :  { %3171 = vmatprep.subr.bf16.mxu1 %v5058_v0  ;;  %v3554_v13 = vld [vmem:[#allocation4 + $0x60] ss:$12 sps:$4 sm:$0xff]   ;;  %v3555_v14 = vld [vmem:[#allocation4 + $0x7c] ss:$12 sps:$4 sm:$0xff]   ;;  %v3557_v16 = vld [vmem:[#allocation4 + $0x78] ss:$12 sps:$4 sm:$0xff]  }
  0x4f   :  { %v3558_v17 = vld [vmem:[#allocation4 + $0x94] ss:$12 sps:$4 sm:$0xff]   ;;  %v3574_v18 = vld [vmem:[#allocation4 + $0x50] ss:$12 sps:$4 sm:$0xff]   ;;  %v3562_v20 = vld [vmem:[#allocation4 + $0xac] ss:$12 sps:$4 sm:$0xff]  }
  0x50   :  { %264 = vmatpush1.bf16.msra.mxu0 %v3545_v5  ;;  %v3560_v19 = vld [vmem:[#allocation4 + $0x90] ss:$12 sps:$4 sm:$0xff]   ;;  %v3578_v21 = vld [vmem:[#allocation4 + $0x68] ss:$12 sps:$4 sm:$0xff]   ;;  %v3582_v24 = vld [vmem:[#allocation4 + $0x80] ss:$12 sps:$4 sm:$0xff]  }
  0x51   :  { %265 = vmatprep.subr.bf16.mxu0 %v3546_v6  ;;  %3172 = vmatpush3.bf16.msra.mxu1 %v3565_v12  ;;  %v3564_v22 = vld [vmem:[#allocation4 + $0xa8] ss:$12 sps:$4 sm:$0xff]   ;;  %v3569_v23 = vld [vmem:[#allocation4 + $0xc4] ss:$12 sps:$4 sm:$0xff]   ;;  %v3567_v26 = vld [vmem:[#allocation4 + $0xc0] ss:$12 sps:$4 sm:$0xff]  }
  0x52   :  { %3173 = vmatprep.subr.bf16.mxu1 %v5058_v0  ;;  %v3573_v27 = vld [vmem:[#allocation4 + $0xdc] ss:$12 sps:$4 sm:$0xff]   ;;  %v3586_v28 = vld [vmem:[#allocation4 + $0x98] ss:$12 sps:$4 sm:$0xff]   ;;  %v3577_v30 = vld [vmem:[#allocation4 + $0xf4] ss:$12 sps:$4 sm:$0xff]  }
  0x53   :  { %v3571_v29 = vld [vmem:[#allocation4 + $0xd8] ss:$12 sps:$4 sm:$0xff]   ;;  %v3590_v31 = vld [vmem:[#allocation4 + $0xb0] ss:$12 sps:$4 sm:$0xff]   ;;  %v3594_v34 = vld [vmem:[#allocation4 + $0xc8] ss:$12 sps:$4 sm:$0xff]  }
  0x54   :  { %266 = vmatpush1.bf16.msra.mxu0 %v3548_v7  ;;  %v3575_v32 = vld [vmem:[#allocation4 + $0xf0] ss:$12 sps:$4 sm:$0xff]   ;;  %v3581_v33 = vld [vmem:[#allocation4 + $0x10c] ss:$12 sps:$4 sm:$0xff]   ;;  %v3579_v35 = vld [vmem:[#allocation4 + $0x108] ss:$12 sps:$4 sm:$0xff]  }
  0x55   :  { %267 = vmatprep.subr.bf16.mxu0 %v3549_v8  ;;  %3174 = vmatpush3.bf16.msra.mxu1 %v3570_v15  ;;  %v3585_v36 = vld [vmem:[#allocation4 + $0x124] ss:$12 sps:$4 sm:$0xff]   ;;  %v3598_v37 = vld [vmem:[#allocation4 + $0xe0] ss:$12 sps:$4 sm:$0xff]   ;;  %v3589_v39 = vld [vmem:[#allocation4 + $0x13c] ss:$12 sps:$4 sm:$0xff]  }
  0x56   :  { %3175 = vmatprep.subr.bf16.mxu1 %v5058_v0  ;;  %v3583_v38 = vld [vmem:[#allocation4 + $0x120] ss:$12 sps:$4 sm:$0xff]   ;;  %v3602_v40 = vld [vmem:[#allocation4 + $0xf8] ss:$12 sps:$4 sm:$0xff]   ;;  %v3606_v43 = vld [vmem:[#allocation4 + $0x110] ss:$12 sps:$4 sm:$0xff]  }
  0x57   :  { %v3587_v41 = vld [vmem:[#allocation4 + $0x138] ss:$12 sps:$4 sm:$0xff]   ;;  %v3593_v42 = vld [vmem:[#allocation4 + $0x154] ss:$12 sps:$4 sm:$0xff]   ;;  %v3591_v44 = vld [vmem:[#allocation4 + $0x150] ss:$12 sps:$4 sm:$0xff]  }
  0x58   :  { %268 = vmatpush1.bf16.msra.mxu0 %v3551_v10  ;;  %v3597_v45 = vld [vmem:[#allocation4 + $0x16c] ss:$12 sps:$4 sm:$0xff]   ;;  %v3610_v46 = vld [vmem:[#allocation4 + $0x128] ss:$12 sps:$4 sm:$0xff]   ;;  %v4121_v48 = vld [vmem:[#allocation6 + $0x4] ss:$12 sps:$4 sm:$0xff]  }
  0x59   :  { %269 = vmatprep.subr.bf16.mxu0 %v3552_v11  ;;  %3176 = vmatpush3.bf16.msra.mxu1 %v3574_v18  ;;  %v3595_v47 = vld [vmem:[#allocation4 + $0x168] ss:$12 sps:$4 sm:$0xff]   ;;  %v3614_v49 = vld [vmem:[#allocation4 + $0x140] ss:$12 sps:$4 sm:$0xff]   ;;  %v3618_v52 = vld [vmem:[#allocation4 + $0x158] ss:$12 sps:$4 sm:$0xff]  }
  0x5a   :  { %3177 = vmatprep.subr.bf16.mxu1 %v5058_v0  ;;  %v4124_v50 = vld [vmem:[#allocation6] ss:$12 sps:$4 sm:$0xff]   ;;  %v4126_v51 = vld [vmem:[#allocation6 + $0x1c] ss:$12 sps:$4 sm:$0xff]   ;;  %v4132_v53 = vld [vmem:[#allocation6 + $0x18] ss:$12 sps:$4 sm:$0xff]  }
  0x5b   :  { %v4136_v54 = vld [vmem:[#allocation6 + $0x34] ss:$12 sps:$4 sm:$0xff]   ;;  %v3622_v55 = vld [vmem:[#allocation4 + $0x170] ss:$12 sps:$4 sm:$0xff]   ;;  %v4142_v57 = vld [vmem:[#allocation6 + $0x4c] ss:$12 sps:$4 sm:$0xff]  }
  0x5c   :  { %270 = vmatpush1.bf16.msra.mxu0 %v3554_v13  ;;  %v4139_v56 = vld [vmem:[#allocation6 + $0x30] ss:$12 sps:$4 sm:$0xff]   ;;  %v4145_v58 = vld [vmem:[#allocation6 + $0x8] ss:$12 sps:$4 sm:$0xff]   ;;  %v4156_v61 = vld [vmem:[#allocation6 + $0x20] ss:$12 sps:$4 sm:$0xff]  }
  0x5d   :  { %271 = vmatprep.subr.bf16.mxu0 %v3555_v14  ;;  %3178 = vmatpush3.bf16.msra.mxu1 %v3578_v21  ;;  %v4149_v59 = vld [vmem:[#allocation6 + $0x48] ss:$12 sps:$4 sm:$0xff]   ;;  %v4153_v60 = vld [vmem:[#allocation6 + $0x64] ss:$12 sps:$4 sm:$0xff]   ;;  %v4162_v62 = vld [vmem:[#allocation6 + $0x60] ss:$12 sps:$4 sm:$0xff]  }
  0x5e   :  { %3179 = vmatprep.subr.bf16.mxu1 %v5058_v0  ;;  %v4165_v63 = vld [vmem:[#allocation6 + $0x7c] ss:$12 sps:$4 sm:$0xff]   ;;  %v4168_v2 = vld [vmem:[#allocation6 + $0x38] ss:$12 sps:$4 sm:$0xff]   ;;  %v4175_v4 = vld [vmem:[#allocation6 + $0x94] ss:$12 sps:$4 sm:$0xff]  }
  0x5f   :  { %v4172_v3 = vld [vmem:[#allocation6 + $0x78] ss:$12 sps:$4 sm:$0xff]   ;;  %5114 = vst [vmem:[#allocation14_spill] sm:$0xff] %v4175_v4  ;;  %v4178_v5 = vld [vmem:[#allocation6 + $0x50] ss:$12 sps:$4 sm:$0xff]  }
  0x60   :  { %272 = vmatpush1.bf16.msra.mxu0 %v3557_v16  ;;  %v4182_v6 = vld [vmem:[#allocation6 + $0x90] ss:$12 sps:$4 sm:$0xff]   ;;  %v4185_v7 = vld [vmem:[#allocation6 + $0xac] ss:$12 sps:$4 sm:$0xff]   ;;  %v4188_v8 = vld [vmem:[#allocation6 + $0x68] ss:$12 sps:$4 sm:$0xff]  }
  0x61   :  { %273 = vmatprep.subr.bf16.mxu0 %v3558_v17  ;;  %3180 = vmatpush3.bf16.msra.mxu1 %v3582_v24  ;;  %5115 = vst [vmem:[#allocation15_spill] sm:$0xff] %v4182_v6  ;;  %5116 = vst [vmem:[#allocation16_spill] sm:$0xff] %v4185_v7  ;;  %v4192_v9 = vld [vmem:[#allocation6 + $0xa8] ss:$12 sps:$4 sm:$0xff]   ;;  %v4195_v10 = vld [vmem:[#allocation6 + $0xc4] ss:$12 sps:$4 sm:$0xff]  }
  0x62   :  { %3181 = vmatprep.subr.bf16.mxu1 %v5058_v0  ;;  %5117 = vst [vmem:[#allocation17_spill] sm:$0xff] %v4192_v9  ;;  %5118 = vst [vmem:[#allocation18_spill] sm:$0xff] %v4195_v10  ;;  %v4198_v11 = vld [vmem:[#allocation6 + $0x80] ss:$12 sps:$4 sm:$0xff]   ;;  %v4205_v13 = vld [vmem:[#allocation6 + $0xdc] ss:$12 sps:$4 sm:$0xff]  }
  0x63   :  { %5119 = vst [vmem:[#allocation19_spill] sm:$0xff] %v4198_v11  ;;  %v4202_v12 = vld [vmem:[#allocation6 + $0xc0] ss:$12 sps:$4 sm:$0xff]   ;;  %v4208_v14 = vld [vmem:[#allocation6 + $0x98] ss:$12 sps:$4 sm:$0xff]  }
  0x64   :  { %274 = vmatpush1.bf16.msra.mxu0 %v3560_v19  ;;  %5120 = vst [vmem:[#allocation20_spill] sm:$0xff] %v4208_v14  ;;  %v4213_v15 = vld [vmem:[#allocation6 + $0xd8] ss:$12 sps:$4 sm:$0xff]   ;;  %v4217_v16 = vld [vmem:[#allocation6 + $0xf4] ss:$12 sps:$4 sm:$0xff]  }
  0x65   :  { %275 = vmatprep.subr.bf16.mxu0 %v3562_v20  ;;  %3182 = vmatpush3.bf16.msra.mxu1 %v3586_v28  ;;  %v4220_v17 = vld [vmem:[#allocation6 + $0xb0] ss:$12 sps:$4 sm:$0xff]   ;;  %v4227_v19 = vld [vmem:[#allocation6 + $0x10c] ss:$12 sps:$4 sm:$0xff]   ;;  %v4230_v20 = vld [vmem:[#allocation6 + $0xc8] ss:$12 sps:$4 sm:$0xff]  }
  0x66   :  { %3183 = vmatprep.subr.bf16.mxu1 %v5058_v0  ;;  %5121 = vst [vmem:[#allocation21_spill] sm:$0xff] %v4220_v17  ;;  %v4224_v18 = vld [vmem:[#allocation6 + $0xf0] ss:$12 sps:$4 sm:$0xff]   ;;  %v4234_v21 = vld [vmem:[#allocation6 + $0x108] ss:$12 sps:$4 sm:$0xff]  }
  0x67   :  { %v4247_v24 = vld [vmem:[#allocation6 + $0x120] ss:$12 sps:$4 sm:$0xff]  }
  0x68   :  { %276 = vmatpush1.bf16.msra.mxu0 %v3564_v22  ;;  %v4238_v22 = vld [vmem:[#allocation6 + $0x124] ss:$12 sps:$4 sm:$0xff]   ;;  %v4260_v28 = vld [vmem:[#allocation6 + $0x154] ss:$12 sps:$4 sm:$0xff]  }
  0x69   :  { %530 = vmatprep.subr.bf16.mxu0 %v3569_v23  ;;  %3184 = vmatpush3.bf16.msra.mxu1 %v3590_v31  ;;  %v4241_v23 = vld [vmem:[#allocation6 + $0xe0] ss:$12 sps:$4 sm:$0xff]  }
  0x6a   :  { %3189 = vmatprep.subr.bf16.mxu1 %v5058_v0  ;;  %v4270_v31 = vld [vmem:[#allocation6 + $0x16c] ss:$12 sps:$4 sm:$0xff]  }
  0x6b   :  { %294 = vmatmul.mubr.bf16.vlgmr.msra.gmra.mrb[0].mxu0 %v4106_v25 }
  0x6c   :  { %531 = vmatpush1.bf16.msra.mxu0 %v3567_v26  ;;  %562 = vmatprep.mubr.bf16.mxu0 %v5056_v1  ;;  %v4253_v26 = vld [vmem:[#allocation6 + $0xf8] ss:$12 sps:$4 sm:$0xff]  }
  0x6d   :  { %532 = vmatprep.subr.bf16.mxu0 %v3573_v27  ;;  %3186 = vmatmul.mubr.bf16.vlgmr.msra.gmra.mrb[0].mxu1 %v4106_v25  ;;  %v4257_v27 = vld [vmem:[#allocation6 + $0x138] ss:$12 sps:$4 sm:$0xff]  }
  0x6e   :  { %3190 = vmatpush3.bf16.msra.mxu1 %v3594_v34  ;;  %3205 = vmatprep.mubr.msk.bf16.mxu1 %vm4009_vm0, %v5058_v0  ;;  %v4281_v34 = vld [vmem:[#allocation6 + $0x140] ss:$12 sps:$4 sm:$0xff]  }
  0x6f   :  { %3191 = vmatprep.subr.bf16.mxu1 %v5058_v0 }
  0x70   :  { %533 = vmatpush1.bf16.msra.mxu0 %v3571_v29  ;;  %v4263_v29 = vld [vmem:[#allocation6 + $0x110] ss:$12 sps:$4 sm:$0xff]  }
  0x71   :  { %534 = vmatprep.subr.bf16.mxu0 %v3577_v30  ;;  %v4267_v30 = vld [vmem:[#allocation6 + $0x150] ss:$12 sps:$4 sm:$0xff]  }
  0x72   :  { %3192 = vmatpush3.bf16.msra.mxu1 %v3598_v37  ;;  %v112_v37 = vlaneseq }
  0x73   :  { %3193 = vmatprep.subr.bf16.mxu1 %v5058_v0 }
  0x74   :  { %535 = vmatpush1.bf16.msra.mxu0 %v3575_v32  ;;  %v4273_v32 = vld [vmem:[#allocation6 + $0x128] ss:$12 sps:$4 sm:$0xff]  }
  0x75   :  { %536 = vmatprep.subr.bf16.mxu0 %v3581_v33  ;;  %v4277_v33 = vld [vmem:[#allocation6 + $0x168] ss:$12 sps:$4 sm:$0xff]  }
  0x76   :  { %3194 = vmatpush3.bf16.msra.mxu1 %v3602_v40  ;;  %v110_v40 = vld [vmem:[#allocation8] sm:$0x7] }
  0x77   :  { %3195 = vmatprep.subr.bf16.mxu1 %v5058_v0 }
  0x78   :  { %537 = vmatpush1.bf16.msra.mxu0 %v3579_v35  ;;  %v4286_v35 = vld [vmem:[#allocation6 + $0x158] ss:$12 sps:$4 sm:$0xff]  }
  0x79   :  { %538 = vmatprep.subr.bf16.mxu0 %v3585_v36  ;;  %v4294_v36 = vld [vmem:[#allocation6 + $0x170] ss:$12 sps:$4 sm:$0xff]  }
  0x7a   :  { %3196 = vmatpush3.bf16.msra.mxu1 %v3606_v43 }
  0x7b   :  { %3197 = vmatprep.subr.bf16.mxu1 %v5058_v0 }
  0x7c   :  { %539 = vmatpush1.bf16.msra.mxu0 %v3583_v38  ;;  %v113_v38 = vshrl.u32 %v112_v37, 7 }
  0x7d   :  { %540 = vmatprep.subr.bf16.mxu0 %v3589_v39 }
  0x7e   :  { %3198 = vmatpush3.bf16.msra.mxu1 %v3610_v46  ;;  %v4333_v39 = vsub.s32 0, %v113_v38 }
  0x7f   :  { %3199 = vmatprep.subr.bf16.mxu1 %v5058_v0 }
  0x80   :  { %541 = vmatpush1.bf16.msra.mxu0 %v3587_v41  ;;  %v4335_v41 = vsub.s32 1, %v113_v38 }
  0x81   :  { %542 = vmatprep.subr.bf16.mxu0 %v3593_v42  ;;  %v115_v42 = vrot.slane %v110_v40, %v4333_v39 }
  0x82   :  { %3200 = vmatpush3.bf16.msra.mxu1 %v3614_v49  ;;  %v119_v43 = vrot.slane %v110_v40, %v4335_v41 }
  0x83   :  { %3201 = vmatprep.subr.bf16.mxu1 %v5058_v0 }
  0x84   :  { %543 = vmatpush1.bf16.msra.mxu0 %v3591_v44 }
  0x85   :  { %544 = vmatprep.subr.bf16.mxu0 %v3597_v45 }
  0x86   :  { %3202 = vmatpush3.bf16.msra.mxu1 %v3618_v52  ;;  %v4339_v52 = vsub.s32 2, %v113_v38 }
  0x87   :  { %3203 = vmatprep.subr.bf16.mxu1 %v5058_v0 }
  0x88   :  { %545 = vmatpush1.bf16.msra.mxu0 %v3595_v47 }
  0x89   :  { %848 = vmatprep.subr.bf16.mxu0 %v4121_v48 }
  0x8a   :  { %3204 = vmatpush3.bf16.msra.mxu1 %v3622_v55 }
  0x8b   :  { %563 = vmatmul.mubr.bf16.vlgmr.msra.gmra.mrb[4].mxu0 %v4106_v25  ;;  %3209 = vmatprep.subr.bf16.mxu1 %v5058_v0 }
  0x8c   :  { %849 = vmatpush1.bf16.msra.mxu0 %v4124_v50  ;;  %880 = vmatprep.mubr.bf16.mxu0 %v5056_v1 }
  0x8d   :  { %850 = vmatprep.subr.bf16.mxu0 %v4126_v51  ;;  %3206 = vmatmul.mubr.bf16.vlgmr.msra.gmra.mrb[4].mxu1 %v4106_v25  ;;  %v4250_v25 = vld [vmem:[#allocation6 + $0x13c] ss:$12 sps:$4 sm:$0xff]  }
  0x8e   :  { %3210 = vmatpush3.bf16.msra.mxu1 %v4145_v58  ;;  %3225 = vmatprep.mubr.msk.bf16.mxu1 %vm4009_vm0, %v5058_v0 }
  0x8f   :  { %3211 = vmatprep.subr.bf16.mxu1 %v5058_v0 }
  0x90   :  { %851 = vmatpush1.bf16.msra.mxu0 %v4132_v53 }
  0x91   :  { %852 = vmatprep.subr.bf16.mxu0 %v4136_v54 }
  0x92   :  { %3212 = vmatpush3.bf16.msra.mxu1 %v4156_v61 }
  0x93   :  { %3213 = vmatprep.subr.bf16.mxu1 %v5058_v0 }
  0x94   :  { %853 = vmatpush1.bf16.msra.mxu0 %v4139_v56 }
  0x95   :  { %854 = vmatprep.subr.bf16.mxu0 %v4142_v57 }
  0x96   :  { %3214 = vmatpush3.bf16.msra.mxu1 %v4168_v2 }
  0x97   :  { %3215 = vmatprep.subr.bf16.mxu1 %v5058_v0 }
  0x98   :  { %855 = vmatpush1.bf16.msra.mxu0 %v4149_v59 }
  0x99   :  { %856 = vmatprep.subr.bf16.mxu0 %v4153_v60 }
  0x9a   :  { %3216 = vmatpush3.bf16.msra.mxu1 %v4178_v5 }
  0x9b   :  { %3217 = vmatprep.subr.bf16.mxu1 %v5058_v0 }
  0x9c   :  { %857 = vmatpush1.bf16.msra.mxu0 %v4162_v62 }
  0x9d   :  { %858 = vmatprep.subr.bf16.mxu0 %v4165_v63 }
  0x9e   :  { %3218 = vmatpush3.bf16.msra.mxu1 %v4188_v8 }
  0x9f   :  { %3219 = vmatprep.subr.bf16.mxu1 %v5058_v0 }
  0xa0   :  { %859 = vmatpush1.bf16.msra.mxu0 %v4172_v3 }
  0xa1   :  { %860 = vmatprep.subr.bf16.mxu0 %v4175_v4 }
  0xa2   :  { %3220 = vmatpush3.bf16.msra.mxu1 %v4198_v11 }
  0xa3   :  { %3221 = vmatprep.subr.bf16.mxu1 %v5058_v0 }
  0xa4   :  { %861 = vmatpush1.bf16.msra.mxu0 %v4182_v6 }
  0xa5   :  { %862 = vmatprep.subr.bf16.mxu0 %v4185_v7 }
  0xa6   :  { %3222 = vmatpush3.bf16.msra.mxu1 %v4208_v14 }
  0xa7   :  { %3223 = vmatprep.subr.bf16.mxu1 %v5058_v0 }
  0xa8   :  { %863 = vmatpush1.bf16.msra.mxu0 %v4192_v9 }
  0xa9   :  { %1083 = vmatprep.subr.bf16.mxu0 %v4195_v10 }
  0xaa   :  { %3224 = vmatpush3.bf16.msra.mxu1 %v4220_v17 }
  0xab   :  { %881 = vmatmul.mubr.bf16.vlgmr.msra.gmra.mrb[8].mxu0 %v5056_v1  ;;  %3229 = vmatprep.subr.bf16.mxu1 %v5058_v0 }
  0xac   :  { %1084 = vmatpush1.bf16.msra.mxu0 %v4202_v12  ;;  %1115 = vmatprep.mubr.bf16.mxu0 %v5056_v1 }
  0xad   :  { %1085 = vmatprep.subr.bf16.mxu0 %v4205_v13  ;;  %3226 = vmatmul.mubr.bf16.vlgmr.msra.gmra.mrb[8].mxu1 %v5056_v1 }
  0xae   :  { %3230 = vmatpush3.bf16.msra.mxu1 %v4230_v20  ;;  %3245 = vmatprep.mubr.msk.bf16.mxu1 %vm4009_vm0, %v5058_v0 }
  0xaf   :  { %3231 = vmatprep.subr.bf16.mxu1 %v5058_v0 }
  0xb0   :  { %1086 = vmatpush1.bf16.msra.mxu0 %v4213_v15 }
  0xb1   :  { %1087 = vmatprep.subr.bf16.mxu0 %v4217_v16 }
  0xb2   :  { %3232 = vmatpush3.bf16.msra.mxu1 %v4241_v23 }
  0xb3   :  { %3233 = vmatprep.subr.bf16.mxu1 %v5058_v0 }
  0xb4   :  { %1088 = vmatpush1.bf16.msra.mxu0 %v4224_v18 }
  0xb5   :  { %1089 = vmatprep.subr.bf16.mxu0 %v4227_v19 }
  0xb6   :  { %3234 = vmatpush3.bf16.msra.mxu1 %v4253_v26 }
  0xb7   :  { %3235 = vmatprep.subr.bf16.mxu1 %v5058_v0 }
  0xb8   :  { %1090 = vmatpush1.bf16.msra.mxu0 %v4234_v21 }
  0xb9   :  { %1091 = vmatprep.subr.bf16.mxu0 %v4238_v22 }
  0xba   :  { %3236 = vmatpush3.bf16.msra.mxu1 %v4263_v29 }
  0xbb   :  { %3237 = vmatprep.subr.bf16.mxu1 %v5058_v0 }
  0xbc   :  { %1092 = vmatpush1.bf16.msra.mxu0 %v4247_v24 }
  0xbd   :  { %1093 = vmatprep.subr.bf16.mxu0 %v4250_v25 }
  0xbe   :  { %3238 = vmatpush3.bf16.msra.mxu1 %v4273_v32 }
  0xbf   :  { %3239 = vmatprep.subr.bf16.mxu1 %v5058_v0 }
  0xc0   :  { %1094 = vmatpush1.bf16.msra.mxu0 %v4257_v27 }
  0xc1   :  { %1095 = vmatprep.subr.bf16.mxu0 %v4260_v28 }
  0xc2   :  { %3240 = vmatpush3.bf16.msra.mxu1 %v4281_v34 }
  0xc3   :  { %3241 = vmatprep.subr.bf16.mxu1 %v5058_v0 }
  0xc4   :  { %1096 = vmatpush1.bf16.msra.mxu0 %v4267_v30 }
  0xc5   :  { %1097 = vmatprep.subr.bf16.mxu0 %v4270_v31 }
  0xc6   :  { %3242 = vmatpush3.bf16.msra.mxu1 %v4286_v35 }
  0xc7   :  { %3243 = vmatprep.subr.bf16.mxu1 %v5058_v0 }
  0xc8   :  { %1098 = vmatpush1.bf16.msra.mxu0 %v4277_v33 }
  0xc9   :  { %1199 = vmatprep.subr.bf16.mxu0 %v4121_v48 }
  0xca   :  { %3244 = vmatpush3.bf16.msra.mxu1 %v4294_v36 }
  0xcb   :  { %1116 = vmatmul.mubr.bf16.vlgmr.msra.gmra.mrb[12].mxu0 %v5056_v1  ;;  %3249 = vmatprep.subr.bf16.mxu1 %v5058_v0 }
  0xcc   :  { %1200 = vmatpush1.bf16.msra.mxu0 %v4124_v50  ;;  %1231 = vmatprep.mubr.bf16.mxu0 %v5056_v1 }
  0xcd   :  { %1201 = vmatprep.subr.bf16.mxu0 %v4126_v51  ;;  %3246 = vmatmul.mubr.bf16.vlgmr.msra.gmra.mrb[12].mxu1 %v5056_v1 }
  0xce   :  { %3250 = vmatpush3.bf16.msra.mxu1 %v4145_v58  ;;  %3265 = vmatprep.mubr.msk.bf16.mxu1 %vm4009_vm0, %v5058_v0 }
  0xcf   :  { %3251 = vmatprep.subr.bf16.mxu1 %v5058_v0 }
  0xd0   :  { %1202 = vmatpush1.bf16.msra.mxu0 %v4132_v53 }
  0xd1   :  { %1203 = vmatprep.subr.bf16.mxu0 %v4136_v54 }
  0xd2   :  { %3252 = vmatpush3.bf16.msra.mxu1 %v4156_v61 }
  0xd3   :  { %3253 = vmatprep.subr.bf16.mxu1 %v5058_v0 }
  0xd4   :  { %1204 = vmatpush1.bf16.msra.mxu0 %v4139_v56 }
  0xd5   :  { %1205 = vmatprep.subr.bf16.mxu0 %v4142_v57 }
  0xd6   :  { %3254 = vmatpush3.bf16.msra.mxu1 %v4168_v2 }
  0xd7   :  { %3255 = vmatprep.subr.bf16.mxu1 %v5058_v0 }
  0xd8   :  { %1206 = vmatpush1.bf16.msra.mxu0 %v4149_v59 }
  0xd9   :  { %1207 = vmatprep.subr.bf16.mxu0 %v4153_v60 }
  0xda   :  { %3256 = vmatpush3.bf16.msra.mxu1 %v4178_v5 }
  0xdb   :  { %3257 = vmatprep.subr.bf16.mxu1 %v5058_v0 }
  0xdc   :  { %1208 = vmatpush1.bf16.msra.mxu0 %v4162_v62 }
  0xdd   :  { %1209 = vmatprep.subr.bf16.mxu0 %v4165_v63 }
  0xde   :  { %3258 = vmatpush3.bf16.msra.mxu1 %v4188_v8 }
  0xdf   :  { %3259 = vmatprep.subr.bf16.mxu1 %v5058_v0 }
  0xe0   :  { %1210 = vmatpush1.bf16.msra.mxu0 %v4172_v3 }
  0xe1   :  { %1211 = vmatprep.subr.bf16.mxu0 %v4175_v4 }
  0xe2   :  { %3260 = vmatpush3.bf16.msra.mxu1 %v4198_v11 }
  0xe3   :  { %3261 = vmatprep.subr.bf16.mxu1 %v5058_v0 }
  0xe4   :  { %1212 = vmatpush1.bf16.msra.mxu0 %v4182_v6 }
  0xe5   :  { %1213 = vmatprep.subr.bf16.mxu0 %v4185_v7 }
  0xe6   :  { %3262 = vmatpush3.bf16.msra.mxu1 %v4208_v14 }
  0xe7   :  { %3263 = vmatprep.subr.bf16.mxu1 %v5058_v0 }
  0xe8   :  { %1214 = vmatpush1.bf16.msra.mxu0 %v4192_v9 }
  0xe9   :  { %1321 = vmatprep.subr.bf16.mxu0 %v4195_v10 }
  0xea   :  { %3264 = vmatpush3.bf16.msra.mxu1 %v4220_v17 }
  0xeb   :  { %3269 = vmatprep.subr.bf16.mxu1 %v5058_v0  ;;  %v123_v0 = vrot.slane %v110_v40, %v4339_v52 }
 0x13e   :  { %v295_v44 = vpop.f32.mrb[0].mxu0 }
 0x13f   :  { %v296_v45 = vadd.f32 %v295_v44, %v115_v42  ;;  %v297_v46 = vpop.f32.mrb[1].mxu0 }
 0x140   :  { %v298_v47 = vadd.f32 %v297_v46, %v119_v43  ;;  %v299_v49 = vpop.f32.mrb[2].mxu0  ;;  %v338_v10 = vpop.f32.mrb[0].mxu1  ;;  %v385_v46 = vld [vmem:[#allocation8 + $0x3] sm:$0x7] }
 0x141   :  { %345 = vst [vmem:[#allocation2] sm:$0xff] %v296_v45  ;;  %v300_v55 = vadd.f32 %v299_v49, %v115_v42  ;;  %v301_v1 = vpop.f32.mrb[3].mxu0  ;;  %v339_v17 = vadd.f32 %v338_v10, %v123_v0  ;;  %v3187_v9 = vpop.f32.mrb[1].mxu1  ;;  %v390_v38 = vrot.slane %v385_v46, %v4333_v39  ;;  %v394_v42 = vrot.slane %v385_v46, %v4335_v41 }
 0x142   :  { %346 = vst [vmem:[#allocation2 + $0x8] sm:$0xff] %v298_v47  ;;  %v302_v37 = vadd.f32 %v301_v1, %v119_v43  ;;  %v341_v7 = vpop.f32.mrb[2].mxu1 }
 0x143   :  { %348 = vst [vmem:[#allocation2 + $0x18] sm:$0xff] %v300_v55  ;;  %347 = vst [vmem:[#allocation2 + $0x10] sm:$0xff] %v339_v17  ;;  %v342_v44 = vadd.f32 %v341_v7, %v123_v0  ;;  %v3188_v14 = vpop.f32.mrb[3].mxu1  ;;  %v398_v0 = vrot.slane %v385_v46, %v4339_v52 }
 0x144   :  { %349 = vst [vmem:[#allocation2 + $0x20] sm:$0xff] %v302_v37 }
 0x145   :  { %350 = vst [vmem:[#allocation2 + $0x28] sm:$0xff] %v342_v44 }
 0x148   :  { %v929_v46 = vld [vmem:[#allocation2] sm:$0x3] }
 0x15e   :  { %v564_v45 = vpop.f32.mrb[4].mxu0 }
 0x15f   :  { %v565_v47 = vadd.f32 %v564_v45, %v390_v38  ;;  %v566_v1 = vpop.f32.mrb[5].mxu0  ;;  %v685_v45 = vld [vmem:[#allocation9] sm:$0x7] }
 0x160   :  { %v567_v43 = vadd.f32 %v566_v1, %v394_v42  ;;  %v568_v49 = vpop.f32.mrb[6].mxu0  ;;  %v607_v7 = vpop.f32.mrb[4].mxu1  ;;  %v4346_v1 = vrot.slane %v685_v45, %v4333_v39 }
 0x161   :  { %614 = vst [vmem:[#allocation3] sm:$0xff] %v565_v47  ;;  %v569_v40 = vadd.f32 %v568_v49, %v390_v38  ;;  %v570_v55 = vpop.f32.mrb[7].mxu0  ;;  %v608_v10 = vadd.f32 %v607_v7, %v398_v0  ;;  %v3207_v14 = vpop.f32.mrb[5].mxu1  ;;  %v4349_v38 = vrot.slane %v685_v45, %v4335_v41  ;;  %v930_v7 = vld [vmem:[#allocation2 + $0x8] sm:$0x3] }
 0x162   :  { %615 = vst [vmem:[#allocation3 + $0x8] sm:$0xff] %v567_v43  ;;  %v571_v9 = vadd.f32 %v570_v55, %v394_v42  ;;  %v610_v17 = vpop.f32.mrb[6].mxu1  ;;  %5122 = vst [vmem:[#allocation22_spill] sm:$0xff] %v4346_v1 }
 0x163   :  { %617 = vst [vmem:[#allocation3 + $0x18] sm:$0xff] %v569_v40  ;;  %616 = vst [vmem:[#allocation3 + $0x10] sm:$0xff] %v608_v10  ;;  %v611_v37 = vadd.f32 %v610_v17, %v398_v0  ;;  %v3208_v44 = vpop.f32.mrb[7].mxu1 }
 0x164   :  { %618 = vst [vmem:[#allocation3 + $0x20] sm:$0xff] %v571_v9  ;;  %5123 = vst [vmem:[#allocation23_spill] sm:$0xff] %v4349_v38 }
 0x165   :  { %619 = vst [vmem:[#allocation3 + $0x28] sm:$0xff] %v611_v37 }
 0x17e   :  { %v882_v42 = vpop.f32.mrb[8].mxu0 }
 0x17f   :  { %v883_v47 = vadd.f32 %v882_v42, %v4346_v1  ;;  %v884_v43 = vpop.f32.mrb[9].mxu0  ;;  %v4354_v42 = vrot.slane %v685_v45, %v4339_v52 }
 0x180   :  { %v885_v49 = vadd.f32 %v884_v43, %v4349_v38  ;;  %v886_v40 = vpop.f32.mrb[10].mxu0  ;;  %v923_v14 = vpop.f32.mrb[8].mxu1 }
 0x181   :  { %v932_v55 = vadd.f32 %v929_v46, %v883_v47  ;;  %v887_v9 = vpop.f32.mrb[11].mxu0  ;;  %v3227_v37 = vpop.f32.mrb[9].mxu1  ;;  %5124 = vst [vmem:[#allocation24_spill] sm:$0xff] %v4354_v42  ;;  %v703_v40 = vld [vmem:[#allocation9 + $0x3] sm:$0x7]  ;;  %v924_v46 = vadd.f32 %v923_v14, %v4354_v42 }
 0x182   :  { %v939_v10 = vadd.f32 %v930_v7, %v885_v49  ;;  %v926_v44 = vpop.f32.mrb[10].mxu1  ;;  %v4358_v49 = vrot.slane %v703_v40, %v4333_v39  ;;  %v4361_v9 = vrot.slane %v703_v40, %v4335_v41  ;;  %v1164_v39 = vld [vmem:[#allocation3 + $0x18] sm:$0xc0]  ;;  %v1165_v41 = vld [vmem:[#allocation3 + $0x20] sm:$0xc0] }
 0x183   :  { %v2951_v0 = vmul.f32 -1.442695, %v932_v55  ;;  %v3228_v6 = vpop.f32.mrb[11].mxu1 }
 0x184   :  { %v2952_v17 = vmul.f32 -1.442695, %v939_v10  ;;  %5125 = vst [vmem:[#allocation25_spill] sm:$0xff] %v4358_v49 }
 0x185   :  { %3669 = vpow2.f32 %v2951_v0  ;;  %v931_v0 = vld [vmem:[#allocation2 + $0x10] sm:$0x3] }
 0x186   :  { %3671 = vpow2.f32 %v2952_v17 }
 0x18f   :  { %v3670_v4 = vpop.eup %3669 }
 0x190   :  { %v936_v11 = vadd.f32 1.0, %v3670_v4  ;;  %v3672_v43 = vpop.eup %3671 }
 0x191   :  { %v943_v47 = vadd.f32 1.0, %v3672_v43 }
 0x192   :  { %3673 = vrcp.f32 %v936_v11 }
 0x193   :  { %3675 = vrcp.f32 %v943_v47 }
 0x19c   :  { %v3674_v55 = vpop.eup %3673 }
 0x19d   :  { %v946_v6 = vmul.f32 %v3674_v55, %v924_v46  ;;  %v3676_v47 = vpop.eup %3675 }
 0x19e   :  { %v1117_v4 = vpop.f32.mrb[12].mxu0 }
 0x19f   :  { %v947_v11 = vadd.f32 %v946_v6, %v931_v0  ;;  %v1118_v45 = vadd.f32 %v1117_v4, %v4358_v49  ;;  %v1119_v7 = vpop.f32.mrb[13].mxu0  ;;  %v949_v4 = vsub.f32 1.0, %v3676_v47 }
 0x1a0   :  { %v1120_v10 = vadd.f32 %v1119_v7, %v4361_v9  ;;  %v1121_v17 = vpop.f32.mrb[14].mxu0  ;;  %v1158_v46 = vpop.f32.mrb[12].mxu1 }
 0x1a1   :  { %3677 = vtanh.f32 %v947_v11  ;;  %v1168_v14 = vrot.slane %v1118_v45, 2  ;;  %v1122_v37 = vpop.f32.mrb[15].mxu0  ;;  %v3247_v55 = vpop.f32.mrb[13].mxu1  ;;  %v951_v17 = vmul.f32 0.0, %v3676_v47 }
 0x1a2   :  { %v1178_v44 = vrot.slane %v1120_v10, 2  ;;  %v1161_v6 = vpop.f32.mrb[14].mxu1 }
 0x1a3   :  { %v1170_v43 = vadd.f32 %v1168_v14, %v1164_v39  ;;  %v3248_v49 = vpop.f32.mrb[15].mxu1 }
 0x1a4   :  { %v1180_v38 = vadd.f32 %v1178_v44, %v1165_v41 }
 0x1a5   :  { %v2977_v42 = vmul.f32 -1.442695, %v1170_v43  ;;  %v1166_v43 = vld [vmem:[#allocation3 + $0x28] sm:$0xc0] }
 0x1a6   :  { %v2978_v0 = vmul.f32 -1.442695, %v1180_v38  ;;  %v4373_v38 = vrot.slane %v703_v40, %v4339_v52 }
 0x1a7   :  { %3679 = vpow2.f32 %v2977_v42  ;;  %v5127_v42 = vmov 0  }
 0x1a8   :  { %3681 = vpow2.f32 %v2978_v0  ;;  %v1159_v49 = vadd.f32 %v1158_v46, %v4373_v38 }
 0x1aa   :  { %v1188_v37 = vrot.slane %v1159_v49, 2 }
 0x1ab   :  { %v3678_v1 = vpop.eup %3677 }
 0x1ac   :  { %v950_v7 = vmul.f32 %v3678_v1, %v949_v4  ;;  %v5126_v1 = vmov 0.0  }
 0x1ae   :  { %v4365_v11 = vadd.f32 %v951_v17, %v950_v7 }
 0x1b0   :  { %v953_v45 = vpack.c.bf16 %v4365_v11, %v4365_v11 }
 0x1b1   :  { %v3680_v10 = vpop.eup %3679 }
 0x1b2   :  { %v1174_v14 = vadd.f32 1.0, %v3680_v10  ;;  %954 = vst [vmem:[%s5055_s5] sm:$0x1] %v953_v45  ;;  %1232 = vmatmul.mubr.bf16.vlgmr.msra.gmra.mrb[16].mxu0 %v953_v45  ;;  %3266 = vmatmul.mubr.bf16.vlgmr.msra.gmra.mrb[16].mxu1 %v953_v45  ;;  %v3682_v52 = vpop.eup %3681  ;;  %v5133_v45 = vld [vmem:[#allocation17_spill] sm:$0xff] }
 0x1b3   :  { %1322 = vmatpush1.bf16.msra.mxu0 %v4202_v12  ;;  %3270 = vmatpush3.bf16.msra.mxu1 %v4230_v20  ;;  %v1184_v40 = vadd.f32 1.0, %v3682_v52  ;;  %v5134_v10 = vld [vmem:[#allocation21_spill] sm:$0xff] }
 0x1b4   :  { %3683 = vrcp.f32 %v1174_v14  ;;  %1323 = vmatprep.subr.bf16.mxu0 %v4205_v13  ;;  %3271 = vmatprep.subr.bf16.mxu1 %v5126_v1  ;;  %v5135_v14 = vld [vmem:[#allocation18_spill] sm:$0xff] }
 0x1b5   :  { %1353 = vmatprep.mubr.bf16.mxu0 %v5127_v42  ;;  %3285 = vmatprep.mubr.msk.bf16.mxu1 %vm4009_vm0, %v5126_v1  ;;  %3685 = vrcp.f32 %v1184_v40  ;;  %v5136_v40 = vld [vmem:[#allocation22_spill] sm:$0xff] }
 0x1b7   :  { %1324 = vmatpush1.bf16.msra.mxu0 %v4213_v15  ;;  %3272 = vmatpush3.bf16.msra.mxu1 %v4241_v23 }
 0x1b8   :  { %1325 = vmatprep.subr.bf16.mxu0 %v4217_v16  ;;  %3273 = vmatprep.subr.bf16.mxu1 %v5126_v1 }
 0x1bb   :  { %1326 = vmatpush1.bf16.msra.mxu0 %v4224_v18  ;;  %3274 = vmatpush3.bf16.msra.mxu1 %v4253_v26 }
 0x1bc   :  { %1327 = vmatprep.subr.bf16.mxu0 %v4227_v19  ;;  %3275 = vmatprep.subr.bf16.mxu1 %v5126_v1 }
 0x1be   :  { %v3684_v39 = vpop.eup %3683 }
 0x1bf   :  { %v1190_v44 = vmul.f32 %v3684_v39, %v1188_v37  ;;  %1328 = vmatpush1.bf16.msra.mxu0 %v4234_v21  ;;  %3276 = vmatpush3.bf16.msra.mxu1 %v4263_v29  ;;  %v3686_v47 = vpop.eup %3685 }
 0x1c0   :  { %1329 = vmatprep.subr.bf16.mxu0 %v4238_v22  ;;  %3277 = vmatprep.subr.bf16.mxu1 %v5126_v1  ;;  %v1193_v46 = vsub.f32 1.0, %v3686_v47  ;;  %v1195_v0 = vmul.f32 0.0, %v3686_v47 }
 0x1c1   :  { %v1191_v41 = vadd.f32 %v1190_v44, %v1166_v43  ;;  %v5137_v43 = vld [vmem:[#allocation23_spill] sm:$0xff] }
 0x1c3   :  { %3687 = vtanh.f32 %v1191_v41  ;;  %1330 = vmatpush1.bf16.msra.mxu0 %v4247_v24  ;;  %3278 = vmatpush3.bf16.msra.mxu1 %v4273_v32 }
 0x1c4   :  { %1331 = vmatprep.subr.bf16.mxu0 %v4250_v25  ;;  %3279 = vmatprep.subr.bf16.mxu1 %v5126_v1 }
 0x1c7   :  { %1332 = vmatpush1.bf16.msra.mxu0 %v4257_v27  ;;  %3280 = vmatpush3.bf16.msra.mxu1 %v4281_v34 }
 0x1c8   :  { %1333 = vmatprep.subr.bf16.mxu0 %v4260_v28  ;;  %3281 = vmatprep.subr.bf16.mxu1 %v5126_v1 }
 0x1cb   :  { %1334 = vmatpush1.bf16.msra.mxu0 %v4267_v30  ;;  %3282 = vmatpush3.bf16.msra.mxu1 %v4286_v35 }
 0x1cc   :  { %1335 = vmatprep.subr.bf16.mxu0 %v4270_v31  ;;  %3283 = vmatprep.subr.bf16.mxu1 %v5126_v1 }
 0x1cd   :  { %v3688_v55 = vpop.eup %3687 }
 0x1ce   :  { %v1194_v6 = vmul.f32 %v3688_v55, %v1193_v46 }
 0x1cf   :  { %1336 = vmatpush1.bf16.msra.mxu0 %v4277_v33  ;;  %3284 = vmatpush3.bf16.msra.mxu1 %v4294_v36 }
 0x1d0   :  { %v4409_v4 = vadd.f32 %v1195_v0, %v1194_v6  ;;  %1443 = vmatprep.subr.bf16.mxu0 %v4121_v48  ;;  %3289 = vmatprep.subr.bf16.mxu1 %v5126_v1  ;;  %v5128_v48 = vld [vmem:[#allocation19_spill] sm:$0xff] }
 0x1d2   :  { %v1197_v7 = vpack.c.bf16 %v4409_v4, %v4409_v4 }
 0x1d4   :  { %1198 = vst [vmem:[%s5055_s5 + $0xc] sm:$0x8] %v1197_v7  ;;  %v1319_v17 = vrot.slane %v1197_v7, 3  ;;  %v1280_v7 = vld [vmem:[#allocation2] sm:$0xc] }
 0x1d6   :  { %1354 = vmatmul.mubr.bf16.vlgmr.msra.gmra.mrb[20].mxu0 %v1319_v17  ;;  %3286 = vmatmul.mubr.bf16.vlgmr.msra.gmra.mrb[20].mxu1 %v1319_v17 }
 0x1d7   :  { %1444 = vmatpush1.bf16.msra.mxu0 %v4124_v50  ;;  %3290 = vmatpush3.bf16.msra.mxu1 %v4145_v58  ;;  %v5129_v50 = vld [vmem:[#allocation14_spill] sm:$0xff] }
 0x1d8   :  { %1445 = vmatprep.subr.bf16.mxu0 %v4126_v51  ;;  %3291 = vmatprep.subr.bf16.mxu1 %v5126_v1  ;;  %v5130_v51 = vld [vmem:[#allocation15_spill] sm:$0xff] }
 0x1d9   :  { %1475 = vmatprep.mubr.bf16.mxu0 %v5127_v42  ;;  %3305 = vmatprep.mubr.msk.bf16.mxu1 %vm4009_vm0, %v5126_v1 }
 0x1db   :  { %1446 = vmatpush1.bf16.msra.mxu0 %v4132_v53  ;;  %3292 = vmatpush3.bf16.msra.mxu1 %v4156_v61  ;;  %v5131_v53 = vld [vmem:[#allocation20_spill] sm:$0xff] }
 0x1dc   :  { %1447 = vmatprep.subr.bf16.mxu0 %v4136_v54  ;;  %3293 = vmatprep.subr.bf16.mxu1 %v5126_v1  ;;  %v5132_v54 = vld [vmem:[#allocation16_spill] sm:$0xff] }
 0x1df   :  { %1448 = vmatpush1.bf16.msra.mxu0 %v4139_v56  ;;  %3294 = vmatpush3.bf16.msra.mxu1 %v4168_v2 }
 0x1e0   :  { %1449 = vmatprep.subr.bf16.mxu0 %v4142_v57  ;;  %3295 = vmatprep.subr.bf16.mxu1 %v5126_v1 }
 0x1e3   :  { %1450 = vmatpush1.bf16.msra.mxu0 %v4149_v59  ;;  %3296 = vmatpush3.bf16.msra.mxu1 %v4178_v5 }
 0x1e4   :  { %1451 = vmatprep.subr.bf16.mxu0 %v4153_v60  ;;  %3297 = vmatprep.subr.bf16.mxu1 %v5126_v1 }
 0x1e7   :  { %1452 = vmatpush1.bf16.msra.mxu0 %v4162_v62  ;;  %3298 = vmatpush3.bf16.msra.mxu1 %v4188_v8 }
 0x1e8   :  { %1453 = vmatprep.subr.bf16.mxu0 %v4165_v63  ;;  %3299 = vmatprep.subr.bf16.mxu1 %v5126_v1 }
 0x1eb   :  { %1454 = vmatpush1.bf16.msra.mxu0 %v4172_v3  ;;  %3300 = vmatpush3.bf16.msra.mxu1 %v5128_v48 }
 0x1ec   :  { %1455 = vmatprep.subr.bf16.mxu0 %v5129_v50  ;;  %3301 = vmatprep.subr.bf16.mxu1 %v5126_v1 }
 0x1ef   :  { %1456 = vmatpush1.bf16.msra.mxu0 %v5130_v51  ;;  %3302 = vmatpush3.bf16.msra.mxu1 %v5131_v53 }
 0x1f0   :  { %1457 = vmatprep.subr.bf16.mxu0 %v5132_v54  ;;  %3303 = vmatprep.subr.bf16.mxu1 %v5126_v1 }
 0x1f3   :  { %1458 = vmatpush1.bf16.msra.mxu0 %v5133_v45  ;;  %3304 = vmatpush3.bf16.msra.mxu1 %v5134_v10  ;;  %v1281_v45 = vld [vmem:[#allocation2 + $0x8] sm:$0xc] }
 0x1f4   :  { %1565 = vmatprep.subr.bf16.mxu0 %v5135_v14  ;;  %3309 = vmatprep.subr.bf16.mxu1 %v5126_v1 }
 0x285   :  { %v1233_v49 = vpop.f32.mrb[16].mxu0  ;;  %v1274_v52 = vpop.f32.mrb[16].mxu1 }
 0x286   :  { %v1234_v37 = vadd.f32 %v1233_v49, %v5136_v40  ;;  %v1235_v39 = vpop.f32.mrb[17].mxu0  ;;  %v3267_v44 = vpop.f32.mrb[17].mxu1 }
 0x287   :  { %v1236_v41 = vadd.f32 %v1235_v39, %v5137_v43  ;;  %v1237_v47 = vpop.f32.mrb[18].mxu0  ;;  %v1277_v46 = vpop.f32.mrb[18].mxu1  ;;  %v5138_v39 = vld [vmem:[#allocation24_spill] sm:$0xff] }
 0x288   :  { %v1284_v55 = vrot.slane %v1234_v37, 6  ;;  %v1238_v6 = vpop.f32.mrb[19].mxu0  ;;  %v3268_v0 = vpop.f32.mrb[19].mxu1  ;;  %v1275_v47 = vadd.f32 %v1274_v52, %v5138_v39 }
 0x289   :  { %v1294_v17 = vrot.slane %v1236_v41, 6  ;;  %v1312_v6 = vrot.slane %v4365_v11, 6  ;;  %v1282_v0 = vld [vmem:[#allocation2 + $0x10] sm:$0xc]  ;;  %v1402_v11 = vld [vmem:[#allocation3 + $0x18] sm:$0x30] }
 0x28a   :  { %v1286_v10 = vadd.f32 %v1284_v55, %v1280_v7  ;;  %v1304_v37 = vrot.slane %v1275_v47, 6 }
 0x28b   :  { %v1296_v14 = vadd.f32 %v1294_v17, %v1281_v45 }
 0x28c   :  { %v2979_v54 = vmul.f32 -1.442695, %v1286_v10 }
 0x28d   :  { %v2980_v53 = vmul.f32 -1.442695, %v1296_v14 }
 0x28e   :  { %3689 = vpow2.f32 %v2979_v54 }
 0x28f   :  { %3691 = vpow2.f32 %v2980_v53  ;;  %v5139_v53 = vld [vmem:[#allocation25_spill] sm:$0xff] }
 0x298   :  { %v3690_v51 = vpop.eup %3689 }
 0x299   :  { %v3692_v49 = vpop.eup %3691  ;;  %v1290_v40 = vadd.f32 1.0, %v3690_v51 }
 0x29a   :  { %v1300_v44 = vadd.f32 1.0, %v3692_v49 }
 0x29b   :  { %3693 = vrcp.f32 %v1290_v40 }
 0x29c   :  { %3695 = vrcp.f32 %v1300_v44 }
 0x2a5   :  { %v3694_v46 = vpop.eup %3693 }
 0x2a6   :  { %v3696_v41 = vpop.eup %3695  ;;  %v1306_v55 = vmul.f32 %v3694_v46, %v1304_v37  ;;  %v1403_v46 = vld [vmem:[#allocation3 + $0x20] sm:$0x30] }
 0x2a7   :  { %v1314_v45 = vmul.f32 %v3696_v41, %v1312_v6 }
 0x2a8   :  { %v1307_v10 = vadd.f32 %v1306_v55, %v1282_v0 }
 0x2a9   :  { %v1355_v14 = vpop.f32.mrb[20].mxu0  ;;  %v1396_v54 = vpop.f32.mrb[20].mxu1 }
 0x2aa   :  { %3697 = vtanh.f32 %v1307_v10  ;;  %v1356_v7 = vadd.f32 %v1355_v14, %v5139_v53  ;;  %v1357_v51 = vpop.f32.mrb[21].mxu0  ;;  %v3287_v17 = vpop.f32.mrb[21].mxu1  ;;  %v1309_v10 = vsub.f32 1.0, %v3696_v41 }
 0x2ab   :  { %v1358_v40 = vadd.f32 %v1357_v51, %v4361_v9  ;;  %v1359_v49 = vpop.f32.mrb[22].mxu0  ;;  %v1399_v52 = vpop.f32.mrb[22].mxu1 }
 0x2ac   :  { %v1406_v44 = vrot.slane %v1356_v7, 4  ;;  %v1360_v47 = vpop.f32.mrb[23].mxu0  ;;  %v3288_v39 = vpop.f32.mrb[23].mxu1  ;;  %v1525_v52 = vld [vmem:[#allocation2 + $0x8] sm:$0x30] }
 0x2ad   :  { %v1416_v43 = vrot.slane %v1358_v40, 4 }
 0x2ae   :  { %v1408_v37 = vadd.f32 %v1406_v44, %v1402_v11 }
 0x2af   :  { %v1418_v6 = vadd.f32 %v1416_v43, %v1403_v46 }
 0x2b0   :  { %v2981_v55 = vmul.f32 -1.442695, %v1408_v37 }
 0x2b1   :  { %v2982_v0 = vmul.f32 -1.442695, %v1418_v6 }
 0x2b2   :  { %3699 = vpow2.f32 %v2981_v55 }
 0x2b3   :  { %3701 = vpow2.f32 %v2982_v0  ;;  %v5148_v0 = vld [vmem:[#allocation24_spill] sm:$0xff] }
 0x2b4   :  { %v3698_v14 = vpop.eup %3697 }
 0x2b5   :  { %v1310_v53 = vmul.f32 %v3698_v14, %v1309_v10 }
 0x2b7   :  { %v4459_v17 = vadd.f32 %v1314_v45, %v1310_v53  ;;  %v1524_v45 = vld [vmem:[#allocation2] sm:$0x30] }
 0x2b9   :  { %v1316_v51 = vpack.c.bf16 %v4459_v17, %v4459_v17 }
 0x2bb   :  { %1317 = vst [vmem:[%s5055_s5] sm:$0x2] %v1316_v51  ;;  %v1441_v39 = vrot.slane %v1316_v51, 1 }
 0x2bc   :  { %v3700_v7 = vpop.eup %3699 }
 0x2bd   :  { %v3702_v40 = vpop.eup %3701  ;;  %v1412_v43 = vadd.f32 1.0, %v3700_v7  ;;  %1476 = vmatmul.mubr.bf16.vlgmr.msra.gmra.mrb[24].mxu0 %v1441_v39  ;;  %3306 = vmatmul.mubr.bf16.vlgmr.msra.gmra.mrb[24].mxu1 %v1441_v39  ;;  %v1556_v39 = vrot.slane %v4459_v17, 6  ;;  %v1646_v17 = vld [vmem:[#allocation3 + $0x18] sm:$0xc] }
 0x2be   :  { %v1422_v49 = vadd.f32 1.0, %v3702_v40  ;;  %1566 = vmatpush1.bf16.msra.mxu0 %v4202_v12  ;;  %3310 = vmatpush3.bf16.msra.mxu1 %v4230_v20  ;;  %v1397_v12 = vadd.f32 %v1396_v54, %v4373_v38 }
 0x2bf   :  { %3703 = vrcp.f32 %v1412_v43  ;;  %1567 = vmatprep.subr.bf16.mxu0 %v4205_v13  ;;  %3311 = vmatprep.subr.bf16.mxu1 %v5126_v1  ;;  %v1526_v43 = vld [vmem:[#allocation2 + $0x10] sm:$0x30] }
 0x2c0   :  { %3705 = vrcp.f32 %v1422_v49  ;;  %1597 = vmatprep.mubr.bf16.mxu0 %v5127_v42  ;;  %3325 = vmatprep.mubr.msk.bf16.mxu1 %vm4009_vm0, %v5126_v1  ;;  %v1426_v13 = vrot.slane %v1397_v12, 4 }
 0x2c2   :  { %1568 = vmatpush1.bf16.msra.mxu0 %v4213_v15  ;;  %3312 = vmatpush3.bf16.msra.mxu1 %v4241_v23  ;;  %v1434_v15 = vrot.slane %v4409_v4, 2 }
 0x2c3   :  { %1569 = vmatprep.subr.bf16.mxu0 %v4217_v16  ;;  %3313 = vmatprep.subr.bf16.mxu1 %v5126_v1  ;;  %v1404_v16 = vld [vmem:[#allocation3 + $0x28] sm:$0x30] }
 0x2c6   :  { %1570 = vmatpush1.bf16.msra.mxu0 %v4224_v18  ;;  %3314 = vmatpush3.bf16.msra.mxu1 %v4253_v26 }
 0x2c7   :  { %1571 = vmatprep.subr.bf16.mxu0 %v4227_v19  ;;  %3315 = vmatprep.subr.bf16.mxu1 %v5126_v1 }
 0x2c9   :  { %v3704_v20 = vpop.eup %3703 }
 0x2ca   :  { %v3706_v41 = vpop.eup %3705  ;;  %v1428_v23 = vmul.f32 %v3704_v20, %v1426_v13  ;;  %1572 = vmatpush1.bf16.msra.mxu0 %v4234_v21  ;;  %3316 = vmatpush3.bf16.msra.mxu1 %v4263_v29  ;;  %v4512_v29 = vld [vmem:[#allocation6] ss:$12 sps:$4 sm:$0xff]  }
 0x2cb   :  { %1573 = vmatprep.subr.bf16.mxu0 %v4238_v22  ;;  %3317 = vmatprep.subr.bf16.mxu1 %v5126_v1  ;;  %v1436_v18 = vmul.f32 %v3706_v41, %v1434_v15  ;;  %v1431_v19 = vsub.f32 1.0, %v3706_v41  ;;  %v5149_v15 = vld [vmem:[#allocation25_spill] sm:$0xff] }
 0x2cc   :  { %v1429_v26 = vadd.f32 %v1428_v23, %v1404_v16 }
 0x2ce   :  { %3707 = vtanh.f32 %v1429_v26  ;;  %1574 = vmatpush1.bf16.msra.mxu0 %v4247_v24  ;;  %3318 = vmatpush3.bf16.msra.mxu1 %v4273_v32  ;;  %v4527_v32 = vld [vmem:[#allocation6 + $0x34] ss:$12 sps:$4 sm:$0xff]  }
 0x2cf   :  { %1575 = vmatprep.subr.bf16.mxu0 %v4250_v25  ;;  %3319 = vmatprep.subr.bf16.mxu1 %v5126_v1  ;;  %v4503_v25 = vld [vmem:[#allocation6 + $0x4] ss:$12 sps:$4 sm:$0xff]  }
 0x2d2   :  { %1576 = vmatpush1.bf16.msra.mxu0 %v4257_v27  ;;  %3320 = vmatpush3.bf16.msra.mxu1 %v4281_v34 }
 0x2d3   :  { %1577 = vmatprep.subr.bf16.mxu0 %v4260_v28  ;;  %3321 = vmatprep.subr.bf16.mxu1 %v5126_v1 }
 0x2d6   :  { %1578 = vmatpush1.bf16.msra.mxu0 %v4267_v30  ;;  %3322 = vmatpush3.bf16.msra.mxu1 %v4286_v35  ;;  %v4516_v30 = vld [vmem:[#allocation6 + $0x1c] ss:$12 sps:$4 sm:$0xff]  }
 0x2d7   :  { %1579 = vmatprep.subr.bf16.mxu0 %v4270_v31  ;;  %3323 = vmatprep.subr.bf16.mxu1 %v5126_v1  ;;  %v4523_v31 = vld [vmem:[#allocation6 + $0x18] ss:$12 sps:$4 sm:$0xff]  }
 0x2d8   :  { %v3708_v21 = vpop.eup %3707 }
 0x2d9   :  { %v1432_v22 = vmul.f32 %v3708_v21, %v1431_v19 }
 0x2da   :  { %1580 = vmatpush1.bf16.msra.mxu0 %v4277_v33  ;;  %3324 = vmatpush3.bf16.msra.mxu1 %v4294_v36  ;;  %v5147_v33 = vld [vmem:[#allocation23_spill] sm:$0xff] }
 0x2db   :  { %v4501_v24 = vadd.f32 %v1436_v18, %v1432_v22  ;;  %1687 = vmatprep.subr.bf16.mxu0 %v4503_v25  ;;  %3329 = vmatprep.subr.bf16.mxu1 %v5126_v1 }
 0x2dd   :  { %v1438_v27 = vpack.c.bf16 %v4501_v24, %v4501_v24 }
 0x2df   :  { %1439 = vst [vmem:[%s5055_s5 + $0xc] sm:$0x4] %v1438_v27  ;;  %v1563_v28 = vrot.slane %v1438_v27, 2 }
 0x2e1   :  { %1598 = vmatmul.mubr.bf16.vlgmr.msra.gmra.mrb[28].mxu0 %v1563_v28  ;;  %3326 = vmatmul.mubr.bf16.vlgmr.msra.gmra.mrb[28].mxu1 %v1563_v28 }
 0x2e2   :  { %1688 = vmatpush1.bf16.msra.mxu0 %v4512_v29  ;;  %3330 = vmatpush3.bf16.msra.mxu1 %v4145_v58  ;;  %v5142_v58 = vld [vmem:[#allocation16_spill] sm:$0xff] }
 0x2e3   :  { %1689 = vmatprep.subr.bf16.mxu0 %v4516_v30  ;;  %3331 = vmatprep.subr.bf16.mxu1 %v5126_v1 }
 0x2e4   :  { %1719 = vmatprep.mubr.bf16.mxu0 %v5127_v42  ;;  %3345 = vmatprep.mubr.msk.bf16.mxu1 %vm4009_vm0, %v5126_v1 }
 0x2e6   :  { %1690 = vmatpush1.bf16.msra.mxu0 %v4523_v31  ;;  %3332 = vmatpush3.bf16.msra.mxu1 %v4156_v61  ;;  %v5145_v61 = vld [vmem:[#allocation18_spill] sm:$0xff] }
 0x2e7   :  { %1691 = vmatprep.subr.bf16.mxu0 %v4527_v32  ;;  %3333 = vmatprep.subr.bf16.mxu1 %v5126_v1 }
 0x2ea   :  { %1692 = vmatpush1.bf16.msra.mxu0 %v4139_v56  ;;  %3334 = vmatpush3.bf16.msra.mxu1 %v4168_v2  ;;  %v5140_v56 = vld [vmem:[#allocation15_spill] sm:$0xff]  ;;  %v5146_v2 = vld [vmem:[#allocation22_spill] sm:$0xff] }
 0x2eb   :  { %1693 = vmatprep.subr.bf16.mxu0 %v4142_v57  ;;  %3335 = vmatprep.subr.bf16.mxu1 %v5126_v1  ;;  %v5141_v57 = vld [vmem:[#allocation20_spill] sm:$0xff] }
 0x2ee   :  { %1694 = vmatpush1.bf16.msra.mxu0 %v4149_v59  ;;  %3336 = vmatpush3.bf16.msra.mxu1 %v4178_v5  ;;  %v5143_v59 = vld [vmem:[#allocation17_spill] sm:$0xff] }
 0x2ef   :  { %1695 = vmatprep.subr.bf16.mxu0 %v4153_v60  ;;  %3337 = vmatprep.subr.bf16.mxu1 %v5126_v1  ;;  %v5144_v60 = vld [vmem:[#allocation21_spill] sm:$0xff] }
 0x2f2   :  { %1696 = vmatpush1.bf16.msra.mxu0 %v4162_v62  ;;  %3338 = vmatpush3.bf16.msra.mxu1 %v4188_v8 }
 0x2f3   :  { %1697 = vmatprep.subr.bf16.mxu0 %v4165_v63  ;;  %3339 = vmatprep.subr.bf16.mxu1 %v5126_v1 }
 0x2f6   :  { %1698 = vmatpush1.bf16.msra.mxu0 %v4172_v3  ;;  %3340 = vmatpush3.bf16.msra.mxu1 %v5128_v48 }
 0x2f7   :  { %1699 = vmatprep.subr.bf16.mxu0 %v5129_v50  ;;  %3341 = vmatprep.subr.bf16.mxu1 %v5126_v1 }
 0x2fa   :  { %1700 = vmatpush1.bf16.msra.mxu0 %v5140_v56  ;;  %3342 = vmatpush3.bf16.msra.mxu1 %v5141_v57  ;;  %v1647_v57 = vld [vmem:[#allocation3 + $0x20] sm:$0xc] }
 0x2fb   :  { %1701 = vmatprep.subr.bf16.mxu0 %v5142_v58  ;;  %3343 = vmatprep.subr.bf16.mxu1 %v5126_v1 }
 0x2fe   :  { %1702 = vmatpush1.bf16.msra.mxu0 %v5143_v59  ;;  %3344 = vmatpush3.bf16.msra.mxu1 %v5144_v60 }
 0x2ff   :  { %1809 = vmatprep.subr.bf16.mxu0 %v5145_v61  ;;  %3349 = vmatprep.subr.bf16.mxu1 %v5126_v1 }
 0x390   :  { %v1477_v62 = vpop.f32.mrb[24].mxu0  ;;  %v1518_v63 = vpop.f32.mrb[24].mxu1 }
 0x391   :  { %v1478_v3 = vadd.f32 %v1477_v62, %v5146_v2  ;;  %v1479_v5 = vpop.f32.mrb[25].mxu0  ;;  %v3307_v8 = vpop.f32.mrb[25].mxu1  ;;  %v1519_v10 = vadd.f32 %v1518_v63, %v5148_v0 }
 0x392   :  { %v1480_v34 = vadd.f32 %v1479_v5, %v5147_v33  ;;  %v1481_v35 = vpop.f32.mrb[26].mxu0  ;;  %v1521_v36 = vpop.f32.mrb[26].mxu1 }
 0x393   :  { %v1528_v4 = vrot.slane %v1478_v3, 4  ;;  %v1482_v48 = vpop.f32.mrb[27].mxu0  ;;  %v3308_v50 = vpop.f32.mrb[27].mxu1  ;;  %v1548_v14 = vrot.slane %v1519_v10, 4 }
 0x394   :  { %v1538_v54 = vrot.slane %v1480_v34, 4  ;;  %v4568_v48 = vld [vmem:[#allocation6 + $0xc0] ss:$12 sps:$4 sm:$0xff]   ;;  %v4571_v50 = vld [vmem:[#allocation6 + $0xc8] ss:$12 sps:$4 sm:$0xff]  }
 0x395   :  { %v1530_v53 = vadd.f32 %v1528_v4, %v1524_v45  ;;  %v4574_v45 = vld [vmem:[#allocation6 + $0xdc] ss:$12 sps:$4 sm:$0xff]  }
 0x396   :  { %v1540_v44 = vadd.f32 %v1538_v54, %v1525_v52  ;;  %v4581_v54 = vld [vmem:[#allocation6 + $0xd8] ss:$12 sps:$4 sm:$0xff]   ;;  %v4587_v52 = vld [vmem:[#allocation6 + $0xf4] ss:$12 sps:$4 sm:$0xff]  }
 0x397   :  { %v2983_v47 = vmul.f32 -1.442695, %v1530_v53  ;;  %v4584_v53 = vld [vmem:[#allocation6 + $0xe0] ss:$12 sps:$4 sm:$0xff]  }
 0x398   :  { %v2984_v11 = vmul.f32 -1.442695, %v1540_v44 }
 0x399   :  { %3709 = vpow2.f32 %v2983_v47  ;;  %v4592_v47 = vld [vmem:[#allocation6 + $0xf0] ss:$12 sps:$4 sm:$0xff]  }
 0x39a   :  { %3711 = vpow2.f32 %v2984_v11  ;;  %v4595_v11 = vld [vmem:[#allocation6 + $0xf8] ss:$12 sps:$4 sm:$0xff]  }
 0x3a3   :  { %v3710_v37 = vpop.eup %3709 }
 0x3a4   :  { %v3712_v46 = vpop.eup %3711  ;;  %v1534_v6 = vadd.f32 1.0, %v3710_v37  ;;  %v4598_v37 = vld [vmem:[#allocation6 + $0x10c] ss:$12 sps:$4 sm:$0xff]  }
 0x3a5   :  { %v1544_v55 = vadd.f32 1.0, %v3712_v46 }
 0x3a6   :  { %3713 = vrcp.f32 %v1534_v6 }
 0x3a7   :  { %3715 = vrcp.f32 %v1544_v55  ;;  %v1678_v55 = vrot.slane %v4501_v24, 2  ;;  %v4613_v24 = vld [vmem:[#allocation6 + $0x120] ss:$12 sps:$4 sm:$0xff]  }
 0x3b0   :  { %v3714_v51 = vpop.eup %3713 }
 0x3b1   :  { %v3716_v7 = vpop.eup %3715  ;;  %v1550_v40 = vmul.f32 %v3714_v51, %v1548_v14  ;;  %v4603_v51 = vld [vmem:[#allocation6 + $0x108] ss:$12 sps:$4 sm:$0xff]  }
 0x3b2   :  { %v1558_v49 = vmul.f32 %v3716_v7, %v1556_v39  ;;  %v1553_v61 = vsub.f32 1.0, %v3716_v7  ;;  %v4606_v39 = vld [vmem:[#allocation6 + $0x110] ss:$12 sps:$4 sm:$0xff]   ;;  %v1648_v7 = vld [vmem:[#allocation3 + $0x28] sm:$0xc] }
 0x3b3   :  { %v1551_v12 = vadd.f32 %v1550_v40, %v1526_v43  ;;  %v4609_v40 = vld [vmem:[#allocation6 + $0x124] ss:$12 sps:$4 sm:$0xff]  }
 0x3b4   :  { %v1599_v13 = vpop.f32.mrb[28].mxu0  ;;  %v1640_v20 = vpop.f32.mrb[28].mxu1 }
 0x3b5   :  { %3717 = vtanh.f32 %v1551_v12  ;;  %v1600_v41 = vadd.f32 %v1599_v13, %v5149_v15  ;;  %v1601_v23 = vpop.f32.mrb[29].mxu0  ;;  %v3327_v16 = vpop.f32.mrb[29].mxu1  ;;  %v1641_v44 = vadd.f32 %v1640_v20, %v4373_v38  ;;  %v4616_v12 = vld [vmem:[#allocation6 + $0x128] ss:$12 sps:$4 sm:$0xff]   ;;  %v4623_v20 = vld [vmem:[#allocation6 + $0x138] ss:$12 sps:$4 sm:$0xff]  }
 0x3b6   :  { %v1602_v18 = vadd.f32 %v1601_v23, %v4361_v9  ;;  %v1603_v26 = vpop.f32.mrb[30].mxu0  ;;  %v1643_v19 = vpop.f32.mrb[30].mxu1  ;;  %v4619_v13 = vld [vmem:[#allocation6 + $0x13c] ss:$12 sps:$4 sm:$0xff]   ;;  %v4629_v23 = vld [vmem:[#allocation6 + $0x154] ss:$12 sps:$4 sm:$0xff]  }
 0x3b7   :  { %v1650_v21 = vrot.slane %v1600_v41, 6  ;;  %v1604_v22 = vpop.f32.mrb[31].mxu0  ;;  %v3328_v27 = vpop.f32.mrb[31].mxu1  ;;  %v1670_v46 = vrot.slane %v1641_v44, 6  ;;  %v4626_v41 = vld [vmem:[#allocation6 + $0x140] ss:$12 sps:$4 sm:$0xff]  }
 0x3b8   :  { %v1660_v28 = vrot.slane %v1602_v18, 6  ;;  %v4633_v16 = vld [vmem:[#allocation6 + $0x150] ss:$12 sps:$4 sm:$0xff]   ;;  %v4636_v18 = vld [vmem:[#allocation6 + $0x158] ss:$12 sps:$4 sm:$0xff]  }
 0x3b9   :  { %v1652_v56 = vadd.f32 %v1650_v21, %v1646_v17  ;;  %v4639_v26 = vld [vmem:[#allocation6 + $0x16c] ss:$12 sps:$4 sm:$0xff]   ;;  %v4643_v27 = vld [vmem:[#allocation6 + $0x168] ss:$12 sps:$4 sm:$0xff]   ;;  %v4646_v17 = vld [vmem:[#allocation6 + $0x170] ss:$12 sps:$4 sm:$0xff]  }
 0x3ba   :  { %v1662_v58 = vadd.f32 %v1660_v28, %v1647_v57  ;;  %v4706_v44 = vld [vmem:[#allocation6 + $0x80] ss:$12 sps:$4 sm:$0xff]  }
 0x3bb   :  { %v2985_v59 = vmul.f32 -1.442695, %v1652_v56  ;;  %5155 = vst [vmem:[#allocation17_spill] sm:$0xff] %v4706_v44 }
 0x3bc   :  { %v2986_v60 = vmul.f32 -1.442695, %v1662_v58  ;;  %v4659_v58 = vld [vmem:[#allocation6 + $0x8] ss:$12 sps:$4 sm:$0xff]  }
 0x3bd   :  { %3719 = vpow2.f32 %v2985_v59  ;;  %v4668_v59 = vld [vmem:[#allocation6 + $0x20] ss:$12 sps:$4 sm:$0xff]  }
 0x3be   :  { %3721 = vpow2.f32 %v2986_v60  ;;  %v4673_v60 = vld [vmem:[#allocation6 + $0x30] ss:$12 sps:$4 sm:$0xff]  }
 0x3bf   :  { %v3718_v62 = vpop.eup %3717 }
 0x3c0   :  { %v1554_v63 = vmul.f32 %v3718_v62, %v1553_v61  ;;  %v4676_v61 = vld [vmem:[#allocation6 + $0x38] ss:$12 sps:$4 sm:$0xff]  }
 0x3c1   :  { %v4679_v62 = vld [vmem:[#allocation6 + $0x4c] ss:$12 sps:$4 sm:$0xff]  }
 0x3c2   :  { %v4561_v3 = vadd.f32 %v1558_v49, %v1554_v63  ;;  %v4683_v63 = vld [vmem:[#allocation6 + $0x48] ss:$12 sps:$4 sm:$0xff]  }
 0x3c4   :  { %v1560_v5 = vpack.c.bf16 %v4561_v3, %v4561_v3 }
 0x3c6   :  { %1561 = vst [vmem:[%s5055_s5] sm:$0x4] %v1560_v5  ;;  %v1685_v8 = vrot.slane %v1560_v5, 2  ;;  %v4686_v5 = vld [vmem:[#allocation6 + $0x50] ss:$12 sps:$4 sm:$0xff]  }
 0x3c7   :  { %v3720_v34 = vpop.eup %3719 }
 0x3c8   :  { %v3722_v35 = vpop.eup %3721  ;;  %v1656_v36 = vadd.f32 1.0, %v3720_v34  ;;  %1720 = vmatmul.mubr.bf16.vlgmr.msra.gmra.mrb[32].mxu0 %v1685_v8  ;;  %3346 = vmatmul.mubr.bf16.vlgmr.msra.gmra.mrb[32].mxu1 %v1685_v8  ;;  %v4689_v8 = vld [vmem:[#allocation6 + $0x64] ss:$12 sps:$4 sm:$0xff]   ;;  %v4693_v34 = vld [vmem:[#allocation6 + $0x60] ss:$12 sps:$4 sm:$0xff]  }
 0x3c9   :  { %v1666_v4 = vadd.f32 1.0, %v3722_v35  ;;  %1810 = vmatpush1.bf16.msra.mxu0 %v4568_v48  ;;  %3350 = vmatpush3.bf16.msra.mxu1 %v4571_v50  ;;  %5150 = vst [vmem:[#allocation19_spill] sm:$0xff] %v4689_v8  ;;  %5151 = vst [vmem:[#allocation14_spill] sm:$0xff] %v4693_v34  ;;  %v4696_v35 = vld [vmem:[#allocation6 + $0x68] ss:$12 sps:$4 sm:$0xff]  }
 0x3ca   :  { %3723 = vrcp.f32 %v1656_v36  ;;  %1811 = vmatprep.subr.bf16.mxu0 %v4574_v45  ;;  %3351 = vmatprep.subr.bf16.mxu1 %v5126_v1  ;;  %5152 = vst [vmem:[#allocation15_spill] sm:$0xff] %v4696_v35  ;;  %v4699_v36 = vld [vmem:[#allocation6 + $0x7c] ss:$12 sps:$4 sm:$0xff]  }
 0x3cb   :  { %3725 = vrcp.f32 %v1666_v4  ;;  %1841 = vmatprep.mubr.bf16.mxu0 %v5127_v42  ;;  %3365 = vmatprep.mubr.msk.bf16.mxu1 %vm4009_vm0, %v5126_v1  ;;  %5153 = vst [vmem:[#allocation20_spill] sm:$0xff] %v4699_v36  ;;  %v4703_v4 = vld [vmem:[#allocation6 + $0x78] ss:$12 sps:$4 sm:$0xff]  }
 0x3cc   :  { %5154 = vst [vmem:[#allocation16_spill] sm:$0xff] %v4703_v4 }
 0x3cd   :  { %1812 = vmatpush1.bf16.msra.mxu0 %v4581_v54  ;;  %3352 = vmatpush3.bf16.msra.mxu1 %v4584_v53 }
 0x3ce   :  { %1813 = vmatprep.subr.bf16.mxu0 %v4587_v52  ;;  %3353 = vmatprep.subr.bf16.mxu1 %v5126_v1 }
 0x3d1   :  { %1814 = vmatpush1.bf16.msra.mxu0 %v4592_v47  ;;  %3354 = vmatpush3.bf16.msra.mxu1 %v4595_v11 }
 0x3d2   :  { %1815 = vmatprep.subr.bf16.mxu0 %v4598_v37  ;;  %3355 = vmatprep.subr.bf16.mxu1 %v5126_v1 }
 0x3d4   :  { %v3724_v6 = vpop.eup %3723 }
 0x3d5   :  { %v3726_v10 = vpop.eup %3725  ;;  %v1672_v14 = vmul.f32 %v3724_v6, %v1670_v46  ;;  %1816 = vmatpush1.bf16.msra.mxu0 %v4603_v51  ;;  %3356 = vmatpush3.bf16.msra.mxu1 %v4606_v39  ;;  %v4709_v46 = vld [vmem:[#allocation6 + $0x94] ss:$12 sps:$4 sm:$0xff]   ;;  %v4713_v6 = vld [vmem:[#allocation6 + $0x90] ss:$12 sps:$4 sm:$0xff]  }
 0x3d6   :  { %1817 = vmatprep.subr.bf16.mxu0 %v4609_v40  ;;  %3357 = vmatprep.subr.bf16.mxu1 %v5126_v1  ;;  %v1680_v43 = vmul.f32 %v3726_v10, %v1678_v55  ;;  %v1675_v19 = vsub.f32 1.0, %v3726_v10  ;;  %5156 = vst [vmem:[#allocation21_spill] sm:$0xff] %v4709_v46  ;;  %5157 = vst [vmem:[#allocation18_spill] sm:$0xff] %v4713_v6  ;;  %v4716_v55 = vld [vmem:[#allocation6 + $0x98] ss:$12 sps:$4 sm:$0xff]  }
 0x3d7   :  { %v1673_v49 = vadd.f32 %v1672_v14, %v1648_v7  ;;  %5158 = vst [vmem:[#allocation26_spill] sm:$0xff] %v4716_v55  ;;  %v4719_v10 = vld [vmem:[#allocation6 + $0xac] ss:$12 sps:$4 sm:$0xff]   ;;  %v4723_v14 = vld [vmem:[#allocation6 + $0xa8] ss:$12 sps:$4 sm:$0xff]  }
 0x3d8   :  { %5159 = vst [vmem:[#allocation27_spill] sm:$0xff] %v4719_v10  ;;  %5160 = vst [vmem:[#allocation28_spill] sm:$0xff] %v4723_v14  ;;  %v4726_v7 = vld [vmem:[#allocation6 + $0xb0] ss:$12 sps:$4 sm:$0xff]  }
 0x3d9   :  { %3727 = vtanh.f32 %v1673_v49  ;;  %1818 = vmatpush1.bf16.msra.mxu0 %v4613_v24  ;;  %3358 = vmatpush3.bf16.msra.mxu1 %v4616_v12  ;;  %5161 = vst [vmem:[#allocation29_spill] sm:$0xff] %v4726_v7 }
 0x3da   :  { %1819 = vmatprep.subr.bf16.mxu0 %v4619_v13  ;;  %3359 = vmatprep.subr.bf16.mxu1 %v5126_v1 }
 0x3dd   :  { %1820 = vmatpush1.bf16.msra.mxu0 %v4623_v20  ;;  %3360 = vmatpush3.bf16.msra.mxu1 %v4626_v41 }
 0x3de   :  { %1821 = vmatprep.subr.bf16.mxu0 %v4629_v23  ;;  %3361 = vmatprep.subr.bf16.mxu1 %v5126_v1 }
 0x3e1   :  { %1822 = vmatpush1.bf16.msra.mxu0 %v4633_v16  ;;  %3362 = vmatpush3.bf16.msra.mxu1 %v4636_v18 }
 0x3e2   :  { %1823 = vmatprep.subr.bf16.mxu0 %v4639_v26  ;;  %3363 = vmatprep.subr.bf16.mxu1 %v5126_v1 }
 0x3e3   :  { %v3728_v21 = vpop.eup %3727 }
 0x3e4   :  { %v1676_v22 = vmul.f32 %v3728_v21, %v1675_v19 }
 0x3e5   :  { %1824 = vmatpush1.bf16.msra.mxu0 %v4643_v27  ;;  %3364 = vmatpush3.bf16.msra.mxu1 %v4646_v17 }
 0x3e6   :  { %v4649_v28 = vadd.f32 %v1680_v43, %v1676_v22  ;;  %1922 = vmatprep.subr.bf16.mxu0 %v4503_v25  ;;  %3369 = vmatprep.subr.bf16.mxu1 %v5126_v1  ;;  %v4729_v43 = vld [vmem:[#allocation6 + $0xc4] ss:$12 sps:$4 sm:$0xff]  }
 0x3e7   :  { %5162 = vst [vmem:[#allocation30_spill] sm:$0xff] %v4729_v43 }
 0x3e8   :  { %v1682_v56 = vpack.c.bf16 %v4649_v28, %v4649_v28 }
 0x3ea   :  { %1683 = vst [vmem:[%s5055_s5 + $0xc] sm:$0x2] %v1682_v56  ;;  %v1807_v57 = vrot.slane %v1682_v56, 1 }
 0x3ec   :  { %1842 = vmatmul.mubr.bf16.vlgmr.msra.gmra.mrb[36].mxu0 %v1807_v57  ;;  %3366 = vmatmul.mubr.bf16.vlgmr.msra.gmra.mrb[36].mxu1 %v1807_v57 }
 0x3ed   :  { %1923 = vmatpush1.bf16.msra.mxu0 %v4512_v29  ;;  %3370 = vmatpush3.bf16.msra.mxu1 %v4659_v58 }
 0x3ee   :  { %1924 = vmatprep.subr.bf16.mxu0 %v4516_v30  ;;  %3371 = vmatprep.subr.bf16.mxu1 %v5126_v1 }
 0x3ef   :  { %1954 = vmatprep.mubr.bf16.mxu0 %v5127_v42  ;;  %3385 = vmatprep.mubr.msk.bf16.mxu1 %vm4009_vm0, %v5126_v1 }
 0x3f1   :  { %1925 = vmatpush1.bf16.msra.mxu0 %v4523_v31  ;;  %3372 = vmatpush3.bf16.msra.mxu1 %v4668_v59 }
 0x3f2   :  { %1926 = vmatprep.subr.bf16.mxu0 %v4527_v32  ;;  %3373 = vmatprep.subr.bf16.mxu1 %v5126_v1 }
 0x3f5   :  { %1927 = vmatpush1.bf16.msra.mxu0 %v4673_v60  ;;  %3374 = vmatpush3.bf16.msra.mxu1 %v4676_v61 }
 0x3f6   :  { %1928 = vmatprep.subr.bf16.mxu0 %v4679_v62  ;;  %3375 = vmatprep.subr.bf16.mxu1 %v5126_v1 }
 0x3f9   :  { %1929 = vmatpush1.bf16.msra.mxu0 %v4683_v63  ;;  %3376 = vmatpush3.bf16.msra.mxu1 %v4686_v5 }
 0x3fa   :  { %1930 = vmatprep.subr.bf16.mxu0 %v4689_v8  ;;  %3377 = vmatprep.subr.bf16.mxu1 %v5126_v1 }
 0x3fd   :  { %1931 = vmatpush1.bf16.msra.mxu0 %v4693_v34  ;;  %3378 = vmatpush3.bf16.msra.mxu1 %v4696_v35 }
 0x3fe   :  { %1932 = vmatprep.subr.bf16.mxu0 %v4699_v36  ;;  %3379 = vmatprep.subr.bf16.mxu1 %v5126_v1  ;;  %v1769_v36 = vld [vmem:[#allocation2 + $0x8] sm:$0xc0] }
 0x401   :  { %1933 = vmatpush1.bf16.msra.mxu0 %v4703_v4  ;;  %3380 = vmatpush3.bf16.msra.mxu1 %v4706_v44 }
 0x402   :  { %1934 = vmatprep.subr.bf16.mxu0 %v4709_v46  ;;  %3381 = vmatprep.subr.bf16.mxu1 %v5126_v1 }
 0x405   :  { %1935 = vmatpush1.bf16.msra.mxu0 %v4713_v6  ;;  %3382 = vmatpush3.bf16.msra.mxu1 %v4716_v55 }
 0x406   :  { %1936 = vmatprep.subr.bf16.mxu0 %v4719_v10  ;;  %3383 = vmatprep.subr.bf16.mxu1 %v5126_v1 }
 0x409   :  { %1937 = vmatpush1.bf16.msra.mxu0 %v4723_v14  ;;  %3384 = vmatpush3.bf16.msra.mxu1 %v4726_v7  ;;  %v1768_v7 = vld [vmem:[#allocation2] sm:$0xc0] }
 0x40a   :  { %2032 = vmatprep.subr.bf16.mxu0 %v4729_v43  ;;  %3389 = vmatprep.subr.bf16.mxu1 %v5126_v1 }
 0x49b   :  { %v1721_v49 = vpop.f32.mrb[32].mxu0  ;;  %v1762_v19 = vpop.f32.mrb[32].mxu1 }
 0x49c   :  { %v1722_v21 = vadd.f32 %v1721_v49, %v5146_v2  ;;  %v1723_v22 = vpop.f32.mrb[33].mxu0  ;;  %v3347_v56 = vpop.f32.mrb[33].mxu1 }
 0x49d   :  { %v1724_v57 = vadd.f32 %v1723_v22, %v5147_v33  ;;  %v1725_v10 = vpop.f32.mrb[34].mxu0  ;;  %v1765_v14 = vpop.f32.mrb[34].mxu1 }
 0x49e   :  { %v1772_v55 = vrot.slane %v1722_v21, 2  ;;  %v1726_v6 = vpop.f32.mrb[35].mxu0  ;;  %v3348_v46 = vpop.f32.mrb[35].mxu1  ;;  %v1763_v10 = vadd.f32 %v1762_v19, %v5148_v0 }
 0x49f   :  { %v1782_v44 = vrot.slane %v1724_v57, 2  ;;  %v1800_v46 = vrot.slane %v4561_v3, 6 }
 0x4a0   :  { %v1774_v4 = vadd.f32 %v1772_v55, %v1768_v7  ;;  %v1792_v14 = vrot.slane %v1763_v10, 2  ;;  %v1770_v7 = vld [vmem:[#allocation2 + $0x10] sm:$0xc0] }
 0x4a1   :  { %v1784_v43 = vadd.f32 %v1782_v44, %v1769_v36 }
 0x4a2   :  { %v2987_v35 = vmul.f32 -1.442695, %v1774_v4 }
 0x4a3   :  { %v2988_v34 = vmul.f32 -1.442695, %v1784_v43 }
 0x4a4   :  { %3729 = vpow2.f32 %v2987_v35 }
 0x4a5   :  { %3731 = vpow2.f32 %v2988_v34 }
 0x4ae   :  { %v3730_v8 = vpop.eup %3729 }
 0x4af   :  { %v3732_v49 = vpop.eup %3731  ;;  %v1778_v2 = vadd.f32 1.0, %v3730_v8 }
 0x4b0   :  { %v1788_v56 = vadd.f32 1.0, %v3732_v49 }
 0x4b1   :  { %3733 = vrcp.f32 %v1778_v2  ;;  %v1890_v2 = vld [vmem:[#allocation3 + $0x18] sm:$0x3] }
 0x4b2   :  { %3735 = vrcp.f32 %v1788_v56  ;;  %v1891_v56 = vld [vmem:[#allocation3 + $0x20] sm:$0x3] }
 0x4bb   :  { %v3734_v6 = vpop.eup %3733 }
 0x4bc   :  { %v3736_v21 = vpop.eup %3735  ;;  %v1794_v55 = vmul.f32 %v3734_v6, %v1792_v14 }
 0x4bd   :  { %v1802_v36 = vmul.f32 %v3736_v21, %v1800_v46 }
 0x4be   :  { %v1795_v4 = vadd.f32 %v1794_v55, %v1770_v7  ;;  %v1797_v55 = vsub.f32 1.0, %v3736_v21 }
 0x4bf   :  { %v1843_v44 = vpop.f32.mrb[36].mxu0  ;;  %v1884_v35 = vpop.f32.mrb[36].mxu1 }
 0x4c0   :  { %3737 = vtanh.f32 %v1795_v4  ;;  %v1844_v34 = vadd.f32 %v1843_v44, %v5149_v15  ;;  %v1845_v8 = vpop.f32.mrb[37].mxu0  ;;  %v3367_v43 = vpop.f32.mrb[37].mxu1  ;;  %v1885_v21 = vadd.f32 %v1884_v35, %v4373_v38 }
 0x4c1   :  { %v1846_v22 = vadd.f32 %v1845_v8, %v4361_v9  ;;  %v1847_v19 = vpop.f32.mrb[38].mxu0  ;;  %v1887_v57 = vpop.f32.mrb[38].mxu1 }
 0x4c2   :  { %v1893_v49 = vadd.f32 %v1890_v2, %v1844_v34  ;;  %v1848_v3 = vpop.f32.mrb[39].mxu0  ;;  %v3368_v10 = vpop.f32.mrb[39].mxu1 }
 0x4c3   :  { %v1900_v14 = vadd.f32 %v1891_v56, %v1846_v22  ;;  %v1913_v22 = vrot.slane %v4649_v28, 2  ;;  %v1892_v3 = vld [vmem:[#allocation3 + $0x28] sm:$0x3] }
 0x4c4   :  { %v2989_v6 = vmul.f32 -1.442695, %v1893_v49 }
 0x4c5   :  { %v2990_v46 = vmul.f32 -1.442695, %v1900_v14 }
 0x4c6   :  { %3739 = vpow2.f32 %v2989_v6 }
 0x4c7   :  { %3741 = vpow2.f32 %v2990_v46 }
 0x4ca   :  { %v3738_v7 = vpop.eup %3737 }
 0x4cb   :  { %v1798_v4 = vmul.f32 %v3738_v7, %v1797_v55  ;;  %v5163_v7 = vld [vmem:[#allocation19_spill] sm:$0xff] }
 0x4cd   :  { %v4739_v44 = vadd.f32 %v1802_v36, %v1798_v4  ;;  %v5164_v4 = vld [vmem:[#allocation14_spill] sm:$0xff] }
 0x4cf   :  { %v1804_v43 = vpack.c.bf16 %v4739_v44, %v4739_v44 }
 0x4d0   :  { %v3740_v8 = vpop.eup %3739 }
 0x4d1   :  { %v3742_v19 = vpop.eup %3741  ;;  %v1897_v57 = vadd.f32 1.0, %v3740_v8  ;;  %1805 = vst [vmem:[%s5055_s5] sm:$0x8] %v1804_v43  ;;  %v1920_v34 = vrot.slane %v1804_v43, 3  ;;  %v5165_v43 = vld [vmem:[#allocation15_spill] sm:$0xff]  ;;  %v5166_v8 = vld [vmem:[#allocation20_spill] sm:$0xff] }
 0x4d2   :  { %v1904_v2 = vadd.f32 1.0, %v3742_v19  ;;  %v5167_v19 = vld [vmem:[#allocation16_spill] sm:$0xff] }
 0x4d3   :  { %3743 = vrcp.f32 %v1897_v57  ;;  %1955 = vmatmul.mubr.bf16.vlgmr.msra.gmra.mrb[40].mxu0 %v1920_v34  ;;  %3386 = vmatmul.mubr.bf16.vlgmr.msra.gmra.mrb[40].mxu1 %v1920_v34  ;;  %v5168_v57 = vld [vmem:[#allocation17_spill] sm:$0xff] }
 0x4d4   :  { %3745 = vrcp.f32 %v1904_v2  ;;  %2033 = vmatpush1.bf16.msra.mxu0 %v4568_v48  ;;  %3390 = vmatpush3.bf16.msra.mxu1 %v4571_v50  ;;  %v5169_v34 = vld [vmem:[#allocation21_spill] sm:$0xff]  ;;  %v5170_v2 = vld [vmem:[#allocation18_spill] sm:$0xff] }
 0x4d5   :  { %2034 = vmatprep.subr.bf16.mxu0 %v4574_v45  ;;  %3391 = vmatprep.subr.bf16.mxu1 %v5126_v1 }
 0x4d6   :  { %2064 = vmatprep.mubr.bf16.mxu0 %v5127_v42  ;;  %3405 = vmatprep.mubr.msk.bf16.mxu1 %vm4009_vm0, %v5126_v1 }
 0x4d8   :  { %2035 = vmatpush1.bf16.msra.mxu0 %v4581_v54  ;;  %3392 = vmatpush3.bf16.msra.mxu1 %v4584_v53 }
 0x4d9   :  { %2036 = vmatprep.subr.bf16.mxu0 %v4587_v52  ;;  %3393 = vmatprep.subr.bf16.mxu1 %v5126_v1 }
 0x4dc   :  { %2037 = vmatpush1.bf16.msra.mxu0 %v4592_v47  ;;  %3394 = vmatpush3.bf16.msra.mxu1 %v4595_v11 }
 0x4dd   :  { %v3744_v36 = vpop.eup %3743  ;;  %2038 = vmatprep.subr.bf16.mxu0 %v4598_v37  ;;  %3395 = vmatprep.subr.bf16.mxu1 %v5126_v1 }
 0x4de   :  { %v3746_v49 = vpop.eup %3745  ;;  %v1907_v56 = vmul.f32 %v3744_v36, %v1885_v21  ;;  %v5171_v21 = vld [vmem:[#allocation26_spill] sm:$0xff]  ;;  %v5172_v36 = vld [vmem:[#allocation27_spill] sm:$0xff] }
 0x4df   :  { %v1915_v10 = vmul.f32 %v3746_v49, %v1913_v22  ;;  %v1910_v28 = vsub.f32 1.0, %v3746_v49  ;;  %v5173_v22 = vld [vmem:[#allocation28_spill] sm:$0xff]  ;;  %v5174_v49 = vld [vmem:[#allocation29_spill] sm:$0xff] }
 0x4e0   :  { %v1908_v14 = vadd.f32 %v1907_v56, %v1892_v3  ;;  %2039 = vmatpush1.bf16.msra.mxu0 %v4603_v51  ;;  %3396 = vmatpush3.bf16.msra.mxu1 %v4606_v39  ;;  %v5175_v56 = vld [vmem:[#allocation30_spill] sm:$0xff] }
 0x4e1   :  { %2040 = vmatprep.subr.bf16.mxu0 %v4609_v40  ;;  %3397 = vmatprep.subr.bf16.mxu1 %v5126_v1 }
 0x4e2   :  { %3747 = vtanh.f32 %v1908_v14  ;;  %v5176_v14 = vld [vmem:[#allocation22_spill] sm:$0xff] }
 0x4e4   :  { %2041 = vmatpush1.bf16.msra.mxu0 %v4613_v24  ;;  %3398 = vmatpush3.bf16.msra.mxu1 %v4616_v12 }
 0x4e5   :  { %2042 = vmatprep.subr.bf16.mxu0 %v4619_v13  ;;  %3399 = vmatprep.subr.bf16.mxu1 %v5126_v1 }
 0x4e8   :  { %2043 = vmatpush1.bf16.msra.mxu0 %v4623_v20  ;;  %3400 = vmatpush3.bf16.msra.mxu1 %v4626_v41 }
 0x4e9   :  { %2044 = vmatprep.subr.bf16.mxu0 %v4629_v23  ;;  %3401 = vmatprep.subr.bf16.mxu1 %v5126_v1 }
 0x4ec   :  { %v3748_v35 = vpop.eup %3747  ;;  %2045 = vmatpush1.bf16.msra.mxu0 %v4633_v16  ;;  %3402 = vmatpush3.bf16.msra.mxu1 %v4636_v18 }
 0x4ed   :  { %2046 = vmatprep.subr.bf16.mxu0 %v4639_v26  ;;  %3403 = vmatprep.subr.bf16.mxu1 %v5126_v1  ;;  %v1911_v6 = vmul.f32 %v3748_v35, %v1910_v28 }
 0x4ef   :  { %v4779_v46 = vadd.f32 %v1915_v10, %v1911_v6 }
 0x4f0   :  { %2047 = vmatpush1.bf16.msra.mxu0 %v4643_v27  ;;  %3404 = vmatpush3.bf16.msra.mxu1 %v4646_v17 }
 0x4f1   :  { %v1917_v55 = vpack.c.bf16 %v4779_v46, %v4779_v46  ;;  %2151 = vmatprep.subr.bf16.mxu0 %v4503_v25  ;;  %3409 = vmatprep.subr.bf16.mxu1 %v5126_v1 }
 0x4f3   :  { %1918 = vst [vmem:[%s5055_s5 + $0xc] sm:$0x1] %v1917_v55  ;;  %2065 = vmatmul.mubr.bf16.vlgmr.msra.gmra.mrb[44].mxu0 %v1917_v55  ;;  %3406 = vmatmul.mubr.bf16.vlgmr.msra.gmra.mrb[44].mxu1 %v1917_v55  ;;  %v2003_v55 = vld [vmem:[#allocation2 + $0x18] sm:$0x3] }
 0x4f4   :  { %2152 = vmatpush1.bf16.msra.mxu0 %v4512_v29  ;;  %3410 = vmatpush3.bf16.msra.mxu1 %v4659_v58 }
 0x4f5   :  { %2153 = vmatprep.subr.bf16.mxu0 %v4516_v30  ;;  %3411 = vmatprep.subr.bf16.mxu1 %v5126_v1 }
 0x4f6   :  { %2183 = vmatprep.mubr.bf16.mxu0 %v5127_v42  ;;  %3425 = vmatprep.mubr.msk.bf16.mxu1 %vm4009_vm0, %v5126_v1 }
 0x4f8   :  { %2154 = vmatpush1.bf16.msra.mxu0 %v4523_v31  ;;  %3412 = vmatpush3.bf16.msra.mxu1 %v4668_v59 }
 0x4f9   :  { %2155 = vmatprep.subr.bf16.mxu0 %v4527_v32  ;;  %3413 = vmatprep.subr.bf16.mxu1 %v5126_v1 }
 0x4fc   :  { %2156 = vmatpush1.bf16.msra.mxu0 %v4673_v60  ;;  %3414 = vmatpush3.bf16.msra.mxu1 %v4676_v61 }
 0x4fd   :  { %2157 = vmatprep.subr.bf16.mxu0 %v4679_v62  ;;  %3415 = vmatprep.subr.bf16.mxu1 %v5126_v1 }
 0x500   :  { %2158 = vmatpush1.bf16.msra.mxu0 %v4683_v63  ;;  %3416 = vmatpush3.bf16.msra.mxu1 %v4686_v5 }
 0x501   :  { %2159 = vmatprep.subr.bf16.mxu0 %v5163_v7  ;;  %3417 = vmatprep.subr.bf16.mxu1 %v5126_v1 }
 0x504   :  { %2160 = vmatpush1.bf16.msra.mxu0 %v5164_v4  ;;  %3418 = vmatpush3.bf16.msra.mxu1 %v5165_v43 }
 0x505   :  { %2161 = vmatprep.subr.bf16.mxu0 %v5166_v8  ;;  %3419 = vmatprep.subr.bf16.mxu1 %v5126_v1 }
 0x508   :  { %2162 = vmatpush1.bf16.msra.mxu0 %v5167_v19  ;;  %3420 = vmatpush3.bf16.msra.mxu1 %v5168_v57  ;;  %v2004_v57 = vld [vmem:[#allocation2 + $0x20] sm:$0x3] }
 0x509   :  { %2163 = vmatprep.subr.bf16.mxu0 %v5169_v34  ;;  %3421 = vmatprep.subr.bf16.mxu1 %v5126_v1 }
 0x50c   :  { %2164 = vmatpush1.bf16.msra.mxu0 %v5170_v2  ;;  %3422 = vmatpush3.bf16.msra.mxu1 %v5171_v21 }
 0x50d   :  { %2165 = vmatprep.subr.bf16.mxu0 %v5172_v36  ;;  %3423 = vmatprep.subr.bf16.mxu1 %v5126_v1 }
 0x510   :  { %2166 = vmatpush1.bf16.msra.mxu0 %v5173_v22  ;;  %3424 = vmatpush3.bf16.msra.mxu1 %v5174_v49 }
 0x511   :  { %2273 = vmatprep.subr.bf16.mxu0 %v5175_v56  ;;  %3429 = vmatprep.subr.bf16.mxu1 %v5126_v1 }
 0x5a6   :  { %v1956_v3 = vpop.f32.mrb[40].mxu0  ;;  %v1997_v10 = vpop.f32.mrb[40].mxu1 }
 0x5a7   :  { %v1957_v28 = vadd.f32 %v1956_v3, %v5176_v14  ;;  %v1958_v35 = vpop.f32.mrb[41].mxu0  ;;  %v3387_v6 = vpop.f32.mrb[41].mxu1 }
 0x5a8   :  { %v1959_v21 = vadd.f32 %v1958_v35, %v5147_v33  ;;  %v1960_v36 = vpop.f32.mrb[42].mxu0  ;;  %v2000_v2 = vpop.f32.mrb[42].mxu1  ;;  %v1998_v6 = vadd.f32 %v1997_v10, %v5148_v0 }
 0x5a9   :  { %v2006_v34 = vadd.f32 %v2003_v55, %v1957_v28  ;;  %v1961_v22 = vpop.f32.mrb[43].mxu0  ;;  %v3388_v19 = vpop.f32.mrb[43].mxu1  ;;  %v2026_v2 = vrot.slane %v4739_v44, 6  ;;  %v2113_v44 = vld [vmem:[#allocation3] sm:$0xc0] }
 0x5aa   :  { %v2013_v49 = vadd.f32 %v2004_v57, %v1959_v21  ;;  %v2005_v22 = vld [vmem:[#allocation2 + $0x28] sm:$0x3] }
 0x5ab   :  { %v2991_v8 = vmul.f32 -1.442695, %v2006_v34 }
 0x5ac   :  { %v2992_v56 = vmul.f32 -1.442695, %v2013_v49 }
 0x5ad   :  { %3749 = vpow2.f32 %v2991_v8 }
 0x5ae   :  { %3751 = vpow2.f32 %v2992_v56 }
 0x5b7   :  { %v3750_v43 = vpop.eup %3749 }
 0x5b8   :  { %v3752_v4 = vpop.eup %3751  ;;  %v2010_v7 = vadd.f32 1.0, %v3750_v43 }
 0x5b9   :  { %v2017_v3 = vadd.f32 1.0, %v3752_v4 }
 0x5ba   :  { %3753 = vrcp.f32 %v2010_v7 }
 0x5bb   :  { %3755 = vrcp.f32 %v2017_v3 }
 0x5c4   :  { %v3754_v35 = vpop.eup %3753 }
 0x5c5   :  { %v3756_v36 = vpop.eup %3755  ;;  %v2020_v28 = vmul.f32 %v3754_v35, %v1998_v6  ;;  %v2114_v35 = vld [vmem:[#allocation3 + $0x8] sm:$0xc0] }
 0x5c6   :  { %v2066_v19 = vpop.f32.mrb[44].mxu0  ;;  %v2107_v57 = vpop.f32.mrb[44].mxu1  ;;  %v2028_v34 = vmul.f32 %v3756_v36, %v2026_v2 }
 0x5c7   :  { %v2021_v21 = vadd.f32 %v2020_v28, %v2005_v22  ;;  %v2067_v8 = vadd.f32 %v2066_v19, %v5149_v15  ;;  %v2068_v49 = vpop.f32.mrb[45].mxu0  ;;  %v3407_v56 = vpop.f32.mrb[45].mxu1  ;;  %v2023_v28 = vsub.f32 1.0, %v3756_v36 }
 0x5c8   :  { %v2069_v4 = vadd.f32 %v2068_v49, %v4361_v9  ;;  %v2070_v7 = vpop.f32.mrb[46].mxu0  ;;  %v2110_v43 = vpop.f32.mrb[46].mxu1 }
 0x5c9   :  { %3757 = vtanh.f32 %v2021_v21  ;;  %v2117_v10 = vrot.slane %v2067_v8, 2  ;;  %v2071_v55 = vpop.f32.mrb[47].mxu0  ;;  %v3408_v3 = vpop.f32.mrb[47].mxu1 }
 0x5ca   :  { %v2127_v0 = vrot.slane %v2069_v4, 2 }
 0x5cb   :  { %v2119_v6 = vadd.f32 %v2117_v10, %v2113_v44  ;;  %v2115_v10 = vld [vmem:[#allocation3 + $0x10] sm:$0xc0] }
 0x5cc   :  { %v2129_v33 = vadd.f32 %v2127_v0, %v2114_v35  ;;  %v2108_v0 = vadd.f32 %v2107_v57, %v4373_v38 }
 0x5cd   :  { %v2993_v14 = vmul.f32 -1.442695, %v2119_v6 }
 0x5ce   :  { %v2994_v2 = vmul.f32 -1.442695, %v2129_v33 }
 0x5cf   :  { %3759 = vpow2.f32 %v2993_v14  ;;  %v2137_v14 = vrot.slane %v2108_v0, 2 }
 0x5d0   :  { %3761 = vpow2.f32 %v2994_v2 }
 0x5d3   :  { %v3758_v22 = vpop.eup %3757 }
 0x5d4   :  { %v2024_v19 = vmul.f32 %v3758_v22, %v2023_v28  ;;  %v5182_v28 = vld [vmem:[#allocation17_spill] sm:$0xff] }
 0x5d5   :  { %v5183_v22 = vld [vmem:[#allocation21_spill] sm:$0xff] }
 0x5d6   :  { %v4831_v56 = vadd.f32 %v2028_v34, %v2024_v19  ;;  %v2145_v34 = vrot.slane %v4779_v46, 2  ;;  %v5184_v19 = vld [vmem:[#allocation18_spill] sm:$0xff] }
 0x5d8   :  { %v2030_v21 = vpack.c.bf16 %v4831_v56, %v4831_v56 }
 0x5d9   :  { %v3760_v8 = vpop.eup %3759 }
 0x5da   :  { %v3762_v49 = vpop.eup %3761  ;;  %v2123_v7 = vadd.f32 1.0, %v3760_v8  ;;  %2031 = vst [vmem:[%s5055_s5 + $0x8] sm:$0x1] %v2030_v21  ;;  %2184 = vmatmul.mubr.bf16.vlgmr.msra.gmra.mrb[48].mxu0 %v2030_v21  ;;  %3426 = vmatmul.mubr.bf16.vlgmr.msra.gmra.mrb[48].mxu1 %v2030_v21  ;;  %v5185_v21 = vld [vmem:[#allocation26_spill] sm:$0xff]  ;;  %v5186_v8 = vld [vmem:[#allocation27_spill] sm:$0xff] }
 0x5db   :  { %v2133_v33 = vadd.f32 1.0, %v3762_v49  ;;  %2274 = vmatpush1.bf16.msra.mxu0 %v4568_v48  ;;  %3430 = vmatpush3.bf16.msra.mxu1 %v4571_v50  ;;  %v5187_v49 = vld [vmem:[#allocation28_spill] sm:$0xff] }
 0x5dc   :  { %3763 = vrcp.f32 %v2123_v7  ;;  %2275 = vmatprep.subr.bf16.mxu0 %v4574_v45  ;;  %3431 = vmatprep.subr.bf16.mxu1 %v5126_v1  ;;  %v5188_v7 = vld [vmem:[#allocation29_spill] sm:$0xff] }
 0x5dd   :  { %3765 = vrcp.f32 %v2133_v33  ;;  %2305 = vmatprep.mubr.bf16.mxu0 %v5127_v42  ;;  %3445 = vmatprep.mubr.msk.bf16.mxu1 %vm4009_vm0, %v5126_v1  ;;  %v5189_v33 = vld [vmem:[#allocation30_spill] sm:$0xff] }
 0x5df   :  { %2276 = vmatpush1.bf16.msra.mxu0 %v4581_v54  ;;  %3432 = vmatpush3.bf16.msra.mxu1 %v4584_v53 }
 0x5e0   :  { %2277 = vmatprep.subr.bf16.mxu0 %v4587_v52  ;;  %3433 = vmatprep.subr.bf16.mxu1 %v5126_v1 }
 0x5e3   :  { %2278 = vmatpush1.bf16.msra.mxu0 %v4592_v47  ;;  %3434 = vmatpush3.bf16.msra.mxu1 %v4595_v11 }
 0x5e4   :  { %2279 = vmatprep.subr.bf16.mxu0 %v4598_v37  ;;  %3435 = vmatprep.subr.bf16.mxu1 %v5126_v1 }
 0x5e6   :  { %v3764_v36 = vpop.eup %3763 }
 0x5e7   :  { %v3766_v4 = vpop.eup %3765  ;;  %v2139_v43 = vmul.f32 %v3764_v36, %v2137_v14  ;;  %2280 = vmatpush1.bf16.msra.mxu0 %v4603_v51  ;;  %3436 = vmatpush3.bf16.msra.mxu1 %v4606_v39  ;;  %v5190_v36 = vld [vmem:[#allocation22_spill] sm:$0xff] }
 0x5e8   :  { %2281 = vmatprep.subr.bf16.mxu0 %v4609_v40  ;;  %3437 = vmatprep.subr.bf16.mxu1 %v5126_v1  ;;  %v2147_v57 = vmul.f32 %v3766_v4, %v2145_v34  ;;  %v2142_v46 = vsub.f32 1.0, %v3766_v4 }
 0x5e9   :  { %v2140_v55 = vadd.f32 %v2139_v43, %v2115_v10  ;;  %v5191_v10 = vld [vmem:[#allocation23_spill] sm:$0xff] }
 0x5eb   :  { %3767 = vtanh.f32 %v2140_v55  ;;  %2282 = vmatpush1.bf16.msra.mxu0 %v4613_v24  ;;  %3438 = vmatpush3.bf16.msra.mxu1 %v4616_v12 }
 0x5ec   :  { %2283 = vmatprep.subr.bf16.mxu0 %v4619_v13  ;;  %3439 = vmatprep.subr.bf16.mxu1 %v5126_v1 }
 0x5ef   :  { %2284 = vmatpush1.bf16.msra.mxu0 %v4623_v20  ;;  %3440 = vmatpush3.bf16.msra.mxu1 %v4626_v41 }
 0x5f0   :  { %2285 = vmatprep.subr.bf16.mxu0 %v4629_v23  ;;  %3441 = vmatprep.subr.bf16.mxu1 %v5126_v1 }
 0x5f3   :  { %2286 = vmatpush1.bf16.msra.mxu0 %v4633_v16  ;;  %3442 = vmatpush3.bf16.msra.mxu1 %v4636_v18 }
 0x5f4   :  { %2287 = vmatprep.subr.bf16.mxu0 %v4639_v26  ;;  %3443 = vmatprep.subr.bf16.mxu1 %v5126_v1 }
 0x5f5   :  { %v3768_v3 = vpop.eup %3767 }
 0x5f6   :  { %v2143_v44 = vmul.f32 %v3768_v3, %v2142_v46 }
 0x5f7   :  { %2288 = vmatpush1.bf16.msra.mxu0 %v4643_v27  ;;  %3444 = vmatpush3.bf16.msra.mxu1 %v4646_v17 }
 0x5f8   :  { %v4873_v6 = vadd.f32 %v2147_v57, %v2143_v44  ;;  %2395 = vmatprep.subr.bf16.mxu0 %v4503_v25  ;;  %3449 = vmatprep.subr.bf16.mxu1 %v5126_v1  ;;  %v5177_v25 = vld [vmem:[#allocation19_spill] sm:$0xff] }
 0x5fa   :  { %v2149_v35 = vpack.c.bf16 %v4873_v6, %v4873_v6 }
 0x5fc   :  { %2150 = vst [vmem:[%s5055_s5 + $0x4] sm:$0x8] %v2149_v35  ;;  %v2271_v2 = vrot.slane %v2149_v35, 3 }
 0x5fe   :  { %2306 = vmatmul.mubr.bf16.vlgmr.msra.gmra.mrb[52].mxu0 %v2271_v2  ;;  %3446 = vmatmul.mubr.bf16.vlgmr.msra.gmra.mrb[52].mxu1 %v2271_v2  ;;  %v2232_v2 = vld [vmem:[#allocation2 + $0x18] sm:$0xc] }
 0x5ff   :  { %2396 = vmatpush1.bf16.msra.mxu0 %v4512_v29  ;;  %3450 = vmatpush3.bf16.msra.mxu1 %v4659_v58  ;;  %v5178_v29 = vld [vmem:[#allocation14_spill] sm:$0xff] }
 0x600   :  { %2397 = vmatprep.subr.bf16.mxu0 %v4516_v30  ;;  %3451 = vmatprep.subr.bf16.mxu1 %v5126_v1  ;;  %v5179_v30 = vld [vmem:[#allocation15_spill] sm:$0xff] }
 0x601   :  { %2427 = vmatprep.mubr.bf16.mxu0 %v5127_v42  ;;  %3465 = vmatprep.mubr.msk.bf16.mxu1 %vm4009_vm0, %v5126_v1 }
 0x603   :  { %2398 = vmatpush1.bf16.msra.mxu0 %v4523_v31  ;;  %3452 = vmatpush3.bf16.msra.mxu1 %v4668_v59  ;;  %v5180_v31 = vld [vmem:[#allocation20_spill] sm:$0xff] }
 0x604   :  { %2399 = vmatprep.subr.bf16.mxu0 %v4527_v32  ;;  %3453 = vmatprep.subr.bf16.mxu1 %v5126_v1  ;;  %v5181_v32 = vld [vmem:[#allocation16_spill] sm:$0xff] }
 0x607   :  { %2400 = vmatpush1.bf16.msra.mxu0 %v4673_v60  ;;  %3454 = vmatpush3.bf16.msra.mxu1 %v4676_v61 }
 0x608   :  { %2401 = vmatprep.subr.bf16.mxu0 %v4679_v62  ;;  %3455 = vmatprep.subr.bf16.mxu1 %v5126_v1 }
 0x60b   :  { %2402 = vmatpush1.bf16.msra.mxu0 %v4683_v63  ;;  %3456 = vmatpush3.bf16.msra.mxu1 %v4686_v5 }
 0x60c   :  { %2403 = vmatprep.subr.bf16.mxu0 %v5177_v25  ;;  %3457 = vmatprep.subr.bf16.mxu1 %v5126_v1 }
 0x60f   :  { %2404 = vmatpush1.bf16.msra.mxu0 %v5178_v29  ;;  %3458 = vmatpush3.bf16.msra.mxu1 %v5179_v30 }
 0x610   :  { %2405 = vmatprep.subr.bf16.mxu0 %v5180_v31  ;;  %3459 = vmatprep.subr.bf16.mxu1 %v5126_v1 }
 0x613   :  { %2406 = vmatpush1.bf16.msra.mxu0 %v5181_v32  ;;  %3460 = vmatpush3.bf16.msra.mxu1 %v5182_v28 }
 0x614   :  { %2407 = vmatprep.subr.bf16.mxu0 %v5183_v22  ;;  %3461 = vmatprep.subr.bf16.mxu1 %v5126_v1 }
 0x617   :  { %2408 = vmatpush1.bf16.msra.mxu0 %v5184_v19  ;;  %3462 = vmatpush3.bf16.msra.mxu1 %v5185_v21 }
 0x618   :  { %2409 = vmatprep.subr.bf16.mxu0 %v5186_v8  ;;  %3463 = vmatprep.subr.bf16.mxu1 %v5126_v1  ;;  %v2233_v8 = vld [vmem:[#allocation2 + $0x20] sm:$0xc] }
 0x61b   :  { %2410 = vmatpush1.bf16.msra.mxu0 %v5187_v49  ;;  %3464 = vmatpush3.bf16.msra.mxu1 %v5188_v7 }
 0x61c   :  { %2517 = vmatprep.subr.bf16.mxu0 %v5189_v33  ;;  %3469 = vmatprep.subr.bf16.mxu1 %v5126_v1 }
 0x6ad   :  { %v2185_v0 = vpop.f32.mrb[48].mxu0  ;;  %v2226_v14 = vpop.f32.mrb[48].mxu1 }
 0x6ae   :  { %v2186_v34 = vadd.f32 %v2185_v0, %v5190_v36  ;;  %v2187_v4 = vpop.f32.mrb[49].mxu0  ;;  %v3427_v43 = vpop.f32.mrb[49].mxu1 }
 0x6af   :  { %v2188_v57 = vadd.f32 %v2187_v4, %v5191_v10  ;;  %v2189_v55 = vpop.f32.mrb[50].mxu0  ;;  %v2229_v46 = vpop.f32.mrb[50].mxu1  ;;  %v5192_v4 = vld [vmem:[#allocation24_spill] sm:$0xff] }
 0x6b0   :  { %v2236_v3 = vrot.slane %v2186_v34, 6  ;;  %v2190_v44 = vpop.f32.mrb[51].mxu0  ;;  %v3428_v35 = vpop.f32.mrb[51].mxu1  ;;  %v2227_v55 = vadd.f32 %v2226_v14, %v5192_v4 }
 0x6b1   :  { %v2246_v49 = vrot.slane %v2188_v57, 6  ;;  %v2264_v44 = vrot.slane %v4831_v56, 6  ;;  %v2234_v35 = vld [vmem:[#allocation2 + $0x28] sm:$0xc]  ;;  %v2354_v56 = vld [vmem:[#allocation3] sm:$0x30] }
 0x6b2   :  { %v2238_v7 = vadd.f32 %v2236_v3, %v2232_v2  ;;  %v2256_v34 = vrot.slane %v2227_v55, 6 }
 0x6b3   :  { %v2248_v33 = vadd.f32 %v2246_v49, %v2233_v8 }
 0x6b4   :  { %v2995_v21 = vmul.f32 -1.442695, %v2238_v7 }
 0x6b5   :  { %v2996_v19 = vmul.f32 -1.442695, %v2248_v33 }
 0x6b6   :  { %3769 = vpow2.f32 %v2995_v21 }
 0x6b7   :  { %3771 = vpow2.f32 %v2996_v19 }
 0x6c0   :  { %v3770_v22 = vpop.eup %3769 }
 0x6c1   :  { %v3772_v0 = vpop.eup %3771  ;;  %v2242_v36 = vadd.f32 1.0, %v3770_v22 }
 0x6c2   :  { %v2252_v43 = vadd.f32 1.0, %v3772_v0 }
 0x6c3   :  { %3773 = vrcp.f32 %v2242_v36 }
 0x6c4   :  { %3775 = vrcp.f32 %v2252_v43 }
 0x6cd   :  { %v3774_v46 = vpop.eup %3773 }
 0x6ce   :  { %v3776_v57 = vpop.eup %3775  ;;  %v2258_v3 = vmul.f32 %v3774_v46, %v2256_v34  ;;  %v2355_v46 = vld [vmem:[#allocation3 + $0x8] sm:$0x30] }
 0x6cf   :  { %v2266_v8 = vmul.f32 %v3776_v57, %v2264_v44 }
 0x6d0   :  { %v2259_v49 = vadd.f32 %v2258_v3, %v2234_v35 }
 0x6d1   :  { %v2307_v7 = vpop.f32.mrb[52].mxu0  ;;  %v2348_v21 = vpop.f32.mrb[52].mxu1 }
 0x6d2   :  { %3777 = vtanh.f32 %v2259_v49  ;;  %v2308_v19 = vadd.f32 %v2307_v7, %v5149_v15  ;;  %v2309_v22 = vpop.f32.mrb[53].mxu0  ;;  %v3447_v33 = vpop.f32.mrb[53].mxu1  ;;  %v2261_v49 = vsub.f32 1.0, %v3776_v57 }
 0x6d3   :  { %v2310_v36 = vadd.f32 %v2309_v22, %v4361_v9  ;;  %v2311_v2 = vpop.f32.mrb[54].mxu0  ;;  %v2351_v14 = vpop.f32.mrb[54].mxu1 }
 0x6d4   :  { %v2358_v0 = vrot.slane %v2308_v19, 4  ;;  %v2312_v43 = vpop.f32.mrb[55].mxu0  ;;  %v3448_v55 = vpop.f32.mrb[55].mxu1 }
 0x6d5   :  { %v2368_v4 = vrot.slane %v2310_v36, 4  ;;  %v2477_v43 = vld [vmem:[#allocation2 + $0x20] sm:$0x30] }
 0x6d6   :  { %v2360_v34 = vadd.f32 %v2358_v0, %v2354_v56 }
 0x6d7   :  { %v2370_v44 = vadd.f32 %v2368_v4, %v2355_v46 }
 0x6d8   :  { %v2997_v3 = vmul.f32 -1.442695, %v2360_v34 }
 0x6d9   :  { %v2998_v35 = vmul.f32 -1.442695, %v2370_v44 }
 0x6da   :  { %3779 = vpow2.f32 %v2997_v3 }
 0x6db   :  { %3781 = vpow2.f32 %v2998_v35 }
 0x6dc   :  { %v3778_v7 = vpop.eup %3777 }
 0x6dd   :  { %v2262_v15 = vmul.f32 %v3778_v7, %v2261_v49  ;;  %v5201_v49 = vld [vmem:[#allocation24_spill] sm:$0xff] }
 0x6df   :  { %v4923_v33 = vadd.f32 %v2266_v8, %v2262_v15  ;;  %v2349_v15 = vadd.f32 %v2348_v21, %v4373_v38  ;;  %v2476_v8 = vld [vmem:[#allocation2 + $0x18] sm:$0x30] }
 0x6e1   :  { %v2268_v22 = vpack.c.bf16 %v4923_v33, %v4923_v33 }
 0x6e3   :  { %2269 = vst [vmem:[%s5055_s5 + $0x8] sm:$0x2] %v2268_v22  ;;  %v2393_v19 = vrot.slane %v2268_v22, 1 }
 0x6e4   :  { %v3780_v36 = vpop.eup %3779 }
 0x6e5   :  { %v3782_v2 = vpop.eup %3781  ;;  %v2364_v4 = vadd.f32 1.0, %v3780_v36  ;;  %2428 = vmatmul.mubr.bf16.vlgmr.msra.gmra.mrb[56].mxu0 %v2393_v19  ;;  %3466 = vmatmul.mubr.bf16.vlgmr.msra.gmra.mrb[56].mxu1 %v2393_v19  ;;  %v2508_v36 = vrot.slane %v4923_v33, 6  ;;  %v2598_v33 = vld [vmem:[#allocation3] sm:$0xc] }
 0x6e6   :  { %v2374_v14 = vadd.f32 1.0, %v3782_v2  ;;  %2518 = vmatpush1.bf16.msra.mxu0 %v4568_v48  ;;  %3470 = vmatpush3.bf16.msra.mxu1 %v4571_v50  ;;  %v2378_v48 = vrot.slane %v2349_v15, 4 }
 0x6e7   :  { %3783 = vrcp.f32 %v2364_v4  ;;  %2519 = vmatprep.subr.bf16.mxu0 %v4574_v45  ;;  %3471 = vmatprep.subr.bf16.mxu1 %v5126_v1  ;;  %v2386_v45 = vrot.slane %v4873_v6, 2 }
 0x6e8   :  { %3785 = vrcp.f32 %v2374_v14  ;;  %2549 = vmatprep.mubr.bf16.mxu0 %v5127_v42  ;;  %3485 = vmatprep.mubr.msk.bf16.mxu1 %vm4009_vm0, %v5126_v1  ;;  %v2478_v14 = vld [vmem:[#allocation2 + $0x28] sm:$0x30] }
 0x6ea   :  { %2520 = vmatpush1.bf16.msra.mxu0 %v4581_v54  ;;  %3472 = vmatpush3.bf16.msra.mxu1 %v4584_v53 }
 0x6eb   :  { %2521 = vmatprep.subr.bf16.mxu0 %v4587_v52  ;;  %3473 = vmatprep.subr.bf16.mxu1 %v5126_v1  ;;  %v2356_v52 = vld [vmem:[#allocation3 + $0x10] sm:$0x30] }
 0x6ee   :  { %2522 = vmatpush1.bf16.msra.mxu0 %v4592_v47  ;;  %3474 = vmatpush3.bf16.msra.mxu1 %v4595_v11 }
 0x6ef   :  { %2523 = vmatprep.subr.bf16.mxu0 %v4598_v37  ;;  %3475 = vmatprep.subr.bf16.mxu1 %v5126_v1 }
 0x6f1   :  { %v3784_v50 = vpop.eup %3783 }
 0x6f2   :  { %v3786_v54 = vpop.eup %3785  ;;  %v2380_v53 = vmul.f32 %v3784_v50, %v2378_v48  ;;  %2524 = vmatpush1.bf16.msra.mxu0 %v4603_v51  ;;  %3476 = vmatpush3.bf16.msra.mxu1 %v4606_v39 }
 0x6f3   :  { %2525 = vmatprep.subr.bf16.mxu0 %v4609_v40  ;;  %3477 = vmatprep.subr.bf16.mxu1 %v5126_v1  ;;  %v2388_v47 = vmul.f32 %v3786_v54, %v2386_v45  ;;  %v2383_v37 = vsub.f32 1.0, %v3786_v54  ;;  %v5202_v54 = vld [vmem:[#allocation25_spill] sm:$0xff] }
 0x6f4   :  { %v2381_v11 = vadd.f32 %v2380_v53, %v2356_v52 }
 0x6f6   :  { %3787 = vtanh.f32 %v2381_v11  ;;  %2526 = vmatpush1.bf16.msra.mxu0 %v4613_v24  ;;  %3478 = vmatpush3.bf16.msra.mxu1 %v4616_v12  ;;  %v3877_v24 = vld [vmem:[#allocation6 + $0x4] ss:$12 sps:$4 sm:$0xff]  }
 0x6f7   :  { %2527 = vmatprep.subr.bf16.mxu0 %v4619_v13  ;;  %3479 = vmatprep.subr.bf16.mxu1 %v5126_v1 }
 0x6fa   :  { %2528 = vmatpush1.bf16.msra.mxu0 %v4623_v20  ;;  %3480 = vmatpush3.bf16.msra.mxu1 %v4626_v41  ;;  %v3878_v20 = vld [vmem:[#allocation6] ss:$12 sps:$4 sm:$0xff]   ;;  %v3879_v41 = vld [vmem:[#allocation6 + $0x1c] ss:$12 sps:$4 sm:$0xff]  }
 0x6fb   :  { %2529 = vmatprep.subr.bf16.mxu0 %v4629_v23  ;;  %3481 = vmatprep.subr.bf16.mxu1 %v5126_v1  ;;  %v3880_v23 = vld [vmem:[#allocation6 + $0x18] ss:$12 sps:$4 sm:$0xff]  }
 0x6fe   :  { %2530 = vmatpush1.bf16.msra.mxu0 %v4633_v16  ;;  %3482 = vmatpush3.bf16.msra.mxu1 %v4636_v18  ;;  %v3881_v16 = vld [vmem:[#allocation6 + $0x34] ss:$12 sps:$4 sm:$0xff]   ;;  %v5193_v18 = vld [vmem:[#allocation21_spill] sm:$0xff] }
 0x6ff   :  { %2531 = vmatprep.subr.bf16.mxu0 %v4639_v26  ;;  %3483 = vmatprep.subr.bf16.mxu1 %v5126_v1  ;;  %v5194_v26 = vld [vmem:[#allocation18_spill] sm:$0xff] }
 0x700   :  { %v3788_v51 = vpop.eup %3787 }
 0x701   :  { %v2384_v39 = vmul.f32 %v3788_v51, %v2383_v37 }
 0x702   :  { %2532 = vmatpush1.bf16.msra.mxu0 %v4643_v27  ;;  %3484 = vmatpush3.bf16.msra.mxu1 %v4646_v17  ;;  %v5195_v27 = vld [vmem:[#allocation26_spill] sm:$0xff]  ;;  %v5196_v17 = vld [vmem:[#allocation27_spill] sm:$0xff] }
 0x703   :  { %v4965_v40 = vadd.f32 %v2388_v47, %v2384_v39  ;;  %2639 = vmatprep.subr.bf16.mxu0 %v3877_v24  ;;  %3489 = vmatprep.subr.bf16.mxu1 %v5126_v1 }
 0x705   :  { %v2390_v12 = vpack.c.bf16 %v4965_v40, %v4965_v40 }
 0x707   :  { %2391 = vst [vmem:[%s5055_s5 + $0x4] sm:$0x4] %v2390_v12  ;;  %v2515_v13 = vrot.slane %v2390_v12, 2 }
 0x709   :  { %2550 = vmatmul.mubr.bf16.vlgmr.msra.gmra.mrb[60].mxu0 %v2515_v13  ;;  %3486 = vmatmul.mubr.bf16.vlgmr.msra.gmra.mrb[60].mxu1 %v2515_v13 }
 0x70a   :  { %2640 = vmatpush1.bf16.msra.mxu0 %v3878_v20  ;;  %3490 = vmatpush3.bf16.msra.mxu1 %v4659_v58  ;;  %v5197_v58 = vld [vmem:[#allocation28_spill] sm:$0xff] }
 0x70b   :  { %2641 = vmatprep.subr.bf16.mxu0 %v3879_v41  ;;  %3491 = vmatprep.subr.bf16.mxu1 %v5126_v1  ;;  %v2599_v41 = vld [vmem:[#allocation3 + $0x8] sm:$0xc] }
 0x70c   :  { %2671 = vmatprep.mubr.bf16.mxu0 %v5127_v42  ;;  %3505 = vmatprep.mubr.msk.bf16.mxu1 %vm4009_vm0, %v5126_v1 }
 0x70e   :  { %2642 = vmatpush1.bf16.msra.mxu0 %v3880_v23  ;;  %3492 = vmatpush3.bf16.msra.mxu1 %v4668_v59  ;;  %v5198_v59 = vld [vmem:[#allocation29_spill] sm:$0xff] }
 0x70f   :  { %2643 = vmatprep.subr.bf16.mxu0 %v3881_v16  ;;  %3493 = vmatprep.subr.bf16.mxu1 %v5126_v1 }
 0x712   :  { %2644 = vmatpush1.bf16.msra.mxu0 %v4673_v60  ;;  %3494 = vmatpush3.bf16.msra.mxu1 %v4676_v61  ;;  %v5199_v60 = vld [vmem:[#allocation30_spill] sm:$0xff] }
 0x713   :  { %2645 = vmatprep.subr.bf16.mxu0 %v4679_v62  ;;  %3495 = vmatprep.subr.bf16.mxu1 %v5126_v1 }
 0x716   :  { %2646 = vmatpush1.bf16.msra.mxu0 %v4683_v63  ;;  %3496 = vmatpush3.bf16.msra.mxu1 %v4686_v5  ;;  %v5200_v63 = vld [vmem:[#allocation22_spill] sm:$0xff] }
 0x717   :  { %2647 = vmatprep.subr.bf16.mxu0 %v5177_v25  ;;  %3497 = vmatprep.subr.bf16.mxu1 %v5126_v1 }
 0x71a   :  { %2648 = vmatpush1.bf16.msra.mxu0 %v5178_v29  ;;  %3498 = vmatpush3.bf16.msra.mxu1 %v5179_v30 }
 0x71b   :  { %2649 = vmatprep.subr.bf16.mxu0 %v5180_v31  ;;  %3499 = vmatprep.subr.bf16.mxu1 %v5126_v1 }
 0x71e   :  { %2650 = vmatpush1.bf16.msra.mxu0 %v5181_v32  ;;  %3500 = vmatpush3.bf16.msra.mxu1 %v5182_v28 }
 0x71f   :  { %2651 = vmatprep.subr.bf16.mxu0 %v5193_v18  ;;  %3501 = vmatprep.subr.bf16.mxu1 %v5126_v1 }
 0x722   :  { %2652 = vmatpush1.bf16.msra.mxu0 %v5194_v26  ;;  %3502 = vmatpush3.bf16.msra.mxu1 %v5195_v27 }
 0x723   :  { %2653 = vmatprep.subr.bf16.mxu0 %v5196_v17  ;;  %3503 = vmatprep.subr.bf16.mxu1 %v5126_v1 }
 0x726   :  { %2654 = vmatpush1.bf16.msra.mxu0 %v5197_v58  ;;  %3504 = vmatpush3.bf16.msra.mxu1 %v5198_v59 }
 0x727   :  { %2761 = vmatprep.subr.bf16.mxu0 %v5199_v60  ;;  %3509 = vmatprep.subr.bf16.mxu1 %v5126_v1 }
 0x7b8   :  { %v2429_v61 = vpop.f32.mrb[56].mxu0  ;;  %v2470_v62 = vpop.f32.mrb[56].mxu1 }
 0x7b9   :  { %v2430_v5 = vadd.f32 %v2429_v61, %v5200_v63  ;;  %v2431_v6 = vpop.f32.mrb[57].mxu0  ;;  %v3467_v25 = vpop.f32.mrb[57].mxu1  ;;  %v2471_v7 = vadd.f32 %v2470_v62, %v5201_v49 }
 0x7ba   :  { %v2432_v29 = vadd.f32 %v2431_v6, %v5191_v10  ;;  %v2433_v30 = vpop.f32.mrb[58].mxu0  ;;  %v2473_v31 = vpop.f32.mrb[58].mxu1  ;;  %v3882_v25 = vld [vmem:[#allocation6 + $0xc0] ss:$12 sps:$4 sm:$0xff]  }
 0x7bb   :  { %v2480_v32 = vrot.slane %v2430_v5, 4  ;;  %v2434_v28 = vpop.f32.mrb[59].mxu0  ;;  %v3468_v57 = vpop.f32.mrb[59].mxu1  ;;  %v2500_v22 = vrot.slane %v2471_v7, 4  ;;  %v3884_v30 = vld [vmem:[#allocation6 + $0xdc] ss:$12 sps:$4 sm:$0xff]  }
 0x7bc   :  { %v2490_v21 = vrot.slane %v2432_v29, 4  ;;  %v3883_v29 = vld [vmem:[#allocation6 + $0xc8] ss:$12 sps:$4 sm:$0xff]   ;;  %v3885_v31 = vld [vmem:[#allocation6 + $0xd8] ss:$12 sps:$4 sm:$0xff]  }
 0x7bd   :  { %v2482_v0 = vadd.f32 %v2480_v32, %v2476_v8  ;;  %v3886_v32 = vld [vmem:[#allocation6 + $0xe0] ss:$12 sps:$4 sm:$0xff]   ;;  %v3888_v8 = vld [vmem:[#allocation6 + $0xf0] ss:$12 sps:$4 sm:$0xff]  }
 0x7be   :  { %v2492_v55 = vadd.f32 %v2490_v21, %v2477_v43  ;;  %v3887_v28 = vld [vmem:[#allocation6 + $0xf4] ss:$12 sps:$4 sm:$0xff]   ;;  %v3889_v21 = vld [vmem:[#allocation6 + $0xf8] ss:$12 sps:$4 sm:$0xff]  }
 0x7bf   :  { %v2999_v56 = vmul.f32 -1.442695, %v2482_v0  ;;  %v3890_v0 = vld [vmem:[#allocation6 + $0x10c] ss:$12 sps:$4 sm:$0xff]  }
 0x7c0   :  { %v3000_v34 = vmul.f32 -1.442695, %v2492_v55  ;;  %v2630_v55 = vrot.slane %v4965_v40, 2  ;;  %v3897_v40 = vld [vmem:[#allocation6 + $0x138] ss:$12 sps:$4 sm:$0xff]  }
 0x7c1   :  { %3789 = vpow2.f32 %v2999_v56 }
 0x7c2   :  { %3791 = vpow2.f32 %v3000_v34 }
 0x7cb   :  { %v3790_v46 = vpop.eup %3789 }
 0x7cc   :  { %v3792_v44 = vpop.eup %3791  ;;  %v2486_v3 = vadd.f32 1.0, %v3790_v46  ;;  %v3891_v46 = vld [vmem:[#allocation6 + $0x108] ss:$12 sps:$4 sm:$0xff]  }
 0x7cd   :  { %v2496_v35 = vadd.f32 1.0, %v3792_v44  ;;  %v3892_v44 = vld [vmem:[#allocation6 + $0x110] ss:$12 sps:$4 sm:$0xff]  }
 0x7ce   :  { %3793 = vrcp.f32 %v2486_v3  ;;  %v2600_v3 = vld [vmem:[#allocation3 + $0x10] sm:$0xc] }
 0x7cf   :  { %3795 = vrcp.f32 %v2496_v35  ;;  %v3893_v35 = vld [vmem:[#allocation6 + $0x124] ss:$12 sps:$4 sm:$0xff]  }
 0x7d8   :  { %v3794_v19 = vpop.eup %3793 }
 0x7d9   :  { %v3796_v2 = vpop.eup %3795  ;;  %v2502_v4 = vmul.f32 %v3794_v19, %v2500_v22  ;;  %v3894_v19 = vld [vmem:[#allocation6 + $0x120] ss:$12 sps:$4 sm:$0xff]  }
 0x7da   :  { %v2510_v15 = vmul.f32 %v3796_v2, %v2508_v36  ;;  %v2505_v26 = vsub.f32 1.0, %v3796_v2  ;;  %v3895_v36 = vld [vmem:[#allocation6 + $0x128] ss:$12 sps:$4 sm:$0xff]  }
 0x7db   :  { %v2503_v48 = vadd.f32 %v2502_v4, %v2478_v14  ;;  %v3896_v2 = vld [vmem:[#allocation6 + $0x13c] ss:$12 sps:$4 sm:$0xff]   ;;  %v3898_v4 = vld [vmem:[#allocation6 + $0x140] ss:$12 sps:$4 sm:$0xff]  }
 0x7dc   :  { %v2551_v50 = vpop.f32.mrb[60].mxu0  ;;  %v2592_v45 = vpop.f32.mrb[60].mxu1  ;;  %v3899_v14 = vld [vmem:[#allocation6 + $0x154] ss:$12 sps:$4 sm:$0xff]  }
 0x7dd   :  { %3797 = vtanh.f32 %v2503_v48  ;;  %v2552_v53 = vadd.f32 %v2551_v50, %v5202_v54  ;;  %v2553_v52 = vpop.f32.mrb[61].mxu0  ;;  %v3487_v47 = vpop.f32.mrb[61].mxu1  ;;  %v2593_v57 = vadd.f32 %v2592_v45, %v4373_v38  ;;  %v3901_v48 = vld [vmem:[#allocation6 + $0x158] ss:$12 sps:$4 sm:$0xff]  }
 0x7de   :  { %v2554_v11 = vadd.f32 %v2553_v52, %v4361_v9  ;;  %v2555_v37 = vpop.f32.mrb[62].mxu0  ;;  %v2595_v51 = vpop.f32.mrb[62].mxu1  ;;  %v3902_v50 = vld [vmem:[#allocation6 + $0x16c] ss:$12 sps:$4 sm:$0xff]   ;;  %v3903_v47 = vld [vmem:[#allocation6 + $0x168] ss:$12 sps:$4 sm:$0xff]  }
 0x7df   :  { %v2602_v39 = vrot.slane %v2552_v53, 6  ;;  %v2556_v24 = vpop.f32.mrb[63].mxu0  ;;  %v3488_v12 = vpop.f32.mrb[63].mxu1 }
 0x7e0   :  { %v2612_v13 = vrot.slane %v2554_v11, 6  ;;  %v3904_v11 = vld [vmem:[#allocation6 + $0x170] ss:$12 sps:$4 sm:$0xff]  }
 0x7e1   :  { %v2604_v20 = vadd.f32 %v2602_v39, %v2598_v33 }
 0x7e2   :  { %v2614_v23 = vadd.f32 %v2612_v13, %v2599_v41 }
 0x7e3   :  { %v3001_v16 = vmul.f32 -1.442695, %v2604_v20 }
 0x7e4   :  { %v3002_v18 = vmul.f32 -1.442695, %v2614_v23 }
 0x7e5   :  { %3799 = vpow2.f32 %v3001_v16 }
 0x7e6   :  { %3801 = vpow2.f32 %v3002_v18 }
 0x7e7   :  { %v3798_v27 = vpop.eup %3797 }
 0x7e8   :  { %v2506_v17 = vmul.f32 %v3798_v27, %v2505_v26  ;;  %v2720_v27 = vld [vmem:[#allocation2 + $0x18] sm:$0xc0] }
 0x7ea   :  { %v5010_v58 = vadd.f32 %v2510_v15, %v2506_v17  ;;  %v3900_v15 = vld [vmem:[#allocation6 + $0x150] ss:$12 sps:$4 sm:$0xff]  }
 0x7ec   :  { %v2512_v59 = vpack.c.bf16 %v5010_v58, %v5010_v58 }
 0x7ee   :  { %2513 = vst [vmem:[%s5055_s5 + $0x8] sm:$0x4] %v2512_v59  ;;  %v2637_v60 = vrot.slane %v2512_v59, 2 }
 0x7ef   :  { %v3800_v61 = vpop.eup %3799 }
 0x7f0   :  { %v3802_v62 = vpop.eup %3801  ;;  %v2608_v5 = vadd.f32 1.0, %v3800_v61  ;;  %2672 = vmatmul.mubr.bf16.vlgmr.msra.gmra.mrb[64].mxu0 %v2637_v60  ;;  %3506 = vmatmul.mubr.bf16.vlgmr.msra.gmra.mrb[64].mxu1 %v2637_v60  ;;  %v2721_v60 = vld [vmem:[#allocation2 + $0x20] sm:$0xc0] }
 0x7f1   :  { %v2618_v6 = vadd.f32 1.0, %v3802_v62  ;;  %2762 = vmatpush1.bf16.msra.mxu0 %v3882_v25  ;;  %3510 = vmatpush3.bf16.msra.mxu1 %v3883_v29 }
 0x7f2   :  { %3803 = vrcp.f32 %v2608_v5  ;;  %2763 = vmatprep.subr.bf16.mxu0 %v3884_v30  ;;  %3511 = vmatprep.subr.bf16.mxu1 %v5126_v1 }
 0x7f3   :  { %3805 = vrcp.f32 %v2618_v6  ;;  %2793 = vmatprep.mubr.bf16.mxu0 %v5127_v42  ;;  %3525 = vmatprep.mubr.msk.bf16.mxu1 %vm4009_vm0, %v5126_v1  ;;  %v2622_v42 = vrot.slane %v2593_v57, 6 }
 0x7f5   :  { %2764 = vmatpush1.bf16.msra.mxu0 %v3885_v31  ;;  %3512 = vmatpush3.bf16.msra.mxu1 %v3886_v32  ;;  %v2752_v32 = vrot.slane %v5010_v58, 6 }
 0x7f6   :  { %2765 = vmatprep.subr.bf16.mxu0 %v3887_v28  ;;  %3513 = vmatprep.subr.bf16.mxu1 %v5126_v1 }
 0x7f9   :  { %2766 = vmatpush1.bf16.msra.mxu0 %v3888_v8  ;;  %3514 = vmatpush3.bf16.msra.mxu1 %v3889_v21  ;;  %v2722_v8 = vld [vmem:[#allocation2 + $0x28] sm:$0xc0] }
 0x7fa   :  { %2767 = vmatprep.subr.bf16.mxu0 %v3890_v0  ;;  %3515 = vmatprep.subr.bf16.mxu1 %v5126_v1 }
 0x7fc   :  { %v3804_v43 = vpop.eup %3803 }
 0x7fd   :  { %v3806_v56 = vpop.eup %3805  ;;  %v2624_v34 = vmul.f32 %v3804_v43, %v2622_v42  ;;  %2768 = vmatpush1.bf16.msra.mxu0 %v3891_v46  ;;  %3516 = vmatpush3.bf16.msra.mxu1 %v3892_v44  ;;  %v2842_v46 = vld [vmem:[#allocation3] sm:$0x3] }
 0x7fe   :  { %2769 = vmatprep.subr.bf16.mxu0 %v3893_v35  ;;  %3517 = vmatprep.subr.bf16.mxu1 %v5126_v1  ;;  %v2632_v7 = vmul.f32 %v3806_v56, %v2630_v55  ;;  %v2627_v45 = vsub.f32 1.0, %v3806_v56 }
 0x7ff   :  { %v2625_v22 = vadd.f32 %v2624_v34, %v2600_v3 }
 0x801   :  { %3807 = vtanh.f32 %v2625_v22  ;;  %2770 = vmatpush1.bf16.msra.mxu0 %v3894_v19  ;;  %3518 = vmatpush3.bf16.msra.mxu1 %v3895_v36 }
 0x802   :  { %2771 = vmatprep.subr.bf16.mxu0 %v3896_v2  ;;  %3519 = vmatprep.subr.bf16.mxu1 %v5126_v1 }
 0x805   :  { %2772 = vmatpush1.bf16.msra.mxu0 %v3897_v40  ;;  %3520 = vmatpush3.bf16.msra.mxu1 %v3898_v4 }
 0x806   :  { %2773 = vmatprep.subr.bf16.mxu0 %v3899_v14  ;;  %3521 = vmatprep.subr.bf16.mxu1 %v5126_v1 }
 0x809   :  { %2774 = vmatpush1.bf16.msra.mxu0 %v3900_v15  ;;  %3522 = vmatpush3.bf16.msra.mxu1 %v3901_v48 }
 0x80a   :  { %2775 = vmatprep.subr.bf16.mxu0 %v3902_v50  ;;  %3523 = vmatprep.subr.bf16.mxu1 %v5126_v1 }
 0x80b   :  { %v3808_v53 = vpop.eup %3807 }
 0x80c   :  { %v2628_v52 = vmul.f32 %v3808_v53, %v2627_v45 }
 0x80d   :  { %2776 = vmatpush1.bf16.msra.mxu0 %v3903_v47  ;;  %3524 = vmatpush3.bf16.msra.mxu1 %v3904_v11 }
 0x80e   :  { %v5029_v37 = vadd.f32 %v2632_v7, %v2628_v52  ;;  %v2843_v7 = vld [vmem:[#allocation3 + $0x8] sm:$0x3] }
 0x810   :  { %v2634_v51 = vpack.c.bf16 %v5029_v37, %v5029_v37  ;;  %v2865_v47 = vrot.slane %v5029_v37, 2 }
 0x812   :  { %2635 = vst [vmem:[%s5055_s5 + $0x4] sm:$0x2] %v2634_v51  ;;  %v2759_v39 = vrot.slane %v2634_v51, 1 }
 0x814   :  { %2794 = vmatmul.mubr.bf16.vlgmr.msra.gmra.mrb[68].mxu0 %v2759_v39  ;;  %3526 = vmatmul.mubr.bf16.vlgmr.msra.gmra.mrb[68].mxu1 %v2759_v39  ;;  %v2844_v39 = vld [vmem:[#allocation3 + $0x10] sm:$0x3] }
 0x8c3   :  { %v2673_v1 = vpop.f32.mrb[64].mxu0  ;;  %v2714_v24 = vpop.f32.mrb[64].mxu1 }
 0x8c4   :  { %v2674_v12 = vadd.f32 %v2673_v1, %v5200_v63  ;;  %v2675_v33 = vpop.f32.mrb[65].mxu0  ;;  %v3507_v13 = vpop.f32.mrb[65].mxu1 }
 0x8c5   :  { %v2676_v20 = vadd.f32 %v2675_v33, %v5191_v10  ;;  %v2677_v41 = vpop.f32.mrb[66].mxu0  ;;  %v2717_v23 = vpop.f32.mrb[66].mxu1  ;;  %v2715_v10 = vadd.f32 %v2714_v24, %v5201_v49 }
 0x8c6   :  { %v2724_v16 = vrot.slane %v2674_v12, 2  ;;  %v2678_v18 = vpop.f32.mrb[67].mxu0  ;;  %v3508_v26 = vpop.f32.mrb[67].mxu1 }
 0x8c7   :  { %v2734_v17 = vrot.slane %v2676_v20, 2  ;;  %v2744_v30 = vrot.slane %v2715_v10, 2 }
 0x8c8   :  { %v2726_v59 = vadd.f32 %v2724_v16, %v2720_v27 }
 0x8c9   :  { %v2736_v61 = vadd.f32 %v2734_v17, %v2721_v60 }
 0x8ca   :  { %v3003_v62 = vmul.f32 -1.442695, %v2726_v59 }
 0x8cb   :  { %v3004_v5 = vmul.f32 -1.442695, %v2736_v61 }
 0x8cc   :  { %3809 = vpow2.f32 %v3003_v62 }
 0x8cd   :  { %3811 = vpow2.f32 %v3004_v5 }
 0x8d6   :  { %v3810_v6 = vpop.eup %3809 }
 0x8d7   :  { %v3812_v63 = vpop.eup %3811  ;;  %v2730_v25 = vadd.f32 1.0, %v3810_v6 }
 0x8d8   :  { %v2740_v29 = vadd.f32 1.0, %v3812_v63 }
 0x8d9   :  { %3813 = vrcp.f32 %v2730_v25 }
 0x8da   :  { %3815 = vrcp.f32 %v2740_v29 }
 0x8e3   :  { %v3814_v31 = vpop.eup %3813 }
 0x8e4   :  { %v3816_v28 = vpop.eup %3815  ;;  %v2746_v57 = vmul.f32 %v3814_v31, %v2744_v30 }
 0x8e5   :  { %v2754_v21 = vmul.f32 %v3816_v28, %v2752_v32  ;;  %v2749_v40 = vsub.f32 1.0, %v3816_v28 }
 0x8e6   :  { %v2747_v0 = vadd.f32 %v2746_v57, %v2722_v8 }
 0x8e7   :  { %v2795_v42 = vpop.f32.mrb[68].mxu0  ;;  %v2836_v43 = vpop.f32.mrb[68].mxu1 }
 0x8e8   :  { %3817 = vtanh.f32 %v2747_v0  ;;  %v2796_v55 = vadd.f32 %v2795_v42, %v5202_v54  ;;  %v2797_v56 = vpop.f32.mrb[69].mxu0  ;;  %v3527_v34 = vpop.f32.mrb[69].mxu1  ;;  %v2837_v53 = vadd.f32 %v2836_v43, %v4373_v38 }
 0x8e9   :  { %v2798_v44 = vadd.f32 %v2797_v56, %v4361_v9  ;;  %v2799_v49 = vpop.f32.mrb[70].mxu0  ;;  %v2839_v3 = vpop.f32.mrb[70].mxu1 }
 0x8ea   :  { %v2845_v35 = vadd.f32 %v2842_v46, %v2796_v55  ;;  %v2800_v58 = vpop.f32.mrb[71].mxu0  ;;  %v3528_v22 = vpop.f32.mrb[71].mxu1 }
 0x8eb   :  { %v2852_v19 = vadd.f32 %v2843_v7, %v2798_v44 }
 0x8ec   :  { %v3005_v36 = vmul.f32 -1.442695, %v2845_v35 }
 0x8ed   :  { %v3006_v2 = vmul.f32 -1.442695, %v2852_v19 }
 0x8ee   :  { %3819 = vpow2.f32 %v3005_v36 }
 0x8ef   :  { %3821 = vpow2.f32 %v3006_v2 }
 0x8f2   :  { %v3818_v4 = vpop.eup %3817 }
 0x8f3   :  { %v2750_v14 = vmul.f32 %v3818_v4, %v2749_v40 }
 0x8f5   :  { %v2755_v54 = vadd.f32 %v2754_v21, %v2750_v14 }
 0x8f7   :  { %v2756_v15 = vpack.c.bf16 %v2755_v54, %v2755_v54 }
 0x8f8   :  { %v3820_v48 = vpop.eup %3819 }
 0x8f9   :  { %v3822_v50 = vpop.eup %3821  ;;  %2757 = vst [vmem:[%s5055_s5 + $0x8] sm:$0x8] %v2756_v15  ;;  %v2849_v9 = vadd.f32 1.0, %v3820_v48 }
 0x8fa   :  { %v2856_v45 = vadd.f32 1.0, %v3822_v50 }
 0x8fb   :  { %3823 = vrcp.f32 %v2849_v9 }
 0x8fc   :  { %3825 = vrcp.f32 %v2856_v45 }
 0x905   :  { %v3824_v52 = vpop.eup %3823 }
 0x906   :  { %v3826_v11 = vpop.eup %3825  ;;  %v2859_v51 = vmul.f32 %v3824_v52, %v2837_v53 }
 0x907   :  { %v2867_v1 = vmul.f32 %v3826_v11, %v2865_v47  ;;  %v2862_v12 = vsub.f32 1.0, %v3826_v11 }
 0x908   :  { %v2860_v24 = vadd.f32 %v2859_v51, %v2844_v39 }
 0x90a   :  { %3827 = vtanh.f32 %v2860_v24 }
 0x914   :  { %v3828_v33 = vpop.eup %3827 }
 0x915   :  { %v2863_v13 = vmul.f32 %v3828_v33, %v2862_v12 }
 0x917   :  { %v2868_v20 = vadd.f32 %v2867_v1, %v2863_v13 }
 0x919   :  { %v2869_v41 = vpack.c.bf16 %v2868_v20, %v2868_v20 }
 0x91b   :  { %2870 = vst [vmem:[%s5055_s5 + $0x4] sm:$0x1] %v2869_v41 }
 0x91c   :  { %2875 = vsyncpa [#allocation5], 1 }
 0x91d   :  { %2876 = vsyncpa [#allocation7], 1 }
 0x91e   :  { %2877 = vsyncpa [#allocation10], 1 }

// kernel: seq_tagger_forward.3
= control target key start
LH: loop header
LB: loop body
LE: loop exit
PB: predicated region body
PF: predicated region fallthrough
CT: control target
= control target key end

     0   :  { %12 = vsyncpa [#allocation6], 0  ;;  %s4643_s24 = smov [#allocation5]   ;;  %s5941_s0 = inlined_call_operand.vmem [shape: bf16[16,256], index: 0, kind: input, shape index: {}]   ;;  %s5942_s1 = inlined_call_operand.vmem [shape: bf16[2,256,384], index: 1, kind: input, shape index: {}]   ;;  %s5943_s2 = inlined_call_operand.hbm [shape: bf16[2,128,384], index: 2, kind: input, shape index: {}]   ;;  %s5944_s3 = inlined_call_operand.vmem [shape: f32[2,1,384], index: 3, kind: input, shape index: {}]   ;;  %s5945_s4 = inlined_call_operand.vmem [shape: f32[2,1,384], index: 4, kind: input, shape index: {}]   ;;  %s5946_s5 = inlined_call_operand.vmem [shape: bf16[256,128], index: 5, kind: input, shape index: {}]   ;;  %s5947_s6 = inlined_call_operand.vmem [shape: f32[1,128], index: 6, kind: input, shape index: {}]   ;;  %s5948_s7 = inlined_call_operand.vmem [shape: f32[16,128], index: 7, kind: output, shape index: {}]  }
   0x1   :  { %s22_s25 = sshll.u32 %s4643_s24, 4  ;;  %s4619_s28 = scalar_lea.hbm %s5943_s2, 6144  ;;  %s23_s25 = int_to_ptr.vmem [resolvable:$true] %s22_s25 }
   0x2   :  { %p4620_p0 = scmp.ne.s32.totalorder %s5943_s2, %s4619_s28  ;;  %p4623_p1 = scmp.lt.u32.totalorder %s4619_s28, %s5943_s2 }
   0x4   :  { %p4625_p2 = pnand %p4623_p1, %p4620_p0 }
   0x6   :  { %4628 = shalt.err (!%p4625_p2)
}
   0x7   :  { %s4629_s10 = scalar_lea.vmem %s23_s25, 6144  ;;  %p4634_p4 = scmp.lt.s32.totalorder %s23_s25, %s23_s25 }
   0x8   :  { %p4630_p3 = scmp.ne.s32.totalorder %s23_s25, %s4629_s10  ;;  %p4635_p5 = scmp.lt.s32.totalorder %s4629_s10, %s4629_s10 }
   0xa   :  { %p4636_p6 = por %p4635_p5, %p4634_p4 }
   0xc   :  { %p4637_p7 = pnand %p4636_p6, %p4630_p3 }
   0xe   :  { %4640 = shalt.err (!%p4637_p7)
}
   0xf   :  { %s4644_s11 = smov 192   ;;  %s4645_s12 = smov 12  }
  0x10   :  { %28 = dma.hbm_to_vmem [thread:$0]  %s5943_s2, 6144, %s23_s25, [#allocation6], %s4644_s11, %s4644_s11, %s4645_s12  }
  0x11   :  { %4641 = dma.done.wait [#allocation6], 6144  }
  0x12   :  { %4642 = vsyncadd [#allocation6], 4294961152  ;;  %v4161_v0 = vld [vmem:[%s5942_s1 + $0x4] ss:$12 sps:$4 sm:$0xff]   ;;  %v4163_v1 = vld [vmem:[%s5942_s1] ss:$12 sps:$4 sm:$0xff]  }
  0x13   :  { %390 = vmatprep.subr.bf16.mxu0 %v4161_v0  ;;  %v4164_v2 = vld [vmem:[%s5942_s1 + $0x1c] ss:$12 sps:$4 sm:$0xff]   ;;  %v4166_v3 = vld [vmem:[%s5942_s1 + $0x18] ss:$12 sps:$4 sm:$0xff]   ;;  %v4167_v4 = vld [vmem:[%s5942_s1 + $0x34] ss:$12 sps:$4 sm:$0xff]  }
  0x14   :  { %391 = vmatpush1.bf16.msra.mxu0 %v4163_v1  ;;  %v4169_v5 = vld [vmem:[%s5942_s1 + $0x30] ss:$12 sps:$4 sm:$0xff]   ;;  %v4170_v6 = vld [vmem:[%s5942_s1 + $0x4c] ss:$12 sps:$4 sm:$0xff]   ;;  %v4172_v7 = vld [vmem:[%s5942_s1 + $0x48] ss:$12 sps:$4 sm:$0xff]  }
  0x15   :  { %392 = vmatprep.subr.bf16.mxu0 %v4164_v2  ;;  %v4182_v8 = vld [vmem:[%s5942_s1 + $0xc8] ss:$12 sps:$4 sm:$0xff]   ;;  %v4173_v10 = vld [vmem:[%s5942_s1 + $0x64] ss:$12 sps:$4 sm:$0xff]   ;;  %v4187_v11 = vld [vmem:[%s5942_s1 + $0xe0] ss:$12 sps:$4 sm:$0xff]  }
  0x16   :  { %v4183_v9 = vld [vmem:[%s5942_s1 + $0x8] ss:$12 sps:$4 sm:$0xff]   ;;  %3625 = vmatprep.subr.bf16.mxu1 %v4182_v8  ;;  %v4188_v12 = vld [vmem:[%s5942_s1 + $0x20] ss:$12 sps:$4 sm:$0xff]   ;;  %v4192_v15 = vld [vmem:[%s5942_s1 + $0xf8] ss:$12 sps:$4 sm:$0xff]  }
  0x17   :  { %3626 = vmatpush3.bf16.msra.mxu1 %v4183_v9  ;;  %v4175_v13 = vld [vmem:[%s5942_s1 + $0x60] ss:$12 sps:$4 sm:$0xff]   ;;  %v4176_v14 = vld [vmem:[%s5942_s1 + $0x7c] ss:$12 sps:$4 sm:$0xff]   ;;  %v4193_v16 = vld [vmem:[%s5942_s1 + $0x38] ss:$12 sps:$4 sm:$0xff]  }
  0x18   :  { %393 = vmatpush1.bf16.msra.mxu0 %v4166_v3  ;;  %3627 = vmatprep.subr.bf16.mxu1 %v4187_v11  ;;  %v4178_v17 = vld [vmem:[%s5942_s1 + $0x78] ss:$12 sps:$4 sm:$0xff]   ;;  %v4179_v18 = vld [vmem:[%s5942_s1 + $0x94] ss:$12 sps:$4 sm:$0xff]   ;;  %v4197_v19 = vld [vmem:[%s5942_s1 + $0x110] ss:$12 sps:$4 sm:$0xff]  }
  0x19   :  { %394 = vmatprep.subr.bf16.mxu0 %v4167_v4  ;;  %v4198_v20 = vld [vmem:[%s5942_s1 + $0x50] ss:$12 sps:$4 sm:$0xff]   ;;  %v4202_v22 = vld [vmem:[%s5942_s1 + $0x128] ss:$12 sps:$4 sm:$0xff]   ;;  %v4184_v23 = vld [vmem:[%s5942_s1 + $0xac] ss:$12 sps:$4 sm:$0xff]  }
  0x1a   :  { %v4181_v21 = vld [vmem:[%s5942_s1 + $0x90] ss:$12 sps:$4 sm:$0xff]   ;;  %v4203_v24 = vld [vmem:[%s5942_s1 + $0x68] ss:$12 sps:$4 sm:$0xff]   ;;  %v4207_v25 = vld [vmem:[%s5942_s1 + $0x140] ss:$12 sps:$4 sm:$0xff]  }
  0x1b   :  { %3628 = vmatpush3.bf16.msra.mxu1 %v4188_v12  ;;  %v4186_v26 = vld [vmem:[%s5942_s1 + $0xa8] ss:$12 sps:$4 sm:$0xff]   ;;  %v4189_v27 = vld [vmem:[%s5942_s1 + $0xc4] ss:$12 sps:$4 sm:$0xff]   ;;  %v4208_v28 = vld [vmem:[%s5942_s1 + $0x80] ss:$12 sps:$4 sm:$0xff]  }
  0x1c   :  { %395 = vmatpush1.bf16.msra.mxu0 %v4169_v5  ;;  %3629 = vmatprep.subr.bf16.mxu1 %v4192_v15  ;;  %v4212_v29 = vld [vmem:[%s5942_s1 + $0x158] ss:$12 sps:$4 sm:$0xff]   ;;  %v4191_v30 = vld [vmem:[%s5942_s1 + $0xc0] ss:$12 sps:$4 sm:$0xff]   ;;  %v4194_v31 = vld [vmem:[%s5942_s1 + $0xdc] ss:$12 sps:$4 sm:$0xff]  }
  0x1d   :  { %396 = vmatprep.subr.bf16.mxu0 %v4170_v6  ;;  %v4213_v32 = vld [vmem:[%s5942_s1 + $0x98] ss:$12 sps:$4 sm:$0xff]   ;;  %v4217_v33 = vld [vmem:[%s5942_s1 + $0x170] ss:$12 sps:$4 sm:$0xff]   ;;  %v4199_v35 = vld [vmem:[%s5942_s1 + $0xf4] ss:$12 sps:$4 sm:$0xff]  }
  0x1e   :  { %v4196_v34 = vld [vmem:[%s5942_s1 + $0xd8] ss:$12 sps:$4 sm:$0xff]   ;;  %v4218_v37 = vld [vmem:[%s5942_s1 + $0xb0] ss:$12 sps:$4 sm:$0xff]   ;;  %v4831_v41 = vld [vmem:[%s5941_s0] ss:$8 sps:$4 sm:$0xff]  }
  0x1f   :  { %3630 = vmatpush3.bf16.msra.mxu1 %v4193_v16  ;;  %v4812_v36 = vld [vmem:[%s5941_s0 + $0x4] ss:$8 sps:$4 sm:$0xff]   ;;  %v4201_v39 = vld [vmem:[%s5942_s1 + $0xf0] ss:$12 sps:$4 sm:$0xff]   ;;  %v4206_v44 = vld [vmem:[%s5942_s1 + $0x108] ss:$12 sps:$4 sm:$0xff]  }
  0x20   :  { %397 = vmatpush1.bf16.msra.mxu0 %v4172_v7  ;;  %3631 = vmatprep.subr.bf16.mxu1 %v4197_v19  ;;  %v4226_v38 = vld [vmem:[%s5942_s1 + $0x184] ss:$12 sps:$4 sm:$0xff]   ;;  %v4204_v40 = vld [vmem:[%s5942_s1 + $0x10c] ss:$12 sps:$4 sm:$0xff]   ;;  %v4233_v43 = vld [vmem:[%s5942_s1 + $0x19c] ss:$12 sps:$4 sm:$0xff]  }
  0x21   :  { %398 = vmatprep.subr.bf16.mxu0 %v4173_v10  ;;  %465 = vmatprep.mubr.bf16.mxu1 %v4812_v36  ;;  %v4224_v42 = vld [vmem:[%s5942_s1 + $0x180] ss:$12 sps:$4 sm:$0xff]   ;;  %v4209_v45 = vld [vmem:[%s5942_s1 + $0x124] ss:$12 sps:$4 sm:$0xff]   ;;  %v4214_v49 = vld [vmem:[%s5942_s1 + $0x13c] ss:$12 sps:$4 sm:$0xff]  }
  0x22   :  { %422 = vmatprep.mubr.bf16.mxu0 %v4812_v36  ;;  %v4231_v46 = vld [vmem:[%s5942_s1 + $0x198] ss:$12 sps:$4 sm:$0xff]   ;;  %v4237_v47 = vld [vmem:[%s5942_s1 + $0x1b4] ss:$12 sps:$4 sm:$0xff]   ;;  %v4235_v50 = vld [vmem:[%s5942_s1 + $0x1b0] ss:$12 sps:$4 sm:$0xff]  }
  0x23   :  { %3632 = vmatpush3.bf16.msra.mxu1 %v4198_v20  ;;  %v4211_v48 = vld [vmem:[%s5942_s1 + $0x120] ss:$12 sps:$4 sm:$0xff]   ;;  %v4216_v52 = vld [vmem:[%s5942_s1 + $0x138] ss:$12 sps:$4 sm:$0xff]   ;;  %v4240_v54 = vld [vmem:[%s5942_s1 + $0x1c8] ss:$12 sps:$4 sm:$0xff]  }
  0x24   :  { %399 = vmatpush1.bf16.msra.mxu0 %v4175_v13  ;;  %3633 = vmatprep.subr.bf16.mxu1 %v4202_v22  ;;  %v4242_v51 = vld [vmem:[%s5942_s1 + $0x1cc] ss:$12 sps:$4 sm:$0xff]   ;;  %v4219_v53 = vld [vmem:[%s5942_s1 + $0x154] ss:$12 sps:$4 sm:$0xff]   ;;  %v4247_v55 = vld [vmem:[%s5942_s1 + $0x1e4] ss:$12 sps:$4 sm:$0xff]  }
  0x25   :  { %400 = vmatprep.subr.bf16.mxu0 %v4176_v14  ;;  %v4221_v56 = vld [vmem:[%s5942_s1 + $0x150] ss:$12 sps:$4 sm:$0xff]   ;;  %v4228_v57 = vld [vmem:[%s5942_s1 + $0x16c] ss:$12 sps:$4 sm:$0xff]   ;;  %v4230_v60 = vld [vmem:[%s5942_s1 + $0x168] ss:$12 sps:$4 sm:$0xff]  }
  0x26   :  { %v4245_v58 = vld [vmem:[%s5942_s1 + $0x1e0] ss:$12 sps:$4 sm:$0xff]   ;;  %v4252_v59 = vld [vmem:[%s5942_s1 + $0x1fc] ss:$12 sps:$4 sm:$0xff]   ;;  %v4250_v62 = vld [vmem:[%s5942_s1 + $0x1f8] ss:$12 sps:$4 sm:$0xff]  }
  0x27   :  { %3634 = vmatpush3.bf16.msra.mxu1 %v4203_v24  ;;  %v4234_v61 = vld [vmem:[%s5942_s1 + $0x248] ss:$12 sps:$4 sm:$0xff]   ;;  %v4239_v1 = vld [vmem:[%s5942_s1 + $0x260] ss:$12 sps:$4 sm:$0xff]   ;;  %v4255_v2 = vld [vmem:[%s5942_s1 + $0x210] ss:$12 sps:$4 sm:$0xff]  }
  0x28   :  { %401 = vmatpush1.bf16.msra.mxu0 %v4178_v17  ;;  %3635 = vmatprep.subr.bf16.mxu1 %v4207_v25  ;;  %v4257_v63 = vld [vmem:[%s5942_s1 + $0x214] ss:$12 sps:$4 sm:$0xff]   ;;  %v4262_v3 = vld [vmem:[%s5942_s1 + $0x22c] ss:$12 sps:$4 sm:$0xff]   ;;  %v4267_v7 = vld [vmem:[%s5942_s1 + $0x244] ss:$12 sps:$4 sm:$0xff]  }
  0x29   :  { %402 = vmatprep.subr.bf16.mxu0 %v4179_v18  ;;  %v4238_v0 = vld [vmem:[%s5942_s1 + $0x188] ss:$12 sps:$4 sm:$0xff]   ;;  %v4243_v4 = vld [vmem:[%s5942_s1 + $0x1a0] ss:$12 sps:$4 sm:$0xff]   ;;  %v4244_v5 = vld [vmem:[%s5942_s1 + $0x278] ss:$12 sps:$4 sm:$0xff]  }
  0x2a   :  { %v4260_v6 = vld [vmem:[%s5942_s1 + $0x228] ss:$12 sps:$4 sm:$0xff]   ;;  %v4248_v8 = vld [vmem:[%s5942_s1 + $0x1b8] ss:$12 sps:$4 sm:$0xff]   ;;  %v4249_v9 = vld [vmem:[%s5942_s1 + $0x290] ss:$12 sps:$4 sm:$0xff]  }
  0x2b   :  { %3636 = vmatpush3.bf16.msra.mxu1 %v4208_v28  ;;  %v4265_v10 = vld [vmem:[%s5942_s1 + $0x240] ss:$12 sps:$4 sm:$0xff]   ;;  %v4272_v11 = vld [vmem:[%s5942_s1 + $0x25c] ss:$12 sps:$4 sm:$0xff]   ;;  %v4270_v14 = vld [vmem:[%s5942_s1 + $0x258] ss:$12 sps:$4 sm:$0xff]  }
  0x2c   :  { %403 = vmatpush1.bf16.msra.mxu0 %v4181_v21  ;;  %3637 = vmatprep.subr.bf16.mxu1 %v4212_v29  ;;  %v4253_v12 = vld [vmem:[%s5942_s1 + $0x1d0] ss:$12 sps:$4 sm:$0xff]   ;;  %v4254_v13 = vld [vmem:[%s5942_s1 + $0x2a8] ss:$12 sps:$4 sm:$0xff]   ;;  %v4259_v17 = vld [vmem:[%s5942_s1 + $0x2c0] ss:$12 sps:$4 sm:$0xff]  }
  0x2d   :  { %404 = vmatprep.subr.bf16.mxu0 %v4184_v23  ;;  %v4278_v15 = vld [vmem:[%s5942_s1 + $0x274] ss:$12 sps:$4 sm:$0xff]   ;;  %v4276_v18 = vld [vmem:[%s5942_s1 + $0x270] ss:$12 sps:$4 sm:$0xff]   ;;  %v4284_v19 = vld [vmem:[%s5942_s1 + $0x28c] ss:$12 sps:$4 sm:$0xff]  }
  0x2e   :  { %v4258_v16 = vld [vmem:[%s5942_s1 + $0x1e8] ss:$12 sps:$4 sm:$0xff]   ;;  %v4263_v20 = vld [vmem:[%s5942_s1 + $0x200] ss:$12 sps:$4 sm:$0xff]   ;;  %v4264_v21 = vld [vmem:[%s5942_s1 + $0x2d8] ss:$12 sps:$4 sm:$0xff]  }
  0x2f   :  { %3638 = vmatpush3.bf16.msra.mxu1 %v4213_v32  ;;  %v4282_v22 = vld [vmem:[%s5942_s1 + $0x288] ss:$12 sps:$4 sm:$0xff]   ;;  %v4290_v23 = vld [vmem:[%s5942_s1 + $0x2a4] ss:$12 sps:$4 sm:$0xff]   ;;  %vm4648_vm0 = vmmov 0  }
  0x30   :  { %405 = vmatpush1.bf16.msra.mxu0 %v4186_v26  ;;  %3639 = vmatprep.subr.bf16.mxu1 %v4217_v33  ;;  %v4268_v24 = vld [vmem:[%s5942_s1 + $0x218] ss:$12 sps:$4 sm:$0xff]   ;;  %v4269_v25 = vld [vmem:[%s5942_s1 + $0x2f0] ss:$12 sps:$4 sm:$0xff]   ;;  %v4288_v26 = vld [vmem:[%s5942_s1 + $0x2a0] ss:$12 sps:$4 sm:$0xff]  }
  0x31   :  { %406 = vmatprep.subr.bf16.mxu0 %v4189_v27  ;;  %v4296_v27 = vld [vmem:[%s5942_s1 + $0x2bc] ss:$12 sps:$4 sm:$0xff]   ;;  %v4990_v29 = vld [vmem:[#allocation5 + $0x4] ss:$12 sps:$4 sm:$0xff]   ;;  %v5001_v33 = vld [vmem:[#allocation5 + $0x1c] ss:$12 sps:$4 sm:$0xff]  }
  0x32   :  { %v4273_v28 = vld [vmem:[%s5942_s1 + $0x230] ss:$12 sps:$4 sm:$0xff]  }
  0x33   :  { %3640 = vmatpush3.bf16.msra.mxu1 %v4218_v37  ;;  %v4998_v32 = vld [vmem:[#allocation5] ss:$12 sps:$4 sm:$0xff]   ;;  %v5949_v37 = vmov 0  }
  0x34   :  { %407 = vmatpush1.bf16.msra.mxu0 %v4191_v30  ;;  %819 = vmatprep.subr.bf16.mxu1 %v4226_v38  ;;  %v4294_v30 = vld [vmem:[%s5942_s1 + $0x2b8] ss:$12 sps:$4 sm:$0xff]  }
  0x35   :  { %408 = vmatprep.subr.bf16.mxu0 %v4194_v31  ;;  %v4302_v31 = vld [vmem:[%s5942_s1 + $0x2d4] ss:$12 sps:$4 sm:$0xff]   ;;  %v5015_v38 = vld [vmem:[#allocation5 + $0x34] ss:$12 sps:$4 sm:$0xff]  }
  0x36   :  { %466 = vmatmul.mubr.bf16.vlgmr.msra.gmra.mrb[0].mxu1 %v4831_v41 }
  0x37   :  { %820 = vmatpush1.bf16.msra.mxu1 %v4224_v42  ;;  %851 = vmatprep.mubr.bf16.mxu1 %v4812_v36  ;;  %v5024_v42 = vld [vmem:[#allocation5 + $0x4c] ss:$12 sps:$4 sm:$0xff]  }
  0x38   :  { %409 = vmatpush1.bf16.msra.mxu0 %v4196_v34  ;;  %821 = vmatprep.subr.bf16.mxu1 %v4233_v43  ;;  %v4300_v34 = vld [vmem:[%s5942_s1 + $0x2d0] ss:$12 sps:$4 sm:$0xff]   ;;  %v5026_v43 = vld [vmem:[#allocation5 + $0x8] ss:$12 sps:$4 sm:$0xff]  }
  0x39   :  { %410 = vmatprep.subr.bf16.mxu0 %v4199_v35  ;;  %v4308_v35 = vld [vmem:[%s5942_s1 + $0x2ec] ss:$12 sps:$4 sm:$0xff]  }
  0x3b   :  { %822 = vmatpush1.bf16.msra.mxu1 %v4231_v46  ;;  %v5033_v46 = vld [vmem:[#allocation5 + $0x64] ss:$12 sps:$4 sm:$0xff]  }
  0x3c   :  { %411 = vmatpush1.bf16.msra.mxu0 %v4201_v39  ;;  %823 = vmatprep.subr.bf16.mxu1 %v4237_v47  ;;  %v4306_v39 = vld [vmem:[%s5942_s1 + $0x2e8] ss:$12 sps:$4 sm:$0xff]   ;;  %v5037_v47 = vld [vmem:[#allocation5 + $0x20] ss:$12 sps:$4 sm:$0xff]  }
  0x3d   :  { %412 = vmatprep.subr.bf16.mxu0 %v4204_v40  ;;  %v5021_v40 = vld [vmem:[#allocation5 + $0x30] ss:$12 sps:$4 sm:$0xff]  }
  0x3f   :  { %824 = vmatpush1.bf16.msra.mxu1 %v4235_v50  ;;  %v5048_v50 = vld [vmem:[#allocation5 + $0x78] ss:$12 sps:$4 sm:$0xff]  }
  0x40   :  { %413 = vmatpush1.bf16.msra.mxu0 %v4206_v44  ;;  %825 = vmatprep.subr.bf16.mxu1 %v4242_v51  ;;  %v5951_v44 = vmov 0.0   ;;  %v5053_v51 = vld [vmem:[#allocation5 + $0x94] ss:$12 sps:$4 sm:$0xff]  }
  0x41   :  { %414 = vmatprep.subr.bf16.mxu0 %v4209_v45  ;;  %v5030_v45 = vld [vmem:[#allocation5 + $0x48] ss:$12 sps:$4 sm:$0xff]   ;;  %6005 = vst [vmem:[#allocation8_spill] sm:$0xff] %v5053_v51 }
  0x43   :  { %826 = vmatpush1.bf16.msra.mxu1 %v4240_v54  ;;  %v5063_v54 = vld [vmem:[#allocation5 + $0xac] ss:$12 sps:$4 sm:$0xff]  }
  0x44   :  { %415 = vmatpush1.bf16.msra.mxu0 %v4211_v48  ;;  %827 = vmatprep.subr.bf16.mxu1 %v4247_v55  ;;  %v5043_v48 = vld [vmem:[#allocation5 + $0x60] ss:$12 sps:$4 sm:$0xff]   ;;  %6007 = vst [vmem:[#allocation10_spill] sm:$0xff] %v5063_v54  ;;  %v5067_v55 = vld [vmem:[#allocation5 + $0x68] ss:$12 sps:$4 sm:$0xff]  }
  0x45   :  { %416 = vmatprep.subr.bf16.mxu0 %v4214_v49  ;;  %v5046_v49 = vld [vmem:[#allocation5 + $0x7c] ss:$12 sps:$4 sm:$0xff]  }
  0x47   :  { %828 = vmatpush1.bf16.msra.mxu1 %v4245_v58  ;;  %v5079_v58 = vld [vmem:[#allocation5 + $0x80] ss:$12 sps:$4 sm:$0xff]  }
  0x48   :  { %417 = vmatpush1.bf16.msra.mxu0 %v4216_v52  ;;  %829 = vmatprep.subr.bf16.mxu1 %v4252_v59  ;;  %v5057_v52 = vld [vmem:[#allocation5 + $0x50] ss:$12 sps:$4 sm:$0xff]   ;;  %6010 = vst [vmem:[#allocation13_spill] sm:$0xff] %v5079_v58  ;;  %v5083_v59 = vld [vmem:[#allocation5 + $0xc0] ss:$12 sps:$4 sm:$0xff]  }
  0x49   :  { %418 = vmatprep.subr.bf16.mxu0 %v4219_v53  ;;  %v5060_v53 = vld [vmem:[#allocation5 + $0x90] ss:$12 sps:$4 sm:$0xff]  }
  0x4a   :  { %6006 = vst [vmem:[#allocation9_spill] sm:$0xff] %v5060_v53 }
  0x4b   :  { %830 = vmatpush1.bf16.msra.mxu1 %v4250_v62  ;;  %v5094_v62 = vld [vmem:[#allocation5 + $0xd8] ss:$12 sps:$4 sm:$0xff]  }
  0x4c   :  { %419 = vmatpush1.bf16.msra.mxu0 %v4221_v56  ;;  %831 = vmatprep.subr.bf16.mxu1 %v4257_v63  ;;  %v5070_v56 = vld [vmem:[#allocation5 + $0xa8] ss:$12 sps:$4 sm:$0xff]  }
  0x4d   :  { %420 = vmatprep.subr.bf16.mxu0 %v4228_v57  ;;  %6008 = vst [vmem:[#allocation11_spill] sm:$0xff] %v5070_v56  ;;  %v5076_v57 = vld [vmem:[#allocation5 + $0xc4] ss:$12 sps:$4 sm:$0xff]   ;;  %v5098_v63 = vld [vmem:[#allocation5 + $0xf4] ss:$12 sps:$4 sm:$0xff]  }
  0x4e   :  { %6009 = vst [vmem:[#allocation12_spill] sm:$0xff] %v5076_v57 }
  0x4f   :  { %832 = vmatpush1.bf16.msra.mxu1 %v4255_v2  ;;  %v5108_v2 = vld [vmem:[#allocation5 + $0x10c] ss:$12 sps:$4 sm:$0xff]  }
  0x50   :  { %421 = vmatpush1.bf16.msra.mxu0 %v4230_v60  ;;  %833 = vmatprep.subr.bf16.mxu1 %v4262_v3  ;;  %v5086_v60 = vld [vmem:[#allocation5 + $0xdc] ss:$12 sps:$4 sm:$0xff]  }
  0x51   :  { %3647 = vmatprep.subr.bf16.mxu0 %v4234_v61  ;;  %v5089_v61 = vld [vmem:[#allocation5 + $0x98] ss:$12 sps:$4 sm:$0xff]   ;;  %v5111_v3 = vld [vmem:[#allocation5 + $0xc8] ss:$12 sps:$4 sm:$0xff]  }
  0x52   :  { %6011 = vst [vmem:[#allocation14_spill] sm:$0xff] %v5089_v61 }
  0x53   :  { %423 = vmatmul.mubr.bf16.vlgmr.msra.gmra.mrb[0].mxu0 %v4831_v41  ;;  %834 = vmatpush1.bf16.msra.mxu1 %v4260_v6  ;;  %v5122_v6 = vld [vmem:[#allocation5 + $0xe0] ss:$12 sps:$4 sm:$0xff]  }
  0x54   :  { %3648 = vmatpush3.bf16.msra.mxu0 %v4238_v0  ;;  %894 = vmatprep.mubr.bf16.mxu0 %v4812_v36  ;;  %v5011_v36 = vld [vmem:[#allocation5 + $0x18] ss:$12 sps:$4 sm:$0xff]   ;;  %v5101_v0 = vld [vmem:[#allocation5 + $0xb0] ss:$12 sps:$4 sm:$0xff]  }
  0x55   :  { %3649 = vmatprep.subr.bf16.mxu0 %v4239_v1  ;;  %835 = vmatprep.subr.bf16.mxu1 %v4267_v7  ;;  %6012 = vst [vmem:[#allocation15_spill] sm:$0xff] %v5101_v0  ;;  %v5105_v1 = vld [vmem:[#allocation5 + $0xf0] ss:$12 sps:$4 sm:$0xff]   ;;  %v5128_v7 = vld [vmem:[#allocation5 + $0x120] ss:$12 sps:$4 sm:$0xff]  }
  0x57   :  { %836 = vmatpush1.bf16.msra.mxu1 %v4265_v10  ;;  %v5138_v10 = vld [vmem:[#allocation5 + $0x138] ss:$12 sps:$4 sm:$0xff]  }
  0x58   :  { %3650 = vmatpush3.bf16.msra.mxu0 %v4243_v4  ;;  %837 = vmatprep.subr.bf16.mxu1 %v4272_v11  ;;  %v5115_v4 = vld [vmem:[#allocation5 + $0x108] ss:$12 sps:$4 sm:$0xff]  }
  0x59   :  { %3651 = vmatprep.subr.bf16.mxu0 %v4244_v5  ;;  %v5118_v5 = vld [vmem:[#allocation5 + $0x124] ss:$12 sps:$4 sm:$0xff]   ;;  %v5141_v11 = vld [vmem:[#allocation5 + $0x154] ss:$12 sps:$4 sm:$0xff]  }
  0x5b   :  { %838 = vmatpush1.bf16.msra.mxu1 %v4270_v14  ;;  %v5151_v14 = vld [vmem:[#allocation5 + $0x16c] ss:$12 sps:$4 sm:$0xff]  }
  0x5c   :  { %3652 = vmatpush3.bf16.msra.mxu0 %v4248_v8  ;;  %839 = vmatprep.subr.bf16.mxu1 %v4278_v15  ;;  %v5131_v8 = vld [vmem:[#allocation5 + $0x13c] ss:$12 sps:$4 sm:$0xff]  }
  0x5d   :  { %3653 = vmatprep.subr.bf16.mxu0 %v4249_v9  ;;  %v5134_v9 = vld [vmem:[#allocation5 + $0xf8] ss:$12 sps:$4 sm:$0xff]   ;;  %v5154_v15 = vld [vmem:[#allocation5 + $0x128] ss:$12 sps:$4 sm:$0xff]  }
  0x5f   :  { %840 = vmatpush1.bf16.msra.mxu1 %v4276_v18  ;;  %v5168_v18 = vld [vmem:[#allocation5 + $0x158] ss:$12 sps:$4 sm:$0xff]  }
  0x60   :  { %3654 = vmatpush3.bf16.msra.mxu0 %v4253_v12  ;;  %841 = vmatprep.subr.bf16.mxu1 %v4284_v19  ;;  %v5144_v12 = vld [vmem:[#allocation5 + $0x110] ss:$12 sps:$4 sm:$0xff]  }
  0x61   :  { %3655 = vmatprep.subr.bf16.mxu0 %v4254_v13  ;;  %v5148_v13 = vld [vmem:[#allocation5 + $0x150] ss:$12 sps:$4 sm:$0xff]  }
  0x62   :  { %v5176_v19 = vld [vmem:[#allocation5 + $0x170] ss:$12 sps:$4 sm:$0xff]  }
  0x63   :  { %842 = vmatpush1.bf16.msra.mxu1 %v4282_v22 }
  0x64   :  { %3656 = vmatpush3.bf16.msra.mxu0 %v4258_v16  ;;  %843 = vmatprep.subr.bf16.mxu1 %v4290_v23  ;;  %v5158_v16 = vld [vmem:[#allocation5 + $0x168] ss:$12 sps:$4 sm:$0xff]   ;;  %v107_v23 = vld [vmem:[%s5944_s3] sm:$0x7] }
  0x65   :  { %3657 = vmatprep.subr.bf16.mxu0 %v4259_v17  ;;  %v5162_v17 = vld [vmem:[#allocation5 + $0x140] ss:$12 sps:$4 sm:$0xff]  }
  0x67   :  { %844 = vmatpush1.bf16.msra.mxu1 %v4288_v26 }
  0x68   :  { %3658 = vmatpush3.bf16.msra.mxu0 %v4263_v20  ;;  %845 = vmatprep.subr.bf16.mxu1 %v4296_v27  ;;  %v109_v20 = vlaneseq }
  0x69   :  { %3659 = vmatprep.subr.bf16.mxu0 %v4264_v21 }
  0x6a   :  { %v110_v21 = vshrl.u32 %v109_v20, 7 }
  0x6b   :  { %846 = vmatpush1.bf16.msra.mxu1 %v4294_v30 }
  0x6c   :  { %3660 = vmatpush3.bf16.msra.mxu0 %v4268_v24  ;;  %847 = vmatprep.subr.bf16.mxu1 %v4302_v31  ;;  %v5214_v22 = vsub.s32 2, %v110_v21  ;;  %v5222_v20 = vsub.s32 1, %v110_v21 }
  0x6d   :  { %3661 = vmatprep.subr.bf16.mxu0 %v4269_v25 }
  0x6e   :  { %v120_v25 = vrot.slane %v107_v23, %v5214_v22 }
  0x6f   :  { %848 = vmatpush1.bf16.msra.mxu1 %v4300_v34 }
  0x70   :  { %3662 = vmatpush3.bf16.msra.mxu0 %v4273_v28  ;;  %849 = vmatprep.subr.bf16.mxu1 %v4308_v35 }
  0x71   :  { %1137 = vmatprep.subr.bf16.mxu0 %v4990_v29 }
  0x73   :  { %895 = vmatmul.mubr.bf16.vlgmr.msra.gmra.mrb[4].mxu0 %v4831_v41  ;;  %850 = vmatpush1.bf16.msra.mxu1 %v4306_v39  ;;  %v5220_v39 = vsub.s32 0, %v110_v21  ;;  %v3478_v21 = vld [vmem:[%s5944_s3 + $0x3] sm:$0x7] }
  0x74   :  { %1138 = vmatpush1.bf16.msra.mxu0 %v4998_v32  ;;  %1169 = vmatprep.mubr.bf16.mxu0 %v5949_v37 }
  0x75   :  { %1139 = vmatprep.subr.bf16.mxu0 %v5001_v33  ;;  %3835 = vmatprep.subr.bf16.mxu1 %v5951_v44 }
  0x76   :  { %852 = vmatmul.mubr.bf16.vlgmr.msra.gmra.mrb[4].mxu1 %v4831_v41  ;;  %v5051_v41 = vld [vmem:[#allocation5 + $0x38] ss:$12 sps:$4 sm:$0xff]  }
  0x77   :  { %3836 = vmatpush3.bf16.msra.mxu1 %v5026_v43  ;;  %3851 = vmatprep.mubr.msk.bf16.mxu1 %vm4648_vm0, %v5951_v44 }
  0x78   :  { %1140 = vmatpush1.bf16.msra.mxu0 %v5011_v36  ;;  %3837 = vmatprep.subr.bf16.mxu1 %v5951_v44 }
  0x79   :  { %1141 = vmatprep.subr.bf16.mxu0 %v5015_v38 }
  0x7b   :  { %3838 = vmatpush3.bf16.msra.mxu1 %v5037_v47 }
  0x7c   :  { %1142 = vmatpush1.bf16.msra.mxu0 %v5021_v40  ;;  %3839 = vmatprep.subr.bf16.mxu1 %v5951_v44 }
  0x7d   :  { %1143 = vmatprep.subr.bf16.mxu0 %v5024_v42 }
  0x7f   :  { %3840 = vmatpush3.bf16.msra.mxu1 %v5051_v41 }
  0x80   :  { %1144 = vmatpush1.bf16.msra.mxu0 %v5030_v45  ;;  %3841 = vmatprep.subr.bf16.mxu1 %v5951_v44 }
  0x81   :  { %1145 = vmatprep.subr.bf16.mxu0 %v5033_v46 }
  0x83   :  { %3842 = vmatpush3.bf16.msra.mxu1 %v5057_v52 }
  0x84   :  { %1146 = vmatpush1.bf16.msra.mxu0 %v5043_v48  ;;  %3843 = vmatprep.subr.bf16.mxu1 %v5951_v44 }
  0x85   :  { %1147 = vmatprep.subr.bf16.mxu0 %v5046_v49 }
  0x87   :  { %3844 = vmatpush3.bf16.msra.mxu1 %v5067_v55 }
  0x88   :  { %1148 = vmatpush1.bf16.msra.mxu0 %v5048_v50  ;;  %3845 = vmatprep.subr.bf16.mxu1 %v5951_v44 }
  0x89   :  { %1149 = vmatprep.subr.bf16.mxu0 %v5053_v51 }
  0x8b   :  { %3846 = vmatpush3.bf16.msra.mxu1 %v5079_v58 }
  0x8c   :  { %1150 = vmatpush1.bf16.msra.mxu0 %v5060_v53  ;;  %3847 = vmatprep.subr.bf16.mxu1 %v5951_v44 }
  0x8d   :  { %1151 = vmatprep.subr.bf16.mxu0 %v5063_v54 }
  0x8f   :  { %3848 = vmatpush3.bf16.msra.mxu1 %v5089_v61 }
  0x90   :  { %1152 = vmatpush1.bf16.msra.mxu0 %v5070_v56  ;;  %3849 = vmatprep.subr.bf16.mxu1 %v5951_v44 }
  0x91   :  { %1372 = vmatprep.subr.bf16.mxu0 %v5076_v57 }
  0x93   :  { %1170 = vmatmul.mubr.bf16.vlgmr.msra.gmra.mrb[8].mxu0 %v5949_v37  ;;  %3850 = vmatpush3.bf16.msra.mxu1 %v5101_v0 }
  0x94   :  { %1373 = vmatpush1.bf16.msra.mxu0 %v5083_v59  ;;  %1404 = vmatprep.mubr.bf16.mxu0 %v5949_v37 }
  0x95   :  { %1374 = vmatprep.subr.bf16.mxu0 %v5086_v60  ;;  %3855 = vmatprep.subr.bf16.mxu1 %v5951_v44 }
  0x96   :  { %3852 = vmatmul.mubr.bf16.vlgmr.msra.gmra.mrb[8].mxu1 %v5949_v37 }
  0x97   :  { %3856 = vmatpush3.bf16.msra.mxu1 %v5111_v3  ;;  %3871 = vmatprep.mubr.msk.bf16.mxu1 %vm4648_vm0, %v5951_v44 }
  0x98   :  { %1375 = vmatpush1.bf16.msra.mxu0 %v5094_v62  ;;  %3857 = vmatprep.subr.bf16.mxu1 %v5951_v44 }
  0x99   :  { %1376 = vmatprep.subr.bf16.mxu0 %v5098_v63 }
  0x9b   :  { %3858 = vmatpush3.bf16.msra.mxu1 %v5122_v6 }
  0x9c   :  { %1377 = vmatpush1.bf16.msra.mxu0 %v5105_v1  ;;  %3859 = vmatprep.subr.bf16.mxu1 %v5951_v44 }
  0x9d   :  { %1378 = vmatprep.subr.bf16.mxu0 %v5108_v2 }
  0x9f   :  { %3860 = vmatpush3.bf16.msra.mxu1 %v5134_v9 }
  0xa0   :  { %1379 = vmatpush1.bf16.msra.mxu0 %v5115_v4  ;;  %3861 = vmatprep.subr.bf16.mxu1 %v5951_v44 }
  0xa1   :  { %1380 = vmatprep.subr.bf16.mxu0 %v5118_v5 }
  0xa3   :  { %3862 = vmatpush3.bf16.msra.mxu1 %v5144_v12 }
  0xa4   :  { %1381 = vmatpush1.bf16.msra.mxu0 %v5128_v7  ;;  %3863 = vmatprep.subr.bf16.mxu1 %v5951_v44 }
  0xa5   :  { %1382 = vmatprep.subr.bf16.mxu0 %v5131_v8 }
  0xa7   :  { %3864 = vmatpush3.bf16.msra.mxu1 %v5154_v15 }
  0xa8   :  { %1383 = vmatpush1.bf16.msra.mxu0 %v5138_v10  ;;  %3865 = vmatprep.subr.bf16.mxu1 %v5951_v44 }
  0xa9   :  { %1384 = vmatprep.subr.bf16.mxu0 %v5141_v11 }
  0xab   :  { %3866 = vmatpush3.bf16.msra.mxu1 %v5162_v17 }
  0xac   :  { %1385 = vmatpush1.bf16.msra.mxu0 %v5148_v13  ;;  %3867 = vmatprep.subr.bf16.mxu1 %v5951_v44 }
  0xad   :  { %1386 = vmatprep.subr.bf16.mxu0 %v5151_v14 }
  0xaf   :  { %3868 = vmatpush3.bf16.msra.mxu1 %v5168_v18 }
  0xb0   :  { %1387 = vmatpush1.bf16.msra.mxu0 %v5158_v16  ;;  %3869 = vmatprep.subr.bf16.mxu1 %v5951_v44 }
  0xb1   :  { %1491 = vmatprep.subr.bf16.mxu0 %v4990_v29 }
  0xb3   :  { %1405 = vmatmul.mubr.bf16.vlgmr.msra.gmra.mrb[12].mxu0 %v5949_v37  ;;  %3870 = vmatpush3.bf16.msra.mxu1 %v5176_v19 }
  0xb4   :  { %1492 = vmatpush1.bf16.msra.mxu0 %v4998_v32  ;;  %1523 = vmatprep.mubr.bf16.mxu0 %v5949_v37 }
  0xb5   :  { %1493 = vmatprep.subr.bf16.mxu0 %v5001_v33  ;;  %3875 = vmatprep.subr.bf16.mxu1 %v5951_v44 }
  0xb6   :  { %3872 = vmatmul.mubr.bf16.vlgmr.msra.gmra.mrb[12].mxu1 %v5949_v37  ;;  %v112_v37 = vrot.slane %v107_v23, %v5220_v39 }
  0xb7   :  { %3876 = vmatpush3.bf16.msra.mxu1 %v5026_v43  ;;  %3891 = vmatprep.mubr.msk.bf16.mxu1 %vm4648_vm0, %v5951_v44 }
  0xb8   :  { %1494 = vmatpush1.bf16.msra.mxu0 %v5011_v36  ;;  %3877 = vmatprep.subr.bf16.mxu1 %v5951_v44 }
  0xb9   :  { %1495 = vmatprep.subr.bf16.mxu0 %v5015_v38 }
  0xbb   :  { %3878 = vmatpush3.bf16.msra.mxu1 %v5037_v47 }
  0xbc   :  { %1496 = vmatpush1.bf16.msra.mxu0 %v5021_v40  ;;  %3879 = vmatprep.subr.bf16.mxu1 %v5951_v44 }
  0xbd   :  { %1497 = vmatprep.subr.bf16.mxu0 %v5024_v42 }
  0xbf   :  { %3880 = vmatpush3.bf16.msra.mxu1 %v5051_v41 }
  0xc0   :  { %1498 = vmatpush1.bf16.msra.mxu0 %v5030_v45  ;;  %3881 = vmatprep.subr.bf16.mxu1 %v5951_v44 }
  0xc1   :  { %1499 = vmatprep.subr.bf16.mxu0 %v5033_v46 }
  0xc3   :  { %3882 = vmatpush3.bf16.msra.mxu1 %v5057_v52 }
  0xc4   :  { %1500 = vmatpush1.bf16.msra.mxu0 %v5043_v48  ;;  %3883 = vmatprep.subr.bf16.mxu1 %v5951_v44 }
  0xc5   :  { %1501 = vmatprep.subr.bf16.mxu0 %v5046_v49 }
  0xc7   :  { %3884 = vmatpush3.bf16.msra.mxu1 %v5067_v55 }
  0xc8   :  { %1502 = vmatpush1.bf16.msra.mxu0 %v5048_v50  ;;  %3885 = vmatprep.subr.bf16.mxu1 %v5951_v44 }
  0xc9   :  { %1503 = vmatprep.subr.bf16.mxu0 %v5053_v51 }
  0xcb   :  { %3886 = vmatpush3.bf16.msra.mxu1 %v5079_v58 }
  0xcc   :  { %1504 = vmatpush1.bf16.msra.mxu0 %v5060_v53  ;;  %3887 = vmatprep.subr.bf16.mxu1 %v5951_v44 }
  0xcd   :  { %1505 = vmatprep.subr.bf16.mxu0 %v5063_v54 }
  0xcf   :  { %3888 = vmatpush3.bf16.msra.mxu1 %v5089_v61 }
  0xd0   :  { %1506 = vmatpush1.bf16.msra.mxu0 %v5070_v56  ;;  %3889 = vmatprep.subr.bf16.mxu1 %v5951_v44 }
  0xd1   :  { %1612 = vmatprep.subr.bf16.mxu0 %v5076_v57 }
  0xd3   :  { %3890 = vmatpush3.bf16.msra.mxu1 %v5101_v0 }
  0xd4   :  { %3895 = vmatprep.subr.bf16.mxu1 %v5951_v44  ;;  %v116_v44 = vrot.slane %v107_v23, %v5222_v20 }
 0x109   :  { %v3641_v24 = vpop.f32.mrb[0].mxu1 }
 0x10a   :  { %v3642_v26 = vpop.f32.mrb[1].mxu1 }
 0x10b   :  { %v3643_v27 = vadd.f32 %v3642_v26, %v3641_v24  ;;  %v3644_v28 = vpop.f32.mrb[2].mxu1 }
 0x10c   :  { %v3645_v30 = vpop.f32.mrb[3].mxu1 }
 0x10d   :  { %v468_v31 = vadd.f32 %v3643_v27, %v120_v25  ;;  %v3646_v34 = vadd.f32 %v3645_v30, %v3644_v28  ;;  %v559_v30 = vrot.slane %v3478_v21, %v5214_v22 }
 0x10f   :  { %476 = vst [vmem:[#allocation2 + $0x10] sm:$0xff] %v468_v31  ;;  %v471_v35 = vadd.f32 %v3646_v34, %v120_v25 }
 0x111   :  { %479 = vst [vmem:[#allocation2 + $0x28] sm:$0xff] %v471_v35 }
 0x126   :  { %v424_v57 = vpop.f32.mrb[0].mxu0 }
 0x127   :  { %v425_v0 = vadd.f32 %v424_v57, %v112_v37  ;;  %v426_v56 = vpop.f32.mrb[1].mxu0 }
 0x128   :  { %v427_v54 = vadd.f32 %v426_v56, %v116_v44  ;;  %v428_v24 = vpop.f32.mrb[2].mxu0 }
 0x129   :  { %474 = vst [vmem:[#allocation2] sm:$0xff] %v425_v0  ;;  %v429_v26 = vadd.f32 %v428_v24, %v112_v37  ;;  %v430_v27 = vpop.f32.mrb[3].mxu0 }
 0x12a   :  { %475 = vst [vmem:[#allocation2 + $0x8] sm:$0xff] %v427_v54  ;;  %v431_v28 = vadd.f32 %v430_v27, %v116_v44  ;;  %v551_v54 = vrot.slane %v3478_v21, %v5220_v39  ;;  %v555_v44 = vrot.slane %v3478_v21, %v5222_v20 }
 0x12b   :  { %477 = vst [vmem:[#allocation2 + $0x18] sm:$0xff] %v429_v26 }
 0x12c   :  { %478 = vst [vmem:[#allocation2 + $0x20] sm:$0xff] %v431_v28 }
 0x146   :  { %v3663_v25 = vpop.f32.mrb[4].mxu0 }
 0x147   :  { %v3664_v23 = vpop.f32.mrb[5].mxu0 }
 0x148   :  { %v3665_v31 = vadd.f32 %v3664_v23, %v3663_v25  ;;  %v3666_v57 = vpop.f32.mrb[6].mxu0 }
 0x149   :  { %v3667_v34 = vpop.f32.mrb[7].mxu0  ;;  %v853_v0 = vpop.f32.mrb[4].mxu1 }
 0x14a   :  { %v897_v56 = vadd.f32 %v3665_v31, %v559_v30  ;;  %v3668_v35 = vadd.f32 %v3667_v34, %v3666_v57  ;;  %v854_v24 = vadd.f32 %v853_v0, %v551_v54  ;;  %v855_v26 = vpop.f32.mrb[5].mxu1 }
 0x14b   :  { %v856_v27 = vadd.f32 %v855_v26, %v555_v44  ;;  %v857_v28 = vpop.f32.mrb[6].mxu1 }
 0x14c   :  { %905 = vst [vmem:[#allocation3 + $0x10] sm:$0xff] %v897_v56  ;;  %v900_v37 = vadd.f32 %v3668_v35, %v559_v30  ;;  %903 = vst [vmem:[#allocation3] sm:$0xff] %v854_v24  ;;  %v858_v61 = vadd.f32 %v857_v28, %v551_v54  ;;  %v859_v53 = vpop.f32.mrb[7].mxu1  ;;  %v974_v30 = vld [vmem:[%s5945_s4] sm:$0x7] }
 0x14d   :  { %904 = vst [vmem:[#allocation3 + $0x8] sm:$0xff] %v856_v27  ;;  %v860_v25 = vadd.f32 %v859_v53, %v555_v44  ;;  %v5236_v23 = vrot.slane %v974_v30, %v5220_v39  ;;  %v5239_v21 = vrot.slane %v974_v30, %v5222_v20  ;;  %v1218_v56 = vld [vmem:[#allocation2] sm:$0x3]  ;;  %v1219_v44 = vld [vmem:[#allocation2 + $0x8] sm:$0x3] }
 0x14e   :  { %908 = vst [vmem:[#allocation3 + $0x28] sm:$0xff] %v900_v37  ;;  %906 = vst [vmem:[#allocation3 + $0x18] sm:$0xff] %v858_v61 }
 0x14f   :  { %907 = vst [vmem:[#allocation3 + $0x20] sm:$0xff] %v860_v25  ;;  %6013 = vst [vmem:[#allocation16_spill] sm:$0xff] %v5236_v23 }
 0x150   :  { %6014 = vst [vmem:[#allocation17_spill] sm:$0xff] %v5239_v21 }
 0x166   :  { %v1171_v31 = vpop.f32.mrb[8].mxu0 }
 0x167   :  { %v1172_v57 = vadd.f32 %v1171_v31, %v5236_v23  ;;  %v1173_v34 = vpop.f32.mrb[9].mxu0  ;;  %v5244_v31 = vrot.slane %v974_v30, %v5214_v22 }
 0x168   :  { %v1174_v35 = vadd.f32 %v1173_v34, %v5239_v21  ;;  %v1175_v53 = vpop.f32.mrb[10].mxu0 }
 0x169   :  { %v1221_v61 = vadd.f32 %v1218_v56, %v1172_v57  ;;  %v1176_v37 = vpop.f32.mrb[11].mxu0  ;;  %v1212_v26 = vpop.f32.mrb[8].mxu1  ;;  %6015 = vst [vmem:[#allocation18_spill] sm:$0xff] %v5244_v31  ;;  %v3527_v57 = vld [vmem:[%s5945_s4 + $0x3] sm:$0x7] }
 0x16a   :  { %v1228_v0 = vadd.f32 %v1219_v44, %v1174_v35  ;;  %v3853_v27 = vpop.f32.mrb[9].mxu1  ;;  %v1213_v35 = vadd.f32 %v1212_v26, %v5244_v31  ;;  %v5251_v53 = vrot.slane %v3527_v57, %v5220_v39  ;;  %v5254_v37 = vrot.slane %v3527_v57, %v5222_v20  ;;  %v1453_v39 = vld [vmem:[#allocation3 + $0x18] sm:$0xc0]  ;;  %v1454_v20 = vld [vmem:[#allocation3 + $0x20] sm:$0xc0] }
 0x16b   :  { %v3552_v54 = vmul.f32 -1.442695, %v1221_v61  ;;  %v1215_v28 = vpop.f32.mrb[10].mxu1 }
 0x16c   :  { %v3553_v24 = vmul.f32 -1.442695, %v1228_v0  ;;  %v3854_v25 = vpop.f32.mrb[11].mxu1  ;;  %6016 = vst [vmem:[#allocation19_spill] sm:$0xff] %v5251_v53 }
 0x16d   :  { %4372 = vpow2.f32 %v3552_v54 }
 0x16e   :  { %4374 = vpow2.f32 %v3553_v24 }
 0x177   :  { %v4373_v51 = vpop.eup %4372 }
 0x178   :  { %v1225_v58 = vadd.f32 1.0, %v4373_v51  ;;  %v4375_v34 = vpop.eup %4374 }
 0x179   :  { %v1232_v56 = vadd.f32 1.0, %v4375_v34 }
 0x17a   :  { %4376 = vrcp.f32 %v1225_v58  ;;  %v1220_v58 = vld [vmem:[#allocation2 + $0x10] sm:$0x3] }
 0x17b   :  { %4378 = vrcp.f32 %v1232_v56 }
 0x184   :  { %v4377_v61 = vpop.eup %4376 }
 0x185   :  { %v1235_v51 = vmul.f32 %v4377_v61, %v1213_v35  ;;  %v4379_v56 = vpop.eup %4378 }
 0x186   :  { %v1406_v30 = vpop.f32.mrb[12].mxu0 }
 0x187   :  { %v1236_v54 = vadd.f32 %v1235_v51, %v1220_v58  ;;  %v1407_v44 = vadd.f32 %v1406_v30, %v5251_v53  ;;  %v1408_v0 = vpop.f32.mrb[13].mxu0  ;;  %v1238_v58 = vsub.f32 1.0, %v4379_v56 }
 0x188   :  { %v1409_v24 = vadd.f32 %v1408_v0, %v5254_v37  ;;  %v1410_v27 = vpop.f32.mrb[14].mxu0 }
 0x189   :  { %4380 = vtanh.f32 %v1236_v54  ;;  %v1457_v26 = vrot.slane %v1407_v44, 2  ;;  %v1411_v28 = vpop.f32.mrb[15].mxu0  ;;  %v1447_v35 = vpop.f32.mrb[12].mxu1  ;;  %v1240_v27 = vmul.f32 0.0, %v4379_v56 }
 0x18a   :  { %v1467_v25 = vrot.slane %v1409_v24, 2  ;;  %v3873_v61 = vpop.f32.mrb[13].mxu1 }
 0x18b   :  { %v1459_v34 = vadd.f32 %v1457_v26, %v1453_v39  ;;  %v1450_v30 = vpop.f32.mrb[14].mxu1 }
 0x18c   :  { %v1469_v21 = vadd.f32 %v1467_v25, %v1454_v20  ;;  %v3874_v23 = vpop.f32.mrb[15].mxu1 }
 0x18d   :  { %v3578_v31 = vmul.f32 -1.442695, %v1459_v34  ;;  %v6017_v23 = vmov 0.0   ;;  %v1455_v34 = vld [vmem:[#allocation3 + $0x28] sm:$0xc0] }
 0x18e   :  { %v3579_v51 = vmul.f32 -1.442695, %v1469_v21  ;;  %v6018_v21 = vmov 0  }
 0x18f   :  { %4382 = vpow2.f32 %v3578_v31  ;;  %v5263_v31 = vrot.slane %v3527_v57, %v5214_v22 }
 0x190   :  { %4384 = vpow2.f32 %v3579_v51 }
 0x193   :  { %v4381_v53 = vpop.eup %4380 }
 0x194   :  { %v1239_v0 = vmul.f32 %v4381_v53, %v1238_v58  ;;  %v1448_v53 = vadd.f32 %v1447_v35, %v5263_v31 }
 0x196   :  { %v5258_v54 = vadd.f32 %v1240_v27, %v1239_v0  ;;  %v1477_v28 = vrot.slane %v1448_v53, 2 }
 0x198   :  { %v1242_v44 = vpack.c.bf16 %v5258_v54, %v5258_v54 }
 0x199   :  { %v4383_v24 = vpop.eup %4382 }
 0x19a   :  { %v1463_v26 = vadd.f32 1.0, %v4383_v24  ;;  %1243 = vst [vmem:[#allocation4] sm:$0x1] %v1242_v44  ;;  %1524 = vmatmul.mubr.bf16.vlgmr.msra.gmra.mrb[16].mxu0 %v1242_v44  ;;  %3892 = vmatmul.mubr.bf16.vlgmr.msra.gmra.mrb[16].mxu1 %v1242_v44  ;;  %v4385_v22 = vpop.eup %4384 }
 0x19b   :  { %1613 = vmatpush1.bf16.msra.mxu0 %v5083_v59  ;;  %3896 = vmatpush3.bf16.msra.mxu1 %v5111_v3  ;;  %v1473_v57 = vadd.f32 1.0, %v4385_v22 }
 0x19c   :  { %4386 = vrcp.f32 %v1463_v26  ;;  %1614 = vmatprep.subr.bf16.mxu0 %v5086_v60  ;;  %3897 = vmatprep.subr.bf16.mxu1 %v6017_v23 }
 0x19d   :  { %1644 = vmatprep.mubr.bf16.mxu0 %v6018_v21  ;;  %3911 = vmatprep.mubr.msk.bf16.mxu1 %vm4648_vm0, %v6017_v23  ;;  %4388 = vrcp.f32 %v1473_v57 }
 0x19f   :  { %1615 = vmatpush1.bf16.msra.mxu0 %v5094_v62  ;;  %3898 = vmatpush3.bf16.msra.mxu1 %v5122_v6 }
 0x1a0   :  { %1616 = vmatprep.subr.bf16.mxu0 %v5098_v63  ;;  %3899 = vmatprep.subr.bf16.mxu1 %v6017_v23 }
 0x1a3   :  { %1617 = vmatpush1.bf16.msra.mxu0 %v5105_v1  ;;  %3900 = vmatpush3.bf16.msra.mxu1 %v5134_v9 }
 0x1a4   :  { %1618 = vmatprep.subr.bf16.mxu0 %v5108_v2  ;;  %3901 = vmatprep.subr.bf16.mxu1 %v6017_v23 }
 0x1a6   :  { %v4387_v39 = vpop.eup %4386 }
 0x1a7   :  { %v1479_v25 = vmul.f32 %v4387_v39, %v1477_v28  ;;  %1619 = vmatpush1.bf16.msra.mxu0 %v5115_v4  ;;  %3902 = vmatpush3.bf16.msra.mxu1 %v5144_v12  ;;  %v4389_v56 = vpop.eup %4388  ;;  %v1572_v39 = vld [vmem:[#allocation2] sm:$0xc] }
 0x1a8   :  { %1620 = vmatprep.subr.bf16.mxu0 %v5118_v5  ;;  %3903 = vmatprep.subr.bf16.mxu1 %v6017_v23  ;;  %v1482_v35 = vsub.f32 1.0, %v4389_v56  ;;  %v1484_v58 = vmul.f32 0.0, %v4389_v56 }
 0x1a9   :  { %v1480_v20 = vadd.f32 %v1479_v25, %v1455_v34 }
 0x1ab   :  { %4390 = vtanh.f32 %v1480_v20  ;;  %1621 = vmatpush1.bf16.msra.mxu0 %v5128_v7  ;;  %3904 = vmatpush3.bf16.msra.mxu1 %v5154_v15  ;;  %v1573_v20 = vld [vmem:[#allocation2 + $0x8] sm:$0xc] }
 0x1ac   :  { %1622 = vmatprep.subr.bf16.mxu0 %v5131_v8  ;;  %3905 = vmatprep.subr.bf16.mxu1 %v6017_v23 }
 0x1af   :  { %1623 = vmatpush1.bf16.msra.mxu0 %v5138_v10  ;;  %3906 = vmatpush3.bf16.msra.mxu1 %v5162_v17 }
 0x1b0   :  { %1624 = vmatprep.subr.bf16.mxu0 %v5141_v11  ;;  %3907 = vmatprep.subr.bf16.mxu1 %v6017_v23 }
 0x1b3   :  { %1625 = vmatpush1.bf16.msra.mxu0 %v5148_v13  ;;  %3908 = vmatpush3.bf16.msra.mxu1 %v5168_v18 }
 0x1b4   :  { %1626 = vmatprep.subr.bf16.mxu0 %v5151_v14  ;;  %3909 = vmatprep.subr.bf16.mxu1 %v6017_v23 }
 0x1b5   :  { %v4391_v61 = vpop.eup %4390 }
 0x1b6   :  { %v1483_v51 = vmul.f32 %v4391_v61, %v1482_v35 }
 0x1b7   :  { %1627 = vmatpush1.bf16.msra.mxu0 %v5158_v16  ;;  %3910 = vmatpush3.bf16.msra.mxu1 %v5176_v19 }
 0x1b8   :  { %v5299_v30 = vadd.f32 %v1484_v58, %v1483_v51  ;;  %1737 = vmatprep.subr.bf16.mxu0 %v4990_v29  ;;  %3915 = vmatprep.subr.bf16.mxu1 %v6017_v23  ;;  %v6019_v29 = vld [vmem:[#allocation13_spill] sm:$0xff] }
 0x1ba   :  { %v1486_v0 = vpack.c.bf16 %v5299_v30, %v5299_v30 }
 0x1bc   :  { %v1488_v27 = vrot.slane %v1486_v0, 4  ;;  %v1610_v44 = vrot.slane %v1486_v0, 3 }
 0x1be   :  { %1490 = vst [vmem:[#allocation4 + $0x8] sm:$0x80] %v1488_v27  ;;  %1645 = vmatmul.mubr.bf16.vlgmr.msra.gmra.mrb[20].mxu0 %v1610_v44  ;;  %3912 = vmatmul.mubr.bf16.vlgmr.msra.gmra.mrb[20].mxu1 %v1610_v44  ;;  %v6029_v44 = vld [vmem:[#allocation18_spill] sm:$0xff] }
 0x1bf   :  { %1738 = vmatpush1.bf16.msra.mxu0 %v4998_v32  ;;  %3916 = vmatpush3.bf16.msra.mxu1 %v5026_v43  ;;  %v6020_v32 = vld [vmem:[#allocation8_spill] sm:$0xff] }
 0x1c0   :  { %1739 = vmatprep.subr.bf16.mxu0 %v5001_v33  ;;  %3917 = vmatprep.subr.bf16.mxu1 %v6017_v23  ;;  %v6021_v33 = vld [vmem:[#allocation9_spill] sm:$0xff]  ;;  %v6026_v43 = vld [vmem:[#allocation12_spill] sm:$0xff] }
 0x1c1   :  { %1769 = vmatprep.mubr.bf16.mxu0 %v6018_v21  ;;  %3931 = vmatprep.mubr.msk.bf16.mxu1 %vm4648_vm0, %v6017_v23 }
 0x1c3   :  { %1740 = vmatpush1.bf16.msra.mxu0 %v5011_v36  ;;  %3918 = vmatpush3.bf16.msra.mxu1 %v5037_v47  ;;  %v6022_v36 = vld [vmem:[#allocation14_spill] sm:$0xff]  ;;  %v6027_v47 = vld [vmem:[#allocation16_spill] sm:$0xff] }
 0x1c4   :  { %1741 = vmatprep.subr.bf16.mxu0 %v5015_v38  ;;  %3919 = vmatprep.subr.bf16.mxu1 %v6017_v23  ;;  %v6023_v38 = vld [vmem:[#allocation10_spill] sm:$0xff] }
 0x1c7   :  { %1742 = vmatpush1.bf16.msra.mxu0 %v5021_v40  ;;  %3920 = vmatpush3.bf16.msra.mxu1 %v5051_v41  ;;  %v6024_v40 = vld [vmem:[#allocation11_spill] sm:$0xff]  ;;  %v6028_v41 = vld [vmem:[#allocation17_spill] sm:$0xff] }
 0x1c8   :  { %1743 = vmatprep.subr.bf16.mxu0 %v5024_v42  ;;  %3921 = vmatprep.subr.bf16.mxu1 %v6017_v23  ;;  %v6025_v42 = vld [vmem:[#allocation15_spill] sm:$0xff] }
 0x1cb   :  { %1744 = vmatpush1.bf16.msra.mxu0 %v5030_v45  ;;  %3922 = vmatpush3.bf16.msra.mxu1 %v5057_v52 }
 0x1cc   :  { %1745 = vmatprep.subr.bf16.mxu0 %v5033_v46  ;;  %3923 = vmatprep.subr.bf16.mxu1 %v6017_v23 }
 0x1cf   :  { %1746 = vmatpush1.bf16.msra.mxu0 %v5043_v48  ;;  %3924 = vmatpush3.bf16.msra.mxu1 %v5067_v55 }
 0x1d0   :  { %1747 = vmatprep.subr.bf16.mxu0 %v5046_v49  ;;  %3925 = vmatprep.subr.bf16.mxu1 %v6017_v23 }
 0x1d3   :  { %1748 = vmatpush1.bf16.msra.mxu0 %v5048_v50  ;;  %3926 = vmatpush3.bf16.msra.mxu1 %v6019_v29 }
 0x1d4   :  { %1749 = vmatprep.subr.bf16.mxu0 %v6020_v32  ;;  %3927 = vmatprep.subr.bf16.mxu1 %v6017_v23 }
 0x1d7   :  { %1750 = vmatpush1.bf16.msra.mxu0 %v6021_v33  ;;  %3928 = vmatpush3.bf16.msra.mxu1 %v6022_v36 }
 0x1d8   :  { %1751 = vmatprep.subr.bf16.mxu0 %v6023_v38  ;;  %3929 = vmatprep.subr.bf16.mxu1 %v6017_v23 }
 0x1db   :  { %1752 = vmatpush1.bf16.msra.mxu0 %v6024_v40  ;;  %3930 = vmatpush3.bf16.msra.mxu1 %v6025_v42 }
 0x1dc   :  { %1858 = vmatprep.subr.bf16.mxu0 %v6026_v43  ;;  %3935 = vmatprep.subr.bf16.mxu1 %v6017_v23 }
 0x26d   :  { %v1525_v45 = vpop.f32.mrb[16].mxu0  ;;  %v1566_v46 = vpop.f32.mrb[16].mxu1 }
 0x26e   :  { %v1526_v48 = vadd.f32 %v1525_v45, %v6027_v47  ;;  %v1527_v49 = vpop.f32.mrb[17].mxu0  ;;  %v3893_v50 = vpop.f32.mrb[17].mxu1  ;;  %v1567_v32 = vadd.f32 %v1566_v46, %v6029_v44 }
 0x26f   :  { %v1528_v24 = vadd.f32 %v1527_v49, %v6028_v41  ;;  %v1529_v26 = vpop.f32.mrb[18].mxu0  ;;  %v1569_v53 = vpop.f32.mrb[18].mxu1  ;;  %v1604_v49 = vrot.slane %v5258_v54, 6  ;;  %v1693_v54 = vld [vmem:[#allocation3 + $0x18] sm:$0x30] }
 0x270   :  { %v1576_v22 = vrot.slane %v1526_v48, 6  ;;  %v1530_v57 = vpop.f32.mrb[19].mxu0  ;;  %v3894_v28 = vpop.f32.mrb[19].mxu1  ;;  %v1596_v45 = vrot.slane %v1567_v32, 6  ;;  %v1574_v26 = vld [vmem:[#allocation2 + $0x10] sm:$0xc] }
 0x271   :  { %v1586_v25 = vrot.slane %v1528_v24, 6  ;;  %v1694_v32 = vld [vmem:[#allocation3 + $0x20] sm:$0x30] }
 0x272   :  { %v1578_v34 = vadd.f32 %v1576_v22, %v1572_v39  ;;  %v6030_v39 = vld [vmem:[#allocation19_spill] sm:$0xff] }
 0x273   :  { %v1588_v56 = vadd.f32 %v1586_v25, %v1573_v20 }
 0x274   :  { %v3580_v35 = vmul.f32 -1.442695, %v1578_v34 }
 0x275   :  { %v3581_v61 = vmul.f32 -1.442695, %v1588_v56 }
 0x276   :  { %4392 = vpow2.f32 %v3580_v35 }
 0x277   :  { %4394 = vpow2.f32 %v3581_v61 }
 0x280   :  { %v4393_v51 = vpop.eup %4392 }
 0x281   :  { %v4395_v58 = vpop.eup %4394  ;;  %v1582_v0 = vadd.f32 1.0, %v4393_v51 }
 0x282   :  { %v1592_v27 = vadd.f32 1.0, %v4395_v58 }
 0x283   :  { %4396 = vrcp.f32 %v1582_v0 }
 0x284   :  { %4398 = vrcp.f32 %v1592_v27 }
 0x28d   :  { %v4397_v48 = vpop.eup %4396 }
 0x28e   :  { %v4399_v50 = vpop.eup %4398  ;;  %v1598_v24 = vmul.f32 %v4397_v48, %v1596_v45 }
 0x28f   :  { %v1606_v53 = vmul.f32 %v4399_v50, %v1604_v49 }
 0x290   :  { %v1599_v22 = vadd.f32 %v1598_v24, %v1574_v26  ;;  %v1601_v24 = vsub.f32 1.0, %v4399_v50 }
 0x291   :  { %v1646_v57 = vpop.f32.mrb[20].mxu0  ;;  %v1687_v28 = vpop.f32.mrb[20].mxu1 }
 0x292   :  { %4400 = vtanh.f32 %v1599_v22  ;;  %v1647_v25 = vadd.f32 %v1646_v57, %v6030_v39  ;;  %v1648_v34 = vpop.f32.mrb[21].mxu0  ;;  %v3913_v20 = vpop.f32.mrb[21].mxu1 }
 0x293   :  { %v1649_v56 = vadd.f32 %v1648_v34, %v5254_v37  ;;  %v1650_v35 = vpop.f32.mrb[22].mxu0  ;;  %v1690_v46 = vpop.f32.mrb[22].mxu1 }
 0x294   :  { %v1697_v61 = vrot.slane %v1647_v25, 4  ;;  %v1651_v51 = vpop.f32.mrb[23].mxu0  ;;  %v3914_v58 = vpop.f32.mrb[23].mxu1 }
 0x295   :  { %v1707_v0 = vrot.slane %v1649_v56, 4  ;;  %v5434_v51 = vld [vmem:[#allocation5 + $0x60] ss:$12 sps:$4 sm:$0xff]   ;;  %v5438_v58 = vld [vmem:[#allocation5 + $0x7c] ss:$12 sps:$4 sm:$0xff]  }
 0x296   :  { %v1699_v27 = vadd.f32 %v1697_v61, %v1693_v54  ;;  %v5430_v61 = vld [vmem:[#allocation5 + $0x64] ss:$12 sps:$4 sm:$0xff]   ;;  %6032 = vst [vmem:[#allocation8_spill] sm:$0xff] %v5434_v51  ;;  %6033 = vst [vmem:[#allocation9_spill] sm:$0xff] %v5438_v58 }
 0x297   :  { %v1709_v45 = vadd.f32 %v1707_v0, %v1694_v32  ;;  %6031 = vst [vmem:[#allocation13_spill] sm:$0xff] %v5430_v61  ;;  %v5442_v54 = vld [vmem:[#allocation5 + $0x78] ss:$12 sps:$4 sm:$0xff]  }
 0x298   :  { %v3582_v48 = vmul.f32 -1.442695, %v1699_v27  ;;  %6034 = vst [vmem:[#allocation14_spill] sm:$0xff] %v5442_v54 }
 0x299   :  { %v3583_v49 = vmul.f32 -1.442695, %v1709_v45 }
 0x29a   :  { %4402 = vpow2.f32 %v3582_v48 }
 0x29b   :  { %4404 = vpow2.f32 %v3583_v49 }
 0x29c   :  { %v4401_v26 = vpop.eup %4400 }
 0x29d   :  { %v1602_v22 = vmul.f32 %v4401_v26, %v1601_v24  ;;  %v1819_v26 = vld [vmem:[#allocation2 + $0x8] sm:$0x30] }
 0x29f   :  { %v5346_v57 = vadd.f32 %v1606_v53, %v1602_v22  ;;  %v5422_v53 = vld [vmem:[#allocation5 + $0x4c] ss:$12 sps:$4 sm:$0xff]  }
 0x2a1   :  { %v1608_v34 = vpack.c.bf16 %v5346_v57, %v5346_v57 }
 0x2a3   :  { %1609 = vst [vmem:[#allocation4] sm:$0x2] %v1608_v34  ;;  %v1735_v25 = vrot.slane %v1608_v34, 1 }
 0x2a4   :  { %v4403_v20 = vpop.eup %4402 }
 0x2a5   :  { %v4405_v35 = vpop.eup %4404  ;;  %v1703_v56 = vadd.f32 1.0, %v4403_v20  ;;  %1770 = vmatmul.mubr.bf16.vlgmr.msra.gmra.mrb[24].mxu0 %v1735_v25  ;;  %3932 = vmatmul.mubr.bf16.vlgmr.msra.gmra.mrb[24].mxu1 %v1735_v25 }
 0x2a6   :  { %v1713_v46 = vadd.f32 1.0, %v4405_v35  ;;  %1859 = vmatpush1.bf16.msra.mxu0 %v5083_v59  ;;  %3936 = vmatpush3.bf16.msra.mxu1 %v5111_v3  ;;  %v1688_v59 = vadd.f32 %v1687_v28, %v5263_v31  ;;  %v5426_v28 = vld [vmem:[#allocation5 + $0x48] ss:$12 sps:$4 sm:$0xff]  }
 0x2a7   :  { %4406 = vrcp.f32 %v1703_v56  ;;  %1860 = vmatprep.subr.bf16.mxu0 %v5086_v60  ;;  %3937 = vmatprep.subr.bf16.mxu1 %v6017_v23 }
 0x2a8   :  { %4408 = vrcp.f32 %v1713_v46  ;;  %1890 = vmatprep.mubr.bf16.mxu0 %v6018_v21  ;;  %3951 = vmatprep.mubr.msk.bf16.mxu1 %vm4648_vm0, %v6017_v23  ;;  %v1717_v60 = vrot.slane %v1688_v59, 4 }
 0x2aa   :  { %1861 = vmatpush1.bf16.msra.mxu0 %v5094_v62  ;;  %3938 = vmatpush3.bf16.msra.mxu1 %v5122_v6  ;;  %v1725_v62 = vrot.slane %v5299_v30, 2  ;;  %v5419_v30 = vld [vmem:[#allocation5 + $0x38] ss:$12 sps:$4 sm:$0xff]  }
 0x2ab   :  { %1862 = vmatprep.subr.bf16.mxu0 %v5098_v63  ;;  %3939 = vmatprep.subr.bf16.mxu1 %v6017_v23  ;;  %v1695_v63 = vld [vmem:[#allocation3 + $0x28] sm:$0x30] }
 0x2ae   :  { %1863 = vmatpush1.bf16.msra.mxu0 %v5105_v1  ;;  %3940 = vmatpush3.bf16.msra.mxu1 %v5134_v9 }
 0x2af   :  { %1864 = vmatprep.subr.bf16.mxu0 %v5108_v2  ;;  %3941 = vmatprep.subr.bf16.mxu1 %v6017_v23 }
 0x2b1   :  { %v4407_v3 = vpop.eup %4406 }
 0x2b2   :  { %v4409_v50 = vpop.eup %4408  ;;  %v1719_v6 = vmul.f32 %v4407_v3, %v1717_v60  ;;  %1865 = vmatpush1.bf16.msra.mxu0 %v5115_v4  ;;  %3942 = vmatpush3.bf16.msra.mxu1 %v5144_v12  ;;  %v1850_v3 = vrot.slane %v5346_v57, 6  ;;  %v1939_v57 = vld [vmem:[#allocation3 + $0x18] sm:$0xc] }
 0x2b3   :  { %1866 = vmatprep.subr.bf16.mxu0 %v5118_v5  ;;  %3943 = vmatprep.subr.bf16.mxu1 %v6017_v23  ;;  %v1727_v1 = vmul.f32 %v4409_v50, %v1725_v62  ;;  %v1722_v2 = vsub.f32 1.0, %v4409_v50 }
 0x2b4   :  { %v1720_v9 = vadd.f32 %v1719_v6, %v1695_v63  ;;  %v1820_v6 = vld [vmem:[#allocation2 + $0x10] sm:$0x30] }
 0x2b6   :  { %4410 = vtanh.f32 %v1720_v9  ;;  %1867 = vmatpush1.bf16.msra.mxu0 %v5128_v7  ;;  %3944 = vmatpush3.bf16.msra.mxu1 %v5154_v15  ;;  %v5399_v15 = vld [vmem:[#allocation5 + $0x1c] ss:$12 sps:$4 sm:$0xff]  }
 0x2b7   :  { %1868 = vmatprep.subr.bf16.mxu0 %v5131_v8  ;;  %3945 = vmatprep.subr.bf16.mxu1 %v6017_v23  ;;  %v5387_v8 = vld [vmem:[#allocation5 + $0x4] ss:$12 sps:$4 sm:$0xff]  }
 0x2ba   :  { %1869 = vmatpush1.bf16.msra.mxu0 %v5138_v10  ;;  %3946 = vmatpush3.bf16.msra.mxu1 %v5162_v17  ;;  %v5409_v17 = vld [vmem:[#allocation5 + $0x20] ss:$12 sps:$4 sm:$0xff]  }
 0x2bb   :  { %1870 = vmatprep.subr.bf16.mxu0 %v5141_v11  ;;  %3947 = vmatprep.subr.bf16.mxu1 %v6017_v23 }
 0x2be   :  { %1871 = vmatpush1.bf16.msra.mxu0 %v5148_v13  ;;  %3948 = vmatpush3.bf16.msra.mxu1 %v5168_v18  ;;  %v5393_v13 = vld [vmem:[#allocation5] ss:$12 sps:$4 sm:$0xff]  }
 0x2bf   :  { %1872 = vmatprep.subr.bf16.mxu0 %v5151_v14  ;;  %3949 = vmatprep.subr.bf16.mxu1 %v6017_v23  ;;  %v5396_v14 = vld [vmem:[#allocation5 + $0x8] ss:$12 sps:$4 sm:$0xff]  }
 0x2c0   :  { %v4411_v4 = vpop.eup %4410  ;;  %v5412_v18 = vld [vmem:[#allocation5 + $0x34] ss:$12 sps:$4 sm:$0xff]  }
 0x2c1   :  { %v1723_v5 = vmul.f32 %v4411_v4, %v1722_v2 }
 0x2c2   :  { %1873 = vmatpush1.bf16.msra.mxu0 %v5158_v16  ;;  %3950 = vmatpush3.bf16.msra.mxu1 %v5176_v19  ;;  %v5406_v16 = vld [vmem:[#allocation5 + $0x18] ss:$12 sps:$4 sm:$0xff]   ;;  %v5416_v19 = vld [vmem:[#allocation5 + $0x30] ss:$12 sps:$4 sm:$0xff]  }
 0x2c3   :  { %v5385_v7 = vadd.f32 %v1727_v1, %v1723_v5  ;;  %1983 = vmatprep.subr.bf16.mxu0 %v5387_v8  ;;  %3955 = vmatprep.subr.bf16.mxu1 %v6017_v23 }
 0x2c5   :  { %v1729_v10 = vpack.c.bf16 %v5385_v7, %v5385_v7 }
 0x2c7   :  { %v1731_v11 = vrot.slane %v1729_v10, 4  ;;  %v1856_v12 = vrot.slane %v1729_v10, 2 }
 0x2c9   :  { %1733 = vst [vmem:[#allocation4 + $0x8] sm:$0x40] %v1731_v11  ;;  %1891 = vmatmul.mubr.bf16.vlgmr.msra.gmra.mrb[28].mxu0 %v1856_v12  ;;  %3952 = vmatmul.mubr.bf16.vlgmr.msra.gmra.mrb[28].mxu1 %v1856_v12 }
 0x2ca   :  { %1984 = vmatpush1.bf16.msra.mxu0 %v5393_v13  ;;  %3956 = vmatpush3.bf16.msra.mxu1 %v5396_v14 }
 0x2cb   :  { %1985 = vmatprep.subr.bf16.mxu0 %v5399_v15  ;;  %3957 = vmatprep.subr.bf16.mxu1 %v6017_v23 }
 0x2cc   :  { %2015 = vmatprep.mubr.bf16.mxu0 %v6018_v21  ;;  %3971 = vmatprep.mubr.msk.bf16.mxu1 %vm4648_vm0, %v6017_v23 }
 0x2ce   :  { %1986 = vmatpush1.bf16.msra.mxu0 %v5406_v16  ;;  %3958 = vmatpush3.bf16.msra.mxu1 %v5409_v17 }
 0x2cf   :  { %1987 = vmatprep.subr.bf16.mxu0 %v5412_v18  ;;  %3959 = vmatprep.subr.bf16.mxu1 %v6017_v23 }
 0x2d2   :  { %1988 = vmatpush1.bf16.msra.mxu0 %v5416_v19  ;;  %3960 = vmatpush3.bf16.msra.mxu1 %v5419_v30 }
 0x2d3   :  { %1989 = vmatprep.subr.bf16.mxu0 %v5422_v53  ;;  %3961 = vmatprep.subr.bf16.mxu1 %v6017_v23 }
 0x2d6   :  { %1990 = vmatpush1.bf16.msra.mxu0 %v5426_v28  ;;  %3962 = vmatpush3.bf16.msra.mxu1 %v5057_v52  ;;  %v5446_v52 = vld [vmem:[#allocation5 + $0x94] ss:$12 sps:$4 sm:$0xff]  }
 0x2d7   :  { %1991 = vmatprep.subr.bf16.mxu0 %v5430_v61  ;;  %3963 = vmatprep.subr.bf16.mxu1 %v6017_v23  ;;  %6035 = vst [vmem:[#allocation10_spill] sm:$0xff] %v5446_v52 }
 0x2da   :  { %1992 = vmatpush1.bf16.msra.mxu0 %v5434_v51  ;;  %3964 = vmatpush3.bf16.msra.mxu1 %v5067_v55 }
 0x2db   :  { %1993 = vmatprep.subr.bf16.mxu0 %v5438_v58  ;;  %3965 = vmatprep.subr.bf16.mxu1 %v6017_v23 }
 0x2de   :  { %1994 = vmatpush1.bf16.msra.mxu0 %v5442_v54  ;;  %3966 = vmatpush3.bf16.msra.mxu1 %v6019_v29 }
 0x2df   :  { %1995 = vmatprep.subr.bf16.mxu0 %v5446_v52  ;;  %3967 = vmatprep.subr.bf16.mxu1 %v6017_v23 }
 0x2e2   :  { %1996 = vmatpush1.bf16.msra.mxu0 %v6021_v33  ;;  %3968 = vmatpush3.bf16.msra.mxu1 %v6022_v36 }
 0x2e3   :  { %1997 = vmatprep.subr.bf16.mxu0 %v6023_v38  ;;  %3969 = vmatprep.subr.bf16.mxu1 %v6017_v23 }
 0x2e6   :  { %1998 = vmatpush1.bf16.msra.mxu0 %v6024_v40  ;;  %3970 = vmatpush3.bf16.msra.mxu1 %v6025_v42  ;;  %v1818_v40 = vld [vmem:[#allocation2] sm:$0x30] }
 0x2e7   :  { %2104 = vmatprep.subr.bf16.mxu0 %v6026_v43  ;;  %3975 = vmatprep.subr.bf16.mxu1 %v6017_v23 }
 0x378   :  { %v1771_v55 = vpop.f32.mrb[24].mxu0  ;;  %v1812_v29 = vpop.f32.mrb[24].mxu1 }
 0x379   :  { %v1772_v0 = vadd.f32 %v1771_v55, %v6027_v47  ;;  %v1773_v27 = vpop.f32.mrb[25].mxu0  ;;  %v3933_v33 = vpop.f32.mrb[25].mxu1  ;;  %v1813_v46 = vadd.f32 %v1812_v29, %v6029_v44 }
 0x37a   :  { %v1774_v36 = vadd.f32 %v1773_v27, %v6028_v41  ;;  %v1775_v32 = vpop.f32.mrb[26].mxu0  ;;  %v1815_v38 = vpop.f32.mrb[26].mxu1 }
 0x37b   :  { %v1822_v45 = vrot.slane %v1772_v0, 4  ;;  %v1776_v48 = vpop.f32.mrb[27].mxu0  ;;  %v3934_v49 = vpop.f32.mrb[27].mxu1  ;;  %v1842_v59 = vrot.slane %v1813_v46, 4  ;;  %v1940_v32 = vld [vmem:[#allocation3 + $0x20] sm:$0xc] }
 0x37c   :  { %v1832_v24 = vrot.slane %v1774_v36, 4  ;;  %v5474_v46 = vld [vmem:[#allocation5 + $0xdc] ss:$12 sps:$4 sm:$0xff]  }
 0x37d   :  { %v1824_v42 = vadd.f32 %v1822_v45, %v1818_v40 }
 0x37e   :  { %v1834_v43 = vadd.f32 %v1832_v24, %v1819_v26 }
 0x37f   :  { %v3584_v22 = vmul.f32 -1.442695, %v1824_v42 }
 0x380   :  { %v3585_v34 = vmul.f32 -1.442695, %v1834_v43 }
 0x381   :  { %4412 = vpow2.f32 %v3584_v22 }
 0x382   :  { %4414 = vpow2.f32 %v3585_v34 }
 0x38b   :  { %v4413_v25 = vpop.eup %4412 }
 0x38c   :  { %v4415_v20 = vpop.eup %4414  ;;  %v1828_v35 = vadd.f32 1.0, %v4413_v25 }
 0x38d   :  { %v1838_v56 = vadd.f32 1.0, %v4415_v20 }
 0x38e   :  { %4416 = vrcp.f32 %v1828_v35  ;;  %v5468_v35 = vld [vmem:[#allocation5 + $0xc0] ss:$12 sps:$4 sm:$0xff]  }
 0x38f   :  { %4418 = vrcp.f32 %v1838_v56  ;;  %v5471_v56 = vld [vmem:[#allocation5 + $0xc8] ss:$12 sps:$4 sm:$0xff]  }
 0x398   :  { %v4417_v60 = vpop.eup %4416 }
 0x399   :  { %v4419_v62 = vpop.eup %4418  ;;  %v1844_v50 = vmul.f32 %v4417_v60, %v1842_v59  ;;  %v5481_v59 = vld [vmem:[#allocation5 + $0xd8] ss:$12 sps:$4 sm:$0xff]   ;;  %v5484_v60 = vld [vmem:[#allocation5 + $0xe0] ss:$12 sps:$4 sm:$0xff]  }
 0x39a   :  { %v1852_v63 = vmul.f32 %v4419_v62, %v1850_v3  ;;  %v1847_v49 = vsub.f32 1.0, %v4419_v62  ;;  %v5487_v3 = vld [vmem:[#allocation5 + $0xf4] ss:$12 sps:$4 sm:$0xff]  }
 0x39b   :  { %v1845_v1 = vadd.f32 %v1844_v50, %v1820_v6  ;;  %v5492_v50 = vld [vmem:[#allocation5 + $0xf0] ss:$12 sps:$4 sm:$0xff]   ;;  %v5495_v6 = vld [vmem:[#allocation5 + $0xf8] ss:$12 sps:$4 sm:$0xff]  }
 0x39c   :  { %v1892_v9 = vpop.f32.mrb[28].mxu0  ;;  %v1933_v2 = vpop.f32.mrb[28].mxu1 }
 0x39d   :  { %4420 = vtanh.f32 %v1845_v1  ;;  %v1893_v4 = vadd.f32 %v1892_v9, %v6030_v39  ;;  %v1894_v5 = vpop.f32.mrb[29].mxu0  ;;  %v3953_v10 = vpop.f32.mrb[29].mxu1  ;;  %v1934_v62 = vadd.f32 %v1933_v2, %v5263_v31 }
 0x39e   :  { %v1895_v11 = vadd.f32 %v1894_v5, %v5254_v37  ;;  %v1896_v12 = vpop.f32.mrb[30].mxu0  ;;  %v1936_v55 = vpop.f32.mrb[30].mxu1  ;;  %v5503_v10 = vld [vmem:[#allocation5 + $0x108] ss:$12 sps:$4 sm:$0xff]  }
 0x39f   :  { %v1943_v29 = vrot.slane %v1893_v4, 6  ;;  %v1897_v0 = vpop.f32.mrb[31].mxu0  ;;  %v3954_v27 = vpop.f32.mrb[31].mxu1  ;;  %v1963_v1 = vrot.slane %v1934_v62, 6  ;;  %v1971_v4 = vrot.slane %v5385_v7, 2 }
 0x3a0   :  { %v1953_v33 = vrot.slane %v1895_v11, 6  ;;  %v5506_v11 = vld [vmem:[#allocation5 + $0x110] ss:$12 sps:$4 sm:$0xff]   ;;  %v1941_v12 = vld [vmem:[#allocation3 + $0x28] sm:$0xc] }
 0x3a1   :  { %v1945_v36 = vadd.f32 %v1943_v29, %v1939_v57  ;;  %v5509_v55 = vld [vmem:[#allocation5 + $0x124] ss:$12 sps:$4 sm:$0xff]   ;;  %v5513_v7 = vld [vmem:[#allocation5 + $0x120] ss:$12 sps:$4 sm:$0xff]   ;;  %v5516_v27 = vld [vmem:[#allocation5 + $0x128] ss:$12 sps:$4 sm:$0xff]  }
 0x3a2   :  { %v1955_v38 = vadd.f32 %v1953_v33, %v1940_v32  ;;  %v5519_v57 = vld [vmem:[#allocation5 + $0x13c] ss:$12 sps:$4 sm:$0xff]   ;;  %v5523_v33 = vld [vmem:[#allocation5 + $0x138] ss:$12 sps:$4 sm:$0xff]   ;;  %v5529_v32 = vld [vmem:[#allocation5 + $0x154] ss:$12 sps:$4 sm:$0xff]  }
 0x3a3   :  { %v3586_v45 = vmul.f32 -1.442695, %v1945_v36  ;;  %v5526_v36 = vld [vmem:[#allocation5 + $0x140] ss:$12 sps:$4 sm:$0xff]   ;;  %v5571_v62 = vld [vmem:[#allocation5 + $0x50] ss:$12 sps:$4 sm:$0xff]  }
 0x3a4   :  { %v3587_v48 = vmul.f32 -1.442695, %v1955_v38  ;;  %v5533_v38 = vld [vmem:[#allocation5 + $0x150] ss:$12 sps:$4 sm:$0xff]  }
 0x3a5   :  { %4422 = vpow2.f32 %v3586_v45  ;;  %v5536_v45 = vld [vmem:[#allocation5 + $0x158] ss:$12 sps:$4 sm:$0xff]  }
 0x3a6   :  { %4424 = vpow2.f32 %v3587_v48  ;;  %v5539_v48 = vld [vmem:[#allocation5 + $0x16c] ss:$12 sps:$4 sm:$0xff]  }
 0x3a7   :  { %v4421_v40 = vpop.eup %4420 }
 0x3a8   :  { %v1848_v24 = vmul.f32 %v4421_v40, %v1847_v49 }
 0x3aa   :  { %v5464_v42 = vadd.f32 %v1852_v63, %v1848_v24  ;;  %v5498_v63 = vld [vmem:[#allocation5 + $0x10c] ss:$12 sps:$4 sm:$0xff]  }
 0x3ac   :  { %v1854_v26 = vpack.c.bf16 %v5464_v42, %v5464_v42 }
 0x3ae   :  { %1855 = vst [vmem:[#allocation4] sm:$0x4] %v1854_v26  ;;  %v1981_v43 = vrot.slane %v1854_v26, 2  ;;  %v5543_v26 = vld [vmem:[#allocation5 + $0x168] ss:$12 sps:$4 sm:$0xff]  }
 0x3af   :  { %v4423_v22 = vpop.eup %4422 }
 0x3b0   :  { %v4425_v34 = vpop.eup %4424  ;;  %v1949_v25 = vadd.f32 1.0, %v4423_v22  ;;  %2016 = vmatmul.mubr.bf16.vlgmr.msra.gmra.mrb[32].mxu0 %v1981_v43  ;;  %3972 = vmatmul.mubr.bf16.vlgmr.msra.gmra.mrb[32].mxu1 %v1981_v43  ;;  %v5546_v43 = vld [vmem:[#allocation5 + $0x170] ss:$12 sps:$4 sm:$0xff]  }
 0x3b1   :  { %v1959_v20 = vadd.f32 1.0, %v4425_v34  ;;  %2105 = vmatpush1.bf16.msra.mxu0 %v5468_v35  ;;  %3976 = vmatpush3.bf16.msra.mxu1 %v5471_v56 }
 0x3b2   :  { %4426 = vrcp.f32 %v1949_v25  ;;  %2106 = vmatprep.subr.bf16.mxu0 %v5474_v46  ;;  %3977 = vmatprep.subr.bf16.mxu1 %v6017_v23 }
 0x3b3   :  { %4428 = vrcp.f32 %v1959_v20  ;;  %2136 = vmatprep.mubr.bf16.mxu0 %v6018_v21  ;;  %3991 = vmatprep.mubr.msk.bf16.mxu1 %vm4648_vm0, %v6017_v23 }
 0x3b5   :  { %2107 = vmatpush1.bf16.msra.mxu0 %v5481_v59  ;;  %3978 = vmatpush3.bf16.msra.mxu1 %v5484_v60 }
 0x3b6   :  { %2108 = vmatprep.subr.bf16.mxu0 %v5487_v3  ;;  %3979 = vmatprep.subr.bf16.mxu1 %v6017_v23 }
 0x3b9   :  { %2109 = vmatpush1.bf16.msra.mxu0 %v5492_v50  ;;  %3980 = vmatpush3.bf16.msra.mxu1 %v5495_v6 }
 0x3ba   :  { %2110 = vmatprep.subr.bf16.mxu0 %v5498_v63  ;;  %3981 = vmatprep.subr.bf16.mxu1 %v6017_v23 }
 0x3bc   :  { %v4427_v9 = vpop.eup %4426 }
 0x3bd   :  { %v4429_v5 = vpop.eup %4428  ;;  %v1965_v2 = vmul.f32 %v4427_v9, %v1963_v1  ;;  %2111 = vmatpush1.bf16.msra.mxu0 %v5503_v10  ;;  %3982 = vmatpush3.bf16.msra.mxu1 %v5506_v11  ;;  %v5577_v1 = vld [vmem:[#allocation5 + $0x68] ss:$12 sps:$4 sm:$0xff]   ;;  %v5583_v9 = vld [vmem:[#allocation5 + $0x80] ss:$12 sps:$4 sm:$0xff]  }
 0x3be   :  { %2112 = vmatprep.subr.bf16.mxu0 %v5509_v55  ;;  %3983 = vmatprep.subr.bf16.mxu1 %v6017_v23  ;;  %v1973_v29 = vmul.f32 %v4429_v5, %v1971_v4  ;;  %v1968_v49 = vsub.f32 1.0, %v4429_v5  ;;  %6036 = vst [vmem:[#allocation11_spill] sm:$0xff] %v5577_v1  ;;  %6037 = vst [vmem:[#allocation15_spill] sm:$0xff] %v5583_v9  ;;  %v5588_v4 = vld [vmem:[#allocation5 + $0x90] ss:$12 sps:$4 sm:$0xff]  }
 0x3bf   :  { %v1966_v0 = vadd.f32 %v1965_v2, %v1941_v12  ;;  %6038 = vst [vmem:[#allocation12_spill] sm:$0xff] %v5588_v4  ;;  %v5591_v5 = vld [vmem:[#allocation5 + $0x98] ss:$12 sps:$4 sm:$0xff]   ;;  %v5598_v12 = vld [vmem:[#allocation5 + $0xa8] ss:$12 sps:$4 sm:$0xff]  }
 0x3c0   :  { %6039 = vst [vmem:[#allocation19_spill] sm:$0xff] %v5591_v5  ;;  %v5594_v2 = vld [vmem:[#allocation5 + $0xac] ss:$12 sps:$4 sm:$0xff]   ;;  %6041 = vst [vmem:[#allocation21_spill] sm:$0xff] %v5598_v12 }
 0x3c1   :  { %4430 = vtanh.f32 %v1966_v0  ;;  %2113 = vmatpush1.bf16.msra.mxu0 %v5513_v7  ;;  %3984 = vmatpush3.bf16.msra.mxu1 %v5516_v27  ;;  %6040 = vst [vmem:[#allocation20_spill] sm:$0xff] %v5594_v2  ;;  %v5604_v0 = vld [vmem:[#allocation5 + $0xc4] ss:$12 sps:$4 sm:$0xff]  }
 0x3c2   :  { %2114 = vmatprep.subr.bf16.mxu0 %v5519_v57  ;;  %3985 = vmatprep.subr.bf16.mxu1 %v6017_v23  ;;  %6043 = vst [vmem:[#allocation23_spill] sm:$0xff] %v5604_v0 }
 0x3c5   :  { %2115 = vmatpush1.bf16.msra.mxu0 %v5523_v33  ;;  %3986 = vmatpush3.bf16.msra.mxu1 %v5526_v36 }
 0x3c6   :  { %2116 = vmatprep.subr.bf16.mxu0 %v5529_v32  ;;  %3987 = vmatprep.subr.bf16.mxu1 %v6017_v23 }
 0x3c9   :  { %2117 = vmatpush1.bf16.msra.mxu0 %v5533_v38  ;;  %3988 = vmatpush3.bf16.msra.mxu1 %v5536_v45 }
 0x3ca   :  { %2118 = vmatprep.subr.bf16.mxu0 %v5539_v48  ;;  %3989 = vmatprep.subr.bf16.mxu1 %v6017_v23 }
 0x3cb   :  { %v4431_v40 = vpop.eup %4430 }
 0x3cc   :  { %v1969_v24 = vmul.f32 %v4431_v40, %v1968_v49 }
 0x3cd   :  { %2119 = vmatpush1.bf16.msra.mxu0 %v5543_v26  ;;  %3990 = vmatpush3.bf16.msra.mxu1 %v5546_v43 }
 0x3ce   :  { %v5549_v22 = vadd.f32 %v1973_v29, %v1969_v24  ;;  %2220 = vmatprep.subr.bf16.mxu0 %v5387_v8  ;;  %3995 = vmatprep.subr.bf16.mxu1 %v6017_v23  ;;  %v5601_v29 = vld [vmem:[#allocation5 + $0xb0] ss:$12 sps:$4 sm:$0xff]  }
 0x3cf   :  { %6042 = vst [vmem:[#allocation22_spill] sm:$0xff] %v5601_v29 }
 0x3d0   :  { %v1975_v34 = vpack.c.bf16 %v5549_v22, %v5549_v22 }
 0x3d2   :  { %v1977_v25 = vrot.slane %v1975_v34, 4  ;;  %v2102_v20 = vrot.slane %v1975_v34, 1 }
 0x3d4   :  { %1979 = vst [vmem:[#allocation4 + $0x8] sm:$0x20] %v1977_v25  ;;  %2137 = vmatmul.mubr.bf16.vlgmr.msra.gmra.mrb[36].mxu0 %v2102_v20  ;;  %3992 = vmatmul.mubr.bf16.vlgmr.msra.gmra.mrb[36].mxu1 %v2102_v20 }
 0x3d5   :  { %2221 = vmatpush1.bf16.msra.mxu0 %v5393_v13  ;;  %3996 = vmatpush3.bf16.msra.mxu1 %v5396_v14 }
 0x3d6   :  { %2222 = vmatprep.subr.bf16.mxu0 %v5399_v15  ;;  %3997 = vmatprep.subr.bf16.mxu1 %v6017_v23 }
 0x3d7   :  { %2252 = vmatprep.mubr.bf16.mxu0 %v6018_v21  ;;  %4011 = vmatprep.mubr.msk.bf16.mxu1 %vm4648_vm0, %v6017_v23 }
 0x3d9   :  { %2223 = vmatpush1.bf16.msra.mxu0 %v5406_v16  ;;  %3998 = vmatpush3.bf16.msra.mxu1 %v5409_v17 }
 0x3da   :  { %2224 = vmatprep.subr.bf16.mxu0 %v5412_v18  ;;  %3999 = vmatprep.subr.bf16.mxu1 %v6017_v23 }
 0x3dd   :  { %2225 = vmatpush1.bf16.msra.mxu0 %v5416_v19  ;;  %4000 = vmatpush3.bf16.msra.mxu1 %v5419_v30 }
 0x3de   :  { %2226 = vmatprep.subr.bf16.mxu0 %v5422_v53  ;;  %4001 = vmatprep.subr.bf16.mxu1 %v6017_v23 }
 0x3e1   :  { %2227 = vmatpush1.bf16.msra.mxu0 %v5426_v28  ;;  %4002 = vmatpush3.bf16.msra.mxu1 %v5571_v62 }
 0x3e2   :  { %2228 = vmatprep.subr.bf16.mxu0 %v5430_v61  ;;  %4003 = vmatprep.subr.bf16.mxu1 %v6017_v23 }
 0x3e5   :  { %2229 = vmatpush1.bf16.msra.mxu0 %v5434_v51  ;;  %4004 = vmatpush3.bf16.msra.mxu1 %v5577_v1 }
 0x3e6   :  { %2230 = vmatprep.subr.bf16.mxu0 %v5438_v58  ;;  %4005 = vmatprep.subr.bf16.mxu1 %v6017_v23  ;;  %v2065_v58 = vld [vmem:[#allocation2 + $0x8] sm:$0xc0] }
 0x3e9   :  { %2231 = vmatpush1.bf16.msra.mxu0 %v5442_v54  ;;  %4006 = vmatpush3.bf16.msra.mxu1 %v5583_v9 }
 0x3ea   :  { %2232 = vmatprep.subr.bf16.mxu0 %v5446_v52  ;;  %4007 = vmatprep.subr.bf16.mxu1 %v6017_v23 }
 0x3ed   :  { %2233 = vmatpush1.bf16.msra.mxu0 %v5588_v4  ;;  %4008 = vmatpush3.bf16.msra.mxu1 %v5591_v5 }
 0x3ee   :  { %2234 = vmatprep.subr.bf16.mxu0 %v5594_v2  ;;  %4009 = vmatprep.subr.bf16.mxu1 %v6017_v23 }
 0x3f1   :  { %2235 = vmatpush1.bf16.msra.mxu0 %v5598_v12  ;;  %4010 = vmatpush3.bf16.msra.mxu1 %v5601_v29  ;;  %v2064_v29 = vld [vmem:[#allocation2] sm:$0xc0] }
 0x3f2   :  { %2333 = vmatprep.subr.bf16.mxu0 %v5604_v0  ;;  %4015 = vmatprep.subr.bf16.mxu1 %v6017_v23 }
 0x483   :  { %v2017_v49 = vpop.f32.mrb[32].mxu0  ;;  %v2058_v40 = vpop.f32.mrb[32].mxu1 }
 0x484   :  { %v2018_v24 = vadd.f32 %v2017_v49, %v6027_v47  ;;  %v2019_v34 = vpop.f32.mrb[33].mxu0  ;;  %v3973_v25 = vpop.f32.mrb[33].mxu1 }
 0x485   :  { %v2020_v20 = vadd.f32 %v2019_v34, %v6028_v41  ;;  %v2021_v2 = vpop.f32.mrb[34].mxu0  ;;  %v2061_v12 = vpop.f32.mrb[34].mxu1 }
 0x486   :  { %v2068_v5 = vrot.slane %v2018_v24, 2  ;;  %v2022_v4 = vpop.f32.mrb[35].mxu0  ;;  %v3974_v52 = vpop.f32.mrb[35].mxu1  ;;  %v2059_v2 = vadd.f32 %v2058_v40, %v6029_v44 }
 0x487   :  { %v2078_v9 = vrot.slane %v2020_v20, 2  ;;  %v2096_v52 = vrot.slane %v5464_v42, 6 }
 0x488   :  { %v2070_v54 = vadd.f32 %v2068_v5, %v2064_v29  ;;  %v2088_v12 = vrot.slane %v2059_v2, 2  ;;  %v2066_v29 = vld [vmem:[#allocation2 + $0x10] sm:$0xc0] }
 0x489   :  { %v2080_v0 = vadd.f32 %v2078_v9, %v2065_v58 }
 0x48a   :  { %v3588_v1 = vmul.f32 -1.442695, %v2070_v54 }
 0x48b   :  { %v3589_v51 = vmul.f32 -1.442695, %v2080_v0 }
 0x48c   :  { %4432 = vpow2.f32 %v3588_v1 }
 0x48d   :  { %4434 = vpow2.f32 %v3589_v51 }
 0x496   :  { %v4433_v61 = vpop.eup %4432 }
 0x497   :  { %v4435_v49 = vpop.eup %4434  ;;  %v2074_v47 = vadd.f32 1.0, %v4433_v61 }
 0x498   :  { %v2084_v25 = vadd.f32 1.0, %v4435_v49 }
 0x499   :  { %4436 = vrcp.f32 %v2074_v47  ;;  %v2185_v47 = vld [vmem:[#allocation3 + $0x18] sm:$0x3] }
 0x49a   :  { %4438 = vrcp.f32 %v2084_v25  ;;  %v2186_v25 = vld [vmem:[#allocation3 + $0x20] sm:$0x3] }
 0x4a3   :  { %v4437_v4 = vpop.eup %4436 }
 0x4a4   :  { %v4439_v24 = vpop.eup %4438  ;;  %v2090_v5 = vmul.f32 %v4437_v4, %v2088_v12 }
 0x4a5   :  { %v2098_v58 = vmul.f32 %v4439_v24, %v2096_v52 }
 0x4a6   :  { %v2091_v54 = vadd.f32 %v2090_v5, %v2066_v29  ;;  %v2093_v5 = vsub.f32 1.0, %v4439_v24 }
 0x4a7   :  { %v2138_v9 = vpop.f32.mrb[36].mxu0  ;;  %v2179_v1 = vpop.f32.mrb[36].mxu1 }
 0x4a8   :  { %4440 = vtanh.f32 %v2091_v54  ;;  %v2139_v51 = vadd.f32 %v2138_v9, %v6030_v39  ;;  %v2140_v61 = vpop.f32.mrb[37].mxu0  ;;  %v3993_v0 = vpop.f32.mrb[37].mxu1  ;;  %v2180_v24 = vadd.f32 %v2179_v1, %v5263_v31 }
 0x4a9   :  { %v2141_v34 = vadd.f32 %v2140_v61, %v5254_v37  ;;  %v2142_v40 = vpop.f32.mrb[38].mxu0  ;;  %v2182_v20 = vpop.f32.mrb[38].mxu1 }
 0x4aa   :  { %v2188_v49 = vadd.f32 %v2185_v47, %v2139_v51  ;;  %v2143_v42 = vpop.f32.mrb[39].mxu0  ;;  %v3994_v2 = vpop.f32.mrb[39].mxu1 }
 0x4ab   :  { %v2195_v12 = vadd.f32 %v2186_v25, %v2141_v34  ;;  %v2208_v34 = vrot.slane %v5549_v22, 2  ;;  %v2187_v42 = vld [vmem:[#allocation3 + $0x28] sm:$0x3] }
 0x4ac   :  { %v3590_v4 = vmul.f32 -1.442695, %v2188_v49 }
 0x4ad   :  { %v3591_v52 = vmul.f32 -1.442695, %v2195_v12 }
 0x4ae   :  { %4442 = vpow2.f32 %v3590_v4 }
 0x4af   :  { %4444 = vpow2.f32 %v3591_v52 }
 0x4b2   :  { %v4441_v29 = vpop.eup %4440 }
 0x4b3   :  { %v2094_v54 = vmul.f32 %v4441_v29, %v2093_v5 }
 0x4b5   :  { %v5614_v9 = vadd.f32 %v2098_v58, %v2094_v54  ;;  %v6044_v54 = vld [vmem:[#allocation13_spill] sm:$0xff] }
 0x4b7   :  { %v2100_v0 = vpack.c.bf16 %v5614_v9, %v5614_v9 }
 0x4b8   :  { %v4443_v61 = vpop.eup %4442 }
 0x4b9   :  { %v4445_v40 = vpop.eup %4444  ;;  %v2192_v20 = vadd.f32 1.0, %v4443_v61  ;;  %2101 = vst [vmem:[#allocation4] sm:$0x8] %v2100_v0  ;;  %v2218_v51 = vrot.slane %v2100_v0, 3  ;;  %v6045_v0 = vld [vmem:[#allocation8_spill] sm:$0xff]  ;;  %v6046_v61 = vld [vmem:[#allocation11_spill] sm:$0xff] }
 0x4ba   :  { %v2199_v47 = vadd.f32 1.0, %v4445_v40  ;;  %v6047_v40 = vld [vmem:[#allocation9_spill] sm:$0xff] }
 0x4bb   :  { %4446 = vrcp.f32 %v2192_v20  ;;  %2253 = vmatmul.mubr.bf16.vlgmr.msra.gmra.mrb[40].mxu0 %v2218_v51  ;;  %4012 = vmatmul.mubr.bf16.vlgmr.msra.gmra.mrb[40].mxu1 %v2218_v51  ;;  %v6048_v20 = vld [vmem:[#allocation14_spill] sm:$0xff]  ;;  %v6049_v51 = vld [vmem:[#allocation15_spill] sm:$0xff] }
 0x4bc   :  { %4448 = vrcp.f32 %v2199_v47  ;;  %2334 = vmatpush1.bf16.msra.mxu0 %v5468_v35  ;;  %4016 = vmatpush3.bf16.msra.mxu1 %v5471_v56  ;;  %v6050_v47 = vld [vmem:[#allocation10_spill] sm:$0xff] }
 0x4bd   :  { %2335 = vmatprep.subr.bf16.mxu0 %v5474_v46  ;;  %4017 = vmatprep.subr.bf16.mxu1 %v6017_v23 }
 0x4be   :  { %2365 = vmatprep.mubr.bf16.mxu0 %v6018_v21  ;;  %4031 = vmatprep.mubr.msk.bf16.mxu1 %vm4648_vm0, %v6017_v23 }
 0x4c0   :  { %2336 = vmatpush1.bf16.msra.mxu0 %v5481_v59  ;;  %4018 = vmatpush3.bf16.msra.mxu1 %v5484_v60 }
 0x4c1   :  { %2337 = vmatprep.subr.bf16.mxu0 %v5487_v3  ;;  %4019 = vmatprep.subr.bf16.mxu1 %v6017_v23 }
 0x4c4   :  { %2338 = vmatpush1.bf16.msra.mxu0 %v5492_v50  ;;  %4020 = vmatpush3.bf16.msra.mxu1 %v5495_v6 }
 0x4c5   :  { %v4447_v58 = vpop.eup %4446  ;;  %2339 = vmatprep.subr.bf16.mxu0 %v5498_v63  ;;  %4021 = vmatprep.subr.bf16.mxu1 %v6017_v23 }
 0x4c6   :  { %v4449_v49 = vpop.eup %4448  ;;  %v2202_v25 = vmul.f32 %v4447_v58, %v2180_v24  ;;  %v6051_v24 = vld [vmem:[#allocation12_spill] sm:$0xff]  ;;  %v6052_v58 = vld [vmem:[#allocation19_spill] sm:$0xff] }
 0x4c7   :  { %v2210_v2 = vmul.f32 %v4449_v49, %v2208_v34  ;;  %v2205_v22 = vsub.f32 1.0, %v4449_v49  ;;  %v6053_v34 = vld [vmem:[#allocation20_spill] sm:$0xff]  ;;  %v6054_v49 = vld [vmem:[#allocation21_spill] sm:$0xff] }
 0x4c8   :  { %v2203_v12 = vadd.f32 %v2202_v25, %v2187_v42  ;;  %2340 = vmatpush1.bf16.msra.mxu0 %v5503_v10  ;;  %4022 = vmatpush3.bf16.msra.mxu1 %v5506_v11  ;;  %v6055_v25 = vld [vmem:[#allocation22_spill] sm:$0xff]  ;;  %v6056_v42 = vld [vmem:[#allocation23_spill] sm:$0xff] }
 0x4c9   :  { %2341 = vmatprep.subr.bf16.mxu0 %v5509_v55  ;;  %4023 = vmatprep.subr.bf16.mxu1 %v6017_v23 }
 0x4ca   :  { %4450 = vtanh.f32 %v2203_v12 }
 0x4cc   :  { %2342 = vmatpush1.bf16.msra.mxu0 %v5513_v7  ;;  %4024 = vmatpush3.bf16.msra.mxu1 %v5516_v27 }
 0x4cd   :  { %2343 = vmatprep.subr.bf16.mxu0 %v5519_v57  ;;  %4025 = vmatprep.subr.bf16.mxu1 %v6017_v23 }
 0x4d0   :  { %2344 = vmatpush1.bf16.msra.mxu0 %v5523_v33  ;;  %4026 = vmatpush3.bf16.msra.mxu1 %v5526_v36 }
 0x4d1   :  { %2345 = vmatprep.subr.bf16.mxu0 %v5529_v32  ;;  %4027 = vmatprep.subr.bf16.mxu1 %v6017_v23 }
 0x4d4   :  { %v4451_v1 = vpop.eup %4450  ;;  %2346 = vmatpush1.bf16.msra.mxu0 %v5533_v38  ;;  %4028 = vmatpush3.bf16.msra.mxu1 %v5536_v45 }
 0x4d5   :  { %2347 = vmatprep.subr.bf16.mxu0 %v5539_v48  ;;  %4029 = vmatprep.subr.bf16.mxu1 %v6017_v23  ;;  %v2206_v4 = vmul.f32 %v4451_v1, %v2205_v22  ;;  %v6057_v22 = vld [vmem:[#allocation16_spill] sm:$0xff] }
 0x4d7   :  { %v5651_v52 = vadd.f32 %v2210_v2, %v2206_v4 }
 0x4d8   :  { %2348 = vmatpush1.bf16.msra.mxu0 %v5543_v26  ;;  %4030 = vmatpush3.bf16.msra.mxu1 %v5546_v43 }
 0x4d9   :  { %v2212_v5 = vpack.c.bf16 %v5651_v52, %v5651_v52  ;;  %2452 = vmatprep.subr.bf16.mxu0 %v5387_v8  ;;  %4035 = vmatprep.subr.bf16.mxu1 %v6017_v23 }
 0x4db   :  { %v2214_v29 = vrot.slane %v2212_v5, 4  ;;  %2366 = vmatmul.mubr.bf16.vlgmr.msra.gmra.mrb[44].mxu0 %v2212_v5  ;;  %4032 = vmatmul.mubr.bf16.vlgmr.msra.gmra.mrb[44].mxu1 %v2212_v5 }
 0x4dc   :  { %2453 = vmatpush1.bf16.msra.mxu0 %v5393_v13  ;;  %4036 = vmatpush3.bf16.msra.mxu1 %v5396_v14 }
 0x4dd   :  { %2216 = vst [vmem:[#allocation4 + $0x8] sm:$0x10] %v2214_v29  ;;  %2454 = vmatprep.subr.bf16.mxu0 %v5399_v15  ;;  %4037 = vmatprep.subr.bf16.mxu1 %v6017_v23  ;;  %v2301_v29 = vld [vmem:[#allocation2 + $0x18] sm:$0x3] }
 0x4de   :  { %2484 = vmatprep.mubr.bf16.mxu0 %v6018_v21  ;;  %4051 = vmatprep.mubr.msk.bf16.mxu1 %vm4648_vm0, %v6017_v23 }
 0x4e0   :  { %2455 = vmatpush1.bf16.msra.mxu0 %v5406_v16  ;;  %4038 = vmatpush3.bf16.msra.mxu1 %v5409_v17 }
 0x4e1   :  { %2456 = vmatprep.subr.bf16.mxu0 %v5412_v18  ;;  %4039 = vmatprep.subr.bf16.mxu1 %v6017_v23 }
 0x4e4   :  { %2457 = vmatpush1.bf16.msra.mxu0 %v5416_v19  ;;  %4040 = vmatpush3.bf16.msra.mxu1 %v5419_v30 }
 0x4e5   :  { %2458 = vmatprep.subr.bf16.mxu0 %v5422_v53  ;;  %4041 = vmatprep.subr.bf16.mxu1 %v6017_v23 }
 0x4e8   :  { %2459 = vmatpush1.bf16.msra.mxu0 %v5426_v28  ;;  %4042 = vmatpush3.bf16.msra.mxu1 %v5571_v62 }
 0x4e9   :  { %2460 = vmatprep.subr.bf16.mxu0 %v6044_v54  ;;  %4043 = vmatprep.subr.bf16.mxu1 %v6017_v23 }
 0x4ec   :  { %2461 = vmatpush1.bf16.msra.mxu0 %v6045_v0  ;;  %4044 = vmatpush3.bf16.msra.mxu1 %v6046_v61 }
 0x4ed   :  { %2462 = vmatprep.subr.bf16.mxu0 %v6047_v40  ;;  %4045 = vmatprep.subr.bf16.mxu1 %v6017_v23 }
 0x4f0   :  { %2463 = vmatpush1.bf16.msra.mxu0 %v6048_v20  ;;  %4046 = vmatpush3.bf16.msra.mxu1 %v6049_v51  ;;  %v2302_v51 = vld [vmem:[#allocation2 + $0x20] sm:$0x3] }
 0x4f1   :  { %2464 = vmatprep.subr.bf16.mxu0 %v6050_v47  ;;  %4047 = vmatprep.subr.bf16.mxu1 %v6017_v23 }
 0x4f4   :  { %2465 = vmatpush1.bf16.msra.mxu0 %v6051_v24  ;;  %4048 = vmatpush3.bf16.msra.mxu1 %v6052_v58 }
 0x4f5   :  { %2466 = vmatprep.subr.bf16.mxu0 %v6053_v34  ;;  %4049 = vmatprep.subr.bf16.mxu1 %v6017_v23 }
 0x4f8   :  { %2467 = vmatpush1.bf16.msra.mxu0 %v6054_v49  ;;  %4050 = vmatpush3.bf16.msra.mxu1 %v6055_v25 }
 0x4f9   :  { %2577 = vmatprep.subr.bf16.mxu0 %v6056_v42  ;;  %4055 = vmatprep.subr.bf16.mxu1 %v6017_v23 }
 0x58e   :  { %v2254_v2 = vpop.f32.mrb[40].mxu0  ;;  %v2295_v12 = vpop.f32.mrb[40].mxu1 }
 0x58f   :  { %v2255_v1 = vadd.f32 %v2254_v2, %v6057_v22  ;;  %v2256_v4 = vpop.f32.mrb[41].mxu0  ;;  %v4013_v5 = vpop.f32.mrb[41].mxu1 }
 0x590   :  { %v2257_v58 = vadd.f32 %v2256_v4, %v6028_v41  ;;  %v2258_v34 = vpop.f32.mrb[42].mxu0  ;;  %v2298_v24 = vpop.f32.mrb[42].mxu1  ;;  %v2296_v5 = vadd.f32 %v2295_v12, %v6029_v44 }
 0x591   :  { %v2304_v47 = vadd.f32 %v2301_v29, %v2255_v1  ;;  %v2259_v49 = vpop.f32.mrb[43].mxu0  ;;  %v4014_v20 = vpop.f32.mrb[43].mxu1  ;;  %v2324_v24 = vrot.slane %v5614_v9, 6  ;;  %v2414_v9 = vld [vmem:[#allocation3] sm:$0xc0] }
 0x592   :  { %v2311_v25 = vadd.f32 %v2302_v51, %v2257_v58  ;;  %v2303_v49 = vld [vmem:[#allocation2 + $0x28] sm:$0x3] }
 0x593   :  { %v3592_v40 = vmul.f32 -1.442695, %v2304_v47 }
 0x594   :  { %v3593_v42 = vmul.f32 -1.442695, %v2311_v25 }
 0x595   :  { %4452 = vpow2.f32 %v3592_v40 }
 0x596   :  { %4454 = vpow2.f32 %v3593_v42 }
 0x59f   :  { %v4453_v61 = vpop.eup %4452 }
 0x5a0   :  { %v4455_v0 = vpop.eup %4454  ;;  %v2308_v54 = vadd.f32 1.0, %v4453_v61 }
 0x5a1   :  { %v2315_v2 = vadd.f32 1.0, %v4455_v0 }
 0x5a2   :  { %4456 = vrcp.f32 %v2308_v54 }
 0x5a3   :  { %4458 = vrcp.f32 %v2315_v2 }
 0x5ac   :  { %v4457_v4 = vpop.eup %4456 }
 0x5ad   :  { %v4459_v34 = vpop.eup %4458  ;;  %v2318_v1 = vmul.f32 %v4457_v4, %v2296_v5  ;;  %v2415_v4 = vld [vmem:[#allocation3 + $0x8] sm:$0xc0] }
 0x5ae   :  { %v2367_v20 = vpop.f32.mrb[44].mxu0  ;;  %v2408_v51 = vpop.f32.mrb[44].mxu1  ;;  %v2326_v47 = vmul.f32 %v4459_v34, %v2324_v24 }
 0x5af   :  { %v2319_v58 = vadd.f32 %v2318_v1, %v2303_v49  ;;  %v2368_v40 = vadd.f32 %v2367_v20, %v6030_v39  ;;  %v2369_v25 = vpop.f32.mrb[45].mxu0  ;;  %v4033_v42 = vpop.f32.mrb[45].mxu1  ;;  %v2321_v1 = vsub.f32 1.0, %v4459_v34  ;;  %v2446_v34 = vrot.slane %v5651_v52, 2 }
 0x5b0   :  { %v2370_v0 = vadd.f32 %v2369_v25, %v5254_v37  ;;  %v2371_v54 = vpop.f32.mrb[46].mxu0  ;;  %v2411_v61 = vpop.f32.mrb[46].mxu1 }
 0x5b1   :  { %4460 = vtanh.f32 %v2319_v58  ;;  %v2418_v12 = vrot.slane %v2368_v40, 2  ;;  %v2372_v29 = vpop.f32.mrb[47].mxu0  ;;  %v4034_v2 = vpop.f32.mrb[47].mxu1 }
 0x5b2   :  { %v2428_v44 = vrot.slane %v2370_v0, 2  ;;  %v2416_v29 = vld [vmem:[#allocation3 + $0x10] sm:$0xc0] }
 0x5b3   :  { %v2420_v5 = vadd.f32 %v2418_v12, %v2414_v9 }
 0x5b4   :  { %v2430_v41 = vadd.f32 %v2428_v44, %v2415_v4 }
 0x5b5   :  { %v3594_v22 = vmul.f32 -1.442695, %v2420_v5 }
 0x5b6   :  { %v3595_v24 = vmul.f32 -1.442695, %v2430_v41  ;;  %v2409_v41 = vadd.f32 %v2408_v51, %v5263_v31 }
 0x5b7   :  { %4462 = vpow2.f32 %v3594_v22 }
 0x5b8   :  { %4464 = vpow2.f32 %v3595_v24  ;;  %v2438_v44 = vrot.slane %v2409_v41, 2  ;;  %v6072_v41 = vld [vmem:[#allocation17_spill] sm:$0xff] }
 0x5bb   :  { %v4461_v49 = vpop.eup %4460 }
 0x5bc   :  { %v2322_v20 = vmul.f32 %v4461_v49, %v2321_v1  ;;  %v6069_v49 = vld [vmem:[#allocation22_spill] sm:$0xff] }
 0x5be   :  { %v5700_v42 = vadd.f32 %v2326_v47, %v2322_v20  ;;  %v6070_v20 = vld [vmem:[#allocation23_spill] sm:$0xff] }
 0x5c0   :  { %v2328_v58 = vpack.c.bf16 %v5700_v42, %v5700_v42 }
 0x5c1   :  { %v4463_v40 = vpop.eup %4462 }
 0x5c2   :  { %v4465_v25 = vpop.eup %4464  ;;  %v2424_v54 = vadd.f32 1.0, %v4463_v40  ;;  %v2330_v61 = vrot.slane %v2328_v58, 4  ;;  %2485 = vmatmul.mubr.bf16.vlgmr.msra.gmra.mrb[48].mxu0 %v2328_v58  ;;  %4052 = vmatmul.mubr.bf16.vlgmr.msra.gmra.mrb[48].mxu1 %v2328_v58 }
 0x5c3   :  { %v2434_v0 = vadd.f32 1.0, %v4465_v25  ;;  %2578 = vmatpush1.bf16.msra.mxu0 %v5468_v35  ;;  %4056 = vmatpush3.bf16.msra.mxu1 %v5471_v56  ;;  %v6071_v25 = vld [vmem:[#allocation16_spill] sm:$0xff] }
 0x5c4   :  { %4466 = vrcp.f32 %v2424_v54  ;;  %2332 = vst [vmem:[#allocation4] sm:$0x10] %v2330_v61  ;;  %2579 = vmatprep.subr.bf16.mxu0 %v5474_v46  ;;  %4057 = vmatprep.subr.bf16.mxu1 %v6017_v23 }
 0x5c5   :  { %4468 = vrcp.f32 %v2434_v0  ;;  %2609 = vmatprep.mubr.bf16.mxu0 %v6018_v21  ;;  %4071 = vmatprep.mubr.msk.bf16.mxu1 %vm4648_vm0, %v6017_v23 }
 0x5c7   :  { %2580 = vmatpush1.bf16.msra.mxu0 %v5481_v59  ;;  %4058 = vmatpush3.bf16.msra.mxu1 %v5484_v60 }
 0x5c8   :  { %2581 = vmatprep.subr.bf16.mxu0 %v5487_v3  ;;  %4059 = vmatprep.subr.bf16.mxu1 %v6017_v23 }
 0x5cb   :  { %2582 = vmatpush1.bf16.msra.mxu0 %v5492_v50  ;;  %4060 = vmatpush3.bf16.msra.mxu1 %v5495_v6 }
 0x5cc   :  { %2583 = vmatprep.subr.bf16.mxu0 %v5498_v63  ;;  %4061 = vmatprep.subr.bf16.mxu1 %v6017_v23 }
 0x5ce   :  { %v4467_v22 = vpop.eup %4466 }
 0x5cf   :  { %v4469_v47 = vpop.eup %4468  ;;  %v2440_v12 = vmul.f32 %v4467_v22, %v2438_v44  ;;  %2584 = vmatpush1.bf16.msra.mxu0 %v5503_v10  ;;  %4062 = vmatpush3.bf16.msra.mxu1 %v5506_v11 }
 0x5d0   :  { %2585 = vmatprep.subr.bf16.mxu0 %v5509_v55  ;;  %4063 = vmatprep.subr.bf16.mxu1 %v6017_v23  ;;  %v2448_v51 = vmul.f32 %v4469_v47, %v2446_v34  ;;  %v2443_v52 = vsub.f32 1.0, %v4469_v47 }
 0x5d1   :  { %v2441_v2 = vadd.f32 %v2440_v12, %v2416_v29 }
 0x5d3   :  { %4470 = vtanh.f32 %v2441_v2  ;;  %2586 = vmatpush1.bf16.msra.mxu0 %v5513_v7  ;;  %4064 = vmatpush3.bf16.msra.mxu1 %v5516_v27 }
 0x5d4   :  { %2587 = vmatprep.subr.bf16.mxu0 %v5519_v57  ;;  %4065 = vmatprep.subr.bf16.mxu1 %v6017_v23 }
 0x5d7   :  { %2588 = vmatpush1.bf16.msra.mxu0 %v5523_v33  ;;  %4066 = vmatpush3.bf16.msra.mxu1 %v5526_v36 }
 0x5d8   :  { %2589 = vmatprep.subr.bf16.mxu0 %v5529_v32  ;;  %4067 = vmatprep.subr.bf16.mxu1 %v6017_v23 }
 0x5db   :  { %2590 = vmatpush1.bf16.msra.mxu0 %v5533_v38  ;;  %4068 = vmatpush3.bf16.msra.mxu1 %v5536_v45 }
 0x5dc   :  { %2591 = vmatprep.subr.bf16.mxu0 %v5539_v48  ;;  %4069 = vmatprep.subr.bf16.mxu1 %v6017_v23 }
 0x5dd   :  { %v4471_v9 = vpop.eup %4470 }
 0x5de   :  { %v2444_v5 = vmul.f32 %v4471_v9, %v2443_v52  ;;  %v2534_v9 = vld [vmem:[#allocation2 + $0x20] sm:$0xc] }
 0x5df   :  { %2592 = vmatpush1.bf16.msra.mxu0 %v5543_v26  ;;  %4070 = vmatpush3.bf16.msra.mxu1 %v5546_v43 }
 0x5e0   :  { %v5739_v4 = vadd.f32 %v2448_v51, %v2444_v5  ;;  %2698 = vmatprep.subr.bf16.mxu0 %v5387_v8  ;;  %4075 = vmatprep.subr.bf16.mxu1 %v6017_v23  ;;  %v6058_v8 = vld [vmem:[#allocation13_spill] sm:$0xff] }
 0x5e1   :  { %v2533_v51 = vld [vmem:[#allocation2 + $0x18] sm:$0xc] }
 0x5e2   :  { %v2450_v24 = vpack.c.bf16 %v5739_v4, %v5739_v4 }
 0x5e4   :  { %2451 = vst [vmem:[#allocation4 + $0x8] sm:$0x8] %v2450_v24  ;;  %v2575_v1 = vrot.slane %v2450_v24, 3 }
 0x5e6   :  { %2610 = vmatmul.mubr.bf16.vlgmr.msra.gmra.mrb[52].mxu0 %v2575_v1  ;;  %4072 = vmatmul.mubr.bf16.vlgmr.msra.gmra.mrb[52].mxu1 %v2575_v1 }
 0x5e7   :  { %2699 = vmatpush1.bf16.msra.mxu0 %v5393_v13  ;;  %4076 = vmatpush3.bf16.msra.mxu1 %v5396_v14  ;;  %v6059_v13 = vld [vmem:[#allocation8_spill] sm:$0xff]  ;;  %v6060_v14 = vld [vmem:[#allocation11_spill] sm:$0xff] }
 0x5e8   :  { %2700 = vmatprep.subr.bf16.mxu0 %v5399_v15  ;;  %4077 = vmatprep.subr.bf16.mxu1 %v6017_v23  ;;  %v6061_v15 = vld [vmem:[#allocation9_spill] sm:$0xff] }
 0x5e9   :  { %2730 = vmatprep.mubr.bf16.mxu0 %v6018_v21  ;;  %4091 = vmatprep.mubr.msk.bf16.mxu1 %vm4648_vm0, %v6017_v23 }
 0x5eb   :  { %2701 = vmatpush1.bf16.msra.mxu0 %v5406_v16  ;;  %4078 = vmatpush3.bf16.msra.mxu1 %v5409_v17  ;;  %v6062_v16 = vld [vmem:[#allocation14_spill] sm:$0xff]  ;;  %v6063_v17 = vld [vmem:[#allocation15_spill] sm:$0xff] }
 0x5ec   :  { %2702 = vmatprep.subr.bf16.mxu0 %v5412_v18  ;;  %4079 = vmatprep.subr.bf16.mxu1 %v6017_v23  ;;  %v6064_v18 = vld [vmem:[#allocation10_spill] sm:$0xff] }
 0x5ef   :  { %2703 = vmatpush1.bf16.msra.mxu0 %v5416_v19  ;;  %4080 = vmatpush3.bf16.msra.mxu1 %v5419_v30  ;;  %v6065_v19 = vld [vmem:[#allocation12_spill] sm:$0xff]  ;;  %v6066_v30 = vld [vmem:[#allocation19_spill] sm:$0xff] }
 0x5f0   :  { %2704 = vmatprep.subr.bf16.mxu0 %v5422_v53  ;;  %4081 = vmatprep.subr.bf16.mxu1 %v6017_v23  ;;  %v6067_v53 = vld [vmem:[#allocation20_spill] sm:$0xff] }
 0x5f3   :  { %2705 = vmatpush1.bf16.msra.mxu0 %v5426_v28  ;;  %4082 = vmatpush3.bf16.msra.mxu1 %v5571_v62  ;;  %v6068_v28 = vld [vmem:[#allocation21_spill] sm:$0xff] }
 0x5f4   :  { %2706 = vmatprep.subr.bf16.mxu0 %v6058_v8  ;;  %4083 = vmatprep.subr.bf16.mxu1 %v6017_v23 }
 0x5f7   :  { %2707 = vmatpush1.bf16.msra.mxu0 %v6059_v13  ;;  %4084 = vmatpush3.bf16.msra.mxu1 %v6060_v14 }
 0x5f8   :  { %2708 = vmatprep.subr.bf16.mxu0 %v6061_v15  ;;  %4085 = vmatprep.subr.bf16.mxu1 %v6017_v23 }
 0x5fb   :  { %2709 = vmatpush1.bf16.msra.mxu0 %v6062_v16  ;;  %4086 = vmatpush3.bf16.msra.mxu1 %v6063_v17 }
 0x5fc   :  { %2710 = vmatprep.subr.bf16.mxu0 %v6064_v18  ;;  %4087 = vmatprep.subr.bf16.mxu1 %v6017_v23  ;;  %v6073_v18 = vld [vmem:[#allocation18_spill] sm:$0xff] }
 0x5ff   :  { %2711 = vmatpush1.bf16.msra.mxu0 %v6065_v19  ;;  %4088 = vmatpush3.bf16.msra.mxu1 %v6066_v30 }
 0x600   :  { %2712 = vmatprep.subr.bf16.mxu0 %v6067_v53  ;;  %4089 = vmatprep.subr.bf16.mxu1 %v6017_v23 }
 0x603   :  { %2713 = vmatpush1.bf16.msra.mxu0 %v6068_v28  ;;  %4090 = vmatpush3.bf16.msra.mxu1 %v6069_v49 }
 0x604   :  { %2823 = vmatprep.subr.bf16.mxu0 %v6070_v20  ;;  %4095 = vmatprep.subr.bf16.mxu1 %v6017_v23 }
 0x695   :  { %v2486_v58 = vpop.f32.mrb[48].mxu0  ;;  %v2527_v40 = vpop.f32.mrb[48].mxu1 }
 0x696   :  { %v2487_v54 = vadd.f32 %v2486_v58, %v6071_v25  ;;  %v2488_v61 = vpop.f32.mrb[49].mxu0  ;;  %v4053_v0 = vpop.f32.mrb[49].mxu1  ;;  %v2528_v58 = vadd.f32 %v2527_v40, %v6073_v18 }
 0x697   :  { %v2489_v44 = vadd.f32 %v2488_v61, %v6072_v41  ;;  %v2490_v22 = vpop.f32.mrb[50].mxu0  ;;  %v2530_v34 = vpop.f32.mrb[50].mxu1  ;;  %v2565_v0 = vrot.slane %v5700_v42, 6  ;;  %v2658_v42 = vld [vmem:[#allocation3] sm:$0x30] }
 0x698   :  { %v2537_v47 = vrot.slane %v2487_v54, 6  ;;  %v2491_v12 = vpop.f32.mrb[51].mxu0  ;;  %v4054_v29 = vpop.f32.mrb[51].mxu1  ;;  %v2557_v54 = vrot.slane %v2528_v58, 6  ;;  %v2535_v34 = vld [vmem:[#allocation2 + $0x28] sm:$0xc] }
 0x699   :  { %v2547_v2 = vrot.slane %v2489_v44, 6  ;;  %v2659_v58 = vld [vmem:[#allocation3 + $0x8] sm:$0x30] }
 0x69a   :  { %v2539_v52 = vadd.f32 %v2537_v47, %v2533_v51 }
 0x69b   :  { %v2549_v5 = vadd.f32 %v2547_v2, %v2534_v9 }
 0x69c   :  { %v3596_v24 = vmul.f32 -1.442695, %v2539_v52 }
 0x69d   :  { %v3597_v1 = vmul.f32 -1.442695, %v2549_v5 }
 0x69e   :  { %4472 = vpow2.f32 %v3596_v24 }
 0x69f   :  { %4474 = vpow2.f32 %v3597_v1 }
 0x6a8   :  { %v4473_v8 = vpop.eup %4472 }
 0x6a9   :  { %v4475_v13 = vpop.eup %4474  ;;  %v2543_v15 = vadd.f32 1.0, %v4473_v8 }
 0x6aa   :  { %v2553_v16 = vadd.f32 1.0, %v4475_v13 }
 0x6ab   :  { %4476 = vrcp.f32 %v2543_v15 }
 0x6ac   :  { %4478 = vrcp.f32 %v2553_v16 }
 0x6b5   :  { %v4477_v61 = vpop.eup %4476 }
 0x6b6   :  { %v4479_v44 = vpop.eup %4478  ;;  %v2559_v22 = vmul.f32 %v4477_v61, %v2557_v54 }
 0x6b7   :  { %v2567_v47 = vmul.f32 %v4479_v44, %v2565_v0 }
 0x6b8   :  { %v2560_v12 = vadd.f32 %v2559_v22, %v2535_v34  ;;  %v2562_v22 = vsub.f32 1.0, %v4479_v44 }
 0x6b9   :  { %v2611_v29 = vpop.f32.mrb[52].mxu0  ;;  %v2652_v51 = vpop.f32.mrb[52].mxu1 }
 0x6ba   :  { %4480 = vtanh.f32 %v2560_v12  ;;  %v2612_v2 = vadd.f32 %v2611_v29, %v6030_v39  ;;  %v2613_v52 = vpop.f32.mrb[53].mxu0  ;;  %v4073_v9 = vpop.f32.mrb[53].mxu1 }
 0x6bb   :  { %v2614_v5 = vadd.f32 %v2613_v52, %v5254_v37  ;;  %v2615_v24 = vpop.f32.mrb[54].mxu0  ;;  %v2655_v40 = vpop.f32.mrb[54].mxu1 }
 0x6bc   :  { %v2662_v1 = vrot.slane %v2612_v2, 4  ;;  %v2616_v8 = vpop.f32.mrb[55].mxu0  ;;  %v4074_v13 = vpop.f32.mrb[55].mxu1 }
 0x6bd   :  { %v2672_v15 = vrot.slane %v2614_v5, 4  ;;  %v4592_v8 = vld [vmem:[#allocation5 + $0x60] ss:$12 sps:$4 sm:$0xff]   ;;  %v4593_v13 = vld [vmem:[#allocation5 + $0x7c] ss:$12 sps:$4 sm:$0xff]  }
 0x6be   :  { %v2664_v16 = vadd.f32 %v2662_v1, %v2658_v42  ;;  %v4594_v42 = vld [vmem:[#allocation5 + $0x78] ss:$12 sps:$4 sm:$0xff]  }
 0x6bf   :  { %v2674_v54 = vadd.f32 %v2672_v15, %v2659_v58  ;;  %v4595_v15 = vld [vmem:[#allocation5 + $0x94] ss:$12 sps:$4 sm:$0xff]  }
 0x6c0   :  { %v3598_v61 = vmul.f32 -1.442695, %v2664_v16 }
 0x6c1   :  { %v3599_v0 = vmul.f32 -1.442695, %v2674_v54 }
 0x6c2   :  { %4482 = vpow2.f32 %v3598_v61 }
 0x6c3   :  { %4484 = vpow2.f32 %v3599_v0 }
 0x6c4   :  { %v4481_v34 = vpop.eup %4480 }
 0x6c5   :  { %v2563_v12 = vmul.f32 %v4481_v34, %v2562_v22  ;;  %v2780_v34 = vld [vmem:[#allocation2 + $0x20] sm:$0x30] }
 0x6c7   :  { %v5786_v29 = vadd.f32 %v2567_v47, %v2563_v12  ;;  %v4590_v47 = vld [vmem:[#allocation5 + $0x48] ss:$12 sps:$4 sm:$0xff]  }
 0x6c9   :  { %v2569_v52 = vpack.c.bf16 %v5786_v29, %v5786_v29 }
 0x6cb   :  { %v2571_v2 = vrot.slane %v2569_v52, 4  ;;  %v2696_v9 = vrot.slane %v2569_v52, 1 }
 0x6cc   :  { %v4483_v24 = vpop.eup %4482 }
 0x6cd   :  { %v4485_v40 = vpop.eup %4484  ;;  %v2668_v5 = vadd.f32 1.0, %v4483_v24  ;;  %2573 = vst [vmem:[#allocation4] sm:$0x20] %v2571_v2  ;;  %2731 = vmatmul.mubr.bf16.vlgmr.msra.gmra.mrb[56].mxu0 %v2696_v9  ;;  %4092 = vmatmul.mubr.bf16.vlgmr.msra.gmra.mrb[56].mxu1 %v2696_v9 }
 0x6ce   :  { %v2678_v1 = vadd.f32 1.0, %v4485_v40  ;;  %2824 = vmatpush1.bf16.msra.mxu0 %v5468_v35  ;;  %4096 = vmatpush3.bf16.msra.mxu1 %v5471_v56  ;;  %v2653_v35 = vadd.f32 %v2652_v51, %v5263_v31  ;;  %v4591_v51 = vld [vmem:[#allocation5 + $0x64] ss:$12 sps:$4 sm:$0xff]  }
 0x6cf   :  { %4486 = vrcp.f32 %v2668_v5  ;;  %2825 = vmatprep.subr.bf16.mxu0 %v5474_v46  ;;  %4097 = vmatprep.subr.bf16.mxu1 %v6017_v23 }
 0x6d0   :  { %4488 = vrcp.f32 %v2678_v1  ;;  %2855 = vmatprep.mubr.bf16.mxu0 %v6018_v21  ;;  %4111 = vmatprep.mubr.msk.bf16.mxu1 %vm4648_vm0, %v6017_v23  ;;  %v2682_v56 = vrot.slane %v2653_v35, 4 }
 0x6d2   :  { %2826 = vmatpush1.bf16.msra.mxu0 %v5481_v59  ;;  %4098 = vmatpush3.bf16.msra.mxu1 %v5484_v60  ;;  %v2690_v59 = vrot.slane %v5739_v4, 2  ;;  %v4589_v4 = vld [vmem:[#allocation5 + $0x4c] ss:$12 sps:$4 sm:$0xff]  }
 0x6d3   :  { %2827 = vmatprep.subr.bf16.mxu0 %v5487_v3  ;;  %4099 = vmatprep.subr.bf16.mxu1 %v6017_v23  ;;  %v2660_v3 = vld [vmem:[#allocation3 + $0x10] sm:$0x30] }
 0x6d6   :  { %2828 = vmatpush1.bf16.msra.mxu0 %v5492_v50  ;;  %4100 = vmatpush3.bf16.msra.mxu1 %v5495_v6 }
 0x6d7   :  { %2829 = vmatprep.subr.bf16.mxu0 %v5498_v63  ;;  %4101 = vmatprep.subr.bf16.mxu1 %v6017_v23 }
 0x6d9   :  { %v4487_v46 = vpop.eup %4486 }
 0x6da   :  { %v4489_v44 = vpop.eup %4488  ;;  %v2684_v60 = vmul.f32 %v4487_v46, %v2682_v56  ;;  %2830 = vmatpush1.bf16.msra.mxu0 %v5503_v10  ;;  %4102 = vmatpush3.bf16.msra.mxu1 %v5506_v11  ;;  %v2811_v56 = vrot.slane %v5786_v29, 6  ;;  %v2904_v29 = vld [vmem:[#allocation3] sm:$0xc] }
 0x6db   :  { %2831 = vmatprep.subr.bf16.mxu0 %v5509_v55  ;;  %4103 = vmatprep.subr.bf16.mxu1 %v6017_v23  ;;  %v2692_v50 = vmul.f32 %v4489_v44, %v2690_v59  ;;  %v2687_v63 = vsub.f32 1.0, %v4489_v44  ;;  %v2781_v44 = vld [vmem:[#allocation2 + $0x28] sm:$0x30] }
 0x6dc   :  { %v2685_v6 = vadd.f32 %v2684_v60, %v2660_v3 }
 0x6de   :  { %4490 = vtanh.f32 %v2685_v6  ;;  %2832 = vmatpush1.bf16.msra.mxu0 %v5513_v7  ;;  %4104 = vmatpush3.bf16.msra.mxu1 %v5516_v27  ;;  %v4580_v7 = vld [vmem:[#allocation5 + $0x4] ss:$12 sps:$4 sm:$0xff]  }
 0x6df   :  { %2833 = vmatprep.subr.bf16.mxu0 %v5519_v57  ;;  %4105 = vmatprep.subr.bf16.mxu1 %v6017_v23 }
 0x6e2   :  { %2834 = vmatpush1.bf16.msra.mxu0 %v5523_v33  ;;  %4106 = vmatpush3.bf16.msra.mxu1 %v5526_v36  ;;  %v4581_v33 = vld [vmem:[#allocation5] ss:$12 sps:$4 sm:$0xff]   ;;  %v4582_v36 = vld [vmem:[#allocation5 + $0x8] ss:$12 sps:$4 sm:$0xff]  }
 0x6e3   :  { %2835 = vmatprep.subr.bf16.mxu0 %v5529_v32  ;;  %4107 = vmatprep.subr.bf16.mxu1 %v6017_v23  ;;  %v4583_v32 = vld [vmem:[#allocation5 + $0x1c] ss:$12 sps:$4 sm:$0xff]  }
 0x6e6   :  { %2836 = vmatpush1.bf16.msra.mxu0 %v5533_v38  ;;  %4108 = vmatpush3.bf16.msra.mxu1 %v5536_v45  ;;  %v4584_v38 = vld [vmem:[#allocation5 + $0x18] ss:$12 sps:$4 sm:$0xff]   ;;  %v4585_v45 = vld [vmem:[#allocation5 + $0x20] ss:$12 sps:$4 sm:$0xff]  }
 0x6e7   :  { %2837 = vmatprep.subr.bf16.mxu0 %v5539_v48  ;;  %4109 = vmatprep.subr.bf16.mxu1 %v6017_v23  ;;  %v4586_v48 = vld [vmem:[#allocation5 + $0x34] ss:$12 sps:$4 sm:$0xff]  }
 0x6e8   :  { %v4491_v10 = vpop.eup %4490 }
 0x6e9   :  { %v2688_v11 = vmul.f32 %v4491_v10, %v2687_v63 }
 0x6ea   :  { %2838 = vmatpush1.bf16.msra.mxu0 %v5543_v26  ;;  %4110 = vmatpush3.bf16.msra.mxu1 %v5546_v43  ;;  %v4587_v26 = vld [vmem:[#allocation5 + $0x30] ss:$12 sps:$4 sm:$0xff]   ;;  %v4588_v43 = vld [vmem:[#allocation5 + $0x38] ss:$12 sps:$4 sm:$0xff]  }
 0x6eb   :  { %v5825_v55 = vadd.f32 %v2692_v50, %v2688_v11  ;;  %2944 = vmatprep.subr.bf16.mxu0 %v4580_v7  ;;  %4115 = vmatprep.subr.bf16.mxu1 %v6017_v23 }
 0x6ed   :  { %v2694_v27 = vpack.c.bf16 %v5825_v55, %v5825_v55 }
 0x6ef   :  { %2695 = vst [vmem:[#allocation4 + $0x8] sm:$0x4] %v2694_v27  ;;  %v2821_v57 = vrot.slane %v2694_v27, 2 }
 0x6f1   :  { %2856 = vmatmul.mubr.bf16.vlgmr.msra.gmra.mrb[60].mxu0 %v2821_v57  ;;  %4112 = vmatmul.mubr.bf16.vlgmr.msra.gmra.mrb[60].mxu1 %v2821_v57 }
 0x6f2   :  { %2945 = vmatpush1.bf16.msra.mxu0 %v4581_v33  ;;  %4116 = vmatpush3.bf16.msra.mxu1 %v4582_v36 }
 0x6f3   :  { %2946 = vmatprep.subr.bf16.mxu0 %v4583_v32  ;;  %4117 = vmatprep.subr.bf16.mxu1 %v6017_v23 }
 0x6f4   :  { %2976 = vmatprep.mubr.bf16.mxu0 %v6018_v21  ;;  %4131 = vmatprep.mubr.msk.bf16.mxu1 %vm4648_vm0, %v6017_v23 }
 0x6f6   :  { %2947 = vmatpush1.bf16.msra.mxu0 %v4584_v38  ;;  %4118 = vmatpush3.bf16.msra.mxu1 %v4585_v45 }
 0x6f7   :  { %2948 = vmatprep.subr.bf16.mxu0 %v4586_v48  ;;  %4119 = vmatprep.subr.bf16.mxu1 %v6017_v23  ;;  %v2905_v48 = vld [vmem:[#allocation3 + $0x8] sm:$0xc] }
 0x6fa   :  { %2949 = vmatpush1.bf16.msra.mxu0 %v4587_v26  ;;  %4120 = vmatpush3.bf16.msra.mxu1 %v4588_v43 }
 0x6fb   :  { %2950 = vmatprep.subr.bf16.mxu0 %v4589_v4  ;;  %4121 = vmatprep.subr.bf16.mxu1 %v6017_v23 }
 0x6fe   :  { %2951 = vmatpush1.bf16.msra.mxu0 %v4590_v47  ;;  %4122 = vmatpush3.bf16.msra.mxu1 %v5571_v62 }
 0x6ff   :  { %2952 = vmatprep.subr.bf16.mxu0 %v4591_v51  ;;  %4123 = vmatprep.subr.bf16.mxu1 %v6017_v23 }
 0x702   :  { %2953 = vmatpush1.bf16.msra.mxu0 %v4592_v8  ;;  %4124 = vmatpush3.bf16.msra.mxu1 %v6060_v14 }
 0x703   :  { %2954 = vmatprep.subr.bf16.mxu0 %v4593_v13  ;;  %4125 = vmatprep.subr.bf16.mxu1 %v6017_v23 }
 0x706   :  { %2955 = vmatpush1.bf16.msra.mxu0 %v4594_v42  ;;  %4126 = vmatpush3.bf16.msra.mxu1 %v6063_v17 }
 0x707   :  { %2956 = vmatprep.subr.bf16.mxu0 %v4595_v15  ;;  %4127 = vmatprep.subr.bf16.mxu1 %v6017_v23 }
 0x70a   :  { %2957 = vmatpush1.bf16.msra.mxu0 %v6065_v19  ;;  %4128 = vmatpush3.bf16.msra.mxu1 %v6066_v30 }
 0x70b   :  { %2958 = vmatprep.subr.bf16.mxu0 %v6067_v53  ;;  %4129 = vmatprep.subr.bf16.mxu1 %v6017_v23 }
 0x70e   :  { %2959 = vmatpush1.bf16.msra.mxu0 %v6068_v28  ;;  %4130 = vmatpush3.bf16.msra.mxu1 %v6069_v49  ;;  %v2779_v28 = vld [vmem:[#allocation2 + $0x18] sm:$0x30] }
 0x70f   :  { %3069 = vmatprep.subr.bf16.mxu0 %v6070_v20  ;;  %4135 = vmatprep.subr.bf16.mxu1 %v6017_v23 }
 0x7a0   :  { %v2732_v62 = vpop.f32.mrb[56].mxu0  ;;  %v2773_v14 = vpop.f32.mrb[56].mxu1 }
 0x7a1   :  { %v2733_v17 = vadd.f32 %v2732_v62, %v6071_v25  ;;  %v2734_v16 = vpop.f32.mrb[57].mxu0  ;;  %v4093_v19 = vpop.f32.mrb[57].mxu1  ;;  %v2774_v5 = vadd.f32 %v2773_v14, %v6073_v18 }
 0x7a2   :  { %v2735_v30 = vadd.f32 %v2734_v16, %v6072_v41  ;;  %v2736_v58 = vpop.f32.mrb[58].mxu0  ;;  %v2776_v53 = vpop.f32.mrb[58].mxu1 }
 0x7a3   :  { %v2783_v54 = vrot.slane %v2733_v17, 4  ;;  %v2737_v61 = vpop.f32.mrb[59].mxu0  ;;  %v4094_v0 = vpop.f32.mrb[59].mxu1  ;;  %v2803_v1 = vrot.slane %v2774_v5, 4  ;;  %v4597_v58 = vld [vmem:[#allocation5 + $0xc8] ss:$12 sps:$4 sm:$0xff]  }
 0x7a4   :  { %v2793_v22 = vrot.slane %v2735_v30, 4  ;;  %v4596_v30 = vld [vmem:[#allocation5 + $0xc0] ss:$12 sps:$4 sm:$0xff]   ;;  %v4598_v53 = vld [vmem:[#allocation5 + $0xdc] ss:$12 sps:$4 sm:$0xff]  }
 0x7a5   :  { %v2785_v49 = vadd.f32 %v2783_v54, %v2779_v28  ;;  %v4599_v54 = vld [vmem:[#allocation5 + $0xd8] ss:$12 sps:$4 sm:$0xff]   ;;  %v4600_v61 = vld [vmem:[#allocation5 + $0xe0] ss:$12 sps:$4 sm:$0xff]  }
 0x7a6   :  { %v2795_v20 = vadd.f32 %v2793_v22, %v2780_v34  ;;  %v4601_v0 = vld [vmem:[#allocation5 + $0xf4] ss:$12 sps:$4 sm:$0xff]   ;;  %v4602_v22 = vld [vmem:[#allocation5 + $0xf0] ss:$12 sps:$4 sm:$0xff]   ;;  %v4604_v34 = vld [vmem:[#allocation5 + $0x10c] ss:$12 sps:$4 sm:$0xff]  }
 0x7a7   :  { %v3600_v12 = vmul.f32 -1.442695, %v2785_v49  ;;  %v4603_v49 = vld [vmem:[#allocation5 + $0xf8] ss:$12 sps:$4 sm:$0xff]  }
 0x7a8   :  { %v3601_v52 = vmul.f32 -1.442695, %v2795_v20  ;;  %v4607_v5 = vld [vmem:[#allocation5 + $0x124] ss:$12 sps:$4 sm:$0xff]  }
 0x7a9   :  { %4492 = vpow2.f32 %v3600_v12  ;;  %v2936_v12 = vrot.slane %v5825_v55, 2  ;;  %v4611_v55 = vld [vmem:[#allocation5 + $0x138] ss:$12 sps:$4 sm:$0xff]  }
 0x7aa   :  { %4494 = vpow2.f32 %v3601_v52 }
 0x7b3   :  { %v4493_v2 = vpop.eup %4492 }
 0x7b4   :  { %v4495_v9 = vpop.eup %4494  ;;  %v2789_v24 = vadd.f32 1.0, %v4493_v2 }
 0x7b5   :  { %v2799_v40 = vadd.f32 1.0, %v4495_v9  ;;  %v4605_v9 = vld [vmem:[#allocation5 + $0x108] ss:$12 sps:$4 sm:$0xff]  }
 0x7b6   :  { %4496 = vrcp.f32 %v2789_v24  ;;  %v4606_v24 = vld [vmem:[#allocation5 + $0x110] ss:$12 sps:$4 sm:$0xff]  }
 0x7b7   :  { %4498 = vrcp.f32 %v2799_v40  ;;  %v2906_v40 = vld [vmem:[#allocation3 + $0x10] sm:$0xc] }
 0x7c0   :  { %v4497_v35 = vpop.eup %4496 }
 0x7c1   :  { %v4499_v46 = vpop.eup %4498  ;;  %v2805_v59 = vmul.f32 %v4497_v35, %v2803_v1 }
 0x7c2   :  { %v2813_v60 = vmul.f32 %v4499_v46, %v2811_v56  ;;  %v2808_v47 = vsub.f32 1.0, %v4499_v46  ;;  %v4608_v56 = vld [vmem:[#allocation5 + $0x120] ss:$12 sps:$4 sm:$0xff]   ;;  %v4609_v46 = vld [vmem:[#allocation5 + $0x128] ss:$12 sps:$4 sm:$0xff]  }
 0x7c3   :  { %v2806_v3 = vadd.f32 %v2805_v59, %v2781_v44  ;;  %v4610_v59 = vld [vmem:[#allocation5 + $0x13c] ss:$12 sps:$4 sm:$0xff]   ;;  %v4612_v44 = vld [vmem:[#allocation5 + $0x140] ss:$12 sps:$4 sm:$0xff]  }
 0x7c4   :  { %v2857_v50 = vpop.f32.mrb[60].mxu0  ;;  %v2898_v6 = vpop.f32.mrb[60].mxu1 }
 0x7c5   :  { %4500 = vtanh.f32 %v2806_v3  ;;  %v2858_v63 = vadd.f32 %v2857_v50, %v6030_v39  ;;  %v2859_v10 = vpop.f32.mrb[61].mxu0  ;;  %v4113_v11 = vpop.f32.mrb[61].mxu1  ;;  %v2899_v28 = vadd.f32 %v2898_v6, %v5263_v31  ;;  %v4614_v3 = vld [vmem:[#allocation5 + $0x150] ss:$12 sps:$4 sm:$0xff]   ;;  %v4615_v50 = vld [vmem:[#allocation5 + $0x158] ss:$12 sps:$4 sm:$0xff]  }
 0x7c6   :  { %v2860_v7 = vadd.f32 %v2859_v10, %v5254_v37  ;;  %v2861_v27 = vpop.f32.mrb[62].mxu0  ;;  %v2901_v57 = vpop.f32.mrb[62].mxu1  ;;  %v4616_v6 = vld [vmem:[#allocation5 + $0x16c] ss:$12 sps:$4 sm:$0xff]  }
 0x7c7   :  { %v2908_v33 = vrot.slane %v2858_v63, 6  ;;  %v2862_v36 = vpop.f32.mrb[63].mxu0  ;;  %v4114_v32 = vpop.f32.mrb[63].mxu1  ;;  %v4618_v27 = vld [vmem:[#allocation5 + $0x170] ss:$12 sps:$4 sm:$0xff]  }
 0x7c8   :  { %v2918_v38 = vrot.slane %v2860_v7, 6  ;;  %v4617_v7 = vld [vmem:[#allocation5 + $0x168] ss:$12 sps:$4 sm:$0xff]  }
 0x7c9   :  { %v2910_v45 = vadd.f32 %v2908_v33, %v2904_v29  ;;  %v4357_v32 = vld [vmem:[%s5946_s5] sm:$0xff]   ;;  %v4358_v29 = vld [vmem:[%s5946_s5 + $0x48] sm:$0xff]  }
 0x7ca   :  { %v2920_v26 = vadd.f32 %v2918_v38, %v2905_v48  ;;  %v4359_v38 = vld [vmem:[%s5946_s5 + $0x8] sm:$0xff]   ;;  %v4361_v48 = vld [vmem:[%s5946_s5 + $0x10] sm:$0xff]  }
 0x7cb   :  { %v3602_v43 = vmul.f32 -1.442695, %v2910_v45  ;;  %v4360_v45 = vld [vmem:[%s5946_s5 + $0x50] sm:$0xff]  }
 0x7cc   :  { %v3603_v4 = vmul.f32 -1.442695, %v2920_v26  ;;  %v4362_v26 = vld [vmem:[%s5946_s5 + $0x58] sm:$0xff]  }
 0x7cd   :  { %4502 = vpow2.f32 %v3602_v43  ;;  %v4363_v43 = vld [vmem:[%s5946_s5 + $0x18] sm:$0xff]  }
 0x7ce   :  { %4504 = vpow2.f32 %v3603_v4  ;;  %v4364_v4 = vld [vmem:[%s5946_s5 + $0x60] sm:$0xff]  }
 0x7cf   :  { %v4501_v51 = vpop.eup %4500 }
 0x7d0   :  { %v2809_v8 = vmul.f32 %v4501_v51, %v2808_v47  ;;  %v4365_v47 = vld [vmem:[%s5946_s5 + $0x20] sm:$0xff]   ;;  %v4366_v51 = vld [vmem:[%s5946_s5 + $0x68] sm:$0xff]  }
 0x7d2   :  { %v5856_v13 = vadd.f32 %v2813_v60, %v2809_v8  ;;  %v4613_v60 = vld [vmem:[#allocation5 + $0x154] ss:$12 sps:$4 sm:$0xff]   ;;  %v4367_v8 = vld [vmem:[%s5946_s5 + $0x28] sm:$0xff]  }
 0x7d4   :  { %v2815_v42 = vpack.c.bf16 %v5856_v13, %v5856_v13 }
 0x7d6   :  { %v2817_v15 = vrot.slane %v2815_v42, 4  ;;  %v2942_v62 = vrot.slane %v2815_v42, 2  ;;  %v4368_v42 = vld [vmem:[%s5946_s5 + $0x70] sm:$0xff]  }
 0x7d7   :  { %v4503_v14 = vpop.eup %4502 }
 0x7d8   :  { %v4505_v17 = vpop.eup %4504  ;;  %v2914_v16 = vadd.f32 1.0, %v4503_v14  ;;  %2819 = vst [vmem:[#allocation4] sm:$0x40] %v2817_v15  ;;  %2977 = vmatmul.mubr.bf16.vlgmr.msra.gmra.mrb[64].mxu0 %v2942_v62  ;;  %4132 = vmatmul.mubr.bf16.vlgmr.msra.gmra.mrb[64].mxu1 %v2942_v62  ;;  %v4369_v15 = vld [vmem:[%s5946_s5 + $0x30] sm:$0xff]   ;;  %v4370_v62 = vld [vmem:[%s5946_s5 + $0x78] sm:$0xff]  }
 0x7d9   :  { %v2924_v19 = vadd.f32 1.0, %v4505_v17  ;;  %3070 = vmatpush1.bf16.msra.mxu0 %v4596_v30  ;;  %4136 = vmatpush3.bf16.msra.mxu1 %v4597_v58  ;;  %v4371_v14 = vld [vmem:[%s5946_s5 + $0x38] sm:$0xff]  }
 0x7da   :  { %4506 = vrcp.f32 %v2914_v16  ;;  %3071 = vmatprep.subr.bf16.mxu0 %v4598_v53  ;;  %4137 = vmatprep.subr.bf16.mxu1 %v6017_v23 }
 0x7db   :  { %4508 = vrcp.f32 %v2924_v19  ;;  %3101 = vmatprep.mubr.bf16.mxu0 %v6018_v21  ;;  %4151 = vmatprep.mubr.msk.bf16.mxu1 %vm4648_vm0, %v6017_v23  ;;  %v2928_v21 = vrot.slane %v2899_v28, 6 }
 0x7dd   :  { %3072 = vmatpush1.bf16.msra.mxu0 %v4599_v54  ;;  %4138 = vmatpush3.bf16.msra.mxu1 %v4600_v61 }
 0x7de   :  { %3073 = vmatprep.subr.bf16.mxu0 %v4601_v0  ;;  %4139 = vmatprep.subr.bf16.mxu1 %v6017_v23 }
 0x7e1   :  { %3074 = vmatpush1.bf16.msra.mxu0 %v4602_v22  ;;  %4140 = vmatpush3.bf16.msra.mxu1 %v4603_v49  ;;  %v3025_v49 = vld [vmem:[#allocation2 + $0x18] sm:$0xc0] }
 0x7e2   :  { %3075 = vmatprep.subr.bf16.mxu0 %v4604_v34  ;;  %4141 = vmatprep.subr.bf16.mxu1 %v6017_v23 }
 0x7e4   :  { %v4507_v20 = vpop.eup %4506 }
 0x7e5   :  { %v4509_v52 = vpop.eup %4508  ;;  %v2930_v2 = vmul.f32 %v4507_v20, %v2928_v21  ;;  %3076 = vmatpush1.bf16.msra.mxu0 %v4605_v9  ;;  %4142 = vmatpush3.bf16.msra.mxu1 %v4606_v24  ;;  %v3026_v20 = vld [vmem:[#allocation2 + $0x20] sm:$0xc0] }
 0x7e6   :  { %3077 = vmatprep.subr.bf16.mxu0 %v4607_v5  ;;  %4143 = vmatprep.subr.bf16.mxu1 %v6017_v23  ;;  %v2938_v1 = vmul.f32 %v4509_v52, %v2936_v12  ;;  %v2933_v63 = vsub.f32 1.0, %v4509_v52 }
 0x7e7   :  { %v2931_v35 = vadd.f32 %v2930_v2, %v2906_v40 }
 0x7e9   :  { %4510 = vtanh.f32 %v2931_v35  ;;  %3078 = vmatpush1.bf16.msra.mxu0 %v4608_v56  ;;  %4144 = vmatpush3.bf16.msra.mxu1 %v4609_v46  ;;  %v3057_v35 = vrot.slane %v5856_v13, 6 }
 0x7ea   :  { %3079 = vmatprep.subr.bf16.mxu0 %v4610_v59  ;;  %4145 = vmatprep.subr.bf16.mxu1 %v6017_v23  ;;  %v3027_v59 = vld [vmem:[#allocation2 + $0x28] sm:$0xc0] }
 0x7ed   :  { %3080 = vmatpush1.bf16.msra.mxu0 %v4611_v55  ;;  %4146 = vmatpush3.bf16.msra.mxu1 %v4612_v44 }
 0x7ee   :  { %3081 = vmatprep.subr.bf16.mxu0 %v4613_v60  ;;  %4147 = vmatprep.subr.bf16.mxu1 %v6017_v23 }
 0x7f1   :  { %3082 = vmatpush1.bf16.msra.mxu0 %v4614_v3  ;;  %4148 = vmatpush3.bf16.msra.mxu1 %v4615_v50 }
 0x7f2   :  { %3083 = vmatprep.subr.bf16.mxu0 %v4616_v6  ;;  %4149 = vmatprep.subr.bf16.mxu1 %v6017_v23  ;;  %v4356_v23 = vld [vmem:[%s5946_s5 + $0x40] sm:$0xff]  }
 0x7f3   :  { %v4511_v10 = vpop.eup %4510 }
 0x7f4   :  { %v2934_v11 = vmul.f32 %v4511_v10, %v2933_v63  ;;  %v3150_v10 = vld [vmem:[#allocation3] sm:$0x3] }
 0x7f5   :  { %3084 = vmatpush1.bf16.msra.mxu0 %v4617_v7  ;;  %4150 = vmatpush3.bf16.msra.mxu1 %v4618_v27 }
 0x7f6   :  { %v5872_v57 = vadd.f32 %v2938_v1, %v2934_v11  ;;  %3813 = vmatprep.subr.bf16.mxu0 %v4356_v23 }
 0x7f8   :  { %v2940_v33 = vpack.c.bf16 %v5872_v57, %v5872_v57 }
 0x7fa   :  { %2941 = vst [vmem:[#allocation4 + $0x8] sm:$0x2] %v2940_v33  ;;  %v3067_v36 = vrot.slane %v2940_v33, 1  ;;  %v3151_v33 = vld [vmem:[#allocation3 + $0x8] sm:$0x3] }
 0x7fc   :  { %3102 = vmatmul.mubr.bf16.vlgmr.msra.gmra.mrb[68].mxu0 %v3067_v36  ;;  %4152 = vmatmul.mubr.bf16.vlgmr.msra.gmra.mrb[68].mxu1 %v3067_v36 }
 0x7fd   :  { %3814 = vmatpush3.bf16.msra.mxu0 %v4357_v32 }
 0x7fe   :  { %3815 = vmatprep.subr.bf16.mxu0 %v4358_v29 }
 0x801   :  { %3816 = vmatpush3.bf16.msra.mxu0 %v4359_v38 }
 0x802   :  { %3817 = vmatprep.subr.bf16.mxu0 %v4360_v45 }
 0x805   :  { %3818 = vmatpush3.bf16.msra.mxu0 %v4361_v48 }
 0x806   :  { %3819 = vmatprep.subr.bf16.mxu0 %v4362_v26 }
 0x809   :  { %3820 = vmatpush3.bf16.msra.mxu0 %v4363_v43 }
 0x80a   :  { %3821 = vmatprep.subr.bf16.mxu0 %v4364_v4 }
 0x80d   :  { %3822 = vmatpush3.bf16.msra.mxu0 %v4365_v47 }
 0x80e   :  { %3823 = vmatprep.subr.bf16.mxu0 %v4366_v51 }
 0x811   :  { %3824 = vmatpush3.bf16.msra.mxu0 %v4367_v8 }
 0x812   :  { %3825 = vmatprep.subr.bf16.mxu0 %v4368_v42 }
 0x815   :  { %3826 = vmatpush3.bf16.msra.mxu0 %v4369_v15  ;;  %v3173_v15 = vrot.slane %v5872_v57, 2  ;;  %v3608_v57 = vld [vmem:[%s5947_s6] ss:$0 sm:$0xff] }
 0x816   :  { %3827 = vmatprep.subr.bf16.mxu0 %v4370_v62 }
 0x819   :  { %3828 = vmatpush3.bf16.msra.mxu0 %v4371_v14 }
 0x8ab   :  { %v2978_v17 = vpop.f32.mrb[64].mxu0  ;;  %v3019_v16 = vpop.f32.mrb[64].mxu1 }
 0x8ac   :  { %v2979_v19 = vadd.f32 %v2978_v17, %v6071_v25  ;;  %v2980_v30 = vpop.f32.mrb[65].mxu0  ;;  %v4133_v58 = vpop.f32.mrb[65].mxu1  ;;  %v3152_v17 = vld [vmem:[#allocation3 + $0x10] sm:$0x3] }
 0x8ad   :  { %v2981_v53 = vadd.f32 %v2980_v30, %v6072_v41  ;;  %v2982_v54 = vpop.f32.mrb[66].mxu0  ;;  %v3022_v61 = vpop.f32.mrb[66].mxu1  ;;  %v3020_v41 = vadd.f32 %v3019_v16, %v6073_v18 }
 0x8ae   :  { %v3029_v0 = vrot.slane %v2979_v19, 2  ;;  %v2983_v28 = vpop.f32.mrb[67].mxu0  ;;  %v4134_v22 = vpop.f32.mrb[67].mxu1 }
 0x8af   :  { %v3039_v34 = vrot.slane %v2981_v53, 2  ;;  %v3049_v5 = vrot.slane %v3020_v41, 2 }
 0x8b0   :  { %v3031_v21 = vadd.f32 %v3029_v0, %v3025_v49 }
 0x8b1   :  { %v3041_v12 = vadd.f32 %v3039_v34, %v3026_v20 }
 0x8b2   :  { %v3604_v52 = vmul.f32 -1.442695, %v3031_v21 }
 0x8b3   :  { %v3605_v2 = vmul.f32 -1.442695, %v3041_v12 }
 0x8b4   :  { %4512 = vpow2.f32 %v3604_v52 }
 0x8b5   :  { %4514 = vpow2.f32 %v3605_v2 }
 0x8be   :  { %v4513_v9 = vpop.eup %4512 }
 0x8bf   :  { %v4515_v25 = vpop.eup %4514  ;;  %v3035_v24 = vadd.f32 1.0, %v4513_v9 }
 0x8c0   :  { %v3045_v40 = vadd.f32 1.0, %v4515_v25 }
 0x8c1   :  { %4516 = vrcp.f32 %v3035_v24 }
 0x8c2   :  { %4518 = vrcp.f32 %v3045_v40 }
 0x8cb   :  { %v4517_v1 = vpop.eup %4516 }
 0x8cc   :  { %v4519_v56 = vpop.eup %4518  ;;  %v3051_v46 = vmul.f32 %v4517_v1, %v3049_v5 }
 0x8cd   :  { %v3059_v55 = vmul.f32 %v4519_v56, %v3057_v35  ;;  %v3054_v38 = vsub.f32 1.0, %v4519_v56 }
 0x8ce   :  { %v3052_v44 = vadd.f32 %v3051_v46, %v3027_v59 }
 0x8cf   :  { %v3103_v60 = vpop.f32.mrb[68].mxu0  ;;  %v3144_v3 = vpop.f32.mrb[68].mxu1 }
 0x8d0   :  { %4520 = vtanh.f32 %v3052_v44  ;;  %v3104_v50 = vadd.f32 %v3103_v60, %v6030_v39  ;;  %v3105_v6 = vpop.f32.mrb[69].mxu0  ;;  %v4153_v63 = vpop.f32.mrb[69].mxu1  ;;  %v3145_v8 = vadd.f32 %v3144_v3, %v5263_v31 }
 0x8d1   :  { %v3106_v11 = vadd.f32 %v3105_v6, %v5254_v37  ;;  %v3107_v18 = vpop.f32.mrb[70].mxu0  ;;  %v3147_v7 = vpop.f32.mrb[70].mxu1 }
 0x8d2   :  { %v3153_v27 = vadd.f32 %v3150_v10, %v3104_v50  ;;  %v3108_v13 = vpop.f32.mrb[71].mxu0  ;;  %v4154_v36 = vpop.f32.mrb[71].mxu1 }
 0x8d3   :  { %v3160_v23 = vadd.f32 %v3151_v33, %v3106_v11 }
 0x8d4   :  { %v3606_v32 = vmul.f32 -1.442695, %v3153_v27 }
 0x8d5   :  { %v3607_v29 = vmul.f32 -1.442695, %v3160_v23 }
 0x8d6   :  { %4522 = vpow2.f32 %v3606_v32 }
 0x8d7   :  { %4524 = vpow2.f32 %v3607_v29 }
 0x8da   :  { %v4521_v45 = vpop.eup %4520 }
 0x8db   :  { %v3055_v48 = vmul.f32 %v4521_v45, %v3054_v38 }
 0x8dd   :  { %v3060_v39 = vadd.f32 %v3059_v55, %v3055_v48 }
 0x8df   :  { %v3061_v26 = vpack.c.bf16 %v3060_v39, %v3060_v39 }
 0x8e0   :  { %v4523_v43 = vpop.eup %4522 }
 0x8e1   :  { %v4525_v4 = vpop.eup %4524  ;;  %v3063_v47 = vrot.slane %v3061_v26, 4  ;;  %v3157_v37 = vadd.f32 1.0, %v4523_v43 }
 0x8e2   :  { %v3164_v51 = vadd.f32 1.0, %v4525_v4 }
 0x8e3   :  { %3065 = vst [vmem:[#allocation4] sm:$0x80] %v3063_v47  ;;  %4526 = vrcp.f32 %v3157_v37 }
 0x8e4   :  { %4528 = vrcp.f32 %v3164_v51 }
 0x8ea   :  { %v3179_v28 = vld [vmem:[#allocation4] sm:$0xff] }
 0x8ed   :  { %v4527_v42 = vpop.eup %4526 }
 0x8ee   :  { %v4529_v62 = vpop.eup %4528  ;;  %v3167_v14 = vmul.f32 %v4527_v42, %v3145_v8 }
 0x8ef   :  { %v3175_v16 = vmul.f32 %v4529_v62, %v3173_v15  ;;  %v3170_v30 = vsub.f32 1.0, %v4529_v62 }
 0x8f0   :  { %v3168_v19 = vadd.f32 %v3167_v14, %v3152_v17 }
 0x8f2   :  { %4530 = vtanh.f32 %v3168_v19 }
 0x8fc   :  { %v4531_v58 = vpop.eup %4530 }
 0x8fd   :  { %v3171_v53 = vmul.f32 %v4531_v58, %v3170_v30 }
 0x8ff   :  { %v3176_v54 = vadd.f32 %v3175_v16, %v3171_v53 }
 0x901   :  { %v3177_v61 = vpack.c.bf16 %v3176_v54, %v3176_v54 }
 0x903   :  { %3178 = vst [vmem:[#allocation4 + $0x8] sm:$0x1] %v3177_v61 }
 0x90a   :  { %v3180_v0 = vld [vmem:[#allocation4 + $0x8] sm:$0xff] }
 0x90b   :  { %3348 = vmatprep.mubr.bf16.mxu0 %v3180_v0 }
 0x90c   :  { %3349 = vmatmul.mubr.bf16.vlgmr.msra.gmra.mrb[72].mxu0 %v3179_v28 }
 0x9df   :  { %v3829_v31 = vpop.f32.mrb[72].mxu0 }
 0x9e0   :  { %v3830_v22 = vpop.f32.mrb[73].mxu0 }
 0x9e1   :  { %v3831_v49 = vadd.f32 %v3830_v22, %v3829_v31  ;;  %v3832_v34 = vpop.f32.mrb[74].mxu0 }
 0x9e2   :  { %v3833_v21 = vpop.f32.mrb[75].mxu0 }
 0x9e3   :  { %v3351_v20 = vadd.f32 %v3831_v49, %v3608_v57  ;;  %v3834_v12 = vadd.f32 %v3833_v21, %v3832_v34 }
 0x9e5   :  { %3357 = vst [vmem:[%s5948_s7] sm:$0xff] %v3351_v20  ;;  %v3354_v52 = vadd.f32 %v3834_v12, %v3608_v57 }
 0x9e7   :  { %3358 = vst [vmem:[%s5948_s7 + $0x8] sm:$0xff] %v3354_v52 }
 0x9e8   :  { %3363 = vsyncpa [#allocation6], 1 }

</bundles_post_ra>
